<compile_context>
chip_gen: v7x
topology: tpu7x:2x2x1
jax: 0.10.0
libtpu: 0.0.40
codegen_flags: <defaults>
</compile_context>

<pallas_src>
import jax
import jax.numpy as jnp
from jax import lax
from jax.experimental import pallas as pl
from jax.experimental.pallas import tpu as pltpu

EPS = 1e-9


def _residual_block_kernel(x_ref, w1_ref, w2_ref, s1_ref, sh1_ref, s2_ref,
                           sh2_ref, out_ref, pad_ref, acc_ref):
    """Fused ResidualBlock for one batch element.

    x_ref   : (1, H, W, C)  f32  unpadded input (also the residual)
    w1_ref/w2_ref : (3, 3C, C) bf16  packed HWIO weights, row order (kw, cin)
    s*_ref/sh*_ref: (1, C)  f32  instance-norm scale/shift
    out_ref : (1, H, W, C)  f32
    pad_ref : (H+2, W+2, C) f32  VMEM halo scratch (reused by both stages)
    acc_ref : (H*W, C)      f32  VMEM conv accumulator (reused by both stages)
    """
    H = out_ref.shape[1]
    W = out_ref.shape[2]
    C = out_ref.shape[3]

    def reflect_pad_to_scratch(img):
        # 1-pixel reflection halo (matches torch.nn.ReflectionPad2d(1)).
        rows = jnp.concatenate([img[1:2], img, img[H - 2:H - 1]], axis=0)
        pad_ref[...] = jnp.concatenate(
            [rows[:, 1:2], rows, rows[:, W - 2:W - 1]], axis=1)

    def conv3x3(w_ref):
        # 3 matmuls with K = 3*C instead of 9 per-tap matmuls with K = C.
        for kh in range(3):
            rows = pad_ref[kh:kh + H, :, :]                       # (H, W+2, C)
            lhs = jnp.concatenate(
                [rows[:, kw:kw + W, :] for kw in range(3)],
                axis=-1).reshape(H * W, 3 * C).astype(jnp.bfloat16)
            update = jnp.dot(lhs, w_ref[kh],
                             preferred_element_type=jnp.float32)
            if kh == 0:
                # init via store (value depends on the pad_ref reads above,
                # so reuse of acc_ref across stages is ordering-safe).
                acc_ref[...] = update
            else:
                acc_ref[...] += update
        return acc_ref[...]

    def instance_norm(acc, scale, shift):
        # One-pass stats + collapsed normalize/affine (one mul + one add).
        mean = jnp.mean(acc, axis=0, keepdims=True)               # (1, C)
        var = jnp.mean(acc * acc, axis=0, keepdims=True) - mean * mean
        inv = scale * lax.rsqrt(var + EPS)                        # (1, C)
        return acc * inv + (shift - mean * inv)

    x = x_ref[0]                                                  # (H, W, C)

    # Stage 1: relu(IN1(conv1(x)))   (conv bias cancels inside IN -> dropped)
    reflect_pad_to_scratch(x)
    y = jnp.maximum(
        instance_norm(conv3x3(w1_ref), s1_ref[...], sh1_ref[...]), 0.0)

    # Stage 2: IN2(conv2(y)) + x   (halo scratch reused; y never hits HBM)
    reflect_pad_to_scratch(y.reshape(H, W, C))
    out = instance_norm(conv3x3(w2_ref), s2_ref[...], sh2_ref[...])
    out_ref[...] = (out + x.reshape(H * W, C)).reshape(1, H, W, C)


def _vmem_limit_bytes(H, W, C):
    """Heuristic VMEM budget: pipelined I/O blocks + scratch + temporaries."""
    f32, bf16 = 4, 2
    io_block = H * W * C * f32
    pad_scr = (H + 2) * (W + 2) * C * f32
    acc_scr = H * W * C * f32
    wts = 2 * 3 * (3 * C) * C * bf16
    est = 2 * (2 * io_block + wts) + pad_scr + acc_scr + 3 * io_block
    est += 2 << 20                              # relayout-temp headroom
    return int(min(max(est, 32 << 20), 64 << 20))   # cap at v7x physical VMEM


def residual_block_nhwc(x, params):
    """Fused ResidualBlock forward.  x: (B, H, W, C) float32 (NHWC)."""
    (w1, b1, s1, sh1, w2, b2, s2, sh2) = params
    del b1, b2  # cancelled exactly by the instance-norm mean subtraction
    x = x.astype(jnp.float32)
    B, H, W, C = x.shape

    # Pack HWIO (3,3,C,C) weights -> (3, 3C, C) bf16 with row order (kw, cin),
    # matching the lane-concatenated LHS built inside the kernel.
    w1p = w1.reshape(3, 3 * C, C).astype(jnp.bfloat16)
    w2p = w2.reshape(3, 3 * C, C).astype(jnp.bfloat16)
    s1r, sh1r, s2r, sh2r = (v.reshape(1, C).astype(jnp.float32)
                            for v in (s1, sh1, s2, sh2))

    img_spec = pl.BlockSpec((1, H, W, C), lambda b: (b, 0, 0, 0))
    w_spec = pl.BlockSpec((3, 3 * C, C), lambda b: (0, 0, 0))
    vec_spec = pl.BlockSpec((1, C), lambda b: (0, 0))

    call = pl.pallas_call(
        _residual_block_kernel,
        out_shape=jax.ShapeDtypeStruct((B, H, W, C), jnp.float32),
        grid_spec=pltpu.PrefetchScalarGridSpec(
            num_scalar_prefetch=0,
            grid=(B,),
            in_specs=[img_spec, w_spec, w_spec,
                      vec_spec, vec_spec, vec_spec, vec_spec],
            out_specs=img_spec,
            scratch_shapes=[
                pltpu.VMEM((H + 2, W + 2, C), jnp.float32),   # halo scratch
                pltpu.VMEM((H * W, C), jnp.float32),          # conv accumulator
            ],
        ),
        compiler_params=pltpu.CompilerParams(
            dimension_semantics=("parallel",),
            vmem_limit_bytes=_vmem_limit_bytes(H, W, C)),
    )
    return call(x, w1p, w2p, s1r, sh1r, s2r, sh2r)


def residual_block(x_nchw, params):
    """PyTorch-layout wrapper: (B, C, H, W) in / out.

    For a stack of residual blocks keep the model NHWC end-to-end; these two
    transposes are pure HBM overhead on a memory-bound op.
    """
    x = jnp.transpose(x_nchw, (0, 2, 3, 1))
    out = residual_block_nhwc(x, params)
    return jnp.transpose(out, (0, 3, 1, 2))


# ---------------------------------------------------------------------------
# Pure-JAX reference (f32, with the conv bias) for correctness checking.
# ---------------------------------------------------------------------------
def _ref_conv_in(x_nhwc, w, b, scale, shift, relu):
    xpad = jnp.pad(x_nhwc, ((0, 0), (1, 1), (1, 1), (0, 0)), mode="reflect")
    y = lax.conv_general_dilated(
        xpad, w, window_strides=(1, 1), padding="VALID",
        dimension_numbers=("NHWC", "HWIO", "NHWC")) + b
    mean = jnp.mean(y, axis=(1, 2), keepdims=True)
    var = jnp.mean((y - mean) ** 2, axis=(1, 2), keepdims=True)  # biased
    out = (y - mean) / jnp.sqrt(var + EPS) * scale + shift
    return jnp.maximum(out, 0.0) if relu else out


def residual_block_ref(x_nchw, params):
    (w1, b1, s1, sh1, w2, b2, s2, sh2) = params
    x = jnp.transpose(x_nchw, (0, 2, 3, 1)).astype(jnp.float32)
    y = _ref_conv_in(x, w1, b1, s1, sh1, relu=True)
    out = _ref_conv_in(y, w2, b2, s2, sh2, relu=False) + x
    return jnp.transpose(out, (0, 3, 1, 2))


if __name__ == "__main__":
    B, C, H, W = 2, 4, 16, 16
    key = jax.random.PRNGKey(0)
    k_x, k_w1, k_b1, k_s1, k_w2, k_b2, k_s2 = jax.random.split(key, 7)

    x = jax.random.normal(k_x, (B, C, H, W), jnp.float32)

    # HWIO conv weights, per-channel affines (scale ~ U[0,1), shift = 0).
    w1 = jax.random.normal(k_w1, (3, 3, C, C), jnp.float32) * 0.1
    b1 = jax.random.normal(k_b1, (C,), jnp.float32) * 0.1
    s1 = jax.random.uniform(k_s1, (C,), jnp.float32)
    sh1 = jnp.zeros((C,), jnp.float32)
    w2 = jax.random.normal(k_w2, (3, 3, C, C), jnp.float32) * 0.1
    b2 = jax.random.normal(k_b2, (C,), jnp.float32) * 0.1
    s2 = jax.random.uniform(k_s2, (C,), jnp.float32)
    sh2 = jnp.zeros((C,), jnp.float32)

    params = (w1, b1, s1, sh1, w2, b2, s2, sh2)

    fwd = jax.jit(residual_block)
    out = jax.block_until_ready(fwd(x, params))
    ref = jax.block_until_ready(residual_block_ref(x, params))

    assert out.shape == (B, C, H, W)
    # Tolerance sized for bf16 MXU operands in two chained 3x3 convs
    # (IN statistics and accumulation are f32); reference is full f32.
    assert jnp.allclose(out, ref, atol=5e-2, rtol=5e-2), (
        float(jnp.max(jnp.abs(out - ref))))

    print("KERNEL_OK")
</pallas_src>

<mosaic_0001>
module attributes {stable_mosaic.version = 11 : i64} {
  func.func @_residual_block_kernel(%arg0: i32, %arg1: memref<1x16x16x4xf32, #tpu.memory_space<vmem>>, %arg2: memref<3x12x4xbf16, #tpu.memory_space<vmem>>, %arg3: memref<3x12x4xbf16, #tpu.memory_space<vmem>>, %arg4: memref<1x4xf32, #tpu.memory_space<vmem>>, %arg5: memref<1x4xf32, #tpu.memory_space<vmem>>, %arg6: memref<1x4xf32, #tpu.memory_space<vmem>>, %arg7: memref<1x4xf32, #tpu.memory_space<vmem>>, %arg8: memref<1x16x16x4xf32, #tpu.memory_space<vmem>>, %arg9: memref<18x18x4xf32, #tpu.memory_space<vmem>>, %arg10: memref<256x4xf32, #tpu.memory_space<vmem>>) attributes {dimension_semantics = [#tpu.dimension_semantics<parallel>], iteration_bounds = array<i64: 2>, scalar_prefetch = 0 : i64, scratch_operands = 2 : i64, tpu.core_type = #tpu.core_type<tc>, window_params = [{transform_indices = @transform_0, window_bounds = array<i64: 1, 16, 16, 4>}, {pipeline_mode = #tpu.pipeline_mode<synchronous>, transform_indices = @transform_1, window_bounds = array<i64: 3, 12, 4>}, {pipeline_mode = #tpu.pipeline_mode<synchronous>, transform_indices = @transform_2, window_bounds = array<i64: 3, 12, 4>}, {pipeline_mode = #tpu.pipeline_mode<synchronous>, transform_indices = @transform_3, window_bounds = array<i64: 1, 4>}, {pipeline_mode = #tpu.pipeline_mode<synchronous>, transform_indices = @transform_4, window_bounds = array<i64: 1, 4>}, {pipeline_mode = #tpu.pipeline_mode<synchronous>, transform_indices = @transform_5, window_bounds = array<i64: 1, 4>}, {pipeline_mode = #tpu.pipeline_mode<synchronous>, transform_indices = @transform_6, window_bounds = array<i64: 1, 4>}, {transform_indices = @transform_7, window_bounds = array<i64: 1, 16, 16, 4>}]} {
    %c0 = arith.constant 0 : index
    %c0_0 = arith.constant 0 : index
    %c0_1 = arith.constant 0 : index
    %c0_2 = arith.constant 0 : index
    %0 = vector.load %arg1[%c0, %c0_0, %c0_1, %c0_2] : memref<1x16x16x4xf32, #tpu.memory_space<vmem>>, vector<1x16x16x4xf32>
    %1 = vector.shape_cast %0 : vector<1x16x16x4xf32> to vector<16x16x4xf32>
    %2 = vector.extract_strided_slice %1 {offsets = [1, 0, 0], sizes = [1, 16, 4], strides = [1, 1, 1]} : vector<16x16x4xf32> to vector<1x16x4xf32>
    %3 = vector.extract_strided_slice %1 {offsets = [14, 0, 0], sizes = [1, 16, 4], strides = [1, 1, 1]} : vector<16x16x4xf32> to vector<1x16x4xf32>
    %4 = tpu.concatenate %2, %1, %3 in 0 : vector<1x16x4xf32>, vector<16x16x4xf32>, vector<1x16x4xf32> -> vector<18x16x4xf32>
    %5 = vector.extract_strided_slice %4 {offsets = [0, 1, 0], sizes = [18, 1, 4], strides = [1, 1, 1]} : vector<18x16x4xf32> to vector<18x1x4xf32>
    %6 = vector.extract_strided_slice %4 {offsets = [0, 14, 0], sizes = [18, 1, 4], strides = [1, 1, 1]} : vector<18x16x4xf32> to vector<18x1x4xf32>
    %7 = tpu.concatenate %5, %4, %6 in 1 : vector<18x1x4xf32>, vector<18x16x4xf32>, vector<18x1x4xf32> -> vector<18x18x4xf32>
    %c0_3 = arith.constant 0 : index
    %c0_4 = arith.constant 0 : index
    %c0_5 = arith.constant 0 : index
    %8 = vector.load %arg9[%c0_3, %c0_4, %c0_5] : memref<18x18x4xf32, #tpu.memory_space<vmem>>, vector<18x18x4xf32>
    tpu.vector_store %arg9[%c0_3, %c0_4, %c0_5], %7 {strides = array<i32>} : memref<18x18x4xf32, #tpu.memory_space<vmem>>, vector<18x18x4xf32>,
    %c0_6 = arith.constant 0 : index
    %c0_7 = arith.constant 0 : index
    %c0_8 = arith.constant 0 : index
    %9 = vector.load %arg9[%c0_6, %c0_7, %c0_8] : memref<18x18x4xf32, #tpu.memory_space<vmem>>, vector<16x18x4xf32>
    %10 = vector.extract_strided_slice %9 {offsets = [0, 0, 0], sizes = [16, 16, 4], strides = [1, 1, 1]} : vector<16x18x4xf32> to vector<16x16x4xf32>
    %11 = vector.extract_strided_slice %9 {offsets = [0, 1, 0], sizes = [16, 16, 4], strides = [1, 1, 1]} : vector<16x18x4xf32> to vector<16x16x4xf32>
    %12 = vector.extract_strided_slice %9 {offsets = [0, 2, 0], sizes = [16, 16, 4], strides = [1, 1, 1]} : vector<16x18x4xf32> to vector<16x16x4xf32>
    %13 = tpu.concatenate %10, %11, %12 in 2 : vector<16x16x4xf32>, vector<16x16x4xf32>, vector<16x16x4xf32> -> vector<16x16x12xf32>
    %14 = vector.shape_cast %13 : vector<16x16x12xf32> to vector<256x12xf32>
    %15 = arith.truncf %14 : vector<256x12xf32> to vector<256x12xbf16>
    %c0_9 = arith.constant 0 : index
    %c0_10 = arith.constant 0 : index
    %c0_11 = arith.constant 0 : index
    %16 = vector.load %arg2[%c0_9, %c0_10, %c0_11] : memref<3x12x4xbf16, #tpu.memory_space<vmem>>, vector<1x12x4xbf16>
    %17 = vector.shape_cast %16 : vector<1x12x4xbf16> to vector<12x4xbf16>
    %cst = arith.constant dense<0.000000e+00> : vector<256x4xf32>
    %18 = tpu.matmul %15, %17, %cst {dimension_numbers = #tpu.dot_dimension_numbers<[1], [0], [0], [1], [0, 0, 1, 1], [], []>} : vector<256x12xbf16>, vector<12x4xbf16>, vector<256x4xf32> -> vector<256x4xf32>
    %c0_12 = arith.constant 0 : index
    %c0_13 = arith.constant 0 : index
    %19 = vector.load %arg10[%c0_12, %c0_13] : memref<256x4xf32, #tpu.memory_space<vmem>>, vector<256x4xf32>
    tpu.vector_store %arg10[%c0_12, %c0_13], %18 {strides = array<i32>} : memref<256x4xf32, #tpu.memory_space<vmem>>, vector<256x4xf32>,
    %c1 = arith.constant 1 : index
    %c0_14 = arith.constant 0 : index
    %c0_15 = arith.constant 0 : index
    %20 = vector.load %arg9[%c1, %c0_14, %c0_15] : memref<18x18x4xf32, #tpu.memory_space<vmem>>, vector<16x18x4xf32>
    %21 = vector.extract_strided_slice %20 {offsets = [0, 0, 0], sizes = [16, 16, 4], strides = [1, 1, 1]} : vector<16x18x4xf32> to vector<16x16x4xf32>
    %22 = vector.extract_strided_slice %20 {offsets = [0, 1, 0], sizes = [16, 16, 4], strides = [1, 1, 1]} : vector<16x18x4xf32> to vector<16x16x4xf32>
    %23 = vector.extract_strided_slice %20 {offsets = [0, 2, 0], sizes = [16, 16, 4], strides = [1, 1, 1]} : vector<16x18x4xf32> to vector<16x16x4xf32>
    %24 = tpu.concatenate %21, %22, %23 in 2 : vector<16x16x4xf32>, vector<16x16x4xf32>, vector<16x16x4xf32> -> vector<16x16x12xf32>
    %25 = vector.shape_cast %24 : vector<16x16x12xf32> to vector<256x12xf32>
    %26 = arith.truncf %25 : vector<256x12xf32> to vector<256x12xbf16>
    %c1_16 = arith.constant 1 : index
    %c0_17 = arith.constant 0 : index
    %c0_18 = arith.constant 0 : index
    %27 = vector.load %arg2[%c1_16, %c0_17, %c0_18] : memref<3x12x4xbf16, #tpu.memory_space<vmem>>, vector<1x12x4xbf16>
    %28 = vector.shape_cast %27 : vector<1x12x4xbf16> to vector<12x4xbf16>
    %cst_19 = arith.constant dense<0.000000e+00> : vector<256x4xf32>
    %29 = tpu.matmul %26, %28, %cst_19 {dimension_numbers = #tpu.dot_dimension_numbers<[1], [0], [0], [1], [0, 0, 1, 1], [], []>} : vector<256x12xbf16>, vector<12x4xbf16>, vector<256x4xf32> -> vector<256x4xf32>
    %c0_20 = arith.constant 0 : index
    %c0_21 = arith.constant 0 : index
    %30 = vector.load %arg10[%c0_20, %c0_21] : memref<256x4xf32, #tpu.memory_space<vmem>>, vector<256x4xf32>
    %31 = arith.addf %30, %29 : vector<256x4xf32>
    %c0_22 = arith.constant 0 : index
    %c0_23 = arith.constant 0 : index
    %32 = vector.load %arg10[%c0_22, %c0_23] : memref<256x4xf32, #tpu.memory_space<vmem>>, vector<256x4xf32>
    tpu.vector_store %arg10[%c0_22, %c0_23], %31 {strides = array<i32>} : memref<256x4xf32, #tpu.memory_space<vmem>>, vector<256x4xf32>,
    %c2 = arith.constant 2 : index
    %c0_24 = arith.constant 0 : index
    %c0_25 = arith.constant 0 : index
    %33 = vector.load %arg9[%c2, %c0_24, %c0_25] : memref<18x18x4xf32, #tpu.memory_space<vmem>>, vector<16x18x4xf32>
    %34 = vector.extract_strided_slice %33 {offsets = [0, 0, 0], sizes = [16, 16, 4], strides = [1, 1, 1]} : vector<16x18x4xf32> to vector<16x16x4xf32>
    %35 = vector.extract_strided_slice %33 {offsets = [0, 1, 0], sizes = [16, 16, 4], strides = [1, 1, 1]} : vector<16x18x4xf32> to vector<16x16x4xf32>
    %36 = vector.extract_strided_slice %33 {offsets = [0, 2, 0], sizes = [16, 16, 4], strides = [1, 1, 1]} : vector<16x18x4xf32> to vector<16x16x4xf32>
    %37 = tpu.concatenate %34, %35, %36 in 2 : vector<16x16x4xf32>, vector<16x16x4xf32>, vector<16x16x4xf32> -> vector<16x16x12xf32>
    %38 = vector.shape_cast %37 : vector<16x16x12xf32> to vector<256x12xf32>
    %39 = arith.truncf %38 : vector<256x12xf32> to vector<256x12xbf16>
    %c2_26 = arith.constant 2 : index
    %c0_27 = arith.constant 0 : index
    %c0_28 = arith.constant 0 : index
    %40 = vector.load %arg2[%c2_26, %c0_27, %c0_28] : memref<3x12x4xbf16, #tpu.memory_space<vmem>>, vector<1x12x4xbf16>
    %41 = vector.shape_cast %40 : vector<1x12x4xbf16> to vector<12x4xbf16>
    %cst_29 = arith.constant dense<0.000000e+00> : vector<256x4xf32>
    %42 = tpu.matmul %39, %41, %cst_29 {dimension_numbers = #tpu.dot_dimension_numbers<[1], [0], [0], [1], [0, 0, 1, 1], [], []>} : vector<256x12xbf16>, vector<12x4xbf16>, vector<256x4xf32> -> vector<256x4xf32>
    %c0_30 = arith.constant 0 : index
    %c0_31 = arith.constant 0 : index
    %43 = vector.load %arg10[%c0_30, %c0_31] : memref<256x4xf32, #tpu.memory_space<vmem>>, vector<256x4xf32>
    %44 = arith.addf %43, %42 : vector<256x4xf32>
    %c0_32 = arith.constant 0 : index
    %c0_33 = arith.constant 0 : index
    %45 = vector.load %arg10[%c0_32, %c0_33] : memref<256x4xf32, #tpu.memory_space<vmem>>, vector<256x4xf32>
    tpu.vector_store %arg10[%c0_32, %c0_33], %44 {strides = array<i32>} : memref<256x4xf32, #tpu.memory_space<vmem>>, vector<256x4xf32>,
    %c0_34 = arith.constant 0 : index
    %c0_35 = arith.constant 0 : index
    %46 = vector.load %arg10[%c0_34, %c0_35] : memref<256x4xf32, #tpu.memory_space<vmem>>, vector<256x4xf32>
    %c0_36 = arith.constant 0 : index
    %c0_37 = arith.constant 0 : index
    %47 = vector.load %arg4[%c0_36, %c0_37] : memref<1x4xf32, #tpu.memory_space<vmem>>, vector<1x4xf32>
    %c0_38 = arith.constant 0 : index
    %c0_39 = arith.constant 0 : index
    %48 = vector.load %arg5[%c0_38, %c0_39] : memref<1x4xf32, #tpu.memory_space<vmem>>, vector<1x4xf32>
    %cst_40 = arith.constant dense<0.000000e+00> : vector<4xf32>
    %49 = vector.multi_reduction <add>, %46, %cst_40 [0] : vector<256x4xf32> to vector<4xf32>
    %50 = vector.shape_cast %49 : vector<4xf32> to vector<1x4xf32>
    %cst_41 = arith.constant 2.560000e+02 : f32
    %51 = vector.broadcast %cst_41 : f32 to vector<1x4xf32>
    %52 = arith.divf %50, %51 : vector<1x4xf32>
    %53 = arith.mulf %46, %46 : vector<256x4xf32>
    %cst_42 = arith.constant dense<0.000000e+00> : vector<4xf32>
    %54 = vector.multi_reduction <add>, %53, %cst_42 [0] : vector<256x4xf32> to vector<4xf32>
    %55 = vector.shape_cast %54 : vector<4xf32> to vector<1x4xf32>
    %cst_43 = arith.constant 2.560000e+02 : f32
    %56 = vector.broadcast %cst_43 : f32 to vector<1x4xf32>
    %57 = arith.divf %55, %56 : vector<1x4xf32>
    %58 = arith.mulf %52, %52 : vector<1x4xf32>
    %59 = arith.subf %57, %58 : vector<1x4xf32>
    %cst_44 = arith.constant 9.99999971E-10 : f32
    %60 = vector.broadcast %cst_44 : f32 to vector<1x4xf32>
    %61 = arith.addf %59, %60 : vector<1x4xf32>
    %62 = math.rsqrt %61 : vector<1x4xf32>
    %63 = arith.mulf %47, %62 : vector<1x4xf32>
    %64 = vector.broadcast %63 : vector<1x4xf32> to vector<256x4xf32>
    %65 = arith.mulf %46, %64 : vector<256x4xf32>
    %66 = arith.mulf %52, %63 : vector<1x4xf32>
    %67 = arith.subf %48, %66 : vector<1x4xf32>
    %68 = vector.broadcast %67 : vector<1x4xf32> to vector<256x4xf32>
    %69 = arith.addf %65, %68 : vector<256x4xf32>
    %cst_45 = arith.constant 0.000000e+00 : f32
    %70 = vector.broadcast %cst_45 : f32 to vector<256x4xf32>
    %71 = arith.maximumf %69, %70 : vector<256x4xf32>
    %72 = vector.shape_cast %71 : vector<256x4xf32> to vector<16x16x4xf32>
    %73 = vector.extract_strided_slice %72 {offsets = [1, 0, 0], sizes = [1, 16, 4], strides = [1, 1, 1]} : vector<16x16x4xf32> to vector<1x16x4xf32>
    %74 = vector.extract_strided_slice %72 {offsets = [14, 0, 0], sizes = [1, 16, 4], strides = [1, 1, 1]} : vector<16x16x4xf32> to vector<1x16x4xf32>
    %75 = tpu.concatenate %73, %72, %74 in 0 : vector<1x16x4xf32>, vector<16x16x4xf32>, vector<1x16x4xf32> -> vector<18x16x4xf32>
    %76 = vector.extract_strided_slice %75 {offsets = [0, 1, 0], sizes = [18, 1, 4], strides = [1, 1, 1]} : vector<18x16x4xf32> to vector<18x1x4xf32>
    %77 = vector.extract_strided_slice %75 {offsets = [0, 14, 0], sizes = [18, 1, 4], strides = [1, 1, 1]} : vector<18x16x4xf32> to vector<18x1x4xf32>
    %78 = tpu.concatenate %76, %75, %77 in 1 : vector<18x1x4xf32>, vector<18x16x4xf32>, vector<18x1x4xf32> -> vector<18x18x4xf32>
    %c0_46 = arith.constant 0 : index
    %c0_47 = arith.constant 0 : index
    %c0_48 = arith.constant 0 : index
    %79 = vector.load %arg9[%c0_46, %c0_47, %c0_48] : memref<18x18x4xf32, #tpu.memory_space<vmem>>, vector<18x18x4xf32>
    tpu.vector_store %arg9[%c0_46, %c0_47, %c0_48], %78 {strides = array<i32>} : memref<18x18x4xf32, #tpu.memory_space<vmem>>, vector<18x18x4xf32>,
    %c0_49 = arith.constant 0 : index
    %c0_50 = arith.constant 0 : index
    %c0_51 = arith.constant 0 : index
    %80 = vector.load %arg9[%c0_49, %c0_50, %c0_51] : memref<18x18x4xf32, #tpu.memory_space<vmem>>, vector<16x18x4xf32>
    %81 = vector.extract_strided_slice %80 {offsets = [0, 0, 0], sizes = [16, 16, 4], strides = [1, 1, 1]} : vector<16x18x4xf32> to vector<16x16x4xf32>
    %82 = vector.extract_strided_slice %80 {offsets = [0, 1, 0], sizes = [16, 16, 4], strides = [1, 1, 1]} : vector<16x18x4xf32> to vector<16x16x4xf32>
    %83 = vector.extract_strided_slice %80 {offsets = [0, 2, 0], sizes = [16, 16, 4], strides = [1, 1, 1]} : vector<16x18x4xf32> to vector<16x16x4xf32>
    %84 = tpu.concatenate %81, %82, %83 in 2 : vector<16x16x4xf32>, vector<16x16x4xf32>, vector<16x16x4xf32> -> vector<16x16x12xf32>
    %85 = vector.shape_cast %84 : vector<16x16x12xf32> to vector<256x12xf32>
    %86 = arith.truncf %85 : vector<256x12xf32> to vector<256x12xbf16>
    %c0_52 = arith.constant 0 : index
    %c0_53 = arith.constant 0 : index
    %c0_54 = arith.constant 0 : index
    %87 = vector.load %arg3[%c0_52, %c0_53, %c0_54] : memref<3x12x4xbf16, #tpu.memory_space<vmem>>, vector<1x12x4xbf16>
    %88 = vector.shape_cast %87 : vector<1x12x4xbf16> to vector<12x4xbf16>
    %cst_55 = arith.constant dense<0.000000e+00> : vector<256x4xf32>
    %89 = tpu.matmul %86, %88, %cst_55 {dimension_numbers = #tpu.dot_dimension_numbers<[1], [0], [0], [1], [0, 0, 1, 1], [], []>} : vector<256x12xbf16>, vector<12x4xbf16>, vector<256x4xf32> -> vector<256x4xf32>
    %c0_56 = arith.constant 0 : index
    %c0_57 = arith.constant 0 : index
    %90 = vector.load %arg10[%c0_56, %c0_57] : memref<256x4xf32, #tpu.memory_space<vmem>>, vector<256x4xf32>
    tpu.vector_store %arg10[%c0_56, %c0_57], %89 {strides = array<i32>} : memref<256x4xf32, #tpu.memory_space<vmem>>, vector<256x4xf32>,
    %c1_58 = arith.constant 1 : index
    %c0_59 = arith.constant 0 : index
    %c0_60 = arith.constant 0 : index
    %91 = vector.load %arg9[%c1_58, %c0_59, %c0_60] : memref<18x18x4xf32, #tpu.memory_space<vmem>>, vector<16x18x4xf32>
    %92 = vector.extract_strided_slice %91 {offsets = [0, 0, 0], sizes = [16, 16, 4], strides = [1, 1, 1]} : vector<16x18x4xf32> to vector<16x16x4xf32>
    %93 = vector.extract_strided_slice %91 {offsets = [0, 1, 0], sizes = [16, 16, 4], strides = [1, 1, 1]} : vector<16x18x4xf32> to vector<16x16x4xf32>
    %94 = vector.extract_strided_slice %91 {offsets = [0, 2, 0], sizes = [16, 16, 4], strides = [1, 1, 1]} : vector<16x18x4xf32> to vector<16x16x4xf32>
    %95 = tpu.concatenate %92, %93, %94 in 2 : vector<16x16x4xf32>, vector<16x16x4xf32>, vector<16x16x4xf32> -> vector<16x16x12xf32>
    %96 = vector.shape_cast %95 : vector<16x16x12xf32> to vector<256x12xf32>
    %97 = arith.truncf %96 : vector<256x12xf32> to vector<256x12xbf16>
    %c1_61 = arith.constant 1 : index
    %c0_62 = arith.constant 0 : index
    %c0_63 = arith.constant 0 : index
    %98 = vector.load %arg3[%c1_61, %c0_62, %c0_63] : memref<3x12x4xbf16, #tpu.memory_space<vmem>>, vector<1x12x4xbf16>
    %99 = vector.shape_cast %98 : vector<1x12x4xbf16> to vector<12x4xbf16>
    %cst_64 = arith.constant dense<0.000000e+00> : vector<256x4xf32>
    %100 = tpu.matmul %97, %99, %cst_64 {dimension_numbers = #tpu.dot_dimension_numbers<[1], [0], [0], [1], [0, 0, 1, 1], [], []>} : vector<256x12xbf16>, vector<12x4xbf16>, vector<256x4xf32> -> vector<256x4xf32>
    %c0_65 = arith.constant 0 : index
    %c0_66 = arith.constant 0 : index
    %101 = vector.load %arg10[%c0_65, %c0_66] : memref<256x4xf32, #tpu.memory_space<vmem>>, vector<256x4xf32>
    %102 = arith.addf %101, %100 : vector<256x4xf32>
    %c0_67 = arith.constant 0 : index
    %c0_68 = arith.constant 0 : index
    %103 = vector.load %arg10[%c0_67, %c0_68] : memref<256x4xf32, #tpu.memory_space<vmem>>, vector<256x4xf32>
    tpu.vector_store %arg10[%c0_67, %c0_68], %102 {strides = array<i32>} : memref<256x4xf32, #tpu.memory_space<vmem>>, vector<256x4xf32>,
    %c2_69 = arith.constant 2 : index
    %c0_70 = arith.constant 0 : index
    %c0_71 = arith.constant 0 : index
    %104 = vector.load %arg9[%c2_69, %c0_70, %c0_71] : memref<18x18x4xf32, #tpu.memory_space<vmem>>, vector<16x18x4xf32>
    %105 = vector.extract_strided_slice %104 {offsets = [0, 0, 0], sizes = [16, 16, 4], strides = [1, 1, 1]} : vector<16x18x4xf32> to vector<16x16x4xf32>
    %106 = vector.extract_strided_slice %104 {offsets = [0, 1, 0], sizes = [16, 16, 4], strides = [1, 1, 1]} : vector<16x18x4xf32> to vector<16x16x4xf32>
    %107 = vector.extract_strided_slice %104 {offsets = [0, 2, 0], sizes = [16, 16, 4], strides = [1, 1, 1]} : vector<16x18x4xf32> to vector<16x16x4xf32>
    %108 = tpu.concatenate %105, %106, %107 in 2 : vector<16x16x4xf32>, vector<16x16x4xf32>, vector<16x16x4xf32> -> vector<16x16x12xf32>
    %109 = vector.shape_cast %108 : vector<16x16x12xf32> to vector<256x12xf32>
    %110 = arith.truncf %109 : vector<256x12xf32> to vector<256x12xbf16>
    %c2_72 = arith.constant 2 : index
    %c0_73 = arith.constant 0 : index
    %c0_74 = arith.constant 0 : index
    %111 = vector.load %arg3[%c2_72, %c0_73, %c0_74] : memref<3x12x4xbf16, #tpu.memory_space<vmem>>, vector<1x12x4xbf16>
    %112 = vector.shape_cast %111 : vector<1x12x4xbf16> to vector<12x4xbf16>
    %cst_75 = arith.constant dense<0.000000e+00> : vector<256x4xf32>
    %113 = tpu.matmul %110, %112, %cst_75 {dimension_numbers = #tpu.dot_dimension_numbers<[1], [0], [0], [1], [0, 0, 1, 1], [], []>} : vector<256x12xbf16>, vector<12x4xbf16>, vector<256x4xf32> -> vector<256x4xf32>
    %c0_76 = arith.constant 0 : index
    %c0_77 = arith.constant 0 : index
    %114 = vector.load %arg10[%c0_76, %c0_77] : memref<256x4xf32, #tpu.memory_space<vmem>>, vector<256x4xf32>
    %115 = arith.addf %114, %113 : vector<256x4xf32>
    %c0_78 = arith.constant 0 : index
    %c0_79 = arith.constant 0 : index
    %116 = vector.load %arg10[%c0_78, %c0_79] : memref<256x4xf32, #tpu.memory_space<vmem>>, vector<256x4xf32>
    tpu.vector_store %arg10[%c0_78, %c0_79], %115 {strides = array<i32>} : memref<256x4xf32, #tpu.memory_space<vmem>>, vector<256x4xf32>,
    %c0_80 = arith.constant 0 : index
    %c0_81 = arith.constant 0 : index
    %117 = vector.load %arg10[%c0_80, %c0_81] : memref<256x4xf32, #tpu.memory_space<vmem>>, vector<256x4xf32>
    %c0_82 = arith.constant 0 : index
    %c0_83 = arith.constant 0 : index
    %118 = vector.load %arg6[%c0_82, %c0_83] : memref<1x4xf32, #tpu.memory_space<vmem>>, vector<1x4xf32>
    %c0_84 = arith.constant 0 : index
    %c0_85 = arith.constant 0 : index
    %119 = vector.load %arg7[%c0_84, %c0_85] : memref<1x4xf32, #tpu.memory_space<vmem>>, vector<1x4xf32>
    %cst_86 = arith.constant dense<0.000000e+00> : vector<4xf32>
    %120 = vector.multi_reduction <add>, %117, %cst_86 [0] : vector<256x4xf32> to vector<4xf32>
    %121 = vector.shape_cast %120 : vector<4xf32> to vector<1x4xf32>
    %cst_87 = arith.constant 2.560000e+02 : f32
    %122 = vector.broadcast %cst_87 : f32 to vector<1x4xf32>
    %123 = arith.divf %121, %122 : vector<1x4xf32>
    %124 = arith.mulf %117, %117 : vector<256x4xf32>
    %cst_88 = arith.constant dense<0.000000e+00> : vector<4xf32>
    %125 = vector.multi_reduction <add>, %124, %cst_88 [0] : vector<256x4xf32> to vector<4xf32>
    %126 = vector.shape_cast %125 : vector<4xf32> to vector<1x4xf32>
    %cst_89 = arith.constant 2.560000e+02 : f32
    %127 = vector.broadcast %cst_89 : f32 to vector<1x4xf32>
    %128 = arith.divf %126, %127 : vector<1x4xf32>
    %129 = arith.mulf %123, %123 : vector<1x4xf32>
    %130 = arith.subf %128, %129 : vector<1x4xf32>
    %cst_90 = arith.constant 9.99999971E-10 : f32
    %131 = vector.broadcast %cst_90 : f32 to vector<1x4xf32>
    %132 = arith.addf %130, %131 : vector<1x4xf32>
    %133 = math.rsqrt %132 : vector<1x4xf32>
    %134 = arith.mulf %118, %133 : vector<1x4xf32>
    %135 = vector.broadcast %134 : vector<1x4xf32> to vector<256x4xf32>
    %136 = arith.mulf %117, %135 : vector<256x4xf32>
    %137 = arith.mulf %123, %134 : vector<1x4xf32>
    %138 = arith.subf %119, %137 : vector<1x4xf32>
    %139 = vector.broadcast %138 : vector<1x4xf32> to vector<256x4xf32>
    %140 = arith.addf %136, %139 : vector<256x4xf32>
    %141 = vector.shape_cast %1 : vector<16x16x4xf32> to vector<256x4xf32>
    %142 = arith.addf %140, %141 : vector<256x4xf32>
    %143 = vector.shape_cast %142 : vector<256x4xf32> to vector<1x16x16x4xf32>
    %c0_91 = arith.constant 0 : index
    %c0_92 = arith.constant 0 : index
    %c0_93 = arith.constant 0 : index
    %c0_94 = arith.constant 0 : index
    %144 = vector.load %arg8[%c0_91, %c0_92, %c0_93, %c0_94] : memref<1x16x16x4xf32, #tpu.memory_space<vmem>>, vector<1x16x16x4xf32>
    tpu.vector_store %arg8[%c0_91, %c0_92, %c0_93, %c0_94], %143 {strides = array<i32>} : memref<1x16x16x4xf32, #tpu.memory_space<vmem>>, vector<1x16x16x4xf32>,
    return
  }
  func.func @transform_0(%arg0: i32) -> (i32, i32, i32, i32) {
    %c0_i32 = arith.constant 0 : i32
    %c0_i32_0 = arith.constant 0 : i32
    %c0_i32_1 = arith.constant 0 : i32
    %c0_i32_2 = arith.constant 0 : i32
    return %arg0, %c0_i32, %c0_i32_0, %c0_i32_1 : i32, i32, i32, i32
  }
  func.func @transform_1(%arg0: i32) -> (i32, i32, i32) {
    %c0_i32 = arith.constant 0 : i32
    %c0_i32_0 = arith.constant 0 : i32
    %c0_i32_1 = arith.constant 0 : i32
    %c0_i32_2 = arith.constant 0 : i32
    return %c0_i32, %c0_i32_0, %c0_i32_1 : i32, i32, i32
  }
  func.func @transform_2(%arg0: i32) -> (i32, i32, i32) {
    %c0_i32 = arith.constant 0 : i32
    %c0_i32_0 = arith.constant 0 : i32
    %c0_i32_1 = arith.constant 0 : i32
    %c0_i32_2 = arith.constant 0 : i32
    return %c0_i32, %c0_i32_0, %c0_i32_1 : i32, i32, i32
  }
  func.func @transform_3(%arg0: i32) -> (i32, i32) {
    %c0_i32 = arith.constant 0 : i32
    %c0_i32_0 = arith.constant 0 : i32
    %c0_i32_1 = arith.constant 0 : i32
    return %c0_i32, %c0_i32_0 : i32, i32
  }
  func.func @transform_4(%arg0: i32) -> (i32, i32) {
    %c0_i32 = arith.constant 0 : i32
    %c0_i32_0 = arith.constant 0 : i32
    %c0_i32_1 = arith.constant 0 : i32
    return %c0_i32, %c0_i32_0 : i32, i32
  }
  func.func @transform_5(%arg0: i32) -> (i32, i32) {
    %c0_i32 = arith.constant 0 : i32
    %c0_i32_0 = arith.constant 0 : i32
    %c0_i32_1 = arith.constant 0 : i32
    return %c0_i32, %c0_i32_0 : i32, i32
  }
  func.func @transform_6(%arg0: i32) -> (i32, i32) {
    %c0_i32 = arith.constant 0 : i32
    %c0_i32_0 = arith.constant 0 : i32
    %c0_i32_1 = arith.constant 0 : i32
    return %c0_i32, %c0_i32_0 : i32, i32
  }
  func.func @transform_7(%arg0: i32) -> (i32, i32, i32, i32) {
    %c0_i32 = arith.constant 0 : i32
    %c0_i32_0 = arith.constant 0 : i32
    %c0_i32_1 = arith.constant 0 : i32
    %c0_i32_2 = arith.constant 0 : i32
    return %arg0, %c0_i32, %c0_i32_0, %c0_i32_1 : i32, i32, i32, i32
  }
}

</mosaic_0001>

<bundles_post_ra>
// kernel: residual_block.1
= control target key start
LH: loop header
LB: loop body
LE: loop exit
PB: predicated region body
PF: predicated region fallthrough
CT: control target
= control target key end

     0   :  { %s8133_s24 = smov 0   ;;  %s12405_s0 = inlined_call_operand.vmem [shape: f32[2,16,16,4], index: 0, kind: input, shape index: {}]   ;;  %s12406_s1 = inlined_call_operand.vmem [shape: bf16[3,12,4], index: 1, kind: input, shape index: {}]   ;;  %s12407_s2 = inlined_call_operand.vmem [shape: bf16[3,12,4], index: 2, kind: input, shape index: {}]   ;;  %s12408_s3 = inlined_call_operand.vmem [shape: f32[1,4], index: 3, kind: input, shape index: {}]   ;;  %s12409_s4 = inlined_call_operand.vmem [shape: f32[1,4], index: 4, kind: input, shape index: {}]   ;;  %s12410_s5 = inlined_call_operand.vmem [shape: f32[1,4], index: 5, kind: input, shape index: {}]   ;;  %s12411_s6 = inlined_call_operand.vmem [shape: f32[1,4], index: 6, kind: input, shape index: {}]   ;;  %s12412_s7 = inlined_call_operand.vmem [shape: f32[2,16,16,4], index: 7, kind: output, shape index: {}]  }
   0x1 LB: > { %s6541_s25 = sadd.s32 4294967295, %s8089_s24   ;;  %p6545_p0 = scmp.ge.s32.totalorder %s8089_s24, 1  ;;  %s8089_s24 = sphi %s8133_s24, %s17_s24  }
   0x2   : > { %p237_p1 = scmp.lt.s32.totalorder %s8089_s24, 3 }
   0x4   : > { %p238_p2 = pnand %p6545_p0, %p237_p1 }
   0x6   : > { %241 = sbr.rel (%p238_p2) target bundleno = 1306 (0x51a), region = 48 }
   0xd   : > { %p269_p3 = scmp.lt.s32.totalorder %s6541_s25, 1  ;;  %vm376_vm0 = vcmask 1040384   ;;  %vm537_vm1 = vcmask 31744   ;;  %vm540_vm2 = vcmask 25600   ;;  %vm866_vm3 = vcmask 1045504   ;;  %s8091_s30 = smov 8  }
   0xe   : > { %vm689_vm4 = vcmask 1046528   ;;  %s8092_s8 = smov 4   ;;  %vm1075_vm5 = vcmask 64512   ;;  %vm1131_vm6 = vcmask 97280  }
   0xf   : > { %s12650_s25 = smov (!%p269_p3, %s6541_s25), 1 }
  0x10   : > { %s6662_s26 = sshll.u32 %s12650_s25, 8 }
  0x11   : > { %s8149_s29 = scalar_lea.vmem %s12405_s0, %s6662_s26  ;;  %s12284_s12 = scalar_lea.vmem %s12412_s7, %s6662_s26 }
  0x12   : > { %v282_v0 = vld [vmem:[%s8149_s29 + $0x10] sm:$0xff]  ;;  %v283_v1 = vld [vmem:[%s8149_s29 + $0x18] sm:$0xff]  ;;  %v280_v2 = vld [vmem:[%s8149_s29] sm:$0xff] }
  0x13   : > { %v328_v3 = vrot.slane %v282_v0, 1  ;;  %v377_v4 = vrot.slane %v282_v0, 7  ;;  %v378_v5 = vrot.slane %v283_v1, 7  ;;  %v473_v6 = vrot.slane %v283_v1, 5  ;;  %v281_v7 = vld [vmem:[%s8149_s29 + $0x8] sm:$0xff]  ;;  %v284_v8 = vld [vmem:[%s8149_s29 + $0x20] sm:$0xff] }
  0x14   : > { %v329_v9 = vrot.slane %v280_v2, 1  ;;  %v380_v10 = vrot.slane %v280_v2, 7  ;;  %v381_v11 = vrot.slane %v281_v7, 7  ;;  %v474_v12 = vrot.slane %v281_v7, 5  ;;  %v285_v13 = vld [vmem:[%s8149_s29 + $0x28] sm:$0xff]  ;;  %v288_v14 = vld [vmem:[%s8149_s29 + $0x40] sm:$0xff] }
  0x15   : > { %v379_v15 = vsel %vm376_vm0, %v377_v4, %v378_v5  ;;  %v505_v16 = vsel %vm376_vm0, %v328_v3, %v377_v4  ;;  %v521_v17 = vsel %vm376_vm0, %v378_v5, %v473_v6  ;;  %v330_v18 = vrot.slane %v284_v8, 1  ;;  %v289_v19 = vld [vmem:[%s8149_s29 + $0x48] sm:$0xff]  ;;  %v286_v20 = vld [vmem:[%s8149_s29 + $0x30] sm:$0xff]  ;;  %v287_v29 = vld [vmem:[%s8149_s29 + $0x38] sm:$0xff] }
  0x16   : > { %538 = vst.msk [vmem:[#allocation2] sm:$0xff] %vm537_vm1, %v505_v16  ;;  %539 = vst.msk [vmem:[#allocation2 + $0x8] sm:$0xff] %vm537_vm1, %v379_v15  ;;  %v382_v21 = vsel %vm376_vm0, %v380_v10, %v381_v11  ;;  %v506_v22 = vsel %vm376_vm0, %v329_v9, %v380_v10  ;;  %v522_v23 = vsel %vm376_vm0, %v381_v11, %v474_v12  ;;  %v383_v24 = vrot.slane %v284_v8, 7  ;;  %v292_v34 = vld [vmem:[%s8149_s29 + $0x60] sm:$0xff]  ;;  %v8179_v35 = vld [vmem:[%s8149_s29 + $0x68] sm:$0xff] }
  0x17   : > { %541 = vst.msk [vmem:[#allocation2 + $0x10] sm:$0x3] %vm540_vm2, %v521_v17  ;;  %547 = vst.msk [vmem:[#allocation2 + $0x40] sm:$0x3] %vm540_vm2, %v521_v17  ;;  %v384_v25 = vrot.slane %v285_v13, 7  ;;  %v475_v26 = vrot.slane %v285_v13, 5 }
  0x18   : > { %545 = vst.msk [vmem:[#allocation2 + $0x30] sm:$0xff] %vm537_vm1, %v505_v16  ;;  %546 = vst.msk [vmem:[#allocation2 + $0x38] sm:$0xff] %vm537_vm1, %v379_v15  ;;  %v332_v27 = vrot.slane %v288_v14, 1  ;;  %v389_v28 = vrot.slane %v288_v14, 7  ;;  %v507_v30 = vsel %vm376_vm0, %v330_v18, %v383_v24  ;;  %v390_v31 = vrot.slane %v289_v19, 7  ;;  %v8186_v40 = vld [vmem:[%s8149_s29 + $0x50] sm:$0xff] }
  0x19   : > { %542 = vst.msk [vmem:[#allocation2 + $0x18] sm:$0xff] %vm537_vm1, %v506_v22  ;;  %543 = vst.msk [vmem:[#allocation2 + $0x20] sm:$0xff] %vm537_vm1, %v382_v21  ;;  %v477_v32 = vrot.slane %v289_v19, 5  ;;  %v331_v33 = vrot.slane %v286_v20, 1  ;;  %v385_v36 = vsel %vm376_vm0, %v383_v24, %v384_v25  ;;  %v523_v37 = vsel %vm376_vm0, %v384_v25, %v475_v26  ;;  %v8194_v45 = vld [vmem:[%s8149_s29 + $0x58] sm:$0xff] }
  0x1a   : > { %544 = vst.msk [vmem:[#allocation2 + $0x28] sm:$0x3] %vm540_vm2, %v522_v23  ;;  %v509_v38 = vsel %vm376_vm0, %v332_v27, %v389_v28  ;;  %v386_v39 = vrot.slane %v286_v20, 7  ;;  %550 = vst.msk [vmem:[#allocation2 + $0x58] sm:$0x3] %vm540_vm2, %v523_v37  ;;  %v391_v41 = vsel %vm376_vm0, %v389_v28, %v390_v31  ;;  %v387_v43 = vrot.slane %v287_v29, 7 }
  0x1b   : > { %548 = vst.msk [vmem:[#allocation2 + $0x48] sm:$0xff] %vm537_vm1, %v507_v30  ;;  %549 = vst.msk [vmem:[#allocation2 + $0x50] sm:$0xff] %vm537_vm1, %v385_v36  ;;  %v525_v42 = vsel %vm376_vm0, %v390_v31, %v477_v32  ;;  %v476_v44 = vrot.slane %v287_v29, 5  ;;  %v334_v47 = vrot.slane %v292_v34, 1  ;;  %v395_v48 = vrot.slane %v292_v34, 7 }
  0x1c   : > { %554 = vst.msk [vmem:[#allocation2 + $0x78] sm:$0xff] %vm537_vm1, %v509_v38  ;;  %555 = vst.msk [vmem:[#allocation2 + $0x80] sm:$0xff] %vm537_vm1, %v391_v41  ;;  %v508_v46 = vsel %vm376_vm0, %v331_v33, %v386_v39  ;;  %v396_v49 = vrot.slane %v8179_v35, 7  ;;  %v388_v50 = vsel %vm376_vm0, %v386_v39, %v387_v43  ;;  %v479_v52 = vrot.slane %v8179_v35, 5 }
  0x1d   : > { %556 = vst.msk [vmem:[#allocation2 + $0x88] sm:$0x3] %vm540_vm2, %v525_v42  ;;  %v524_v51 = vsel %vm376_vm0, %v387_v43, %v476_v44  ;;  %v333_v53 = vrot.slane %v8186_v40, 1  ;;  %v593_v54 = vld [vmem:[#allocation2] sm:$0xff]  ;;  %v594_v55 = vld [vmem:[#allocation2 + $0x8] sm:$0xff]  ;;  %v511_v58 = vsel %vm376_vm0, %v334_v47, %v395_v48  ;;  %v392_v59 = vrot.slane %v8186_v40, 7 }
  0x1e   : > { %551 = vst.msk [vmem:[#allocation2 + $0x60] sm:$0xff] %vm537_vm1, %v508_v46  ;;  %v595_v56 = vld [vmem:[#allocation2 + $0x10] sm:$0x3]  ;;  %552 = vst.msk [vmem:[#allocation2 + $0x68] sm:$0xff] %vm537_vm1, %v388_v50  ;;  %v397_v57 = vsel %vm376_vm0, %v395_v48, %v396_v49  ;;  %v393_v60 = vrot.slane %v8194_v45, 7  ;;  %v867_v61 = vrot.slane %v593_v54, 2 }
  0x1f   : > { %553 = vst.msk [vmem:[#allocation2 + $0x70] sm:$0x3] %vm540_vm2, %v524_v51  ;;  %v868_v62 = vrot.slane %v594_v55, 2  ;;  %v870_v63 = vrot.slane %v595_v56, 2  ;;  %v690_v0 = vrot.slane %v593_v54, 1  ;;  %v691_v3 = vrot.slane %v594_v55, 1 }
  0x20   : > { %v596_v1 = vld [vmem:[#allocation2 + $0x18] sm:$0xff]  ;;  %v597_v2 = vld [vmem:[#allocation2 + $0x20] sm:$0xff]  ;;  %560 = vst.msk [vmem:[#allocation2 + $0xa8] sm:$0xff] %vm537_vm1, %v511_v58  ;;  %561 = vst.msk [vmem:[#allocation2 + $0xb0] sm:$0xff] %vm537_vm1, %v397_v57  ;;  %v693_v4 = vrot.slane %v595_v56, 1 }
  0x21   : > { %v598_v5 = vld [vmem:[#allocation2 + $0x28] sm:$0x3]  ;;  %v872_v6 = vrot.slane %v596_v1, 2  ;;  %v8215_v7 = vrot.slane %v597_v2, 2  ;;  %v869_v8 = vsel %vm866_vm3, %v867_v61, %v868_v62  ;;  %v871_v9 = vsel %vm866_vm3, %v868_v62, %v870_v63  ;;  %v599_v13 = vld [vmem:[#allocation2 + $0x30] sm:$0xff]  ;;  %v600_v20 = vld [vmem:[#allocation2 + $0x38] sm:$0xff] }
  0x22   : > { %v875_v10 = vrot.slane %v598_v5, 2  ;;  %v695_v11 = vrot.slane %v596_v1, 1  ;;  %v602_v12 = vld [vmem:[#allocation2 + $0x48] sm:$0xff]  ;;  %v6996_v14 = vpack.i.bf16 %v871_v9, %v869_v8  ;;  %v692_v15 = vsel %vm689_vm4, %v690_v0, %v691_v3  ;;  %v603_v18 = vld [vmem:[#allocation2 + $0x50] sm:$0xff]  ;;  %v604_v19 = vld [vmem:[#allocation2 + $0x58] sm:$0x3] }
  0x23   : > { %v694_v16 = vsel %vm689_vm4, %v691_v3, %v693_v4  ;;  %v8223_v17 = vsel %vm866_vm3, %v872_v6, %v8215_v7  ;;  %v8227_v23 = vrot.slane %v597_v2, 1  ;;  %v698_v24 = vrot.slane %v598_v5, 1  ;;  %v601_v25 = vld [vmem:[#allocation2 + $0x40] sm:$0x3]  ;;  %v608_v39 = vld [vmem:[#allocation2 + $0x78] sm:$0xff] }
  0x24   : > { %v6986_v21 = vpack.i.bf16 %v694_v16, %v692_v15  ;;  %v876_v22 = vsel %vm866_vm3, %v8215_v7, %v875_v10  ;;  %6997 = vrot.lane.b32.xlu1 %v6996_v14, %s8091_s30  ;;  %v705_v27 = vrot.slane %v602_v12, 1  ;;  %v8231_v28 = vrot.slane %v603_v18, 1  ;;  %v609_v46 = vld [vmem:[#allocation2 + $0x80] sm:$0xff]  ;;  %v610_v47 = vld [vmem:[#allocation2 + $0x88] sm:$0x3] }
  0x25   : > { %v7001_v26 = vpack.i.bf16 %v876_v22, %v8223_v17  ;;  %v708_v29 = vrot.slane %v604_v19, 1  ;;  %v8236_v30 = vsel %vm689_vm4, %v695_v11, %v8227_v23  ;;  %v699_v31 = vsel %vm689_vm4, %v8227_v23, %v698_v24  ;;  %v605_v55 = vld [vmem:[#allocation2 + $0x60] sm:$0xff]  ;;  %v606_v56 = vld [vmem:[#allocation2 + $0x68] sm:$0xff] }
  0x26   : > { %6987 = vrot.lane.b32.xlu0 %v6986_v21, %s8092_s8  ;;  %v700_v32 = vrot.slane %v599_v13, 1  ;;  %v8240_v33 = vrot.slane %v600_v20, 1  ;;  %v6991_v34 = vpack.i.bf16 %v699_v31, %v8236_v30  ;;  %v8245_v36 = vsel %vm689_vm4, %v705_v27, %v8231_v28  ;;  %v607_v63 = vld [vmem:[#allocation2 + $0x70] sm:$0x3]  ;;  %v8283_v9 = vld [vmem:[%s12406_s1] sm:$0x3f]  }
  0x27   : > { %v709_v37 = vsel %vm689_vm4, %v8231_v28, %v708_v29  ;;  %v703_v38 = vrot.slane %v601_v25, 1  ;;  %v882_v43 = vrot.slane %v602_v12, 2  ;;  %v8254_v44 = vrot.slane %v603_v18, 2  ;;  %6970 = vmatprep.subr.msk.bf16.mxu0 %vm866_vm3, %v8283_v9 }
  0x28   : > { %v7011_v41 = vpack.i.bf16 %v709_v37, %v8245_v36  ;;  %v8252_v42 = vsel %vm689_vm4, %v700_v32, %v8240_v33  ;;  %7002 = vrot.lane.b32.xlu1 %v7001_v26, %s8091_s30  ;;  %v885_v50 = vrot.slane %v604_v19, 2  ;;  %v877_v51 = vrot.slane %v599_v13, 2  ;;  %v614_v19 = vld [vmem:[#allocation2 + $0xa8] sm:$0xff] }
  0x29   : > { %v704_v48 = vsel %vm689_vm4, %v8240_v33, %v703_v38  ;;  %v8259_v54 = vrot.slane %v600_v20, 2  ;;  %v8265_v58 = vsel %vm866_vm3, %v882_v43, %v8254_v44  ;;  %v880_v61 = vrot.slane %v601_v25, 2  ;;  %v615_v20 = vld [vmem:[#allocation2 + $0xb0] sm:$0xff]  ;;  %v297_v43 = vld [vmem:[%s8149_s29 + $0x88] sm:$0xff] }
  0x2a   : > { %6992 = vrot.lane.b32.xlu0 %v6991_v34, %s8092_s8  ;;  %v7006_v57 = vpack.i.bf16 %v704_v48, %v8252_v42  ;;  %v715_v62 = vrot.slane %v608_v39, 1  ;;  %v886_v0 = vsel %vm866_vm3, %v8254_v44, %v885_v50  ;;  %v8273_v2 = vrot.slane %v609_v46, 1 }
  0x2b   : > { %v8271_v1 = vsel %vm866_vm3, %v877_v51, %v8259_v54  ;;  %v718_v3 = vrot.slane %v610_v47, 1  ;;  %v7021_v4 = vpack.i.bf16 %v886_v0, %v8265_v58  ;;  %v881_v5 = vsel %vm866_vm3, %v8259_v54, %v880_v61 }
  0x2c   : > { %v710_v6 = vrot.slane %v605_v55, 1  ;;  %v8278_v8 = vrot.slane %v606_v56, 1  ;;  %7012 = vrot.lane.b32.xlu1 %v7011_v41, %s8092_s8  ;;  %v7016_v10 = vpack.i.bf16 %v881_v5, %v8271_v1  ;;  %v8289_v11 = vsel %vm689_vm4, %v715_v62, %v8273_v2 }
  0x2d   : > { %v719_v12 = vsel %vm689_vm4, %v8273_v2, %v718_v3  ;;  %v713_v13 = vrot.slane %v607_v63, 1  ;;  %v892_v16 = vrot.slane %v608_v39, 2  ;;  %v8299_v18 = vrot.slane %v609_v46, 2  ;;  %v296_v39 = vld [vmem:[%s8149_s29 + $0x80] sm:$0xff]  ;;  %v294_v46 = vld [vmem:[%s8149_s29 + $0x70] sm:$0xff] }
  0x2e   : > { %7007 = vrot.lane.b32.xlu0 %v7006_v57, %s8092_s8  ;;  %v7031_v14 = vpack.i.bf16 %v719_v12, %v8289_v11  ;;  %v8297_v15 = vsel %vm689_vm4, %v710_v6, %v8278_v8  ;;  %v895_v22 = vrot.slane %v610_v47, 2  ;;  %v887_v24 = vrot.slane %v605_v55, 2  ;;  %v295_v55 = vld [vmem:[%s8149_s29 + $0x78] sm:$0xff]  ;;  %v298_v6 = vld [vmem:[%s8149_s29 + $0x90] sm:$0xff] }
  0x2f   : > { %v714_v21 = vsel %vm689_vm4, %v8278_v8, %v713_v13  ;;  %v8305_v25 = vrot.slane %v606_v56, 2  ;;  %v8310_v27 = vsel %vm866_vm3, %v892_v16, %v8299_v18  ;;  %v890_v29 = vrot.slane %v607_v63, 2  ;;  %v300_v63 = vld [vmem:[%s8149_s29 + $0xa0] sm:$0xff]  ;;  %v8374_v16 = vld [vmem:[%s8149_s29 + $0x98] sm:$0xff] }
  0x30   : > { %v7026_v26 = vpack.i.bf16 %v714_v21, %v8297_v15  ;;  %v527_v31 = vsel %vm376_vm0, %v396_v49, %v479_v52  ;;  %7022 = vrot.lane.b32.xlu1 %v7021_v4, %s8091_s30  ;;  %v896_v32 = vsel %vm866_vm3, %v8299_v18, %v895_v22  ;;  %v725_v37 = vrot.slane %v614_v19, 1 }
  0x31   : > { %v8322_v34 = vsel %vm866_vm3, %v887_v24, %v8305_v25  ;;  %562 = vst.msk [vmem:[#allocation2 + $0xb8] sm:$0x3] %vm540_vm2, %v527_v31  ;;  %v8325_v38 = vrot.slane %v615_v20, 1  ;;  %v7041_v35 = vpack.i.bf16 %v896_v32, %v8310_v27  ;;  %v891_v49 = vsel %vm866_vm3, %v8305_v25, %v890_v29 }
  0x32   : > { %7017 = vrot.lane.b32.xlu0 %v7016_v10, %s8091_s30  ;;  %v394_v52 = vsel %vm376_vm0, %v392_v59, %v393_v60  ;;  %v478_v41 = vrot.slane %v8194_v45, 5  ;;  %v7036_v47 = vpack.i.bf16 %v891_v49, %v8322_v34  ;;  %v510_v50 = vsel %vm376_vm0, %v333_v53, %v392_v59  ;;  %v301_v45 = vld [vmem:[%s8149_s29 + $0xa8] sm:$0xff] }
  0x33   : > { %v8343_v48 = vsel %vm689_vm4, %v725_v37, %v8325_v38  ;;  %558 = vst.msk [vmem:[#allocation2 + $0x98] sm:$0xff] %vm537_vm1, %v394_v52  ;;  %v902_v51 = vrot.slane %v614_v19, 2  ;;  %557 = vst.msk [vmem:[#allocation2 + $0x90] sm:$0xff] %vm537_vm1, %v510_v50  ;;  %v8356_v57 = vrot.slane %v615_v20, 2  ;;  %v336_v61 = vrot.slane %v296_v39, 1 }
  0x34   : > { %v526_v56 = vsel %vm376_vm0, %v393_v60, %v478_v41  ;;  %v401_v62 = vrot.slane %v296_v39, 7  ;;  %7032 = vrot.lane.b32.xlu1 %v7031_v14, %s8092_s8  ;;  %v402_v40 = vrot.slane %v297_v43, 7  ;;  %v481_v53 = vrot.slane %v297_v43, 5 }
  0x35   : > { %559 = vst.msk [vmem:[#allocation2 + $0xa0] sm:$0x3] %vm540_vm2, %v526_v56  ;;  %v335_v59 = vrot.slane %v294_v46, 1  ;;  %v398_v0 = vrot.slane %v294_v46, 7  ;;  %v8365_v60 = vsel %vm866_vm3, %v902_v51, %v8356_v57  ;;  %v399_v4 = vrot.slane %v295_v55, 7 }
  0x36   : > { %7027 = vrot.lane.b32.xlu0 %v7026_v26, %s8092_s8  ;;  %v513_v3 = vsel %vm376_vm0, %v336_v61, %v401_v62  ;;  %v480_v5 = vrot.slane %v295_v55, 5  ;;  %v403_v10 = vsel %vm376_vm0, %v401_v62, %v402_v40  ;;  %v529_v12 = vsel %vm376_vm0, %v402_v40, %v481_v53 }
  0x37   : > { %566 = vst.msk [vmem:[#allocation2 + $0xd8] sm:$0xff] %vm537_vm1, %v513_v3  ;;  %v512_v13 = vsel %vm376_vm0, %v335_v59, %v398_v0  ;;  %v338_v14 = vrot.slane %v300_v63, 1  ;;  %567 = vst.msk [vmem:[#allocation2 + $0xe0] sm:$0xff] %vm537_vm1, %v403_v10  ;;  %v400_v20 = vsel %vm376_vm0, %v398_v0, %v399_v4  ;;  %v407_v22 = vrot.slane %v300_v63, 7 }
  0x38   : > { %v616_v19 = vld [vmem:[#allocation2 + $0xb8] sm:$0x3]  ;;  %568 = vst.msk [vmem:[#allocation2 + $0xe8] sm:$0x3] %vm540_vm2, %v529_v12  ;;  %v528_v21 = vsel %vm376_vm0, %v399_v4, %v480_v5  ;;  %v408_v24 = vrot.slane %v301_v45, 7  ;;  %7042 = vrot.lane.b32.xlu1 %v7041_v35, %s8091_s30  ;;  %v483_v31 = vrot.slane %v301_v45, 5 }
  0x39   : > { %563 = vst.msk [vmem:[#allocation2 + $0xc0] sm:$0xff] %vm537_vm1, %v512_v13  ;;  %v728_v26 = vrot.slane %v616_v19, 1  ;;  %v905_v29 = vrot.slane %v616_v19, 2  ;;  %564 = vst.msk [vmem:[#allocation2 + $0xc8] sm:$0xff] %vm537_vm1, %v400_v20  ;;  %v337_v32 = vrot.slane %v298_v6, 1  ;;  %v515_v49 = vsel %vm376_vm0, %v338_v14, %v407_v22 }
  0x3a   : > { %565 = vst.msk [vmem:[#allocation2 + $0xd0] sm:$0x3] %vm540_vm2, %v528_v21  ;;  %7037 = vrot.lane.b32.xlu0 %v7036_v47, %s8091_s30  ;;  %v612_v37 = vld [vmem:[#allocation2 + $0x98] sm:$0xff]  ;;  %v409_v39 = vsel %vm376_vm0, %v407_v22, %v408_v24  ;;  %v404_v52 = vrot.slane %v298_v6, 7  ;;  %v405_v41 = vrot.slane %v8374_v16, 7  ;;  %v611_v43 = vld [vmem:[#allocation2 + $0x90] sm:$0xff]  ;;  %v531_v53 = vsel %vm376_vm0, %v408_v24, %v483_v31 }
  0x3b   : > { %v729_v35 = vsel %vm689_vm4, %v8325_v38, %v728_v26  ;;  %v8390_v46 = vrot.slane %v612_v37, 1  ;;  %v906_v50 = vsel %vm866_vm3, %v8356_v57, %v905_v29  ;;  %v8394_v51 = vrot.slane %v612_v37, 2  ;;  %572 = vst.msk [vmem:[#allocation2 + $0x108] sm:$0xff] %vm537_vm1, %v515_v49  ;;  %573 = vst.msk [vmem:[#allocation2 + $0x110] sm:$0xff] %vm537_vm1, %v409_v39 }
  0x3c   : > { %v7051_v47 = vpack.i.bf16 %v729_v35, %v8343_v48  ;;  %v613_v55 = vld [vmem:[#allocation2 + $0xa0] sm:$0x3]  ;;  %v720_v56 = vrot.slane %v611_v43, 1  ;;  %v7061_v61 = vpack.i.bf16 %v906_v50, %v8365_v60  ;;  %v897_v62 = vrot.slane %v611_v43, 2  ;;  %574 = vst.msk [vmem:[#allocation2 + $0x118] sm:$0x3] %vm540_vm2, %v531_v53 }
  0x3d   : > { %v723_v63 = vrot.slane %v613_v55, 1  ;;  %v900_v40 = vrot.slane %v613_v55, 2  ;;  %v406_v59 = vsel %vm376_vm0, %v404_v52, %v405_v41  ;;  %v482_v4 = vrot.slane %v8374_v16, 5 }
  0x3e   : > { %7052 = vrot.lane.b32.xlu1 %v7051_v47, %s8092_s8  ;;  %v8407_v0 = vsel %vm689_vm4, %v720_v56, %v8390_v46  ;;  %v8411_v45 = vsel %vm866_vm3, %v897_v62, %v8394_v51  ;;  %v620_v3 = vld [vmem:[#allocation2 + $0xd8] sm:$0xff]  ;;  %v514_v5 = vsel %vm376_vm0, %v337_v32, %v404_v52  ;;  %570 = vst.msk [vmem:[#allocation2 + $0xf8] sm:$0xff] %vm537_vm1, %v406_v59  ;;  %v621_v12 = vld [vmem:[#allocation2 + $0xe0] sm:$0xff] }
  0x3f   : > { %v724_v6 = vsel %vm689_vm4, %v8390_v46, %v723_v63  ;;  %v901_v10 = vsel %vm866_vm3, %v8394_v51, %v900_v40  ;;  %v622_v13 = vld [vmem:[#allocation2 + $0xe8] sm:$0x3]  ;;  %v735_v14 = vrot.slane %v620_v3, 1  ;;  %v912_v20 = vrot.slane %v620_v3, 2  ;;  %569 = vst.msk [vmem:[#allocation2 + $0xf0] sm:$0xff] %vm537_vm1, %v514_v5 }
  0x40   : > { %v617_v19 = vld [vmem:[#allocation2 + $0xc0] sm:$0xff]  ;;  %v7046_v21 = vpack.i.bf16 %v724_v6, %v8407_v0  ;;  %v7056_v22 = vpack.i.bf16 %v901_v10, %v8411_v45  ;;  %v8424_v24 = vrot.slane %v621_v12, 1  ;;  %v738_v26 = vrot.slane %v622_v13, 1  ;;  %v618_v29 = vld [vmem:[#allocation2 + $0xc8] sm:$0xff] }
  0x41   : > { %v619_v31 = vld [vmem:[#allocation2 + $0xd0] sm:$0x3]  ;;  %v730_v32 = vrot.slane %v617_v19, 1  ;;  %v8426_v37 = vrot.slane %v618_v29, 1  ;;  %v8428_v49 = vrot.slane %v621_v12, 2  ;;  %v915_v43 = vrot.slane %v622_v13, 2 }
  0x42   : > { %v733_v39 = vrot.slane %v619_v31, 1  ;;  %7047 = vrot.lane.b32.xlu0 %v7046_v21, %s8092_s8  ;;  %7062 = vrot.lane.b32.xlu1 %v7061_v61, %s8091_s30  ;;  %v8434_v52 = vsel %vm689_vm4, %v735_v14, %v8424_v24  ;;  %v739_v35 = vsel %vm689_vm4, %v8424_v24, %v738_v26  ;;  %v907_v50 = vrot.slane %v617_v19, 2  ;;  %v626_v47 = vld [vmem:[#allocation2 + $0x108] sm:$0xff]  ;;  %v627_v55 = vld [vmem:[#allocation2 + $0x110] sm:$0xff] }
  0x43   : > { %12484 = vst [vmem:[#allocation4_spill] sm:$0xff] %v8428_v49  ;;  %12485 = vst [vmem:[#allocation5_spill] sm:$0xff] %v8434_v52  ;;  %v7071_v56 = vpack.i.bf16 %v739_v35, %v8434_v52  ;;  %v8441_v62 = vsel %vm689_vm4, %v730_v32, %v8426_v37  ;;  %v8447_v63 = vsel %vm866_vm3, %v912_v20, %v8428_v49  ;;  %v8452_v59 = vrot.slane %v618_v29, 2  ;;  %v628_v6 = vld [vmem:[#allocation2 + $0x118] sm:$0x3]  ;;  %v305_v32 = vld [vmem:[%s8149_s29 + $0xc8] sm:$0xff] }
  0x44   : > { %v734_v61 = vsel %vm689_vm4, %v8426_v37, %v733_v39  ;;  %12486 = vst [vmem:[#allocation6_spill] sm:$0xff] %v8447_v63  ;;  %v916_v53 = vsel %vm866_vm3, %v8428_v49, %v915_v43  ;;  %v910_v3 = vrot.slane %v619_v31, 2  ;;  %v745_v10 = vrot.slane %v626_v47, 1 }
  0x45   : > { %v7066_v40 = vpack.i.bf16 %v734_v61, %v8441_v62  ;;  %v7081_v5 = vpack.i.bf16 %v916_v53, %v8447_v63  ;;  %v746_v12 = vrot.slane %v627_v55, 1  ;;  %v530_v13 = vsel %vm376_vm0, %v405_v41, %v482_v4  ;;  %v624_v14 = vld [vmem:[#allocation2 + $0xf8] sm:$0xff]  ;;  %v304_v41 = vld [vmem:[%s8149_s29 + $0xc0] sm:$0xff] }
  0x46   : > { %7057 = vrot.lane.b32.xlu0 %v7056_v22, %s8091_s30  ;;  %7072 = vrot.lane.b32.xlu1 %v7071_v56, %s8092_s8  ;;  %v8462_v19 = vsel %vm866_vm3, %v907_v50, %v8452_v59  ;;  %v911_v20 = vsel %vm866_vm3, %v8452_v59, %v910_v3  ;;  %v748_v21 = vrot.slane %v628_v6, 1  ;;  %571 = vst.msk [vmem:[#allocation2 + $0x100] sm:$0x3] %vm540_vm2, %v530_v13  ;;  %v623_v16 = vld [vmem:[#allocation2 + $0xf0] sm:$0xff]  ;;  %v8467_v26 = vrot.slane %v624_v14, 1 }
  0x47   : > { %v7076_v4 = vpack.i.bf16 %v911_v20, %v8462_v19  ;;  %v747_v22 = vsel %vm689_vm4, %v745_v10, %v746_v12  ;;  %v740_v29 = vrot.slane %v623_v16, 1  ;;  %v922_v31 = vrot.slane %v626_v47, 2  ;;  %v302_v56 = vld [vmem:[%s8149_s29 + $0xb0] sm:$0xff]  ;;  %v303_v20 = vld [vmem:[%s8149_s29 + $0xb8] sm:$0xff] }
  0x48   : > { %v749_v39 = vsel %vm689_vm4, %v746_v12, %v748_v21  ;;  %v923_v35 = vrot.slane %v627_v55, 2  ;;  %v925_v43 = vrot.slane %v628_v6, 2  ;;  %v917_v50 = vrot.slane %v623_v16, 2  ;;  %v8486_v12 = vld [vmem:[#allocation2 + $0x40] sm:$0x3] }
  0x49   : > { %v7091_v61 = vpack.i.bf16 %v749_v39, %v747_v22  ;;  %v8477_v53 = vsel %vm689_vm4, %v740_v29, %v8467_v26  ;;  %v8479_v3 = vrot.slane %v624_v14, 2  ;;  %v340_v13 = vrot.slane %v304_v41, 1  ;;  %v1379_v21 = vld [vmem:[#allocation2 + $0x28] sm:$0x3] }
  0x4a   : > { %7067 = vrot.lane.b32.xlu0 %v7066_v40, %s8092_s8  ;;  %7082 = vrot.lane.b32.xlu1 %v7081_v5, %s8091_s30  ;;  %v924_v47 = vsel %vm866_vm3, %v922_v31, %v923_v35  ;;  %v926_v55 = vsel %vm866_vm3, %v923_v35, %v925_v43  ;;  %v413_v6 = vrot.slane %v304_v41, 7  ;;  %v414_v10 = vrot.slane %v305_v32, 7  ;;  %v306_v35 = vld [vmem:[%s8149_s29 + $0xd0] sm:$0xff] }
  0x4b   : > { %12487 = vst [vmem:[#allocation7_spill] sm:$0xff] %v8479_v3  ;;  %v7101_v16 = vpack.i.bf16 %v926_v55, %v924_v47  ;;  %v8490_v14 = vsel %vm866_vm3, %v917_v50, %v8479_v3  ;;  %v485_v22 = vrot.slane %v305_v32, 5  ;;  %v339_v29 = vrot.slane %v302_v56, 1 }
  0x4c   : > { %12488 = vst [vmem:[#allocation8_spill] sm:$0xff] %v8490_v14  ;;  %v415_v40 = vsel %vm376_vm0, %v413_v6, %v414_v10  ;;  %v517_v5 = vsel %vm376_vm0, %v340_v13, %v413_v6  ;;  %v410_v39 = vrot.slane %v302_v56, 7  ;;  %v411_v31 = vrot.slane %v303_v20, 7 }
  0x4d   : > { %v625_v41 = vld [vmem:[#allocation2 + $0x100] sm:$0x3]  ;;  %v533_v43 = vsel %vm376_vm0, %v414_v10, %v485_v22  ;;  %578 = vst.msk [vmem:[#allocation2 + $0x138] sm:$0xff] %vm537_vm1, %v517_v5  ;;  %579 = vst.msk [vmem:[#allocation2 + $0x140] sm:$0xff] %vm537_vm1, %v415_v40  ;;  %v484_v47 = vrot.slane %v303_v20, 5  ;;  %v1481_v32 = vrot.slane %v8486_v12, 1 }
  0x4e   : > { %v1476_v50 = vrot.slane %v1379_v21, 1  ;;  %7077 = vrot.lane.b32.xlu0 %v7076_v4, %s8091_s30  ;;  %7092 = vrot.lane.b32.xlu1 %v7091_v61, %s8092_s8  ;;  %v743_v56 = vrot.slane %v625_v41, 1  ;;  %v920_v13 = vrot.slane %v625_v41, 2  ;;  %580 = vst.msk [vmem:[#allocation2 + $0x148] sm:$0x3] %vm540_vm2, %v533_v43  ;;  %v412_v55 = vsel %vm376_vm0, %v410_v39, %v411_v31  ;;  %v307_v10 = vld [vmem:[%s8149_s29 + $0xd8] sm:$0xff] }
  0x4f   : > { %v516_v6 = vsel %vm376_vm0, %v339_v29, %v410_v39  ;;  %v532_v20 = vsel %vm376_vm0, %v411_v31, %v484_v47  ;;  %576 = vst.msk [vmem:[#allocation2 + $0x128] sm:$0xff] %vm537_vm1, %v412_v55  ;;  %v8510_v4 = vsel %vm689_vm4, %v8240_v33, %v1481_v32  ;;  %v341_v61 = vrot.slane %v306_v35, 1  ;;  %v308_v22 = vld [vmem:[%s8149_s29 + $0xe0] sm:$0xff]  ;;  %v309_v31 = vld [vmem:[%s8149_s29 + $0xe8] sm:$0xff] }
  0x50   : > { %575 = vst.msk [vmem:[#allocation2 + $0x120] sm:$0xff] %vm537_vm1, %v516_v6  ;;  %v744_v40 = vsel %vm689_vm4, %v8467_v26, %v743_v56  ;;  %v921_v5 = vsel %vm866_vm3, %v8479_v3, %v920_v13  ;;  %v8522_v39 = vsel %vm689_vm4, %v8227_v23, %v1476_v50  ;;  %v416_v47 = vrot.slane %v306_v35, 7 }
  0x51   : > { %577 = vst.msk [vmem:[#allocation2 + $0x130] sm:$0x3] %vm540_vm2, %v532_v20  ;;  %v7086_v41 = vpack.i.bf16 %v744_v40, %v8477_v53  ;;  %v7096_v43 = vpack.i.bf16 %v921_v5, %v8490_v14  ;;  %v417_v32 = vrot.slane %v307_v10, 7  ;;  %v486_v56 = vrot.slane %v307_v10, 5 }
  0x52   : > { %7102 = vrot.lane.b32.xlu1 %v7101_v16, %s8091_s30  ;;  %v1652_v13 = vrot.slane %v1379_v21, 2  ;;  %v342_v55 = vrot.slane %v308_v22, 1  ;;  %v419_v6 = vrot.slane %v308_v22, 7  ;;  %v518_v23 = vsel %vm376_vm0, %v341_v61, %v416_v47 }
  0x53   : > { %7087 = vrot.lane.b32.xlu0 %v7086_v41, %s8092_s8  ;;  %v418_v20 = vsel %vm376_vm0, %v416_v47, %v417_v32  ;;  %v420_v50 = vrot.slane %v309_v31, 7  ;;  %v487_v29 = vrot.slane %v309_v31, 5  ;;  %v534_v5 = vsel %vm376_vm0, %v417_v32, %v486_v56  ;;  %581 = vst.msk [vmem:[#allocation2 + $0x150] sm:$0xff] %vm537_vm1, %v518_v23 }
  0x54   : > { %v632_v63 = vld [vmem:[#allocation2 + $0x138] sm:$0xff]  ;;  %v633_v40 = vld [vmem:[#allocation2 + $0x140] sm:$0xff]  ;;  %582 = vst.msk [vmem:[#allocation2 + $0x158] sm:$0xff] %vm537_vm1, %v418_v20  ;;  %v8536_v21 = vsel %vm866_vm3, %v8215_v7, %v1652_v13  ;;  %v519_v16 = vsel %vm376_vm0, %v342_v55, %v419_v6  ;;  %v1657_v35 = vrot.slane %v8486_v12, 2  ;;  %v8555_v13 = vld [vmem:[#allocation2 + $0x70] sm:$0x3] }
  0x55   : > { %v634_v10 = vld [vmem:[#allocation2 + $0x148] sm:$0x3]  ;;  %v755_v61 = vrot.slane %v632_v63, 1  ;;  %v756_v22 = vrot.slane %v633_v40, 1  ;;  %v932_v31 = vrot.slane %v632_v63, 2  ;;  %v933_v41 = vrot.slane %v633_v40, 2 }
  0x56   : > { %583 = vst.msk [vmem:[#allocation2 + $0x160] sm:$0x3] %vm540_vm2, %v534_v5  ;;  %v758_v47 = vrot.slane %v634_v10, 1  ;;  %v630_v56 = vld [vmem:[#allocation2 + $0x128] sm:$0xff]  ;;  %v935_v7 = vrot.slane %v634_v10, 2  ;;  %v421_v12 = vsel %vm376_vm0, %v419_v6, %v420_v50 }
  0x57   : > { %584 = vst.msk [vmem:[#allocation2 + $0x168] sm:$0xff] %vm537_vm1, %v519_v16  ;;  %590 = vst.msk [vmem:[#allocation2 + $0x198] sm:$0xff] %vm537_vm1, %v519_v16  ;;  %v629_v32 = vld [vmem:[#allocation2 + $0x120] sm:$0xff]  ;;  %7097 = vrot.lane.b32.xlu0 %v7096_v43, %s8091_s30  ;;  %v757_v63 = vsel %vm689_vm4, %v755_v61, %v756_v22  ;;  %v8548_v23 = vrot.slane %v630_v56, 1  ;;  %v934_v40 = vsel %vm866_vm3, %v932_v31, %v933_v41  ;;  %v8561_v49 = vrot.slane %v630_v56, 2 }
  0x58   : > { %v631_v55 = vld [vmem:[#allocation2 + $0x130] sm:$0x3]  ;;  %v750_v20 = vrot.slane %v629_v32, 1  ;;  %585 = vst.msk [vmem:[#allocation2 + $0x170] sm:$0xff] %vm537_vm1, %v421_v12  ;;  %591 = vst.msk [vmem:[#allocation2 + $0x1a0] sm:$0xff] %vm537_vm1, %v421_v12  ;;  %v759_v5 = vsel %vm689_vm4, %v756_v22, %v758_v47  ;;  %v936_v10 = vsel %vm866_vm3, %v933_v41, %v935_v7  ;;  %v927_v6 = vrot.slane %v629_v32, 2 }
  0x59   : > { %12489 = vst [vmem:[#allocation9_spill] sm:$0xff] %v8548_v23  ;;  %v753_v16 = vrot.slane %v631_v55, 1  ;;  %v7111_v43 = vpack.i.bf16 %v759_v5, %v757_v63  ;;  %12491 = vst [vmem:[#allocation11_spill] sm:$0xff] %v8561_v49  ;;  %v7121_v22 = vpack.i.bf16 %v936_v10, %v934_v40  ;;  %v930_v47 = vrot.slane %v631_v55, 2  ;;  %v1385_v31 = vld [vmem:[#allocation2 + $0x58] sm:$0x3] }
  0x5a   : > { %v8559_v61 = vsel %vm689_vm4, %v750_v20, %v8548_v23  ;;  %v535_v41 = vsel %vm376_vm0, %v420_v50, %v487_v29  ;;  %v8572_v7 = vsel %vm866_vm3, %v927_v6, %v8561_v49  ;;  %v635_v56 = vld [vmem:[#allocation2 + $0x150] sm:$0xff]  ;;  %v8578_v20 = vsel %vm866_vm3, %v8259_v54, %v1657_v35 }
  0x5b   : > { %12490 = vst [vmem:[#allocation10_spill] sm:$0xff] %v8559_v61  ;;  %v754_v12 = vsel %vm689_vm4, %v8548_v23, %v753_v16  ;;  %7112 = vrot.lane.b32.xlu1 %v7111_v43, %s8092_s8  ;;  %12492 = vst [vmem:[#allocation12_spill] sm:$0xff] %v8572_v7  ;;  %v636_v63 = vld [vmem:[#allocation2 + $0x158] sm:$0xff]  ;;  %v1491_v29 = vrot.slane %v8555_v13, 1  ;;  %v931_v50 = vsel %vm866_vm3, %v8561_v49, %v930_v47  ;;  %v760_v40 = vrot.slane %v635_v56, 1 }
  0x5c   : > { %v7106_v32 = vpack.i.bf16 %v754_v12, %v8559_v61  ;;  %586 = vst.msk [vmem:[#allocation2 + $0x178] sm:$0x3] %vm540_vm2, %v535_v41  ;;  %592 = vst.msk [vmem:[#allocation2 + $0x1a8] sm:$0x3] %vm540_vm2, %v535_v41  ;;  %v761_v5 = vrot.slane %v636_v63, 1  ;;  %v937_v10 = vrot.slane %v635_v56, 2  ;;  %v7116_v6 = vpack.i.bf16 %v931_v50, %v8572_v7 }
  0x5d   : > { %v637_v55 = vld [vmem:[#allocation2 + $0x160] sm:$0x3]  ;;  %v938_v23 = vrot.slane %v636_v63, 2  ;;  %v8588_v47 = vsel %vm689_vm4, %v8278_v8, %v1491_v29  ;;  %v2227_v49 = vld [vmem:[#allocation2 + $0x58] sm:$0x3]  ;;  %v1667_v50 = vrot.slane %v8555_v13, 2 }
  0x5e   : > { %v638_v16 = vld [vmem:[#allocation2 + $0x168] sm:$0xff]  ;;  %7107 = vrot.lane.b32.xlu0 %v7106_v32, %s8092_s8  ;;  %v763_v43 = vrot.slane %v637_v55, 1  ;;  %v762_v35 = vsel %vm689_vm4, %v760_v40, %v761_v5  ;;  %v940_v14 = vrot.slane %v637_v55, 2  ;;  %v2224_v7 = vld [vmem:[#allocation2 + $0x40] sm:$0x3]  ;;  %v1486_v40 = vrot.slane %v1385_v31, 1 }
  0x5f   : > { %v765_v12 = vrot.slane %v638_v16, 1  ;;  %v942_v41 = vrot.slane %v638_v16, 2  ;;  %v639_v61 = vld [vmem:[#allocation2 + $0x170] sm:$0xff]  ;;  %7122 = vrot.lane.b32.xlu1 %v7121_v22, %s8091_s30  ;;  %v8597_v63 = vld [vmem:[%s12406_s1 + $0x8] sm:$0x3f]   ;;  %v8600_v55 = vsel %vm866_vm3, %v937_v10, %v938_v23  ;;  %v2326_v22 = vrot.slane %v2227_v49, 1 }
  0x60   : > { %v764_v32 = vsel %vm689_vm4, %v761_v5, %v763_v43  ;;  %v766_v56 = vrot.slane %v639_v61, 1  ;;  %v943_v16 = vrot.slane %v639_v61, 2  ;;  %12493 = vst [vmem:[#allocation13_spill] sm:$0xff] %v8597_v63  ;;  %v8603_v29 = vsel %vm866_vm3, %v938_v23, %v940_v14  ;;  %6971 = vmatprep.subr.msk.bf16.mxu1 %vm866_vm3, %v8597_v63 }
  0x61   : > { %v7141_v5 = vpack.i.bf16 %v764_v32, %v762_v35  ;;  %v8617_v14 = vsel %vm689_vm4, %v8231_v28, %v1486_v40  ;;  %v1662_v23 = vrot.slane %v1385_v31, 2  ;;  %v2321_v3 = vrot.slane %v2224_v7, 1 }
  0x62   : > { %7117 = vrot.lane.b32.xlu0 %v7116_v6, %s8091_s30  ;;  %v767_v61 = vsel %vm689_vm4, %v765_v12, %v766_v56  ;;  %v8610_v43 = vsel %vm866_vm3, %v942_v41, %v943_v16  ;;  %v12494_v6 = vpack.i.bf16 %v8510_v4, %v8252_v42  ;;  %v8629_v32 = vsel %vm866_vm3, %v8305_v25, %v1667_v50 }
  0x63   : > { %v640_v10 = vld [vmem:[#allocation2 + $0x178] sm:$0x3]  ;;  %v8633_v31 = vsel %vm866_vm3, %v8254_v44, %v1662_v23  ;;  %v8637_v4 = vsel %vm689_vm4, %v8231_v28, %v2326_v22  ;;  %v8641_v40 = vsel %vm689_vm4, %v8240_v33, %v2321_v3  ;;  %v12495_v35 = vpack.i.bf16 %v8522_v39, %v8236_v30  ;;  %v2233_v22 = vld [vmem:[#allocation2 + $0x88] sm:$0x3]  ;;  %v2230_v33 = vld [vmem:[#allocation2 + $0x70] sm:$0x3] }
  0x64   : > { %7132 = vrot.lane.b32.xlu1 %v12494_v6, %s8092_s8  ;;  %v768_v12 = vrot.slane %v640_v10, 1  ;;  %v945_v41 = vrot.slane %v640_v10, 2  ;;  %v1394_v10 = vld [vmem:[#allocation2 + $0xa0] sm:$0x3]  ;;  %v1391_v6 = vld [vmem:[#allocation2 + $0x88] sm:$0x3]  ;;  %v7186_v52 = vpack.i.bf16 %v8641_v40, %v8252_v42 }
  0x65   : > { %v2502_v30 = vrot.slane %v2227_v49, 2  ;;  %v2497_v39 = vrot.slane %v2224_v7, 2  ;;  %v2336_v28 = vrot.slane %v2233_v22, 1  ;;  %v2331_v13 = vrot.slane %v2230_v33, 1  ;;  %v12510_v42 = vld [vmem:[#allocation11_spill] sm:$0xff] }
  0x66   : > { %7127 = vrot.lane.b32.xlu0 %v12495_v35, %s8092_s8  ;;  %v769_v50 = vsel %vm689_vm4, %v766_v56, %v768_v12  ;;  %v946_v23 = vsel %vm866_vm3, %v943_v16, %v945_v41  ;;  %v1501_v56 = vrot.slane %v1394_v10, 1  ;;  %v1496_v16 = vrot.slane %v1391_v6, 1 }
  0x67   : > { %v7151_v3 = vpack.i.bf16 %v769_v50, %v767_v61  ;;  %v7161_v63 = vpack.i.bf16 %v946_v23, %v8610_v43  ;;  %v1677_v12 = vrot.slane %v1394_v10, 2  ;;  %v8659_v41 = vsel %vm866_vm3, %v8254_v44, %v2502_v30  ;;  %v1400_v10 = vld [vmem:[#allocation2 + $0xd0] sm:$0x3] }
  0x68   : > { %7142 = vrot.lane.b32.xlu1 %v7141_v5, %s8092_s8  ;;  %v1672_v35 = vrot.slane %v1391_v6, 2  ;;  %v12496_v61 = vpack.i.bf16 %v8536_v21, %v8223_v17  ;;  %v7201_v49 = vpack.i.bf16 %v8659_v41, %v8265_v58  ;;  %v8669_v7 = vsel %vm866_vm3, %v8259_v54, %v2497_v39  ;;  %v1397_v6 = vld [vmem:[#allocation2 + $0xb8] sm:$0x3] }
  0x69   : > { %v8673_v5 = vsel %vm689_vm4, %v8390_v46, %v1501_v56  ;;  %v8677_v44 = vsel %vm689_vm4, %v8273_v2, %v1496_v16  ;;  %v7196_v43 = vpack.i.bf16 %v8669_v7, %v8271_v1  ;;  %v8687_v54 = vsel %vm866_vm3, %v8394_v51, %v1677_v12  ;;  %v2239_v56 = vld [vmem:[#allocation2 + $0xb8] sm:$0x3]  ;;  %v2236_v16 = vld [vmem:[#allocation2 + $0xa0] sm:$0x3] }
  0x6a   : > { %7137 = vrot.lane.b32.xlu0 %v12496_v61, %s8091_s30  ;;  %v8694_v23 = vsel %vm866_vm3, %v8299_v18, %v1672_v35  ;;  %v8698_v30 = vsel %vm689_vm4, %v8273_v2, %v2336_v28  ;;  %v8702_v39 = vsel %vm689_vm4, %v8278_v8, %v2331_v13  ;;  %v2512_v61 = vrot.slane %v2233_v22, 2 }
  0x6b   : > { %v7226_v35 = vpack.i.bf16 %v8702_v39, %v8297_v15  ;;  %v12497_v2 = vpack.i.bf16 %v8578_v20, %v8271_v1  ;;  %v2507_v28 = vrot.slane %v2230_v33, 2  ;;  %v1511_v8 = vrot.slane %v1400_v10, 1 }
  0x6c   : > { %7152 = vrot.lane.b32.xlu1 %v7151_v3, %s8092_s8  ;;  %v1506_v13 = vrot.slane %v1397_v6, 1  ;;  %v1687_v50 = vrot.slane %v1400_v10, 2  ;;  %v8716_v21 = vsel %vm866_vm3, %v8299_v18, %v2512_v61  ;;  %v1682_v3 = vrot.slane %v1397_v6, 2  ;;  %v1406_v61 = vld [vmem:[#allocation2 + $0x100] sm:$0x3] }
  0x6d   : > { %v2346_v17 = vrot.slane %v2239_v56, 1  ;;  %v2341_v12 = vrot.slane %v2236_v16, 1  ;;  %v7241_v22 = vpack.i.bf16 %v8716_v21, %v8310_v27  ;;  %v8723_v20 = vsel %vm866_vm3, %v8305_v25, %v2507_v28 }
  0x6e   : > { %7147 = vrot.lane.b32.xlu0 %v12497_v2, %s8091_s30  ;;  %v8727_v33 = vsel %vm689_vm4, %v8426_v37, %v1511_v8  ;;  %v8731_v18 = vsel %vm689_vm4, %v8325_v38, %v1506_v13  ;;  %v7236_v10 = vpack.i.bf16 %v8723_v20, %v8322_v34  ;;  %v8741_v25 = vsel %vm866_vm3, %v8452_v59, %v1687_v50  ;;  %v1403_v37 = vld [vmem:[#allocation2 + $0xe8] sm:$0x3]  ;;  %v8776_v50 = vld [vmem:[%s12406_s1 + $0x10] sm:$0x3f]  }
  0x6f   : > { %v7246_v6 = vpack.i.bf16 %v8731_v18, %v8343_v48  ;;  %v12498_v2 = vpack.i.bf16 %v8603_v29, %v8600_v55  ;;  %v7261_v28 = vpack.i.bf16 %v8741_v25, %v8462_v19  ;;  %v8751_v8 = vsel %vm866_vm3, %v8356_v57, %v1682_v3  ;;  %v8914_v18 = vld [vmem:[#allocation2 + $0x108] sm:$0xff]  ;;  %v1408_v19 = vld [vmem:[#allocation2 + $0x110] sm:$0xff] }
  0x70   : > { %7162 = vrot.lane.b32.xlu1 %v7161_v63, %s8091_s30  ;;  %v7251_v63 = vpack.i.bf16 %v8727_v33, %v8441_v62  ;;  %v8755_v13 = vsel %vm689_vm4, %v8325_v38, %v2346_v17  ;;  %v8759_v59 = vsel %vm689_vm4, %v8390_v46, %v2341_v12  ;;  %v12499_v3 = vpack.i.bf16 %v8588_v47, %v8297_v15  ;;  %v2240_v15 = vld [vmem:[#allocation2 + $0xc0] sm:$0xff] }
  0x71   : > { %v7271_v55 = vpack.i.bf16 %v8755_v13, %v8343_v48  ;;  %v7181_v38 = vpack.i.bf16 %v8629_v32, %v8322_v34  ;;  %v2517_v46 = vrot.slane %v2236_v16, 2  ;;  %v1521_v17 = vrot.slane %v1406_v61, 1 }
  0x72   : > { %7157 = vrot.lane.b32.xlu0 %v12498_v2, %s8091_s30  ;;  %v2522_v2 = vrot.slane %v2239_v56, 2  ;;  %v1516_v12 = vrot.slane %v1403_v37, 1  ;;  %v1181_v56 = vsel %vm866_vm3, %v8283_v9, 0  ;;  %v1697_v47 = vrot.slane %v1406_v61, 2 }
  0x73   : > { %v12500_v32 = vpack.i.bf16 %v8617_v14, %v8245_v36  ;;  %6767 = vmatpush3.bf16.msra.mxu0 %v1181_v56  ;;  %v12511_v40 = vpack.i.bf16 %v8673_v5, %v8407_v0  ;;  %v12514_v1 = vpack.i.bf16 %v8687_v54, %v8411_v45  ;;  %v12515_v7 = vpack.i.bf16 %v8694_v23, %v8310_v27  ;;  %v2243_v54 = vld [vmem:[#allocation2 + $0xd8] sm:$0xff]  ;;  %v2244_v23 = vld [vmem:[#allocation2 + $0xe0] sm:$0xff] }
  0x74   : > { %7172 = vrot.lane.b32.xlu1 %v12499_v3, %s8092_s8  ;;  %v8780_v29 = vsel %vm866_vm3, %v8356_v57, %v2522_v2  ;;  %v8792_v3 = vsel %vm866_vm3, %v8394_v51, %v2517_v46  ;;  %v8796_v57 = vsel %vm689_vm4, %v8467_v26, %v1521_v17  ;;  %v8800_v9 = vsel %vm689_vm4, %v8424_v24, %v1516_v12  ;;  %v12501_v2 = vld [vmem:[#allocation5_spill] sm:$0xff]  ;;  %v12502_v51 = vld [vmem:[#allocation7_spill] sm:$0xff]  ;;  %v12503_v26 = vld [vmem:[#allocation8_spill] sm:$0xff] }
  0x75   : > { %v7281_v16 = vpack.i.bf16 %v8780_v29, %v8365_v60  ;;  %v7276_v61 = vpack.i.bf16 %v8792_v3, %v8411_v45  ;;  %v7291_v14 = vpack.i.bf16 %v8796_v57, %v8477_v53  ;;  %v8810_v46 = vsel %vm866_vm3, %v12502_v51, %v1697_v47  ;;  %6972 = vmatprep.subr.msk.bf16.mxu0 %vm866_vm3, %v8776_v50  ;;  %v1412_v47 = vld [vmem:[#allocation2 + $0x130] sm:$0x3]  ;;  %v12506_v51 = vld [vmem:[#allocation6_spill] sm:$0xff] }
  0x76   : > { %7167 = vrot.lane.b32.xlu0 %v12500_v32, %s8092_s8  ;;  %v1692_v17 = vrot.slane %v1403_v37, 2  ;;  %v12504_v12 = vpack.i.bf16 %v8633_v31, %v8265_v58  ;;  %v12505_v32 = vld [vmem:[#allocation4_spill] sm:$0xff]  ;;  %v12507_v37 = vpack.i.bf16 %v8637_v4, %v8245_v36  ;;  %v1531_v24 = vrot.slane %v1412_v47, 1  ;;  %v12508_v31 = vld [vmem:[#allocation9_spill] sm:$0xff] }
  0x77   : > { %v1707_v4 = vrot.slane %v1412_v47, 2  ;;  %v12512_v58 = vld [vmem:[#allocation12_spill] sm:$0xff]  ;;  %v12516_v5 = vpack.i.bf16 %v8698_v30, %v8289_v11  ;;  %v8889_v30 = vld [vmem:[#allocation2 + $0xc8] sm:$0xff]  ;;  %v2353_v21 = vrot.slane %v2243_v54, 1  ;;  %v2529_v33 = vrot.slane %v2243_v54, 2 }
  0x78   : > { %7182 = vrot.lane.b32.xlu1 %v7181_v38, %s8091_s30  ;;  %v8823_v56 = vsel %vm866_vm3, %v12505_v32, %v1692_v17  ;;  %v8837_v32 = vsel %vm689_vm4, %v12508_v31, %v1531_v24  ;;  %v12509_v17 = vld [vmem:[#allocation10_spill] sm:$0xff]  ;;  %v2349_v31 = vrot.slane %v8889_v30, 1  ;;  %v12517_v25 = vpack.i.bf16 %v8751_v8, %v8365_v60  ;;  %v9021_v57 = vld [vmem:[#allocation2 + $0x50] sm:$0xff] }
  0x79   : > { %v7296_v38 = vpack.i.bf16 %v8823_v56, %v12506_v51  ;;  %v7331_v36 = vpack.i.bf16 %v8837_v32, %v12509_v17  ;;  %v1699_v45 = vrot.slane %v8914_v18, 2  ;;  %v12520_v53 = vpack.i.bf16 %v8800_v9, %v12501_v2 }
  0x7a   : > { %7177 = vrot.lane.b32.xlu0 %v12504_v12, %s8091_s30  ;;  %v2807_v51 = vsel %vm866_vm3, %v8776_v50, 0 }
  0x7c   : > { %7192 = vrot.lane.b32.xlu1 %v12507_v37, %s8092_s8  ;;  %v2242_v37 = vld [vmem:[#allocation2 + $0xd0] sm:$0x3] }
  0x7d   : > { %v2351_v62 = vrot.slane %v2242_v37, 1 }
  0x7e   : > { %7187 = vrot.lane.b32.xlu0 %v7186_v52, %s8092_s8  ;;  %v8851_v52 = vsel %vm866_vm3, %v12510_v42, %v1707_v4 }
  0x7f   : > { %v7341_v41 = vpack.i.bf16 %v8851_v52, %v12512_v58 }
  0x80   : > { %7202 = vrot.lane.b32.xlu1 %v7201_v49, %s8091_s30  ;;  %v12513_v49 = vpack.i.bf16 %v8677_v44, %v8289_v11  ;;  %v310_v44 = vld [vmem:[%s8149_s29 + $0xf0] sm:$0xff]  ;;  %v2245_v11 = vld [vmem:[#allocation2 + $0xe8] sm:$0x3] }
  0x81   : > { %v343_v24 = vrot.slane %v310_v44, 1  ;;  %v422_v12 = vrot.slane %v310_v44, 7  ;;  %v2356_v20 = vrot.slane %v2245_v11, 1  ;;  %v2532_v4 = vrot.slane %v2245_v11, 2 }
  0x82   : > { %7197 = vrot.lane.b32.xlu0 %v7196_v43, %s8091_s30  ;;  %v311_v43 = vld [vmem:[%s8149_s29 + $0xf8] sm:$0xff] }
  0x83   : > { %v423_v47 = vrot.slane %v311_v43, 7  ;;  %v488_v39 = vrot.slane %v311_v43, 5  ;;  %v520_v27 = vsel %vm376_vm0, %v343_v24, %v422_v12  ;;  %v12518_v24 = vld [vmem:[#allocation13_spill] sm:$0xff] }
  0x84   : > { %7212 = vrot.lane.b32.xlu1 %v12511_v40, %s8092_s8  ;;  %587 = vst.msk [vmem:[#allocation2 + $0x180] sm:$0xff] %vm537_vm1, %v520_v27  ;;  %v7957_v27 = vld [vmem:[#allocation2 + $0x8] sm:$0xff] }
  0x85   : > { %v536_v34 = vsel %vm376_vm0, %v423_v47, %v488_v39  ;;  %v7956_v39 = vld [vmem:[#allocation2] sm:$0xff] }
  0x86   : > { %7207 = vrot.lane.b32.xlu0 %v12513_v49, %s8092_s8  ;;  %589 = vst.msk [vmem:[#allocation2 + $0x190] sm:$0x3] %vm540_vm2, %v536_v34  ;;  %v2524_v49 = vrot.slane %v2240_v15, 2  ;;  %v8949_v34 = vrot.slane %v1408_v19, 1 }
  0x88   : > { %7222 = vrot.lane.b32.xlu1 %v12514_v1, %s8091_s30  ;;  %v2525_v1 = vrot.slane %v8889_v30, 2  ;;  %v1523_v30 = vrot.slane %v8914_v18, 1 }
  0x8a   : > { %7217 = vrot.lane.b32.xlu0 %v12515_v7, %s8091_s30 }
  0x8c   : > { %7232 = vrot.lane.b32.xlu1 %v12516_v5, %s8092_s8 }
  0x8e   : > { %7227 = vrot.lane.b32.xlu0 %v7226_v35, %s8092_s8  ;;  %v424_v35 = vsel %vm376_vm0, %v422_v12, %v423_v47  ;;  %v1962_v12 = vsel %vm866_vm3, %v12518_v24, 0  ;;  %v8929_v47 = vsel %vm689_vm4, %v2349_v31, %v2351_v62 }
  0x8f   : > { %588 = vst.msk [vmem:[#allocation2 + $0x188] sm:$0xff] %vm537_vm1, %v424_v35  ;;  %6801 = vmatpush3.bf16.msra.mxu1 %v1962_v12 }
  0x90   : > { %7242 = vrot.lane.b32.xlu1 %v7241_v22, %s8091_s30  ;;  %v2354_v22 = vrot.slane %v2244_v23, 1 }
  0x92   : > { %7237 = vrot.lane.b32.xlu0 %v7236_v10, %s8091_s30  ;;  %v2348_v10 = vrot.slane %v2240_v15, 1  ;;  %v8911_v40 = vsel %vm689_vm4, %v2353_v21, %v2354_v22  ;;  %v8917_v44 = vsel %vm689_vm4, %v2354_v22, %v2356_v20  ;;  %v8945_v22 = vsel %vm866_vm3, %v2524_v49, %v2525_v1 }
  0x94   : > { %7252 = vrot.lane.b32.xlu1 %v7251_v63, %s8092_s8  ;;  %v2530_v63 = vrot.slane %v2244_v23, 2  ;;  %v8920_v43 = vsel %vm689_vm4, %v2348_v10, %v2349_v31  ;;  %v2527_v23 = vrot.slane %v2242_v37, 2  ;;  %v8947_v37 = vld [vmem:[#allocation2 + $0x118] sm:$0x3] }
  0x95   : > { %v1526_v49 = vrot.slane %v8947_v37, 1 }
  0x96   : > { %7247 = vrot.lane.b32.xlu0 %v7246_v6, %s8092_s8  ;;  %v6998_v42 = vpop.permute.xlu1 %6997  ;;  %v8932_v11 = vsel %vm866_vm3, %v2529_v33, %v2530_v63  ;;  %v8935_v15 = vsel %vm866_vm3, %v2530_v63, %v2532_v4  ;;  %v8958_v4 = vsel %vm866_vm3, %v2525_v1, %v2527_v23  ;;  %v8986_v23 = vld [vmem:[#allocation2 + $0xf0] sm:$0xff] }
  0x97   : > { %v7000_v6 = vunpack.i.h.bf16 %v6998_v42  ;;  %v6999_v7 = vunpack.i.l.bf16 %v6998_v42  ;;  %v7311_v42 = vpack.i.bf16 %v8917_v44, %v8911_v40  ;;  %v9096_v44 = vld [vmem:[#allocation2 + $0x80] sm:$0xff] }
  0x98   : > { %7262 = vrot.lane.b32.xlu1 %v7261_v28, %s8091_s30  ;;  %v6988_v5 = vpop.permute.xlu0 %6987 }
  0x99   : > { %v6990_v28 = vunpack.i.h.bf16 %v6988_v5  ;;  %v6989_v54 = vunpack.i.l.bf16 %v6988_v5  ;;  %v7306_v5 = vpack.i.bf16 %v8929_v47, %v8920_v43  ;;  %v9110_v47 = vld [vmem:[#allocation2 + $0x60] sm:$0xff] }
  0x9a   : > { %7257 = vrot.lane.b32.xlu0 %v12517_v25, %s8091_s30  ;;  %v7003_v8 = vpop.permute.xlu1 %7002 }
  0x9b   : > { %v1043_v35 = vsel %vm537_vm1, %v7956_v39, %v6989_v54  ;;  %v1044_v21 = vsel %vm537_vm1, %v7957_v27, %v6990_v28  ;;  %v7005_v20 = vunpack.i.h.bf16 %v7003_v8  ;;  %v7004_v10 = vunpack.i.l.bf16 %v7003_v8  ;;  %v8984_v54 = vld [vmem:[#allocation2 + $0x118] sm:$0x3]  ;;  %v8998_v27 = vld [vmem:[#allocation2 + $0x100] sm:$0x3] }
  0x9c   : > { %7272 = vrot.lane.b32.xlu1 %v7271_v55, %s8092_s8  ;;  %v6993_v31 = vpop.permute.xlu0 %6992  ;;  %v1076_v48 = vsel %vm1075_vm5, %v1043_v35, %v6999_v7  ;;  %v1077_v13 = vsel %vm1075_vm5, %v1044_v21, %v7000_v6  ;;  %v12519_v55 = vpack.i.bf16 %v8759_v59, %v8407_v0  ;;  %v8967_v6 = vld [vmem:[#allocation2 + $0x20] sm:$0xff]  ;;  %v8971_v59 = vld [vmem:[#allocation2 + $0x18] sm:$0xff]  ;;  %v7316_v28 = vpack.i.bf16 %v8958_v4, %v8945_v22 }
  0x9d   : > { %v6995_v62 = vunpack.i.h.bf16 %v6993_v31  ;;  %v6994_v33 = vunpack.i.l.bf16 %v6993_v31  ;;  %v1108_v63 = vpack.c.bf16 %v1077_v13, %v1076_v48  ;;  %v8994_v39 = vsel %vm689_vm4, %v1523_v30, %v8949_v34  ;;  %v8996_v35 = vld [vmem:[#allocation2 + $0xf8] sm:$0xff] }
  0x9e   : > { %7267 = vrot.lane.b32.xlu0 %v12519_v55, %s8092_s8  ;;  %v7013_v7 = vpop.permute.xlu1 %7012  ;;  %v1702_v30 = vrot.slane %v8947_v37, 2  ;;  %v2366_v31 = vrot.slane %v8984_v54, 1  ;;  %v2358_v48 = vrot.slane %v8986_v23, 1  ;;  %v2359_v18 = vrot.slane %v8996_v35, 1 }
  0x9f   : > { %v1046_v0 = vsel %vm537_vm1, %v8967_v6, %v6995_v62  ;;  %v1045_v1 = vsel %vm537_vm1, %v8971_v59, %v6994_v33  ;;  %6768 = vmatprep.mubr.msk.bf16.mxu0 %vm1131_vm6, %v1108_v63  ;;  %v7015_v24 = vunpack.i.h.bf16 %v7013_v7  ;;  %v7014_v12 = vunpack.i.l.bf16 %v7013_v7  ;;  %v9033_v7 = vld [vmem:[#allocation2 + $0x30] sm:$0xff] }
  0xa0   : > { %7282 = vrot.lane.b32.xlu1 %v7281_v16, %s8091_s30  ;;  %v7008_v25 = vpop.permute.xlu0 %7007  ;;  %v1078_v60 = vsel %vm1075_vm5, %v1045_v1, %v7004_v10  ;;  %v1079_v29 = vsel %vm1075_vm5, %v1046_v0, %v7005_v20  ;;  %v7321_v16 = vpack.i.bf16 %v8935_v15, %v8932_v11  ;;  %v9002_v10 = vsel %vm689_vm4, %v8949_v34, %v1526_v49  ;;  %v9029_v0 = vld [vmem:[#allocation2 + $0x38] sm:$0xff] }
  0xa1   : > { %v1109_v8 = vpack.c.bf16 %v1079_v29, %v1078_v60  ;;  %v7010_v21 = vunpack.i.h.bf16 %v7008_v25  ;;  %v7009_v20 = vunpack.i.l.bf16 %v7008_v25  ;;  %v2361_v33 = vrot.slane %v8998_v27, 1 }
  0xa2   : > { %7277 = vrot.lane.b32.xlu0 %v7276_v61, %s8091_s30  ;;  %v7023_v3 = vpop.permute.xlu1 %7022  ;;  %v9010_v61 = vrot.slane %v1408_v19, 2  ;;  %v9025_v19 = vld [vmem:[#allocation2 + $0x48] sm:$0xff]  ;;  %v12521_v60 = vpack.i.bf16 %v8810_v46, %v12503_v26  ;;  %v2542_v46 = vrot.slane %v8984_v54, 2  ;;  %v9056_v26 = vld [vmem:[#allocation2 + $0x150] sm:$0xff] }
  0xa3   : > { %6769 = vmatmul.mubr.msk.bf16.vlgmr.msra.gmra.mrb[0].mxu0 %vm1131_vm6, %v1109_v8  ;;  %v7025_v13 = vunpack.i.h.bf16 %v7023_v3  ;;  %v7024_v55 = vunpack.i.l.bf16 %v7023_v3  ;;  %v1049_v37 = vsel %vm537_vm1, %v9025_v19, %v7014_v12  ;;  %v1048_v1 = vsel %vm537_vm1, %v9029_v0, %v7010_v21 }
  0xa4   : > { %7292 = vrot.lane.b32.xlu1 %v7291_v14, %s8092_s8  ;;  %v7018_v62 = vpop.permute.xlu0 %7017  ;;  %v1050_v14 = vsel %vm537_vm1, %v9021_v57, %v7015_v24  ;;  %v1047_v9 = vsel %vm537_vm1, %v9033_v7, %v7009_v20  ;;  %v7326_v21 = vpack.i.bf16 %v9002_v10, %v8994_v39  ;;  %v9075_v56 = vsel %vm689_vm4, %v2359_v18, %v2361_v33 }
  0xa5   : > { %v7020_v63 = vunpack.i.h.bf16 %v7018_v62  ;;  %v7019_v49 = vunpack.i.l.bf16 %v7018_v62  ;;  %v1082_v2 = vsel %vm1075_vm5, %v1049_v37, %v7024_v55  ;;  %v1083_v25 = vsel %vm1075_vm5, %v1050_v14, %v7025_v13  ;;  %v9071_v37 = vld [vmem:[#allocation2 + $0x160] sm:$0x3]  ;;  %6835 = vmatpush3.bf16.msra.mxu0 %v2807_v51 }
  0xa6   : > { %7287 = vrot.lane.b32.xlu0 %v12520_v53, %s8092_s8  ;;  %v7033_v12 = vpop.permute.xlu1 %7032  ;;  %v1111_v8 = vpack.c.bf16 %v1083_v25, %v1082_v2  ;;  %v9049_v55 = vsel %vm866_vm3, %v1699_v45, %v9010_v61  ;;  %v9053_v13 = vsel %vm866_vm3, %v9010_v61, %v1702_v30  ;;  %v9064_v14 = vsel %vm689_vm4, %v8949_v34, %v2366_v31  ;;  %v9069_v30 = vld [vmem:[#allocation2 + $0x158] sm:$0xff]  ;;  %v1414_v25 = vld [vmem:[#allocation2 + $0x140] sm:$0xff] }
  0xa7   : > { %v1080_v29 = vsel %vm1075_vm5, %v1047_v9, %v7019_v49  ;;  %v1081_v24 = vsel %vm1075_vm5, %v1048_v1, %v7020_v63  ;;  %v7035_v62 = vunpack.i.h.bf16 %v7033_v12  ;;  %v7034_v53 = vunpack.i.l.bf16 %v7033_v12  ;;  %v9104_v2 = vld [vmem:[#allocation2 + $0x138] sm:$0xff]  ;;  %v9116_v12 = vld [vmem:[#allocation2 + $0x148] sm:$0x3] }
  0xa8   : > { %7302 = vrot.lane.b32.xlu1 %v12521_v60, %s8091_s30  ;;  %v7028_v3 = vpop.permute.xlu0 %7027  ;;  %v1110_v20 = vpack.c.bf16 %v1081_v24, %v1080_v29  ;;  %v9067_v45 = vsel %vm689_vm4, %v2358_v48, %v2359_v18  ;;  %v2534_v34 = vrot.slane %v8986_v23, 2  ;;  %v2535_v31 = vrot.slane %v8996_v35, 2  ;;  %v9100_v23 = vld [vmem:[#allocation2 + $0x78] sm:$0xff]  ;;  %v9106_v60 = vld [vmem:[#allocation2 + $0x68] sm:$0xff] }
  0xa9   : > { %v7030_v54 = vunpack.i.h.bf16 %v7028_v3  ;;  %v7029_v63 = vunpack.i.l.bf16 %v7028_v3  ;;  %v2537_v48 = vrot.slane %v8998_v27, 2  ;;  %v1538_v18 = vrot.slane %v9056_v26, 1 }
  0xaa   : > { %7297 = vrot.lane.b32.xlu0 %v7296_v38, %s8091_s30  ;;  %6772 = vmatprep.mubr.msk.bf16.mxu0 %vm1131_vm6, %v1110_v20  ;;  %v7043_v38 = vpop.permute.xlu1 %7042  ;;  %v9089_v50 = vrot.slane %v9069_v30, 1  ;;  %v1541_v40 = vrot.slane %v9071_v37, 1  ;;  %v1053_v35 = vsel %vm537_vm1, %v9100_v23, %v7034_v53  ;;  %v1533_v51 = vrot.slane %v9104_v2, 1 }
  0xab   : > { %6773 = vmatmul.mubr.msk.bf16.gmra.mrb[4].mxu0 %vm1131_vm6, %v1111_v8  ;;  %v7045_v33 = vunpack.i.h.bf16 %v7043_v38  ;;  %v7044_v49 = vunpack.i.l.bf16 %v7043_v38  ;;  %v1052_v43 = vsel %vm537_vm1, %v9106_v60, %v7030_v54  ;;  %v9132_v38 = vrot.slane %v1414_v25, 1 }
  0xac   : > { %7312 = vrot.lane.b32.xlu1 %v7311_v42, %s8092_s8  ;;  %v7038_v1 = vpop.permute.xlu0 %7037  ;;  %v1054_v42 = vsel %vm537_vm1, %v9096_v44, %v7035_v62  ;;  %v9126_v62 = vsel %vm866_vm3, %v9010_v61, %v2542_v46  ;;  %v9139_v11 = vsel %vm866_vm3, %v2535_v31, %v2537_v48  ;;  %v9143_v15 = vsel %vm689_vm4, %v1538_v18, %v9089_v50 }
  0xad   : > { %v7040_v27 = vunpack.i.h.bf16 %v7038_v1  ;;  %v7039_v9 = vunpack.i.l.bf16 %v7038_v1  ;;  %v1086_v29 = vsel %vm1075_vm5, %v1053_v35, %v7044_v49  ;;  %v1087_v24 = vsel %vm1075_vm5, %v1054_v42, %v7045_v33  ;;  %v9185_v49 = vld [vmem:[#allocation2 + $0x148] sm:$0x3]  ;;  %v9187_v1 = vld [vmem:[#allocation2 + $0x120] sm:$0xff] }
  0xae   : > { %7307 = vrot.lane.b32.xlu0 %v7306_v5, %s8092_s8  ;;  %v1051_v5 = vsel %vm537_vm1, %v9110_v47, %v7029_v63  ;;  %v1113_v20 = vpack.c.bf16 %v1087_v24, %v1086_v29  ;;  %v9129_v63 = vsel %vm866_vm3, %v2534_v34, %v2535_v31  ;;  %v1536_v61 = vrot.slane %v9116_v12, 1  ;;  %v9193_v42 = vld [vmem:[#allocation2 + $0xa8] sm:$0xff] }
  0xaf   : > { %v1084_v8 = vsel %vm1075_vm5, %v1051_v5, %v7039_v9  ;;  %v1085_v3 = vsel %vm1075_vm5, %v1052_v43, %v7040_v27  ;;  %v7336_v33 = vpack.i.bf16 %v9053_v13, %v9049_v55  ;;  %v7351_v22 = vpack.i.bf16 %v9064_v14, %v8994_v39  ;;  %v9197_v35 = vld [vmem:[#allocation2 + $0x128] sm:$0xff]  ;;  %v9208_v5 = vld [vmem:[#allocation2 + $0x130] sm:$0x3] }
  0xb0   : > { %7322 = vrot.lane.b32.xlu1 %v7321_v16, %s8091_s30  ;;  %v7053_v53 = vpop.permute.xlu1 %7052  ;;  %v1112_v54 = vpack.c.bf16 %v1085_v3, %v1084_v8  ;;  %v9147_v16 = vsel %vm689_vm4, %v9089_v50, %v1541_v40  ;;  %v7346_v4 = vpack.i.bf16 %v9075_v56, %v9067_v45  ;;  %v1714_v13 = vrot.slane %v9056_v26, 2  ;;  %v9189_v40 = vld [vmem:[#allocation2 + $0xb0] sm:$0xff] }
  0xb1   : > { %v7055_v46 = vunpack.i.h.bf16 %v7053_v53  ;;  %v7054_v34 = vunpack.i.l.bf16 %v7053_v53  ;;  %v7356_v18 = vpack.i.bf16 %v9139_v11, %v9129_v63  ;;  %v7371_v32 = vpack.i.bf16 %v9147_v16, %v9143_v15  ;;  %v9223_v53 = vld [vmem:[#allocation2 + $0x98] sm:$0xff] }
  0xb2   : > { %7317 = vrot.lane.b32.xlu0 %v7316_v28, %s8091_s30  ;;  %6776 = vmatprep.mubr.msk.bf16.mxu0 %vm1131_vm6, %v1112_v54  ;;  %v7361_v28 = vpack.i.bf16 %v9126_v62, %v9049_v55  ;;  %v9171_v17 = vsel %vm689_vm4, %v1533_v51, %v9132_v38  ;;  %v9182_v45 = vsel %vm689_vm4, %v9132_v38, %v1536_v61  ;;  %v1717_v56 = vrot.slane %v9071_v37, 2 }
  0xb3   : > { %6777 = vmatmul.mubr.msk.bf16.gmra.mrb[8].mxu0 %vm1131_vm6, %v1113_v20  ;;  %v1057_v39 = vsel %vm537_vm1, %v9193_v42, %v7054_v34  ;;  %v1709_v9 = vrot.slane %v9104_v2, 2  ;;  %v9206_v43 = vrot.slane %v1414_v25, 2  ;;  %v1712_v3 = vrot.slane %v9116_v12, 2  ;;  %v9227_v12 = vld [vmem:[#allocation2 + $0x90] sm:$0xff] }
  0xb4   : > { %7332 = vrot.lane.b32.xlu1 %v7331_v36, %s8092_s8  ;;  %v7048_v31 = vpop.permute.xlu0 %7047  ;;  %v7063_v48 = vpop.permute.xlu1 %7062  ;;  %v9174_v36 = vrot.slane %v9069_v30, 2  ;;  %v1058_v30 = vsel %vm537_vm1, %v9189_v40, %v7055_v46  ;;  %v2376_v52 = vrot.slane %v9185_v49, 1  ;;  %v2368_v58 = vrot.slane %v9187_v1, 1 }
  0xb5   : > { %v7065_v26 = vunpack.i.h.bf16 %v7063_v48  ;;  %v7064_v14 = vunpack.i.l.bf16 %v7063_v48  ;;  %v7050_v10 = vunpack.i.h.bf16 %v7048_v31  ;;  %v2369_v20 = vrot.slane %v9197_v35, 1 }
  0xb6   : > { %7327 = vrot.lane.b32.xlu0 %v7326_v21, %s8092_s8  ;;  %v7049_v21 = vunpack.i.l.bf16 %v7048_v31  ;;  %v9212_v8 = vsel %vm866_vm3, %v1714_v13, %v9174_v36  ;;  %v9220_v25 = vsel %vm866_vm3, %v9174_v36, %v1717_v56  ;;  %v2371_v46 = vrot.slane %v9208_v5, 1 }
  0xb7   : > { %v1090_v37 = vsel %vm1075_vm5, %v1057_v39, %v7064_v14  ;;  %v1091_v27 = vsel %vm1075_vm5, %v1058_v30, %v7065_v26  ;;  %v1056_v54 = vsel %vm537_vm1, %v9223_v53, %v7050_v10  ;;  %v7366_v56 = vpack.i.bf16 %v9182_v45, %v9171_v17 }
  0xb8   : > { %7342 = vrot.lane.b32.xlu1 %v7341_v41, %s8091_s30  ;;  %v7058_v29 = vpop.permute.xlu0 %7057  ;;  %v7073_v24 = vpop.permute.xlu1 %7072  ;;  %v1055_v51 = vsel %vm537_vm1, %v9227_v12, %v7049_v21  ;;  %v1115_v61 = vpack.c.bf16 %v1091_v27, %v1090_v37  ;;  %v7381_v30 = vpack.i.bf16 %v9220_v25, %v9212_v8  ;;  %v9241_v39 = vsel %vm866_vm3, %v1709_v9, %v9206_v43 }
  0xb9   : > { %v7060_v41 = vunpack.i.h.bf16 %v7058_v29  ;;  %v7059_v2 = vunpack.i.l.bf16 %v7058_v29  ;;  %v7075_v13 = vunpack.i.h.bf16 %v7073_v24  ;;  %v7074_v31 = vunpack.i.l.bf16 %v7073_v24 }
  0xba   : > { %7337 = vrot.lane.b32.xlu0 %v7336_v33, %s8091_s30  ;;  %v9250_v37 = vsel %vm689_vm4, %v9132_v38, %v2376_v52  ;;  %v9254_v29 = vsel %vm689_vm4, %v2368_v58, %v2369_v20  ;;  %v2552_v9 = vrot.slane %v9185_v49, 2  ;;  %v9271_v52 = vsel %vm689_vm4, %v2369_v20, %v2371_v46  ;;  %v9289_v46 = vld [vmem:[#allocation2 + $0xc0] sm:$0xff] }
  0xbb   : > { %v1088_v34 = vsel %vm1075_vm5, %v1055_v51, %v7059_v2  ;;  %v1089_v33 = vsel %vm1075_vm5, %v1056_v54, %v7060_v41  ;;  %v2544_v54 = vrot.slane %v9187_v1, 2  ;;  %v2545_v51 = vrot.slane %v9197_v35, 2 }
  0xbc   : > { %7352 = vrot.lane.b32.xlu1 %v7351_v22, %s8092_s8  ;;  %v7068_v48 = vpop.permute.xlu0 %7067  ;;  %v1114_v26 = vpack.c.bf16 %v1089_v33, %v1088_v34  ;;  %v7083_v14 = vpop.permute.xlu1 %7082  ;;  %v9246_v22 = vsel %vm866_vm3, %v9206_v43, %v1712_v3  ;;  %v9261_v3 = vld [vmem:[#allocation2 + $0xd8] sm:$0xff]  ;;  %v7391_v20 = vpack.i.bf16 %v9250_v37, %v9171_v17  ;;  %v9295_v63 = vsel %vm866_vm3, %v9206_v43, %v2552_v9  ;;  %v9310_v43 = vld [vmem:[#allocation2 + $0x188] sm:$0xff] }
  0xbd   : > { %v7085_v10 = vunpack.i.h.bf16 %v7083_v14  ;;  %v7084_v21 = vunpack.i.l.bf16 %v7083_v14  ;;  %v7070_v45 = vunpack.i.h.bf16 %v7068_v48  ;;  %v7069_v27 = vunpack.i.l.bf16 %v7068_v48 }
  0xbe   : > { %7347 = vrot.lane.b32.xlu0 %v7346_v4, %s8092_s8  ;;  %6780 = vmatprep.mubr.msk.bf16.mxu0 %vm1131_vm6, %v1114_v26  ;;  %v9257_v4 = vld [vmem:[#allocation2 + $0xe0] sm:$0xff]  ;;  %v1061_v38 = vsel %vm537_vm1, %v9261_v3, %v7074_v31  ;;  %v2547_v11 = vrot.slane %v9208_v5, 2  ;;  %v9312_v5 = vld [vmem:[#allocation2 + $0x170] sm:$0xff] }
  0xbf   : > { %v1062_v24 = vsel %vm537_vm1, %v9257_v4, %v7075_v13  ;;  %6781 = vmatmul.mubr.msk.bf16.gmra.mrb[12].mxu0 %vm1131_vm6, %v1115_v61  ;;  %v1094_v49 = vsel %vm1075_vm5, %v1061_v38, %v7084_v21  ;;  %v9285_v61 = vld [vmem:[#allocation2 + $0xc8] sm:$0xff]  ;;  %v1059_v35 = vsel %vm537_vm1, %v9289_v46, %v7069_v27  ;;  %v7386_v13 = vpack.i.bf16 %v9271_v52, %v9254_v29  ;;  %v9308_v31 = vld [vmem:[#allocation2 + $0x180] sm:$0xff]  ;;  %v1424_v27 = vld [vmem:[#allocation2 + $0x190] sm:$0x3] }
  0xc0   : > { %7362 = vrot.lane.b32.xlu1 %v7361_v28, %s8091_s30  ;;  %v1095_v58 = vsel %vm1075_vm5, %v1062_v24, %v7085_v10  ;;  %v7078_v41 = vpop.permute.xlu0 %7077  ;;  %v7093_v2 = vpop.permute.xlu1 %7092  ;;  %v7376_v28 = vpack.i.bf16 %v9246_v22, %v9241_v39  ;;  %v1060_v1 = vsel %vm537_vm1, %v9285_v61, %v7070_v45  ;;  %v9315_v21 = vsel %vm866_vm3, %v2544_v54, %v2545_v51  ;;  %v1421_v22 = vld [vmem:[#allocation2 + $0x178] sm:$0x3] }
  0xc1   : > { %v7080_v55 = vunpack.i.h.bf16 %v7078_v41  ;;  %v7079_v62 = vunpack.i.l.bf16 %v7078_v41  ;;  %v1117_v33 = vpack.c.bf16 %v1095_v58, %v1094_v49  ;;  %v7095_v48 = vunpack.i.h.bf16 %v7093_v2  ;;  %v9328_v52 = vld [vmem:[#allocation2 + $0x178] sm:$0x3] }
  0xc2   : > { %7357 = vrot.lane.b32.xlu0 %v7356_v18, %s8091_s30  ;;  %v9298_v18 = vld [vmem:[#allocation2 + $0x168] sm:$0xff]  ;;  %v7094_v26 = vunpack.i.l.bf16 %v7093_v2  ;;  %v7401_v45 = vpack.i.bf16 %v9295_v63, %v9241_v39  ;;  %v2548_v9 = vsel %vm866_vm3, %v2545_v51, %v2547_v11  ;;  %v1548_v24 = vrot.slane %v9308_v31, 1  ;;  %v7976_v2 = vld [vmem:[#allocation2 + $0x110] sm:$0xff] }
  0xc3   : > { %v1092_v17 = vsel %vm1075_vm5, %v1059_v35, %v7079_v62  ;;  %v1093_v34 = vsel %vm1075_vm5, %v1060_v1, %v7080_v55  ;;  %v1543_v29 = vrot.slane %v9298_v18, 1  ;;  %v9325_v38 = vrot.slane %v9310_v43, 1  ;;  %v7977_v51 = vld [vmem:[#allocation2 + $0x108] sm:$0xff] }
  0xc4   : > { %7372 = vrot.lane.b32.xlu1 %v7371_v32, %s8092_s8  ;;  %v1116_v14 = vpack.c.bf16 %v1093_v34, %v1092_v17  ;;  %v7103_v10 = vpop.permute.xlu1 %7102  ;;  %v1546_v39 = vrot.slane %v1421_v22, 1  ;;  %v1719_v41 = vrot.slane %v9298_v18, 2  ;;  %v1066_v54 = vsel %vm537_vm1, %v7976_v2, %v7095_v48 }
  0xc5   : > { %v7088_v16 = vpop.permute.xlu0 %7087  ;;  %v7105_v32 = vunpack.i.h.bf16 %v7103_v10  ;;  %v7104_v37 = vunpack.i.l.bf16 %v7103_v10  ;;  %v1065_v55 = vsel %vm537_vm1, %v7977_v51, %v7094_v26  ;;  %v1551_v62 = vrot.slane %v1424_v27, 1  ;;  %v9350_v26 = vld [vmem:[#allocation2 + $0xf8] sm:$0xff]  ;;  %v2260_v51 = vld [vmem:[#allocation2 + $0x160] sm:$0x3] }
  0xc6   : > { %7367 = vrot.lane.b32.xlu0 %v7366_v56, %s8092_s8  ;;  %6784 = vmatprep.mubr.msk.bf16.mxu0 %vm1131_vm6, %v1116_v14  ;;  %v1544_v56 = vrot.slane %v9312_v5, 1  ;;  %v7090_v49 = vunpack.i.h.bf16 %v7088_v16  ;;  %v7089_v58 = vunpack.i.l.bf16 %v7088_v16  ;;  %v9339_v1 = vrot.slane %v9312_v5, 2  ;;  %v9354_v14 = vld [vmem:[#allocation2 + $0xf0] sm:$0xff] }
  0xc7   : > { %6785 = vmatmul.mubr.msk.bf16.gmra.mrb[16].mxu0 %vm1131_vm6, %v1117_v33  ;;  %v1098_v25 = vsel %vm1075_vm5, %v1065_v55, %v7104_v37  ;;  %v1722_v63 = vrot.slane %v1421_v22, 2  ;;  %v2386_v11 = vrot.slane %v9328_v52, 1  ;;  %v9347_v33 = vsel %vm689_vm4, %v1548_v24, %v9325_v38 }
  0xc8   : > { %7382 = vrot.lane.b32.xlu1 %v7381_v30, %s8091_s30  ;;  %v1099_v30 = vsel %vm1075_vm5, %v1066_v54, %v7105_v32  ;;  %v1724_v48 = vrot.slane %v9308_v31, 2  ;;  %v1063_v10 = vsel %vm537_vm1, %v9354_v14, %v7089_v58  ;;  %v9360_v22 = vrot.slane %v9310_v43, 2 }
  0xc9   : > { %v7098_v35 = vpop.permute.xlu0 %7097  ;;  %v1727_v16 = vrot.slane %v1424_v27, 2  ;;  %v1119_v24 = vpack.c.bf16 %v1099_v30, %v1098_v25  ;;  %v1552_v2 = vsel %vm689_vm4, %v9325_v38, %v1551_v62  ;;  %v7396_v54 = vpack.i.bf16 %v2548_v9, %v9315_v21 }
  0xca   : > { %7377 = vrot.lane.b32.xlu0 %v7376_v28, %s8091_s30  ;;  %v7100_v17 = vunpack.i.h.bf16 %v7098_v35  ;;  %v7099_v34 = vunpack.i.l.bf16 %v7098_v35  ;;  %v1064_v28 = vsel %vm537_vm1, %v9350_v26, %v7090_v49  ;;  %v1547_v27 = vsel %vm689_vm4, %v1544_v56, %v1546_v39 }
  0xcb   : > { %v9374_v55 = vsel %vm866_vm3, %v1719_v41, %v9339_v1  ;;  %v1723_v25 = vsel %vm866_vm3, %v9339_v1, %v1722_v63  ;;  %v7411_v21 = vpack.i.bf16 %v1552_v2, %v9347_v33  ;;  %v9385_v9 = vsel %vm866_vm3, %v1724_v48, %v9360_v22 }
  0xcc   : > { %7392 = vrot.lane.b32.xlu1 %v7391_v20, %s8092_s8  ;;  %v1096_v32 = vsel %vm1075_vm5, %v1063_v10, %v7099_v34  ;;  %v1097_v37 = vsel %vm1075_vm5, %v1064_v28, %v7100_v17  ;;  %v9369_v20 = vsel %vm689_vm4, %v1543_v29, %v1544_v56  ;;  %v2387_v29 = vsel %vm689_vm4, %v1544_v56, %v2386_v11  ;;  %v7980_v10 = vld [vmem:[#allocation2 + $0x140] sm:$0xff] }
  0xcd   : > { %v7113_v49 = vpop.permute.xlu1 %7112  ;;  %v1118_v58 = vpack.c.bf16 %v1097_v37, %v1096_v32  ;;  %v1728_v39 = vsel %vm866_vm3, %v9360_v22, %v1727_v16  ;;  %v2381_v41 = vrot.slane %v2260_v51, 1  ;;  %v7406_v17 = vpack.i.bf16 %v1547_v27, %v9369_v20  ;;  %v7981_v16 = vld [vmem:[#allocation2 + $0x138] sm:$0xff] }
  0xce   : > { %7387 = vrot.lane.b32.xlu0 %v7386_v13, %s8092_s8  ;;  %v7115_v62 = vunpack.i.h.bf16 %v7113_v49  ;;  %v7114_v30 = vunpack.i.l.bf16 %v7113_v49  ;;  %v2562_v34 = vrot.slane %v9328_v52, 2  ;;  %v7416_v28 = vpack.i.bf16 %v1723_v25, %v9374_v55  ;;  %v9402_v25 = vld [vmem:[#allocation2 + $0x1a0] sm:$0xff] }
  0xcf   : > { %6788 = vmatprep.mubr.msk.bf16.mxu0 %vm1131_vm6, %v1118_v58  ;;  %v7431_v48 = vpack.i.bf16 %v2387_v29, %v9369_v20  ;;  %v7421_v2 = vpack.i.bf16 %v1728_v39, %v9385_v9  ;;  %v2557_v49 = vrot.slane %v2260_v51, 2  ;;  %v9404_v29 = vld [vmem:[#allocation2 + $0x128] sm:$0xff] }
  0xd0   : > { %v7108_v13 = vpop.permute.xlu0 %7107  ;;  %7402 = vrot.lane.b32.xlu1 %v7401_v45, %s8091_s30  ;;  %6789 = vmatmul.mubr.msk.bf16.gmra.mrb[20].mxu0 %vm1131_vm6, %v1119_v24  ;;  %v1070_v32 = vsel %vm537_vm1, %v7980_v10, %v7115_v62  ;;  %v1069_v37 = vsel %vm537_vm1, %v7981_v16, %v7114_v30  ;;  %v2269_v62 = vld [vmem:[#allocation2 + $0x1a8] sm:$0x3] }
  0xd1   : > { %v7110_v35 = vunpack.i.h.bf16 %v7108_v13  ;;  %v7109_v63 = vunpack.i.l.bf16 %v7108_v13  ;;  %v7123_v45 = vpop.permute.xlu1 %7122  ;;  %v2266_v13 = vld [vmem:[#allocation2 + $0x190] sm:$0x3] }
  0xd2   : > { %7397 = vrot.lane.b32.xlu0 %v7396_v54, %s8091_s30  ;;  %v7125_v56 = vunpack.i.h.bf16 %v7123_v45  ;;  %v7124_v11 = vunpack.i.l.bf16 %v7123_v45  ;;  %v9398_v54 = vld [vmem:[#allocation2 + $0x198] sm:$0xff]  ;;  %v2382_v45 = vsel %vm689_vm4, %v9089_v50, %v2381_v41  ;;  %v2558_v50 = vsel %vm866_vm3, %v9174_v36, %v2557_v49 }
  0xd3   : > { %v1068_v30 = vsel %vm537_vm1, %v9404_v29, %v7110_v35  ;;  %v2393_v35 = vrot.slane %v9398_v54, 1  ;;  %v7436_v36 = vpack.i.bf16 %v2558_v50, %v9212_v8 }
  0xd4   : > { %v7118_v24 = vpop.permute.xlu0 %7117  ;;  %7412 = vrot.lane.b32.xlu1 %v7411_v21, %s8092_s8  ;;  %v1102_v52 = vsel %vm1075_vm5, %v1069_v37, %v7124_v11  ;;  %v1103_v58 = vsel %vm1075_vm5, %v1070_v32, %v7125_v56  ;;  %v9408_v21 = vld [vmem:[#allocation2 + $0x120] sm:$0xff]  ;;  %v2563_v56 = vsel %vm866_vm3, %v9339_v1, %v2562_v34  ;;  %v2396_v37 = vrot.slane %v2269_v62, 1 }
  0xd5   : > { %v7120_v27 = vunpack.i.h.bf16 %v7118_v24  ;;  %v7119_v20 = vunpack.i.l.bf16 %v7118_v24  ;;  %v1067_v51 = vsel %vm537_vm1, %v9408_v21, %v7109_v63  ;;  %v1121_v32 = vpack.c.bf16 %v1103_v58, %v1102_v52 }
  0xd6   : > { %7407 = vrot.lane.b32.xlu0 %v7406_v17, %s8092_s8  ;;  %v7133_v39 = vpop.permute.xlu1 %7132  ;;  %v2394_v17 = vrot.slane %v9402_v25, 1  ;;  %v2391_v24 = vrot.slane %v2266_v13, 1  ;;  %v7426_v52 = vpack.i.bf16 %v2382_v45, %v9143_v15  ;;  %v2569_v58 = vrot.slane %v9398_v54, 2 }
  0xd7   : > { %v1100_v11 = vsel %vm1075_vm5, %v1067_v51, %v7119_v20  ;;  %v1101_v10 = vsel %vm1075_vm5, %v1068_v30, %v7120_v27  ;;  %v2570_v27 = vrot.slane %v9402_v25, 2  ;;  %v2572_v45 = vrot.slane %v2269_v62, 2 }
  0xd8   : > { %v7128_v16 = vpop.permute.xlu0 %7127  ;;  %7422 = vrot.lane.b32.xlu1 %v7421_v2, %s8091_s30  ;;  %v1120_v63 = vpack.c.bf16 %v1101_v10, %v1100_v11  ;;  %v7441_v2 = vpack.i.bf16 %v2563_v56, %v9374_v55  ;;  %v2397_v49 = vsel %vm689_vm4, %v2394_v17, %v2396_v37  ;;  %v2392_v15 = vsel %vm689_vm4, %v9325_v38, %v2391_v24 }
  0xd9   : > { %v7130_v41 = vunpack.i.h.bf16 %v7128_v16  ;;  %v7129_v1 = vunpack.i.l.bf16 %v7128_v16  ;;  %v2567_v55 = vrot.slane %v2266_v13, 2  ;;  %v7135_v56 = vunpack.i.h.bf16 %v7133_v39 }
  0xda   : > { %7417 = vrot.lane.b32.xlu0 %v7416_v28, %s8091_s30  ;;  %6792 = vmatprep.mubr.msk.bf16.mxu0 %vm1131_vm6, %v1120_v63  ;;  %v9426_v34 = vpop.permute.xlu1 %7142  ;;  %v2395_v28 = vsel %vm689_vm4, %v2393_v35, %v2394_v17  ;;  %v7134_v11 = vunpack.i.l.bf16 %v7133_v39  ;;  %v7446_v16 = vpack.i.bf16 %v2392_v15, %v9347_v33  ;;  %v2571_v17 = vsel %vm866_vm3, %v2569_v58, %v2570_v27 }
  0xdb   : > { %6793 = vmatmul.mubr.msk.bf16.gmra.mrb[24].mxu0 %vm1131_vm6, %v1121_v32  ;;  %v1826_v8 = vsel %vm537_vm1, %v8967_v6, %v7130_v41  ;;  %v7451_v38 = vpack.i.bf16 %v2397_v49, %v2395_v28  ;;  %v2573_v24 = vsel %vm866_vm3, %v2570_v27, %v2572_v45  ;;  %v2568_v6 = vsel %vm866_vm3, %v9360_v22, %v2567_v55  ;;  %v7985_v49 = vld [vmem:[#allocation2 + $0x168] sm:$0xff] }
  0xdc   : > { %v7138_v20 = vpop.permute.xlu0 %7137  ;;  %7432 = vrot.lane.b32.xlu1 %v7431_v48, %s8092_s8  ;;  %v1825_v48 = vsel %vm537_vm1, %v8971_v59, %v7129_v1  ;;  %v1828_v50 = vsel %vm537_vm1, %v9029_v0, %v7135_v56  ;;  %v1827_v33 = vsel %vm537_vm1, %v9033_v7, %v7134_v11  ;;  %v7145_v41 = vunpack.i.h.bf16 %v9426_v34  ;;  %v7986_v11 = vld [vmem:[#allocation2 + $0x158] sm:$0xff] }
  0xdd   : > { %v7140_v30 = vunpack.i.h.bf16 %v7138_v20  ;;  %v7139_v51 = vunpack.i.l.bf16 %v7138_v20  ;;  %v7144_v1 = vunpack.i.l.bf16 %v9426_v34  ;;  %v7984_v20 = vld [vmem:[#allocation2 + $0x170] sm:$0xff] }
  0xde   : > { %7427 = vrot.lane.b32.xlu0 %v7426_v52, %s8092_s8  ;;  %v7153_v10 = vpop.permute.xlu1 %7152 }
  0xdf   : > { %v1857_v32 = vsel %vm1075_vm5, %v1825_v48, %v7139_v51  ;;  %v1858_v35 = vsel %vm1075_vm5, %v1826_v8, %v7140_v30  ;;  %v7155_v62 = vunpack.i.h.bf16 %v7153_v10  ;;  %v7154_v13 = vunpack.i.l.bf16 %v7153_v10  ;;  %v7987_v48 = vld [vmem:[#allocation2 + $0x150] sm:$0xff] }
  0xe0   : > { %v7148_v63 = vpop.permute.xlu0 %7147  ;;  %7442 = vrot.lane.b32.xlu1 %v7441_v2, %s8091_s30  ;;  %v1889_v39 = vpack.c.bf16 %v1858_v35, %v1857_v32  ;;  %v1072_v10 = vsel %vm537_vm1, %v7986_v11, %v7145_v41  ;;  %v1071_v8 = vsel %vm537_vm1, %v7987_v48, %v7144_v1  ;;  %v7456_v35 = vpack.i.bf16 %v2568_v6, %v9385_v9 }
  0xe1   : > { %v7150_v37 = vunpack.i.h.bf16 %v7148_v63  ;;  %v7149_v59 = vunpack.i.l.bf16 %v7148_v63  ;;  %v1074_v28 = vsel %vm537_vm1, %v7984_v20, %v7155_v62  ;;  %v1073_v15 = vsel %vm537_vm1, %v7985_v49, %v7154_v13 }
  0xe2   : > { %7437 = vrot.lane.b32.xlu0 %v7436_v36, %s8091_s30  ;;  %6802 = vmatprep.mubr.msk.bf16.mxu1 %vm1131_vm6, %v1889_v39  ;;  %v7163_v52 = vpop.permute.xlu1 %7162  ;;  %v7461_v36 = vpack.i.bf16 %v2573_v24, %v2571_v17 }
  0xe3   : > { %v1860_v2 = vsel %vm1075_vm5, %v1828_v50, %v7150_v37  ;;  %v1859_v58 = vsel %vm1075_vm5, %v1827_v33, %v7149_v59  ;;  %v7165_v22 = vunpack.i.h.bf16 %v7163_v52  ;;  %v7164_v27 = vunpack.i.l.bf16 %v7163_v52 }
  0xe4   : > { %v7158_v30 = vpop.permute.xlu0 %7157  ;;  %7452 = vrot.lane.b32.xlu1 %v7451_v38, %s8092_s8  ;;  %v1890_v34 = vpack.c.bf16 %v1860_v2, %v1859_v58 }
  0xe5   : > { %v1106_v51 = vsel %vm1075_vm5, %v1073_v15, %v7164_v27  ;;  %v1107_v45 = vsel %vm1075_vm5, %v1074_v28, %v7165_v22  ;;  %v7160_v55 = vunpack.i.h.bf16 %v7158_v30  ;;  %v7159_v56 = vunpack.i.l.bf16 %v7158_v30 }
  0xe6   : > { %7447 = vrot.lane.b32.xlu0 %v7446_v16, %s8092_s8  ;;  %6803 = vmatmul.mubr.msk.bf16.vlgmr.msra.gmra.mrb[0].mxu1 %vm1131_vm6, %v1890_v34  ;;  %v7173_v32 = vpop.permute.xlu1 %7172  ;;  %v1123_v13 = vpack.c.bf16 %v1107_v45, %v1106_v51 }
  0xe7   : > { %v1105_v38 = vsel %vm1075_vm5, %v1072_v10, %v7160_v55  ;;  %v1104_v62 = vsel %vm1075_vm5, %v1071_v8, %v7159_v56  ;;  %v7175_v63 = vunpack.i.h.bf16 %v7173_v32  ;;  %v7174_v39 = vunpack.i.l.bf16 %v7173_v32 }
  0xe8   : > { %v7168_v17 = vpop.permute.xlu0 %7167  ;;  %7462 = vrot.lane.b32.xlu1 %v7461_v36, %s8091_s30  ;;  %v1122_v37 = vpack.c.bf16 %v1105_v38, %v1104_v62 }
  0xe9   : > { %v7170_v59 = vunpack.i.h.bf16 %v7168_v17  ;;  %v7169_v24 = vunpack.i.l.bf16 %v7168_v17  ;;  %v1832_v50 = vsel %vm537_vm1, %v9106_v60, %v7175_v63  ;;  %v1831_v33 = vsel %vm537_vm1, %v9110_v47, %v7174_v39 }
  0xea   : > { %7457 = vrot.lane.b32.xlu0 %v7456_v35, %s8091_s30  ;;  %6796 = vmatprep.mubr.msk.bf16.mxu0 %vm1131_vm6, %v1122_v37  ;;  %v7183_v16 = vpop.permute.xlu1 %7182 }
  0xeb   : > { %6797 = vmatmul.mubr.msk.bf16.gmra.mrb[28].mxu0 %vm1131_vm6, %v1123_v13  ;;  %v7185_v9 = vunpack.i.h.bf16 %v7183_v16  ;;  %v7184_v6 = vunpack.i.l.bf16 %v7183_v16  ;;  %v1830_v22 = vsel %vm537_vm1, %v9021_v57, %v7170_v59  ;;  %v1829_v27 = vsel %vm537_vm1, %v9025_v19, %v7169_v24 }
  0xec   : > { %v7178_v41 = vpop.permute.xlu0 %7177 }
  0xed   : > { %v1863_v1 = vsel %vm1075_vm5, %v1831_v33, %v7184_v6  ;;  %v1864_v52 = vsel %vm1075_vm5, %v1832_v50, %v7185_v9  ;;  %v7180_v2 = vunpack.i.h.bf16 %v7178_v41  ;;  %v7179_v58 = vunpack.i.l.bf16 %v7178_v41 }
  0xee   : > { %v7193_v20 = vpop.permute.xlu1 %7192  ;;  %v1892_v15 = vpack.c.bf16 %v1864_v52, %v1863_v1 }
  0xef   : > { %v1861_v28 = vsel %vm1075_vm5, %v1829_v27, %v7179_v58  ;;  %v1862_v49 = vsel %vm1075_vm5, %v1830_v22, %v7180_v2  ;;  %v7195_v30 = vunpack.i.h.bf16 %v7193_v20  ;;  %v7194_v34 = vunpack.i.l.bf16 %v7193_v20 }
  0xf0   : > { %v7188_v36 = vpop.permute.xlu0 %7187  ;;  %v1891_v51 = vpack.c.bf16 %v1862_v49, %v1861_v28 }
  0xf1   : > { %v7190_v45 = vunpack.i.h.bf16 %v7188_v36  ;;  %v7189_v55 = vunpack.i.l.bf16 %v7188_v36  ;;  %v2673_v48 = vsel %vm537_vm1, %v9021_v57, %v7195_v30  ;;  %v2672_v8 = vsel %vm537_vm1, %v9025_v19, %v7194_v34 }
  0xf2   : > { %6806 = vmatprep.mubr.msk.bf16.mxu1 %vm1131_vm6, %v1891_v51  ;;  %v7203_v56 = vpop.permute.xlu1 %7202 }
  0xf3   : > { %6807 = vmatmul.mubr.msk.bf16.gmra.mrb[4].mxu1 %vm1131_vm6, %v1892_v15  ;;  %v7205_v11 = vunpack.i.h.bf16 %v7203_v56  ;;  %v7204_v10 = vunpack.i.l.bf16 %v7203_v56  ;;  %v2671_v63 = vsel %vm537_vm1, %v9029_v0, %v7190_v45  ;;  %v2670_v39 = vsel %vm537_vm1, %v9033_v7, %v7189_v55 }
  0xf4   : > { %v7198_v32 = vpop.permute.xlu0 %7197 }
  0xf5   : > { %v2704_v35 = vsel %vm1075_vm5, %v2672_v8, %v7204_v10  ;;  %v2705_v38 = vsel %vm1075_vm5, %v2673_v48, %v7205_v11  ;;  %v7200_v62 = vunpack.i.h.bf16 %v7198_v32  ;;  %v7199_v13 = vunpack.i.l.bf16 %v7198_v32 }
  0xf6   : > { %v7213_v17 = vpop.permute.xlu1 %7212  ;;  %v2735_v37 = vpack.c.bf16 %v2705_v38, %v2704_v35 }
  0xf7   : > { %v2702_v57 = vsel %vm1075_vm5, %v2670_v39, %v7199_v13  ;;  %v2703_v59 = vsel %vm1075_vm5, %v2671_v63, %v7200_v62  ;;  %v7215_v19 = vunpack.i.h.bf16 %v7213_v17  ;;  %v7214_v24 = vunpack.i.l.bf16 %v7213_v17 }
  0xf8   : > { %v7208_v16 = vpop.permute.xlu0 %7207  ;;  %v2734_v9 = vpack.c.bf16 %v2703_v59, %v2702_v57 }
  0xf9   : > { %v7210_v6 = vunpack.i.h.bf16 %v7208_v16  ;;  %v7209_v50 = vunpack.i.l.bf16 %v7208_v16  ;;  %v1836_v7 = vsel %vm537_vm1, %v9223_v53, %v7215_v19  ;;  %v1835_v1 = vsel %vm537_vm1, %v9227_v12, %v7214_v24 }
  0xfa   : > { %6836 = vmatprep.mubr.msk.bf16.mxu0 %vm1131_vm6, %v2734_v9  ;;  %v7223_v33 = vpop.permute.xlu1 %7222 }
  0xfb   : > { %6837 = vmatmul.mubr.msk.bf16.vlgmr.msra.gmra.mrb[32].mxu0 %vm1131_vm6, %v2735_v37  ;;  %v7225_v0 = vunpack.i.h.bf16 %v7223_v33  ;;  %v7224_v41 = vunpack.i.l.bf16 %v7223_v33  ;;  %v1834_v20 = vsel %vm537_vm1, %v9096_v44, %v7210_v6  ;;  %v1833_v28 = vsel %vm537_vm1, %v9100_v23, %v7209_v50 }
  0xfc   : > { %v7218_v52 = vpop.permute.xlu0 %7217 }
  0xfd   : > { %v1867_v2 = vsel %vm1075_vm5, %v1835_v1, %v7224_v41  ;;  %v1868_v58 = vsel %vm1075_vm5, %v1836_v7, %v7225_v0  ;;  %v7220_v22 = vunpack.i.h.bf16 %v7218_v52  ;;  %v7219_v27 = vunpack.i.l.bf16 %v7218_v52 }
  0xfe   : > { %v7233_v49 = vpop.permute.xlu1 %7232  ;;  %v1894_v34 = vpack.c.bf16 %v1868_v58, %v1867_v2 }
  0xff   : > { %v1865_v15 = vsel %vm1075_vm5, %v1833_v28, %v7219_v27  ;;  %v1866_v30 = vsel %vm1075_vm5, %v1834_v20, %v7220_v22  ;;  %v7235_v36 = vunpack.i.h.bf16 %v7233_v49  ;;  %v7234_v51 = vunpack.i.l.bf16 %v7233_v49 }
 0x100   : > { %v7228_v45 = vpop.permute.xlu0 %7227  ;;  %v1893_v55 = vpack.c.bf16 %v1866_v30, %v1865_v15 }
 0x101   : > { %v7230_v56 = vunpack.i.h.bf16 %v7228_v45  ;;  %v7229_v11 = vunpack.i.l.bf16 %v7228_v45  ;;  %v2677_v32 = vsel %vm537_vm1, %v9096_v44, %v7235_v36  ;;  %v2676_v35 = vsel %vm537_vm1, %v9100_v23, %v7234_v51 }
 0x102   : > { %6810 = vmatprep.mubr.msk.bf16.mxu1 %vm1131_vm6, %v1893_v55  ;;  %v7243_v10 = vpop.permute.xlu1 %7242 }
 0x103   : > { %6811 = vmatmul.mubr.msk.bf16.gmra.mrb[8].mxu1 %vm1131_vm6, %v1894_v34  ;;  %v7245_v48 = vunpack.i.h.bf16 %v7243_v10  ;;  %v7244_v8 = vunpack.i.l.bf16 %v7243_v10  ;;  %v2675_v17 = vsel %vm537_vm1, %v9106_v60, %v7230_v56  ;;  %v2674_v37 = vsel %vm537_vm1, %v9110_v47, %v7229_v11 }
 0x104   : > { %v7238_v38 = vpop.permute.xlu0 %7237 }
 0x105   : > { %v2708_v62 = vsel %vm1075_vm5, %v2676_v35, %v7244_v8  ;;  %v2709_v13 = vsel %vm1075_vm5, %v2677_v32, %v7245_v48  ;;  %v7240_v63 = vunpack.i.h.bf16 %v7238_v38  ;;  %v7239_v39 = vunpack.i.l.bf16 %v7238_v38 }
 0x106   : > { %v7253_v57 = vpop.permute.xlu1 %7252  ;;  %v2737_v19 = vpack.c.bf16 %v2709_v13, %v2708_v62 }
 0x107   : > { %v2706_v59 = vsel %vm1075_vm5, %v2674_v37, %v7239_v39  ;;  %v2707_v44 = vsel %vm1075_vm5, %v2675_v17, %v7240_v63  ;;  %v7255_v23 = vunpack.i.h.bf16 %v7253_v57  ;;  %v7254_v24 = vunpack.i.l.bf16 %v7253_v57 }
 0x108   : > { %v7248_v16 = vpop.permute.xlu0 %7247  ;;  %v2736_v9 = vpack.c.bf16 %v2707_v44, %v2706_v59 }
 0x109   : > { %v7250_v6 = vunpack.i.h.bf16 %v7248_v16  ;;  %v7249_v50 = vunpack.i.l.bf16 %v7248_v16  ;;  %v1840_v47 = vsel %vm537_vm1, %v9285_v61, %v7255_v23  ;;  %v1839_v41 = vsel %vm537_vm1, %v9289_v46, %v7254_v24 }
 0x10a   : > { %6840 = vmatprep.mubr.msk.bf16.mxu0 %vm1131_vm6, %v2736_v9  ;;  %v7263_v33 = vpop.permute.xlu1 %7262 }
 0x10b   : > { %6841 = vmatmul.mubr.msk.bf16.gmra.mrb[36].mxu0 %vm1131_vm6, %v2737_v19  ;;  %v7265_v60 = vunpack.i.h.bf16 %v7263_v33  ;;  %v7264_v0 = vunpack.i.l.bf16 %v7263_v33  ;;  %v1838_v22 = vsel %vm537_vm1, %v9189_v40, %v7250_v6  ;;  %v1837_v27 = vsel %vm537_vm1, %v9193_v42, %v7249_v50 }
 0x10c   : > { %v7258_v7 = vpop.permute.xlu0 %7257 }
 0x10d   : > { %v1871_v1 = vsel %vm1075_vm5, %v1839_v41, %v7264_v0  ;;  %v1872_v52 = vsel %vm1075_vm5, %v1840_v47, %v7265_v60  ;;  %v7260_v2 = vunpack.i.h.bf16 %v7258_v7  ;;  %v7259_v58 = vunpack.i.l.bf16 %v7258_v7 }
 0x10e   : > { %v7273_v20 = vpop.permute.xlu1 %7272  ;;  %v1896_v49 = vpack.c.bf16 %v1872_v52, %v1871_v1 }
 0x10f   : > { %v1869_v28 = vsel %vm1075_vm5, %v1837_v27, %v7259_v58  ;;  %v1870_v61 = vsel %vm1075_vm5, %v1838_v22, %v7260_v2  ;;  %v7275_v46 = vunpack.i.h.bf16 %v7273_v20  ;;  %v7274_v15 = vunpack.i.l.bf16 %v7273_v20 }
 0x110   : > { %v7268_v30 = vpop.permute.xlu0 %7267  ;;  %v1895_v34 = vpack.c.bf16 %v1870_v61, %v1869_v28 }
 0x111   : > { %v7270_v36 = vunpack.i.h.bf16 %v7268_v30  ;;  %v7269_v51 = vunpack.i.l.bf16 %v7268_v30  ;;  %v2681_v11 = vsel %vm537_vm1, %v9189_v40, %v7275_v46  ;;  %v2680_v10 = vsel %vm537_vm1, %v9193_v42, %v7274_v15 }
 0x112   : > { %6814 = vmatprep.mubr.msk.bf16.mxu1 %vm1131_vm6, %v1895_v34  ;;  %v7283_v45 = vpop.permute.xlu1 %7282 }
 0x113   : > { %6815 = vmatmul.mubr.msk.bf16.gmra.mrb[12].mxu1 %vm1131_vm6, %v1896_v49  ;;  %v7285_v55 = vunpack.i.h.bf16 %v7283_v45  ;;  %v7284_v56 = vunpack.i.l.bf16 %v7283_v45  ;;  %v2679_v62 = vsel %vm537_vm1, %v9223_v53, %v7270_v36  ;;  %v2678_v13 = vsel %vm537_vm1, %v9227_v12, %v7269_v51  ;;  %v7989_v49 = vld [vmem:[#allocation2 + $0xd8] sm:$0xff]  ;;  %v7990_v45 = vld [vmem:[#allocation2 + $0xc8] sm:$0xff] }
 0x114   : > { %v7278_v48 = vpop.permute.xlu0 %7277 }
 0x115   : > { %v2712_v8 = vsel %vm1075_vm5, %v2680_v10, %v7284_v56  ;;  %v2713_v32 = vsel %vm1075_vm5, %v2681_v11, %v7285_v55  ;;  %v7280_v35 = vunpack.i.h.bf16 %v7278_v48  ;;  %v7279_v38 = vunpack.i.l.bf16 %v7278_v48  ;;  %v7991_v56 = vld [vmem:[#allocation2 + $0xc0] sm:$0xff] }
 0x116   : > { %v7293_v63 = vpop.permute.xlu1 %7292  ;;  %v2739_v17 = vpack.c.bf16 %v2713_v32, %v2712_v8 }
 0x117   : > { %v2710_v39 = vsel %vm1075_vm5, %v2678_v13, %v7279_v38  ;;  %v2711_v40 = vsel %vm1075_vm5, %v2679_v62, %v7280_v35  ;;  %v7295_v42 = vunpack.i.h.bf16 %v7293_v63  ;;  %v7294_v37 = vunpack.i.l.bf16 %v7293_v63 }
 0x118   : > { %v7288_v57 = vpop.permute.xlu0 %7287  ;;  %v2738_v59 = vpack.c.bf16 %v2711_v40, %v2710_v39 }
 0x119   : > { %v7290_v44 = vunpack.i.h.bf16 %v7288_v57  ;;  %v7289_v19 = vunpack.i.l.bf16 %v7288_v57  ;;  %v1844_v12 = vsel %vm537_vm1, %v9350_v26, %v7295_v42  ;;  %v1843_v16 = vsel %vm537_vm1, %v9354_v14, %v7294_v37 }
 0x11a   : > { %6844 = vmatprep.mubr.msk.bf16.mxu0 %vm1131_vm6, %v2738_v59  ;;  %v7303_v23 = vpop.permute.xlu1 %7302 }
 0x11b   : > { %6845 = vmatmul.mubr.msk.bf16.gmra.mrb[40].mxu0 %vm1131_vm6, %v2739_v17  ;;  %v7305_v53 = vunpack.i.h.bf16 %v7303_v23  ;;  %v7304_v24 = vunpack.i.l.bf16 %v7303_v23  ;;  %v1842_v0 = vsel %vm537_vm1, %v9257_v4, %v7290_v44  ;;  %v1841_v47 = vsel %vm537_vm1, %v9261_v3, %v7289_v19  ;;  %v7988_v3 = vld [vmem:[#allocation2 + $0xe0] sm:$0xff] }
 0x11c   : > { %v7298_v9 = vpop.permute.xlu0 %7297 }
 0x11d   : > { %v1875_v6 = vsel %vm1075_vm5, %v1843_v16, %v7304_v24  ;;  %v1876_v50 = vsel %vm1075_vm5, %v1844_v12, %v7305_v53  ;;  %v7300_v33 = vunpack.i.h.bf16 %v7298_v9  ;;  %v7299_v60 = vunpack.i.l.bf16 %v7298_v9  ;;  %v7992_v24 = vld [vmem:[#allocation2 + $0x110] sm:$0xff]  ;;  %v7993_v16 = vld [vmem:[#allocation2 + $0x108] sm:$0xff] }
 0x11e   : > { %v7313_v41 = vpop.permute.xlu1 %7312  ;;  %v1898_v1 = vpack.c.bf16 %v1876_v50, %v1875_v6 }
 0x11f   : > { %v1873_v7 = vsel %vm1075_vm5, %v1841_v47, %v7299_v60  ;;  %v1874_v26 = vsel %vm1075_vm5, %v1842_v0, %v7300_v33  ;;  %v7315_v14 = vunpack.i.h.bf16 %v7313_v41  ;;  %v7314_v52 = vunpack.i.l.bf16 %v7313_v41 }
 0x120   : > { %v7308_v2 = vpop.permute.xlu0 %7307  ;;  %v1897_v58 = vpack.c.bf16 %v1874_v26, %v1873_v7 }
 0x121   : > { %v7310_v22 = vunpack.i.h.bf16 %v7308_v2  ;;  %v7309_v27 = vunpack.i.l.bf16 %v7308_v2  ;;  %v2685_v61 = vsel %vm537_vm1, %v7988_v3, %v7315_v14  ;;  %v2684_v46 = vsel %vm537_vm1, %v7989_v49, %v7314_v52 }
 0x122   : > { %6818 = vmatprep.mubr.msk.bf16.mxu1 %vm1131_vm6, %v1897_v58  ;;  %v7323_v20 = vpop.permute.xlu1 %7322 }
 0x123   : > { %6819 = vmatmul.mubr.msk.bf16.gmra.mrb[16].mxu1 %vm1131_vm6, %v1898_v1  ;;  %v7325_v4 = vunpack.i.h.bf16 %v7323_v20  ;;  %v7324_v28 = vunpack.i.l.bf16 %v7323_v20  ;;  %v2683_v55 = vsel %vm537_vm1, %v7990_v45, %v7310_v22  ;;  %v2682_v11 = vsel %vm537_vm1, %v7991_v56, %v7309_v27 }
 0x124   : > { %v7318_v15 = vpop.permute.xlu0 %7317 }
 0x125   : > { %v2716_v30 = vsel %vm1075_vm5, %v2684_v46, %v7324_v28  ;;  %v2717_v34 = vsel %vm1075_vm5, %v2685_v61, %v7325_v4  ;;  %v7320_v36 = vunpack.i.h.bf16 %v7318_v15  ;;  %v7319_v51 = vunpack.i.l.bf16 %v7318_v15  ;;  %v7994_v28 = vld [vmem:[#allocation2 + $0xf8] sm:$0xff]  ;;  %v7995_v61 = vld [vmem:[#allocation2 + $0xf0] sm:$0xff] }
 0x126   : > { %v7333_v10 = vpop.permute.xlu1 %7332  ;;  %v2741_v32 = vpack.c.bf16 %v2717_v34, %v2716_v30 }
 0x127   : > { %v2714_v48 = vsel %vm1075_vm5, %v2682_v11, %v7319_v51  ;;  %v2715_v8 = vsel %vm1075_vm5, %v2683_v55, %v7320_v36  ;;  %v7335_v35 = vunpack.i.h.bf16 %v7333_v10  ;;  %v7334_v38 = vunpack.i.l.bf16 %v7333_v10 }
 0x128   : > { %v7328_v62 = vpop.permute.xlu0 %7327  ;;  %v2740_v13 = vpack.c.bf16 %v2715_v8, %v2714_v48 }
 0x129   : > { %v7330_v63 = vunpack.i.h.bf16 %v7328_v62  ;;  %v7329_v39 = vunpack.i.l.bf16 %v7328_v62  ;;  %v1848_v37 = vsel %vm537_vm1, %v9404_v29, %v7335_v35  ;;  %v1847_v57 = vsel %vm537_vm1, %v9408_v21, %v7334_v38  ;;  %v9612_v38 = vld [vmem:[#allocation2 + $0x150] sm:$0xff] }
 0x12a   : > { %6848 = vmatprep.mubr.msk.bf16.mxu0 %vm1131_vm6, %v2740_v13  ;;  %v7343_v40 = vpop.permute.xlu1 %7342 }
 0x12b   : > { %6849 = vmatmul.mubr.msk.bf16.gmra.mrb[44].mxu0 %vm1131_vm6, %v2741_v32  ;;  %v7345_v17 = vunpack.i.h.bf16 %v7343_v40  ;;  %v7344_v42 = vunpack.i.l.bf16 %v7343_v40  ;;  %v1846_v12 = vsel %vm537_vm1, %v7992_v24, %v7330_v63  ;;  %v1845_v9 = vsel %vm537_vm1, %v7993_v16, %v7329_v39  ;;  %v9608_v32 = vld [vmem:[#allocation2 + $0x158] sm:$0xff] }
 0x12c   : > { %v7338_v59 = vpop.permute.xlu0 %7337 }
 0x12d   : > { %v1879_v44 = vsel %vm1075_vm5, %v1847_v57, %v7344_v42  ;;  %v1880_v19 = vsel %vm1075_vm5, %v1848_v37, %v7345_v17  ;;  %v7340_v23 = vunpack.i.h.bf16 %v7338_v59  ;;  %v7339_v53 = vunpack.i.l.bf16 %v7338_v59  ;;  %v7998_v42 = vld [vmem:[#allocation2 + $0x140] sm:$0xff]  ;;  %v7999_v57 = vld [vmem:[#allocation2 + $0x138] sm:$0xff] }
 0x12e   : > { %v7353_v6 = vpop.permute.xlu1 %7352  ;;  %v1900_v33 = vpack.c.bf16 %v1880_v19, %v1879_v44 }
 0x12f   : > { %v1877_v50 = vsel %vm1075_vm5, %v1845_v9, %v7339_v53  ;;  %v1878_v29 = vsel %vm1075_vm5, %v1846_v12, %v7340_v23  ;;  %v7355_v21 = vunpack.i.h.bf16 %v7353_v6  ;;  %v7354_v60 = vunpack.i.l.bf16 %v7353_v6 }
 0x130   : > { %v7348_v0 = vpop.permute.xlu0 %7347  ;;  %v1899_v47 = vpack.c.bf16 %v1878_v29, %v1877_v50 }
 0x131   : > { %v7350_v41 = vunpack.i.h.bf16 %v7348_v0  ;;  %v7349_v7 = vunpack.i.l.bf16 %v7348_v0  ;;  %v2689_v52 = vsel %vm537_vm1, %v7992_v24, %v7355_v21  ;;  %v2688_v2 = vsel %vm537_vm1, %v7993_v16, %v7354_v60 }
 0x132   : > { %6822 = vmatprep.mubr.msk.bf16.mxu1 %vm1131_vm6, %v1899_v47  ;;  %v7363_v26 = vpop.permute.xlu1 %7362 }
 0x133   : > { %6823 = vmatmul.mubr.msk.bf16.gmra.mrb[20].mxu1 %vm1131_vm6, %v1900_v33  ;;  %v7365_v1 = vunpack.i.h.bf16 %v7363_v26  ;;  %v7364_v14 = vunpack.i.l.bf16 %v7363_v26  ;;  %v2687_v3 = vsel %vm537_vm1, %v7994_v28, %v7350_v41  ;;  %v2686_v49 = vsel %vm537_vm1, %v7995_v61, %v7349_v7 }
 0x134   : > { %v7358_v58 = vpop.permute.xlu0 %7357 }
 0x135   : > { %v2720_v22 = vsel %vm1075_vm5, %v2688_v2, %v7364_v14  ;;  %v2721_v27 = vsel %vm1075_vm5, %v2689_v52, %v7365_v1  ;;  %v7360_v20 = vunpack.i.h.bf16 %v7358_v58  ;;  %v7359_v4 = vunpack.i.l.bf16 %v7358_v58  ;;  %v8000_v14 = vld [vmem:[#allocation2 + $0x128] sm:$0xff]  ;;  %v8001_v2 = vld [vmem:[#allocation2 + $0x120] sm:$0xff] }
 0x136   : > { %v7373_v46 = vpop.permute.xlu1 %7372  ;;  %v2743_v34 = vpack.c.bf16 %v2721_v27, %v2720_v22 }
 0x137   : > { %v2718_v15 = vsel %vm1075_vm5, %v2686_v49, %v7359_v4  ;;  %v2719_v30 = vsel %vm1075_vm5, %v2687_v3, %v7360_v20  ;;  %v7375_v36 = vunpack.i.h.bf16 %v7373_v46  ;;  %v7374_v51 = vunpack.i.l.bf16 %v7373_v46 }
 0x138   : > { %v7368_v45 = vpop.permute.xlu0 %7367  ;;  %v2742_v55 = vpack.c.bf16 %v2719_v30, %v2718_v15 }
 0x139   : > { %v7370_v56 = vunpack.i.h.bf16 %v7368_v45  ;;  %v7369_v11 = vunpack.i.l.bf16 %v7368_v45  ;;  %v1852_v35 = vsel %vm537_vm1, %v9608_v32, %v7375_v36  ;;  %v1851_v62 = vsel %vm537_vm1, %v9612_v38, %v7374_v51 }
 0x13a   : > { %6852 = vmatprep.mubr.msk.bf16.mxu0 %vm1131_vm6, %v2742_v55  ;;  %v7383_v10 = vpop.permute.xlu1 %7382 }
 0x13b   : > { %6853 = vmatmul.mubr.msk.bf16.gmra.mrb[48].mxu0 %vm1131_vm6, %v2743_v34  ;;  %v7385_v48 = vunpack.i.h.bf16 %v7383_v10  ;;  %v7384_v8 = vunpack.i.l.bf16 %v7383_v10  ;;  %v1850_v37 = vsel %vm537_vm1, %v7998_v42, %v7370_v56  ;;  %v1849_v59 = vsel %vm537_vm1, %v7999_v57, %v7369_v11 }
 0x13c   : > { %v7378_v13 = vpop.permute.xlu0 %7377 }
 0x13d   : > { %v1883_v63 = vsel %vm1075_vm5, %v1851_v62, %v7384_v8  ;;  %v1884_v39 = vsel %vm1075_vm5, %v1852_v35, %v7385_v48  ;;  %v7380_v40 = vunpack.i.h.bf16 %v7378_v13  ;;  %v7379_v17 = vunpack.i.l.bf16 %v7378_v13 }
 0x13e   : > { %v7393_v44 = vpop.permute.xlu1 %7392  ;;  %v1902_v53 = vpack.c.bf16 %v1884_v39, %v1883_v63 }
 0x13f   : > { %v1881_v19 = vsel %vm1075_vm5, %v1849_v59, %v7379_v17  ;;  %v1882_v23 = vsel %vm1075_vm5, %v1850_v37, %v7380_v40  ;;  %v7395_v24 = vunpack.i.h.bf16 %v7393_v44  ;;  %v7394_v12 = vunpack.i.l.bf16 %v7393_v44 }
 0x140   : > { %v7388_v16 = vpop.permute.xlu0 %7387  ;;  %v1901_v9 = vpack.c.bf16 %v1882_v23, %v1881_v19  ;;  %v8002_v19 = vld [vmem:[#allocation2 + $0x168] sm:$0xff] }
 0x141   : > { %v7390_v6 = vunpack.i.h.bf16 %v7388_v16  ;;  %v7389_v50 = vunpack.i.l.bf16 %v7388_v16  ;;  %v2693_v60 = vsel %vm537_vm1, %v7998_v42, %v7395_v24  ;;  %v2692_v0 = vsel %vm537_vm1, %v7999_v57, %v7394_v12 }
 0x142   : > { %6826 = vmatprep.mubr.msk.bf16.mxu1 %vm1131_vm6, %v1901_v9  ;;  %v7403_v29 = vpop.permute.xlu1 %7402 }
 0x143   : > { %6827 = vmatmul.mubr.msk.bf16.gmra.mrb[24].mxu1 %vm1131_vm6, %v1902_v53  ;;  %v7405_v33 = vunpack.i.h.bf16 %v7403_v29  ;;  %v7404_v21 = vunpack.i.l.bf16 %v7403_v29  ;;  %v2691_v52 = vsel %vm537_vm1, %v8000_v14, %v7390_v6  ;;  %v2690_v58 = vsel %vm537_vm1, %v8001_v2, %v7389_v50 }
 0x144   : > { %v7398_v47 = vpop.permute.xlu0 %7397 }
 0x145   : > { %v2724_v41 = vsel %vm1075_vm5, %v2692_v0, %v7404_v21  ;;  %v2725_v7 = vsel %vm1075_vm5, %v2693_v60, %v7405_v33  ;;  %v7400_v26 = vunpack.i.h.bf16 %v7398_v47  ;;  %v7399_v1 = vunpack.i.l.bf16 %v7398_v47 }
 0x146   : > { %v7413_v22 = vpop.permute.xlu1 %7412  ;;  %v2745_v4 = vpack.c.bf16 %v2725_v7, %v2724_v41 }
 0x147   : > { %v2722_v27 = vsel %vm1075_vm5, %v2690_v58, %v7399_v1  ;;  %v2723_v20 = vsel %vm1075_vm5, %v2691_v52, %v7400_v26  ;;  %v7415_v28 = vunpack.i.h.bf16 %v7413_v22  ;;  %v7414_v3 = vunpack.i.l.bf16 %v7413_v22 }
 0x148   : > { %v7408_v61 = vpop.permute.xlu0 %7407  ;;  %v2744_v49 = vpack.c.bf16 %v2723_v20, %v2722_v27 }
 0x149   : > { %v7410_v46 = vunpack.i.h.bf16 %v7408_v61  ;;  %v7409_v15 = vunpack.i.l.bf16 %v7408_v61  ;;  %v1856_v51 = vsel %vm537_vm1, %v9310_v43, %v7415_v28  ;;  %v1855_v45 = vsel %vm537_vm1, %v9308_v31, %v7414_v3  ;;  %v8004_v3 = vld [vmem:[#allocation2 + $0x180] sm:$0xff] }
 0x14a   : > { %6856 = vmatprep.mubr.msk.bf16.mxu0 %vm1131_vm6, %v2744_v49  ;;  %v7423_v30 = vpop.permute.xlu1 %7422 }
 0x14b   : > { %6857 = vmatmul.mubr.msk.bf16.gmra.mrb[52].mxu0 %vm1131_vm6, %v2745_v4  ;;  %v7425_v34 = vunpack.i.h.bf16 %v7423_v30  ;;  %v7424_v36 = vunpack.i.l.bf16 %v7423_v30  ;;  %v1854_v8 = vsel %vm537_vm1, %v9312_v5, %v7410_v46  ;;  %v1853_v35 = vsel %vm537_vm1, %v9298_v18, %v7409_v15  ;;  %v8003_v4 = vld [vmem:[#allocation2 + $0x188] sm:$0xff] }
 0x14c   : > { %v7418_v55 = vpop.permute.xlu0 %7417 }
 0x14d   : > { %v1887_v56 = vsel %vm1075_vm5, %v1855_v45, %v7424_v36  ;;  %v1888_v11 = vsel %vm1075_vm5, %v1856_v51, %v7425_v34  ;;  %v7420_v10 = vunpack.i.h.bf16 %v7418_v55  ;;  %v7419_v48 = vunpack.i.l.bf16 %v7418_v55 }
 0x14e   : > { %v7433_v62 = vpop.permute.xlu1 %7432  ;;  %v1904_v63 = vpack.c.bf16 %v1888_v11, %v1887_v56 }
 0x14f   : > { %v1885_v13 = vsel %vm1075_vm5, %v1853_v35, %v7419_v48  ;;  %v1886_v43 = vsel %vm1075_vm5, %v1854_v8, %v7420_v10  ;;  %v7435_v31 = vunpack.i.h.bf16 %v7433_v62  ;;  %v7434_v39 = vunpack.i.l.bf16 %v7433_v62 }
 0x150   : > { %v7428_v40 = vpop.permute.xlu0 %7427  ;;  %v1903_v17 = vpack.c.bf16 %v1886_v43, %v1885_v13 }
 0x151   : > { %v7430_v42 = vunpack.i.h.bf16 %v7428_v40  ;;  %v7429_v37 = vunpack.i.l.bf16 %v7428_v40  ;;  %v2697_v18 = vsel %vm537_vm1, %v9312_v5, %v7435_v31  ;;  %v2696_v23 = vsel %vm537_vm1, %v8002_v19, %v7434_v39 }
 0x152   : > { %6830 = vmatprep.mubr.msk.bf16.mxu1 %vm1131_vm6, %v1903_v17  ;;  %v7443_v57 = vpop.permute.xlu1 %7442 }
 0x153   : > { %6831 = vmatmul.mubr.msk.bf16.gmra.mrb[28].mxu1 %vm1131_vm6, %v1904_v63  ;;  %v7445_v59 = vunpack.i.h.bf16 %v7443_v57  ;;  %v7444_v44 = vunpack.i.l.bf16 %v7443_v57  ;;  %v2695_v6 = vsel %vm537_vm1, %v9608_v32, %v7430_v42  ;;  %v2694_v50 = vsel %vm537_vm1, %v9612_v38, %v7429_v37 }
 0x154   : > { %v7438_v53 = vpop.permute.xlu0 %7437 }
 0x155   : > { %v2728_v24 = vsel %vm1075_vm5, %v2696_v23, %v7444_v44  ;;  %v2729_v12 = vsel %vm1075_vm5, %v2697_v18, %v7445_v59  ;;  %v7440_v16 = vunpack.i.h.bf16 %v7438_v53  ;;  %v7439_v9 = vunpack.i.l.bf16 %v7438_v53 }
 0x156   : > { %v7453_v29 = vpop.permute.xlu1 %7452  ;;  %v2747_v21 = vpack.c.bf16 %v2729_v12, %v2728_v24 }
 0x157   : > { %v2726_v33 = vsel %vm1075_vm5, %v2694_v50, %v7439_v9  ;;  %v2727_v5 = vsel %vm1075_vm5, %v2695_v6, %v7440_v16  ;;  %v7455_v60 = vunpack.i.h.bf16 %v7453_v29  ;;  %v7454_v0 = vunpack.i.l.bf16 %v7453_v29 }
 0x158   : > { %v7448_v47 = vpop.permute.xlu0 %7447  ;;  %v2746_v41 = vpack.c.bf16 %v2727_v5, %v2726_v33 }
 0x159   : > { %v7450_v7 = vunpack.i.h.bf16 %v7448_v47  ;;  %v7449_v26 = vunpack.i.l.bf16 %v7448_v47  ;;  %v2701_v38 = vsel %vm537_vm1, %v9402_v25, %v7455_v60  ;;  %v2700_v52 = vsel %vm537_vm1, %v9398_v54, %v7454_v0 }
 0x15a   : > { %6860 = vmatprep.mubr.msk.bf16.mxu0 %vm1131_vm6, %v2746_v41  ;;  %v7463_v1 = vpop.permute.xlu1 %7462 }
 0x15b   : > { %6861 = vmatmul.mubr.msk.bf16.gmra.mrb[56].mxu0 %vm1131_vm6, %v2747_v21  ;;  %v7465_v32 = vunpack.i.h.bf16 %v7463_v1  ;;  %v7464_v14 = vunpack.i.l.bf16 %v7463_v1  ;;  %v2699_v28 = vsel %vm537_vm1, %v8003_v4, %v7450_v7  ;;  %v2698_v61 = vsel %vm537_vm1, %v8004_v3, %v7449_v26 }
 0x15c   : > { %v7458_v2 = vpop.permute.xlu0 %7457 }
 0x15d   : > { %v2732_v58 = vsel %vm1075_vm5, %v2700_v52, %v7464_v14  ;;  %v2733_v22 = vsel %vm1075_vm5, %v2701_v38, %v7465_v32  ;;  %v7460_v27 = vunpack.i.h.bf16 %v7458_v2  ;;  %v7459_v20 = vunpack.i.l.bf16 %v7458_v2 }
 0x15e   : > { %v2749_v49 = vpack.c.bf16 %v2733_v22, %v2732_v58 }
 0x15f   : > { %v2730_v46 = vsel %vm1075_vm5, %v2698_v61, %v7459_v20  ;;  %v2731_v25 = vsel %vm1075_vm5, %v2699_v28, %v7460_v27 }
 0x160   : > { %v2748_v15 = vpack.c.bf16 %v2731_v25, %v2730_v46 }
 0x162   : > { %6864 = vmatprep.mubr.msk.bf16.mxu0 %vm1131_vm6, %v2748_v15 }
 0x163   : > { %6865 = vmatmul.mubr.msk.bf16.gmra.mrb[60].mxu0 %vm1131_vm6, %v2749_v49 }
 0x176   : > { %v6770_v54 = vpop.f32.mrb[0].mxu0 }
 0x177   : > { %1346 = vst.msk [vmem:[#allocation3 + $0x10] sm:$0xff] %vm537_vm1, %v6770_v54  ;;  %v1217_v30 = vpop.f32.mrb[1].mxu0 }
 0x178   : > { %1344 = vst.msk [vmem:[#allocation3] sm:$0xff] %vm537_vm1, %v1217_v30  ;;  %v6771_v34 = vpop.f32.mrb[2].mxu0 }
 0x179   : > { %1347 = vst.msk [vmem:[#allocation3 + $0x18] sm:$0xff] %vm537_vm1, %v6771_v34  ;;  %v1220_v36 = vpop.f32.mrb[3].mxu0 }
 0x17a   : > { %1345 = vst.msk [vmem:[#allocation3 + $0x8] sm:$0xff] %vm537_vm1, %v1220_v36 }
 0x17e   : > { %v6774_v51 = vpop.f32.mrb[4].mxu0  ;;  %v2127_v53 = vld [vmem:[#allocation3 + $0x10] sm:$0xff] }
 0x17f   : > { %1350 = vst.msk [vmem:[#allocation3 + $0x30] sm:$0xff] %vm537_vm1, %v6774_v51  ;;  %v1233_v45 = vpop.f32.mrb[5].mxu0  ;;  %v2125_v16 = vld [vmem:[#allocation3] sm:$0xff] }
 0x180   : > { %1348 = vst.msk [vmem:[#allocation3 + $0x20] sm:$0xff] %vm537_vm1, %v1233_v45  ;;  %v6775_v55 = vpop.f32.mrb[6].mxu0  ;;  %v2128_v50 = vld [vmem:[#allocation3 + $0x18] sm:$0xff] }
 0x181   : > { %1351 = vst.msk [vmem:[#allocation3 + $0x38] sm:$0xff] %vm537_vm1, %v6775_v55  ;;  %v1236_v56 = vpop.f32.mrb[7].mxu0  ;;  %v2126_v5 = vld [vmem:[#allocation3 + $0x8] sm:$0xff] }
 0x182   : > { %1349 = vst.msk [vmem:[#allocation3 + $0x28] sm:$0xff] %vm537_vm1, %v1236_v56 }
 0x186   : > { %v6778_v11 = vpop.f32.mrb[8].mxu0  ;;  %v2131_v26 = vld [vmem:[#allocation3 + $0x30] sm:$0xff] }
 0x187   : > { %1354 = vst.msk [vmem:[#allocation3 + $0x50] sm:$0xff] %vm537_vm1, %v6778_v11  ;;  %v1249_v10 = vpop.f32.mrb[9].mxu0  ;;  %v2129_v14 = vld [vmem:[#allocation3 + $0x20] sm:$0xff] }
 0x188   : > { %1352 = vst.msk [vmem:[#allocation3 + $0x40] sm:$0xff] %vm537_vm1, %v1249_v10  ;;  %v6779_v48 = vpop.f32.mrb[10].mxu0  ;;  %v2132_v2 = vld [vmem:[#allocation3 + $0x38] sm:$0xff] }
 0x189   : > { %1355 = vst.msk [vmem:[#allocation3 + $0x58] sm:$0xff] %vm537_vm1, %v6779_v48  ;;  %v1252_v8 = vpop.f32.mrb[11].mxu0  ;;  %v2130_v27 = vld [vmem:[#allocation3 + $0x28] sm:$0xff] }
 0x18a   : > { %1353 = vst.msk [vmem:[#allocation3 + $0x48] sm:$0xff] %vm537_vm1, %v1252_v8 }
 0x18e   : > { %v2135_v45 = vld [vmem:[#allocation3 + $0x50] sm:$0xff] }
 0x18f   : > { %v2133_v11 = vld [vmem:[#allocation3 + $0x40] sm:$0xff] }
 0x190   : > { %v2136_v8 = vld [vmem:[#allocation3 + $0x58] sm:$0xff] }
 0x192   : > { %v6782_v35 = vpop.f32.mrb[12].mxu0 }
 0x193   : > { %1358 = vst.msk [vmem:[#allocation3 + $0x70] sm:$0xff] %vm537_vm1, %v6782_v35  ;;  %v1265_v62 = vpop.f32.mrb[13].mxu0 }
 0x194   : > { %1356 = vst.msk [vmem:[#allocation3 + $0x60] sm:$0xff] %vm537_vm1, %v1265_v62  ;;  %v6783_v13 = vpop.f32.mrb[14].mxu0 }
 0x195   : > { %1359 = vst.msk [vmem:[#allocation3 + $0x78] sm:$0xff] %vm537_vm1, %v6783_v13  ;;  %v1268_v43 = vpop.f32.mrb[15].mxu0  ;;  %v2134_v13 = vld [vmem:[#allocation3 + $0x48] sm:$0xff] }
 0x196   : > { %1357 = vst.msk [vmem:[#allocation3 + $0x68] sm:$0xff] %vm537_vm1, %v1268_v43 }
 0x19a   : > { %v6786_v63 = vpop.f32.mrb[16].mxu0 }
 0x19b   : > { %1362 = vst.msk [vmem:[#allocation3 + $0x90] sm:$0xff] %vm537_vm1, %v6786_v63  ;;  %v1281_v31 = vpop.f32.mrb[17].mxu0 }
 0x19c   : > { %1360 = vst.msk [vmem:[#allocation3 + $0x80] sm:$0xff] %vm537_vm1, %v1281_v31  ;;  %v6787_v39 = vpop.f32.mrb[18].mxu0 }
 0x19d   : > { %1363 = vst.msk [vmem:[#allocation3 + $0x98] sm:$0xff] %vm537_vm1, %v6787_v39  ;;  %v1284_v40 = vpop.f32.mrb[19].mxu0 }
 0x19e   : > { %1361 = vst.msk [vmem:[#allocation3 + $0x88] sm:$0xff] %vm537_vm1, %v1284_v40 }
 0x1a3   : > { %v6790_v17 = vpop.f32.mrb[20].mxu0 }
 0x1a4   : > { %1366 = vst.msk [vmem:[#allocation3 + $0xb0] sm:$0xff] %vm537_vm1, %v6790_v17  ;;  %v1297_v42 = vpop.f32.mrb[21].mxu0 }
 0x1a5   : > { %1364 = vst.msk [vmem:[#allocation3 + $0xa0] sm:$0xff] %vm537_vm1, %v1297_v42  ;;  %v6791_v37 = vpop.f32.mrb[22].mxu0 }
 0x1a6   : > { %1367 = vst.msk [vmem:[#allocation3 + $0xb8] sm:$0xff] %vm537_vm1, %v6791_v37  ;;  %v1300_v57 = vpop.f32.mrb[23].mxu0 }
 0x1a7   : > { %1365 = vst.msk [vmem:[#allocation3 + $0xa8] sm:$0xff] %vm537_vm1, %v1300_v57 }
 0x1ae   : > { %v6794_v59 = vpop.f32.mrb[24].mxu0 }
 0x1af   : > { %1370 = vst.msk [vmem:[#allocation3 + $0xd0] sm:$0xff] %vm537_vm1, %v6794_v59  ;;  %v1313_v44 = vpop.f32.mrb[25].mxu0 }
 0x1b0   : > { %1368 = vst.msk [vmem:[#allocation3 + $0xc0] sm:$0xff] %vm537_vm1, %v1313_v44  ;;  %v6795_v18 = vpop.f32.mrb[26].mxu0 }
 0x1b1   : > { %1371 = vst.msk [vmem:[#allocation3 + $0xd8] sm:$0xff] %vm537_vm1, %v6795_v18  ;;  %v1316_v19 = vpop.f32.mrb[27].mxu0 }
 0x1b2   : > { %1369 = vst.msk [vmem:[#allocation3 + $0xc8] sm:$0xff] %vm537_vm1, %v1316_v19 }
 0x1b9   : > { %v6804_v23 = vpop.f32.mrb[0].mxu1 }
 0x1ba   : > { %v2159_v24 = vadd.f32 %v6804_v23, %v2127_v53  ;;  %v1998_v12 = vpop.f32.mrb[1].mxu1 }
 0x1bb   : > { %v2157_v9 = vadd.f32 %v2125_v16, %v1998_v12  ;;  %v6805_v6 = vpop.f32.mrb[2].mxu1  ;;  %v2139_v16 = vld [vmem:[#allocation3 + $0x70] sm:$0xff] }
 0x1bc   : > { %2191 = vst.msk [vmem:[#allocation3 + $0x10] sm:$0xff] %vm537_vm1, %v2159_v24  ;;  %v2160_v29 = vadd.f32 %v6805_v6, %v2128_v50  ;;  %v2001_v33 = vpop.f32.mrb[3].mxu1  ;;  %v2137_v50 = vld [vmem:[#allocation3 + $0x60] sm:$0xff] }
 0x1bd   : > { %2189 = vst.msk [vmem:[#allocation3] sm:$0xff] %vm537_vm1, %v2157_v9  ;;  %v2158_v21 = vadd.f32 %v2126_v5, %v2001_v33 }
 0x1be   : > { %2192 = vst.msk [vmem:[#allocation3 + $0x18] sm:$0xff] %vm537_vm1, %v2160_v29  ;;  %v6798_v60 = vpop.f32.mrb[28].mxu0 }
 0x1bf   : > { %2190 = vst.msk [vmem:[#allocation3 + $0x8] sm:$0xff] %vm537_vm1, %v2158_v21  ;;  %1374 = vst.msk [vmem:[#allocation3 + $0xf0] sm:$0xff] %vm537_vm1, %v6798_v60  ;;  %v1329_v0 = vpop.f32.mrb[29].mxu0  ;;  %v2140_v60 = vld [vmem:[#allocation3 + $0x78] sm:$0xff] }
 0x1c0   : > { %1372 = vst.msk [vmem:[#allocation3 + $0xe0] sm:$0xff] %vm537_vm1, %v1329_v0  ;;  %v6799_v47 = vpop.f32.mrb[30].mxu0 }
 0x1c1   : > { %1375 = vst.msk [vmem:[#allocation3 + $0xf8] sm:$0xff] %vm537_vm1, %v6799_v47  ;;  %v1332_v41 = vpop.f32.mrb[31].mxu0 }
 0x1c2   : > { %1373 = vst.msk [vmem:[#allocation3 + $0xe8] sm:$0xff] %vm537_vm1, %v1332_v41 }
 0x1c3   : > { %v2972_v28 = vld [vmem:[#allocation3 + $0x10] sm:$0xff] }
 0x1c4   : > { %v2970_v49 = vld [vmem:[#allocation3] sm:$0xff] }
 0x1c5   : > { %v2973_v15 = vld [vmem:[#allocation3 + $0x18] sm:$0xff] }
 0x1c6   : > { %v6808_v7 = vpop.f32.mrb[4].mxu1  ;;  %v2971_v34 = vld [vmem:[#allocation3 + $0x8] sm:$0xff] }
 0x1c7   : > { %v2163_v1 = vadd.f32 %v6808_v7, %v2131_v26  ;;  %v2014_v32 = vpop.f32.mrb[5].mxu1  ;;  %v2138_v7 = vld [vmem:[#allocation3 + $0x68] sm:$0xff] }
 0x1c8   : > { %v2161_v38 = vadd.f32 %v2129_v14, %v2014_v32  ;;  %v6809_v52 = vpop.f32.mrb[6].mxu1 }
 0x1c9   : > { %2195 = vst.msk [vmem:[#allocation3 + $0x30] sm:$0xff] %vm537_vm1, %v2163_v1  ;;  %v2164_v58 = vadd.f32 %v6809_v52, %v2132_v2  ;;  %v2017_v22 = vpop.f32.mrb[7].mxu1 }
 0x1ca   : > { %2193 = vst.msk [vmem:[#allocation3 + $0x20] sm:$0xff] %vm537_vm1, %v2161_v38  ;;  %v2162_v20 = vadd.f32 %v2130_v27, %v2017_v22 }
 0x1cb   : > { %2196 = vst.msk [vmem:[#allocation3 + $0x38] sm:$0xff] %vm537_vm1, %v2164_v58 }
 0x1cc   : > { %2194 = vst.msk [vmem:[#allocation3 + $0x28] sm:$0xff] %vm537_vm1, %v2162_v20 }
 0x1ce   : > { %v6838_v4 = vpop.f32.mrb[32].mxu0 }
 0x1cf   : > { %v3004_v3 = vadd.f32 %v6838_v4, %v2972_v28  ;;  %v2843_v61 = vpop.f32.mrb[33].mxu0 }
 0x1d0   : > { %v3002_v46 = vadd.f32 %v2970_v49, %v2843_v61  ;;  %v6839_v25 = vpop.f32.mrb[34].mxu0  ;;  %v2976_v31 = vld [vmem:[#allocation3 + $0x30] sm:$0xff] }
 0x1d1   : > { %3036 = vst.msk [vmem:[#allocation3 + $0x10] sm:$0xff] %vm537_vm1, %v3004_v3  ;;  %v3005_v54 = vadd.f32 %v6839_v25, %v2973_v15  ;;  %v2846_v30 = vpop.f32.mrb[35].mxu0  ;;  %v2974_v17 = vld [vmem:[#allocation3 + $0x20] sm:$0xff] }
 0x1d2   : > { %3034 = vst.msk [vmem:[#allocation3] sm:$0xff] %vm537_vm1, %v3002_v46  ;;  %v3003_v36 = vadd.f32 %v2971_v34, %v2846_v30  ;;  %v2977_v57 = vld [vmem:[#allocation3 + $0x38] sm:$0xff] }
 0x1d3   : > { %3037 = vst.msk [vmem:[#allocation3 + $0x18] sm:$0xff] %vm537_vm1, %v3005_v54  ;;  %v2975_v18 = vld [vmem:[#allocation3 + $0x28] sm:$0xff] }
 0x1d4   : > { %3035 = vst.msk [vmem:[#allocation3 + $0x8] sm:$0xff] %vm537_vm1, %v3003_v36 }
 0x1d6   : > { %v6812_v51 = vpop.f32.mrb[8].mxu1 }
 0x1d7   : > { %v2167_v55 = vadd.f32 %v6812_v51, %v2135_v45  ;;  %v2030_v56 = vpop.f32.mrb[9].mxu1 }
 0x1d8   : > { %v2165_v10 = vadd.f32 %v2133_v11, %v2030_v56  ;;  %v6813_v48 = vpop.f32.mrb[10].mxu1  ;;  %v9735_v0 = vld [vmem:[#allocation3 + $0x10] sm:$0xff] }
 0x1d9   : > { %2199 = vst.msk [vmem:[#allocation3 + $0x50] sm:$0xff] %vm537_vm1, %v2167_v55  ;;  %v2168_v35 = vadd.f32 %v6813_v48, %v2136_v8  ;;  %v2033_v62 = vpop.f32.mrb[11].mxu1  ;;  %v9727_v53 = vld [vmem:[#allocation3] sm:$0xff]  ;;  %v3173_v38 = vmul.f32 %v9735_v0, %v9735_v0  ;;  %v3103_v27 = vsel %vm537_vm1, %v9735_v0, 0.0 }
 0x1da   : > { %2197 = vst.msk [vmem:[#allocation3 + $0x40] sm:$0xff] %vm537_vm1, %v2165_v10  ;;  %v2166_v43 = vadd.f32 %v2134_v13, %v2033_v62  ;;  %v3171_v29 = vmul.f32 %v9727_v53, %v9727_v53  ;;  %v3100_v26 = vsel %vm537_vm1, %v9727_v53, 0.0  ;;  %v9747_v2 = vld [vmem:[#allocation3 + $0x18] sm:$0xff] }
 0x1db   : > { %2200 = vst.msk [vmem:[#allocation3 + $0x58] sm:$0xff] %vm537_vm1, %v2168_v35  ;;  %v9723_v23 = vld [vmem:[#allocation3 + $0x8] sm:$0xff]  ;;  %v3206_v46 = vsel %vm537_vm1, %v3173_v38, 0.0  ;;  %v3174_v25 = vmul.f32 %v9747_v2, %v9747_v2  ;;  %v3105_v11 = vsel %vm537_vm1, %v9747_v2, 0.0 }
 0x1dc   : > { %2198 = vst.msk [vmem:[#allocation3 + $0x48] sm:$0xff] %vm537_vm1, %v2166_v43  ;;  %v3172_v24 = vmul.f32 %v9723_v23, %v9723_v23  ;;  %v3101_v33 = vsel %vm537_vm1, %v9723_v23, 0.0  ;;  %v3203_v52 = vsel %vm537_vm1, %v3171_v29, 0.0 }
 0x1dd   : > { %v3102_v14 = vadd.f32 %v3101_v33, %v3100_v26  ;;  %v3208_v35 = vsel %vm537_vm1, %v3174_v25, 0.0 }
 0x1de   : > { %v6842_v63 = vpop.f32.mrb[36].mxu0  ;;  %v3204_v1 = vsel %vm537_vm1, %v3172_v24, 0.0  ;;  %v2144_v24 = vld [vmem:[#allocation3 + $0x98] sm:$0xff] }
 0x1df   : > { %v3008_v39 = vadd.f32 %v6842_v63, %v2976_v31  ;;  %v2859_v40 = vpop.f32.mrb[37].mxu0  ;;  %v3205_v58 = vadd.f32 %v3204_v1, %v3203_v52  ;;  %v3104_v28 = vadd.f32 %v3103_v27, %v3102_v14 }
 0x1e0   : > { %v3006_v42 = vadd.f32 %v2974_v17, %v2859_v40  ;;  %v6843_v37 = vpop.f32.mrb[38].mxu0  ;;  %v2980_v4 = vld [vmem:[#allocation3 + $0x50] sm:$0xff] }
 0x1e1   : > { %3040 = vst.msk [vmem:[#allocation3 + $0x30] sm:$0xff] %vm537_vm1, %v3008_v39  ;;  %v3009_v59 = vadd.f32 %v6843_v37, %v2977_v57  ;;  %v2862_v44 = vpop.f32.mrb[39].mxu0  ;;  %v2978_v49 = vld [vmem:[#allocation3 + $0x40] sm:$0xff]  ;;  %v3207_v36 = vadd.f32 %v3206_v46, %v3205_v58  ;;  %v3106_v8 = vadd.f32 %v3105_v11, %v3104_v28  ;;  %v2143_v40 = vld [vmem:[#allocation3 + $0x90] sm:$0xff] }
 0x1e2   : > { %3038 = vst.msk [vmem:[#allocation3 + $0x20] sm:$0xff] %vm537_vm1, %v3006_v42  ;;  %v3007_v19 = vadd.f32 %v2975_v18, %v2862_v44  ;;  %v2981_v34 = vld [vmem:[#allocation3 + $0x58] sm:$0xff] }
 0x1e3   : > { %3041 = vst.msk [vmem:[#allocation3 + $0x38] sm:$0xff] %vm537_vm1, %v3009_v59  ;;  %v2979_v56 = vld [vmem:[#allocation3 + $0x48] sm:$0xff]  ;;  %v3209_v63 = vadd.f32 %v3208_v35, %v3207_v36  ;;  %v2141_v59 = vld [vmem:[#allocation3 + $0x80] sm:$0xff]  ;;  %v2147_v35 = vld [vmem:[#allocation3 + $0xb0] sm:$0xff] }
 0x1e4   : > { %3039 = vst.msk [vmem:[#allocation3 + $0x28] sm:$0xff] %vm537_vm1, %v3007_v19 }
 0x1e6   : > { %v6816_v12 = vpop.f32.mrb[12].mxu1 }
 0x1e7   : > { %v2171_v9 = vadd.f32 %v6816_v12, %v2139_v16  ;;  %v2046_v6 = vpop.f32.mrb[13].mxu1 }
 0x1e8   : > { %v2169_v5 = vadd.f32 %v2137_v50, %v2046_v6  ;;  %v6817_v21 = vpop.f32.mrb[14].mxu1  ;;  %v9774_v17 = vld [vmem:[#allocation3 + $0x30] sm:$0xff]  ;;  %v2142_v6 = vld [vmem:[#allocation3 + $0x88] sm:$0xff] }
 0x1e9   : > { %2203 = vst.msk [vmem:[#allocation3 + $0x70] sm:$0xff] %vm537_vm1, %v2171_v9  ;;  %v2172_v47 = vadd.f32 %v6817_v21, %v2140_v60  ;;  %v2049_v41 = vpop.f32.mrb[15].mxu1  ;;  %v9749_v22 = vld [vmem:[#allocation3 + $0x20] sm:$0xff]  ;;  %v3177_v50 = vmul.f32 %v9774_v17, %v9774_v17  ;;  %v3111_v60 = vsel %vm537_vm1, %v9774_v17, 0.0 }
 0x1ea   : > { %2201 = vst.msk [vmem:[#allocation3 + $0x60] sm:$0xff] %vm537_vm1, %v2169_v5  ;;  %v2170_v32 = vadd.f32 %v2138_v7, %v2049_v41  ;;  %v3175_v15 = vmul.f32 %v9749_v22, %v9749_v22  ;;  %v3107_v10 = vsel %vm537_vm1, %v9749_v22, 0.0  ;;  %v9781_v33 = vld [vmem:[#allocation3 + $0x38] sm:$0xff] }
 0x1eb   : > { %2204 = vst.msk [vmem:[#allocation3 + $0x78] sm:$0xff] %vm537_vm1, %v2172_v47  ;;  %v9758_v51 = vld [vmem:[#allocation3 + $0x28] sm:$0xff]  ;;  %v3108_v43 = vadd.f32 %v3107_v10, %v3106_v8  ;;  %v3214_v41 = vsel %vm537_vm1, %v3177_v50, 0.0  ;;  %v3178_v7 = vmul.f32 %v9781_v33, %v9781_v33 }
 0x1ec   : > { %2202 = vst.msk [vmem:[#allocation3 + $0x68] sm:$0xff] %vm537_vm1, %v2170_v32  ;;  %v3210_v62 = vsel %vm537_vm1, %v3175_v15, 0.0  ;;  %v3176_v13 = vmul.f32 %v9758_v51, %v9758_v51  ;;  %v3109_v31 = vsel %vm537_vm1, %v9758_v51, 0.0 }
 0x1ed   : > { %v3211_v42 = vadd.f32 %v3210_v62, %v3209_v63  ;;  %v3110_v12 = vadd.f32 %v3109_v31, %v3108_v43  ;;  %v2145_v63 = vld [vmem:[#allocation3 + $0xa0] sm:$0xff] }
 0x1ee   : > { %v6846_v20 = vpop.f32.mrb[40].mxu0  ;;  %v3212_v44 = vsel %vm537_vm1, %v3176_v13, 0.0 }
 0x1ef   : > { %v3012_v3 = vadd.f32 %v6846_v20, %v2980_v4  ;;  %v2875_v61 = vpop.f32.mrb[41].mxu0  ;;  %v3213_v5 = vadd.f32 %v3212_v44, %v3211_v42  ;;  %v3112_v47 = vadd.f32 %v3111_v60, %v3110_v12  ;;  %v3113_v20 = vsel %vm537_vm1, %v9781_v33, 0.0  ;;  %v2148_v42 = vld [vmem:[#allocation3 + $0xb8] sm:$0xff] }
 0x1f0   : > { %v3010_v54 = vadd.f32 %v2978_v49, %v2875_v61  ;;  %v6847_v30 = vpop.f32.mrb[42].mxu0  ;;  %v2984_v32 = vld [vmem:[#allocation3 + $0x70] sm:$0xff] }
 0x1f1   : > { %3044 = vst.msk [vmem:[#allocation3 + $0x50] sm:$0xff] %vm537_vm1, %v3012_v3  ;;  %v3013_v45 = vadd.f32 %v6847_v30, %v2981_v34  ;;  %v2878_v55 = vpop.f32.mrb[43].mxu0  ;;  %v3215_v14 = vadd.f32 %v3214_v41, %v3213_v5  ;;  %v2982_v27 = vld [vmem:[#allocation3 + $0x60] sm:$0xff]  ;;  %v3114_v49 = vadd.f32 %v3113_v20, %v3112_v47 }
 0x1f2   : > { %3042 = vst.msk [vmem:[#allocation3 + $0x40] sm:$0xff] %vm537_vm1, %v3010_v54  ;;  %v3011_v48 = vadd.f32 %v2979_v56, %v2878_v55  ;;  %v2985_v61 = vld [vmem:[#allocation3 + $0x78] sm:$0xff]  ;;  %v3216_v54 = vsel %vm537_vm1, %v3178_v7, 0.0 }
 0x1f3   : > { %3045 = vst.msk [vmem:[#allocation3 + $0x58] sm:$0xff] %vm537_vm1, %v3013_v45  ;;  %v2983_v15 = vld [vmem:[#allocation3 + $0x68] sm:$0xff]  ;;  %v3217_v55 = vadd.f32 %v3216_v54, %v3215_v14 }
 0x1f4   : > { %3043 = vst.msk [vmem:[#allocation3 + $0x48] sm:$0xff] %vm537_vm1, %v3011_v48 }
 0x1f6   : > { %v6820_v39 = vpop.f32.mrb[16].mxu1 }
 0x1f7   : > { %v2175_v37 = vadd.f32 %v6820_v39, %v2143_v40  ;;  %v2062_v57 = vpop.f32.mrb[17].mxu1 }
 0x1f8   : > { %v2173_v18 = vadd.f32 %v2141_v59, %v2062_v57  ;;  %v6821_v19 = vpop.f32.mrb[18].mxu1  ;;  %v9810_v11 = vld [vmem:[#allocation3 + $0x50] sm:$0xff] }
 0x1f9   : > { %2207 = vst.msk [vmem:[#allocation3 + $0x90] sm:$0xff] %vm537_vm1, %v2175_v37  ;;  %v2176_v16 = vadd.f32 %v6821_v19, %v2144_v24  ;;  %v2065_v9 = vpop.f32.mrb[19].mxu1  ;;  %v9783_v21 = vld [vmem:[#allocation3 + $0x40] sm:$0xff]  ;;  %v3181_v31 = vmul.f32 %v9810_v11, %v9810_v11  ;;  %v2146_v19 = vld [vmem:[#allocation3 + $0xa8] sm:$0xff]  ;;  %v3119_v24 = vsel %vm537_vm1, %v9810_v11, 0.0 }
 0x1fa   : > { %2205 = vst.msk [vmem:[#allocation3 + $0x80] sm:$0xff] %vm537_vm1, %v2173_v18  ;;  %v2174_v29 = vadd.f32 %v2142_v6, %v2065_v9  ;;  %v3179_v26 = vmul.f32 %v9783_v21, %v9783_v21  ;;  %v3115_v4 = vsel %vm537_vm1, %v9783_v21, 0.0  ;;  %v9815_v37 = vld [vmem:[#allocation3 + $0x58] sm:$0xff] }
 0x1fb   : > { %2208 = vst.msk [vmem:[#allocation3 + $0x98] sm:$0xff] %vm537_vm1, %v2176_v16  ;;  %v9794_v38 = vld [vmem:[#allocation3 + $0x48] sm:$0xff]  ;;  %v3116_v45 = vadd.f32 %v3115_v4, %v3114_v49  ;;  %v3222_v9 = vsel %vm537_vm1, %v3181_v31, 0.0  ;;  %v3182_v6 = vmul.f32 %v9815_v37, %v9815_v37  ;;  %v3121_v60 = vsel %vm537_vm1, %v9815_v37, 0.0 }
 0x1fc   : > { %2206 = vst.msk [vmem:[#allocation3 + $0x88] sm:$0xff] %vm537_vm1, %v2174_v29  ;;  %v3218_v30 = vsel %vm537_vm1, %v3179_v26, 0.0  ;;  %v3180_v34 = vmul.f32 %v9794_v38, %v9794_v38  ;;  %v3117_v56 = vsel %vm537_vm1, %v9794_v38, 0.0 }
 0x1fd   : > { %v3219_v10 = vadd.f32 %v3218_v30, %v3217_v55  ;;  %v3118_v62 = vadd.f32 %v3117_v56, %v3116_v45 }
 0x1fe   : > { %v6850_v1 = vpop.f32.mrb[44].mxu0  ;;  %v3220_v48 = vsel %vm537_vm1, %v3180_v34, 0.0 }
 0x1ff   : > { %v3016_v52 = vadd.f32 %v6850_v1, %v2984_v32  ;;  %v2891_v58 = vpop.f32.mrb[45].mxu0  ;;  %v3221_v57 = vadd.f32 %v3220_v48, %v3219_v10  ;;  %v3120_v16 = vadd.f32 %v3119_v24, %v3118_v62  ;;  %v2151_v10 = vld [vmem:[#allocation3 + $0xd0] sm:$0xff] }
 0x200   : > { %v3014_v28 = vadd.f32 %v2982_v27, %v2891_v58  ;;  %v6851_v3 = vpop.f32.mrb[46].mxu0  ;;  %v2988_v7 = vld [vmem:[#allocation3 + $0x90] sm:$0xff] }
 0x201   : > { %3048 = vst.msk [vmem:[#allocation3 + $0x70] sm:$0xff] %vm537_vm1, %v3016_v52  ;;  %v3017_v46 = vadd.f32 %v6851_v3, %v2985_v61  ;;  %v2894_v25 = vpop.f32.mrb[47].mxu0  ;;  %v3223_v29 = vadd.f32 %v3222_v9, %v3221_v57  ;;  %v3122_v26 = vadd.f32 %v3121_v60, %v3120_v16  ;;  %v2986_v14 = vld [vmem:[#allocation3 + $0x80] sm:$0xff]  ;;  %v3224_v52 = vsel %vm537_vm1, %v3182_v6, 0.0 }
 0x202   : > { %3046 = vst.msk [vmem:[#allocation3 + $0x60] sm:$0xff] %vm537_vm1, %v3014_v28  ;;  %v3015_v36 = vadd.f32 %v2983_v15, %v2894_v25  ;;  %v2989_v28 = vld [vmem:[#allocation3 + $0x98] sm:$0xff] }
 0x203   : > { %3049 = vst.msk [vmem:[#allocation3 + $0x78] sm:$0xff] %vm537_vm1, %v3017_v46  ;;  %v3225_v61 = vadd.f32 %v3224_v52, %v3223_v29  ;;  %v2987_v25 = vld [vmem:[#allocation3 + $0x88] sm:$0xff] }
 0x204   : > { %3047 = vst.msk [vmem:[#allocation3 + $0x68] sm:$0xff] %vm537_vm1, %v3015_v36 }
 0x206   : > { %v6824_v8 = vpop.f32.mrb[20].mxu1 }
 0x207   : > { %v2179_v13 = vadd.f32 %v6824_v8, %v2147_v35  ;;  %v2078_v43 = vpop.f32.mrb[21].mxu1 }
 0x208   : > { %v2177_v39 = vadd.f32 %v2145_v63, %v2078_v43  ;;  %v6825_v40 = vpop.f32.mrb[22].mxu1  ;;  %v9844_v30 = vld [vmem:[#allocation3 + $0x70] sm:$0xff] }
 0x209   : > { %v9817_v59 = vld [vmem:[#allocation3 + $0x60] sm:$0xff]  ;;  %2211 = vst.msk [vmem:[#allocation3 + $0xb0] sm:$0xff] %vm537_vm1, %v2179_v13  ;;  %v2180_v44 = vadd.f32 %v6825_v40, %v2148_v42  ;;  %v2081_v18 = vpop.f32.mrb[23].mxu1  ;;  %v3185_v55 = vmul.f32 %v9844_v30, %v9844_v30  ;;  %v3127_v43 = vsel %vm537_vm1, %v9844_v30, 0.0 }
 0x20a   : > { %2209 = vst.msk [vmem:[#allocation3 + $0xa0] sm:$0xff] %vm537_vm1, %v2177_v39  ;;  %v2178_v12 = vadd.f32 %v2146_v19, %v2081_v18  ;;  %v3183_v50 = vmul.f32 %v9817_v59, %v9817_v59  ;;  %v3123_v47 = vsel %vm537_vm1, %v9817_v59, 0.0  ;;  %v9851_v48 = vld [vmem:[#allocation3 + $0x78] sm:$0xff]  ;;  %v2149_v13 = vld [vmem:[#allocation3 + $0xc0] sm:$0xff]  ;;  %v2150_v18 = vld [vmem:[#allocation3 + $0xc8] sm:$0xff] }
 0x20b   : > { %2212 = vst.msk [vmem:[#allocation3 + $0xb8] sm:$0xff] %vm537_vm1, %v2180_v44  ;;  %v9830_v5 = vld [vmem:[#allocation3 + $0x68] sm:$0xff]  ;;  %v3124_v3 = vadd.f32 %v3123_v47, %v3122_v26  ;;  %v2152_v39 = vld [vmem:[#allocation3 + $0xd8] sm:$0xff]  ;;  %v3230_v19 = vsel %vm537_vm1, %v3185_v55, 0.0  ;;  %v3186_v24 = vmul.f32 %v9851_v48, %v9851_v48 }
 0x20c   : > { %2210 = vst.msk [vmem:[#allocation3 + $0xa8] sm:$0xff] %vm537_vm1, %v2178_v12  ;;  %v3226_v58 = vsel %vm537_vm1, %v3183_v50, 0.0  ;;  %v3184_v27 = vmul.f32 %v9830_v5, %v9830_v5  ;;  %v3125_v15 = vsel %vm537_vm1, %v9830_v5, 0.0  ;;  %v3129_v50 = vsel %vm537_vm1, %v9851_v48, 0.0 }
 0x20d   : > { %v3227_v34 = vadd.f32 %v3226_v58, %v3225_v61  ;;  %v3126_v45 = vadd.f32 %v3125_v15, %v3124_v3  ;;  %v3232_v47 = vsel %vm537_vm1, %v3186_v24, 0.0 }
 0x20e   : > { %v6854_v41 = vpop.f32.mrb[48].mxu0  ;;  %v3228_v36 = vsel %vm537_vm1, %v3184_v27, 0.0 }
 0x20f   : > { %v3020_v1 = vadd.f32 %v6854_v41, %v2988_v7  ;;  %v2907_v32 = vpop.f32.mrb[49].mxu0  ;;  %v3229_v8 = vadd.f32 %v3228_v36, %v3227_v34  ;;  %v3128_v40 = vadd.f32 %v3127_v43, %v3126_v45 }
 0x210   : > { %v3018_v20 = vadd.f32 %v2986_v14, %v2907_v32  ;;  %v6855_v4 = vpop.f32.mrb[50].mxu0 }
 0x211   : > { %3052 = vst.msk [vmem:[#allocation3 + $0x90] sm:$0xff] %vm537_vm1, %v3020_v1  ;;  %v3021_v49 = vadd.f32 %v6855_v4, %v2989_v28  ;;  %v2910_v46 = vpop.f32.mrb[51].mxu0  ;;  %v3231_v9 = vadd.f32 %v3230_v19, %v3229_v8  ;;  %v3130_v60 = vadd.f32 %v3129_v50, %v3128_v40  ;;  %v2992_v1 = vld [vmem:[#allocation3 + $0xb0] sm:$0xff]  ;;  %v2990_v27 = vld [vmem:[#allocation3 + $0xa0] sm:$0xff] }
 0x212   : > { %3050 = vst.msk [vmem:[#allocation3 + $0x80] sm:$0xff] %vm537_vm1, %v3018_v20  ;;  %v3019_v54 = vadd.f32 %v2987_v25, %v2910_v46  ;;  %v2993_v3 = vld [vmem:[#allocation3 + $0xb8] sm:$0xff] }
 0x213   : > { %3053 = vst.msk [vmem:[#allocation3 + $0x98] sm:$0xff] %vm537_vm1, %v3021_v49  ;;  %v3233_v14 = vadd.f32 %v3232_v47, %v3231_v9  ;;  %v2991_v15 = vld [vmem:[#allocation3 + $0xa8] sm:$0xff] }
 0x214   : > { %3051 = vst.msk [vmem:[#allocation3 + $0x88] sm:$0xff] %vm537_vm1, %v3019_v54 }
 0x216   : > { %v6828_v56 = vpop.f32.mrb[24].mxu1 }
 0x217   : > { %v2183_v35 = vadd.f32 %v6828_v56, %v2151_v10  ;;  %v2094_v62 = vpop.f32.mrb[25].mxu1 }
 0x218   : > { %v2181_v63 = vadd.f32 %v2149_v13, %v2094_v62  ;;  %v6829_v31 = vpop.f32.mrb[26].mxu1  ;;  %v9878_v61 = vld [vmem:[#allocation3 + $0x90] sm:$0xff] }
 0x219   : > { %v9855_v42 = vld [vmem:[#allocation3 + $0x80] sm:$0xff]  ;;  %2215 = vst.msk [vmem:[#allocation3 + $0xd0] sm:$0xff] %vm537_vm1, %v2183_v35  ;;  %v2184_v57 = vadd.f32 %v6829_v31, %v2152_v39  ;;  %v2097_v44 = vpop.f32.mrb[27].mxu1  ;;  %v3189_v45 = vmul.f32 %v9878_v61, %v9878_v61  ;;  %v3135_v10 = vsel %vm537_vm1, %v9878_v61, 0.0  ;;  %v2155_v35 = vld [vmem:[#allocation3 + $0xf0] sm:$0xff] }
 0x21a   : > { %v3187_v12 = vmul.f32 %v9855_v42, %v9855_v42  ;;  %2213 = vst.msk [vmem:[#allocation3 + $0xc0] sm:$0xff] %vm537_vm1, %v2181_v63  ;;  %v2182_v16 = vadd.f32 %v2150_v18, %v2097_v44  ;;  %v3131_v29 = vsel %vm537_vm1, %v9855_v42, 0.0  ;;  %v9887_v55 = vld [vmem:[#allocation3 + $0x98] sm:$0xff]  ;;  %v2153_v63 = vld [vmem:[#allocation3 + $0xe0] sm:$0xff] }
 0x21b   : > { %v9864_v6 = vld [vmem:[#allocation3 + $0x88] sm:$0xff]  ;;  %2216 = vst.msk [vmem:[#allocation3 + $0xd8] sm:$0xff] %vm537_vm1, %v2184_v57  ;;  %v3132_v32 = vadd.f32 %v3131_v29, %v3130_v60  ;;  %v3238_v31 = vsel %vm537_vm1, %v3189_v45, 0.0  ;;  %v3190_v39 = vmul.f32 %v9887_v55, %v9887_v55  ;;  %v2156_v44 = vld [vmem:[#allocation3 + $0xf8] sm:$0xff]  ;;  %v3137_v9 = vsel %vm537_vm1, %v9887_v55, 0.0 }
 0x21c   : > { %2214 = vst.msk [vmem:[#allocation3 + $0xc8] sm:$0xff] %vm537_vm1, %v2182_v16  ;;  %v3234_v41 = vsel %vm537_vm1, %v3187_v12, 0.0  ;;  %v3188_v7 = vmul.f32 %v9864_v6, %v9864_v6  ;;  %v3133_v20 = vsel %vm537_vm1, %v9864_v6, 0.0  ;;  %v2154_v16 = vld [vmem:[#allocation3 + $0xe8] sm:$0xff] }
 0x21d   : > { %v3235_v49 = vadd.f32 %v3234_v41, %v3233_v14  ;;  %v3134_v36 = vadd.f32 %v3133_v20, %v3132_v32 }
 0x21e   : > { %v6858_v26 = vpop.f32.mrb[52].mxu0  ;;  %v3236_v54 = vsel %vm537_vm1, %v3188_v7, 0.0  ;;  %v3240_v7 = vsel %vm537_vm1, %v3190_v39, 0.0 }
 0x21f   : > { %v3024_v52 = vadd.f32 %v6858_v26, %v2992_v1  ;;  %v2923_v58 = vpop.f32.mrb[53].mxu0  ;;  %v3237_v56 = vadd.f32 %v3236_v54, %v3235_v49  ;;  %v3136_v62 = vadd.f32 %v3135_v10, %v3134_v36 }
 0x220   : > { %v3022_v4 = vadd.f32 %v2990_v27, %v2923_v58  ;;  %v6859_v28 = vpop.f32.mrb[54].mxu0  ;;  %v2996_v27 = vld [vmem:[#allocation3 + $0xd0] sm:$0xff] }
 0x221   : > { %3056 = vst.msk [vmem:[#allocation3 + $0xb0] sm:$0xff] %vm537_vm1, %v3024_v52  ;;  %v3025_v46 = vadd.f32 %v6859_v28, %v2993_v3  ;;  %v2926_v25 = vpop.f32.mrb[55].mxu0  ;;  %v3239_v18 = vadd.f32 %v3238_v31, %v3237_v56  ;;  %v3138_v47 = vadd.f32 %v3137_v9, %v3136_v62  ;;  %v2994_v49 = vld [vmem:[#allocation3 + $0xc0] sm:$0xff] }
 0x222   : > { %3054 = vst.msk [vmem:[#allocation3 + $0xa0] sm:$0xff] %vm537_vm1, %v3022_v4  ;;  %v3023_v34 = vadd.f32 %v2991_v15, %v2926_v25  ;;  %v2997_v54 = vld [vmem:[#allocation3 + $0xd8] sm:$0xff] }
 0x223   : > { %3057 = vst.msk [vmem:[#allocation3 + $0xb8] sm:$0xff] %vm537_vm1, %v3025_v46  ;;  %v3241_v14 = vadd.f32 %v3240_v7, %v3239_v18  ;;  %v2995_v56 = vld [vmem:[#allocation3 + $0xc8] sm:$0xff] }
 0x224   : > { %3055 = vst.msk [vmem:[#allocation3 + $0xa8] sm:$0xff] %vm537_vm1, %v3023_v34 }
 0x226   : > { %v6832_v8 = vpop.f32.mrb[28].mxu1 }
 0x227   : > { %v2187_v13 = vadd.f32 %v6832_v8, %v2155_v35  ;;  %v2110_v43 = vpop.f32.mrb[29].mxu1 }
 0x228   : > { %v2185_v40 = vadd.f32 %v2153_v63, %v2110_v43  ;;  %v6833_v57 = vpop.f32.mrb[30].mxu1  ;;  %v9914_v20 = vld [vmem:[#allocation3 + $0xb0] sm:$0xff] }
 0x229   : > { %v9894_v19 = vld [vmem:[#allocation3 + $0xa0] sm:$0xff]  ;;  %2219 = vst.msk [vmem:[#allocation3 + $0xf0] sm:$0xff] %vm537_vm1, %v2187_v13  ;;  %v2188_v24 = vadd.f32 %v6833_v57, %v2156_v44  ;;  %v2113_v12 = vpop.f32.mrb[31].mxu1  ;;  %v3193_v10 = vmul.f32 %v9914_v20, %v9914_v20  ;;  %v3143_v13 = vsel %vm537_vm1, %v9914_v20, 0.0 }
 0x22a   : > { %v3139_v50 = vsel %vm537_vm1, %v9894_v19, 0.0  ;;  %v3191_v29 = vmul.f32 %v9894_v19, %v9894_v19  ;;  %2217 = vst.msk [vmem:[#allocation3 + $0xe0] sm:$0xff] %vm537_vm1, %v2185_v40  ;;  %v2186_v60 = vadd.f32 %v2154_v16, %v2113_v12  ;;  %v9921_v35 = vld [vmem:[#allocation3 + $0xb8] sm:$0xff] }
 0x22b   : > { %v9904_v41 = vld [vmem:[#allocation3 + $0xa8] sm:$0xff]  ;;  %2220 = vst.msk [vmem:[#allocation3 + $0xf8] sm:$0xff] %vm537_vm1, %v2188_v24  ;;  %v3140_v32 = vadd.f32 %v3139_v50, %v3138_v47  ;;  %v3246_v63 = vsel %vm537_vm1, %v3193_v10, 0.0  ;;  %v3194_v31 = vmul.f32 %v9921_v35, %v9921_v35  ;;  %v3145_v12 = vsel %vm537_vm1, %v9921_v35, 0.0 }
 0x22c   : > { %v3242_v26 = vsel %vm537_vm1, %v3191_v29, 0.0  ;;  %v3192_v1 = vmul.f32 %v9904_v41, %v9904_v41  ;;  %2218 = vst.msk [vmem:[#allocation3 + $0xe8] sm:$0xff] %vm537_vm1, %v2186_v60  ;;  %v3141_v52 = vsel %vm537_vm1, %v9904_v41, 0.0 }
 0x22d   : > { %v3243_v4 = vadd.f32 %v3242_v26, %v3241_v14  ;;  %v3142_v34 = vadd.f32 %v3141_v52, %v3140_v32  ;;  %v3248_v32 = vsel %vm537_vm1, %v3194_v31, 0.0 }
 0x22e   : > { %v6862_v58 = vpop.f32.mrb[56].mxu0  ;;  %v3244_v46 = vsel %vm537_vm1, %v3192_v1, 0.0 }
 0x22f   : > { %v3028_v28 = vadd.f32 %v6862_v58, %v2996_v27  ;;  %v2939_v3 = vpop.f32.mrb[57].mxu0  ;;  %v3245_v62 = vadd.f32 %v3244_v46, %v3243_v4  ;;  %v3144_v43 = vadd.f32 %v3143_v13, %v3142_v34 }
 0x230   : > { %v3026_v25 = vadd.f32 %v2994_v49, %v2939_v3  ;;  %v6863_v15 = vpop.f32.mrb[58].mxu0  ;;  %v3000_v40 = vld [vmem:[#allocation3 + $0xf0] sm:$0xff] }
 0x231   : > { %3060 = vst.msk [vmem:[#allocation3 + $0xd0] sm:$0xff] %vm537_vm1, %v3028_v28  ;;  %v3029_v36 = vadd.f32 %v6863_v15, %v2997_v54  ;;  %v2942_v45 = vpop.f32.mrb[59].mxu0  ;;  %v3247_v57 = vadd.f32 %v3246_v63, %v3245_v62  ;;  %v2998_v24 = vld [vmem:[#allocation3 + $0xe0] sm:$0xff]  ;;  %v3146_v47 = vadd.f32 %v3145_v12, %v3144_v43 }
 0x232   : > { %3058 = vst.msk [vmem:[#allocation3 + $0xc0] sm:$0xff] %vm537_vm1, %v3026_v25  ;;  %v3027_v8 = vadd.f32 %v2995_v56, %v2942_v45  ;;  %v3001_v50 = vld [vmem:[#allocation3 + $0xf8] sm:$0xff] }
 0x233   : > { %3061 = vst.msk [vmem:[#allocation3 + $0xd8] sm:$0xff] %vm537_vm1, %v3029_v36  ;;  %v2999_v1 = vld [vmem:[#allocation3 + $0xe8] sm:$0xff]  ;;  %v3249_v4 = vadd.f32 %v3248_v32, %v3247_v57 }
 0x234   : > { %3059 = vst.msk [vmem:[#allocation3 + $0xc8] sm:$0xff] %vm537_vm1, %v3027_v8 }
 0x236   : > { %v6866_v39 = vpop.f32.mrb[60].mxu0 }
 0x237   : > { %v3032_v44 = vadd.f32 %v6866_v39, %v3000_v40  ;;  %v2955_v18 = vpop.f32.mrb[61].mxu0 }
 0x238   : > { %v3030_v16 = vadd.f32 %v2998_v24, %v2955_v18  ;;  %v6867_v9 = vpop.f32.mrb[62].mxu0  ;;  %v9932_v29 = vld [vmem:[#allocation3 + $0xd0] sm:$0xff] }
 0x239   : > { %v9934_v60 = vld [vmem:[#allocation3 + $0xc0] sm:$0xff]  ;;  %3064 = vst.msk [vmem:[#allocation3 + $0xf0] sm:$0xff] %vm537_vm1, %v3032_v44  ;;  %v3033_v7 = vadd.f32 %v6867_v9, %v3001_v50  ;;  %v2958_v26 = vpop.f32.mrb[63].mxu0  ;;  %v3197_v49 = vmul.f32 %v9932_v29, %v9932_v29  ;;  %v3151_v36 = vsel %vm537_vm1, %v9932_v29, 0.0 }
 0x23a   : > { %v3147_v14 = vsel %vm537_vm1, %v9934_v60, 0.0  ;;  %v3195_v52 = vmul.f32 %v9934_v60, %v9934_v60  ;;  %3062 = vst.msk [vmem:[#allocation3 + $0xe0] sm:$0xff] %vm537_vm1, %v3030_v16  ;;  %v3031_v58 = vadd.f32 %v2999_v1, %v2958_v26  ;;  %v9943_v28 = vld [vmem:[#allocation3 + $0xd8] sm:$0xff] }
 0x23b   : > { %v3148_v27 = vadd.f32 %v3147_v14, %v3146_v47  ;;  %v9945_v3 = vld [vmem:[#allocation3 + $0xc8] sm:$0xff]  ;;  %3065 = vst.msk [vmem:[#allocation3 + $0xf8] sm:$0xff] %vm537_vm1, %v3033_v7  ;;  %v3198_v45 = vmul.f32 %v9943_v28, %v9943_v28  ;;  %v3254_v62 = vsel %vm537_vm1, %v3197_v49, 0.0  ;;  %v3153_v13 = vsel %vm537_vm1, %v9943_v28, 0.0 }
 0x23c   : > { %v3250_v46 = vsel %vm537_vm1, %v3195_v52, 0.0  ;;  %v3149_v25 = vsel %vm537_vm1, %v9945_v3, 0.0  ;;  %v3196_v15 = vmul.f32 %v9945_v3, %v9945_v3  ;;  %3063 = vst.msk [vmem:[#allocation3 + $0xe8] sm:$0xff] %vm537_vm1, %v3031_v58 }
 0x23d   : > { %v3251_v54 = vadd.f32 %v3250_v46, %v3249_v4  ;;  %v3150_v34 = vadd.f32 %v3149_v25, %v3148_v27  ;;  %v3256_v40 = vsel %vm537_vm1, %v3198_v45, 0.0 }
 0x23e   : > { %v3252_v56 = vsel %vm537_vm1, %v3196_v15, 0.0 }
 0x23f   : > { %v3152_v10 = vadd.f32 %v3151_v36, %v3150_v34  ;;  %v3253_v8 = vadd.f32 %v3252_v56, %v3251_v54 }
 0x240   : > { %v9964_v63 = vld [vmem:[#allocation3 + $0xf0] sm:$0xff] }
 0x241   : > { %v3255_v43 = vadd.f32 %v3254_v62, %v3253_v8  ;;  %v3094_v31 = vld [vmem:[#allocation3 + $0xe0] sm:$0xff]  ;;  %v3154_v39 = vadd.f32 %v3153_v13, %v3152_v10  ;;  %v3201_v9 = vmul.f32 %v9964_v63, %v9964_v63  ;;  %v3159_v32 = vsel %vm537_vm1, %v9964_v63, 0.0 }
 0x242   : > { %v3155_v57 = vsel %vm537_vm1, %v3094_v31, 0.0  ;;  %v3199_v44 = vmul.f32 %v3094_v31, %v3094_v31  ;;  %v9968_v12 = vld [vmem:[#allocation3 + $0xf8] sm:$0xff] }
 0x243   : > { %v3156_v18 = vadd.f32 %v3155_v57, %v3154_v39  ;;  %v3257_v24 = vadd.f32 %v3256_v40, %v3255_v43  ;;  %v3095_v16 = vld [vmem:[#allocation3 + $0xe8] sm:$0xff]  ;;  %v3202_v14 = vmul.f32 %v9968_v12, %v9968_v12  ;;  %v3262_v4 = vsel %vm537_vm1, %v3201_v9, 0.0 }
 0x244   : > { %v3258_v50 = vsel %vm537_vm1, %v3199_v44, 0.0  ;;  %v3157_v47 = vsel %vm537_vm1, %v3095_v16, 0.0  ;;  %v3200_v7 = vmul.f32 %v3095_v16, %v3095_v16  ;;  %v3161_v49 = vsel %vm537_vm1, %v9968_v12, 0.0 }
 0x245   : > { %v3259_v26 = vadd.f32 %v3258_v50, %v3257_v24  ;;  %v3158_v1 = vadd.f32 %v3157_v47, %v3156_v18  ;;  %v3264_v15 = vsel %vm537_vm1, %v3202_v14, 0.0  ;;  %v3279_v47 = vlaneseq }
 0x246   : > { %v3260_v52 = vsel %vm537_vm1, %v3200_v7, 0.0 }
 0x247   : > { %v3160_v58 = vadd.f32 %v3159_v32, %v3158_v1  ;;  %v3261_v27 = vadd.f32 %v3260_v52, %v3259_v26  ;;  %v3280_v7 = vshrl.u32 %v3279_v47, 7  ;;  %v3098_v26 = vld [vmem:[%s12408_s3] sm:$0x1] }
 0x248   : > { %v3099_v52 = vld [vmem:[%s12409_s4] sm:$0x1] }
 0x249   : > { %v3162_v46 = vadd.f32 %v3161_v49, %v3160_v58  ;;  %v3263_v25 = vadd.f32 %v3262_v4, %v3261_v27  ;;  %v9986_v1 = vsub.s32 0, %v3280_v7 }
 0x24b   : > { %v3163_v54 = vrot.slane %v3162_v46, 4  ;;  %v3265_v34 = vadd.f32 %v3264_v15, %v3263_v25  ;;  %12522 = vst [vmem:[#allocation5_spill] sm:$0xff] %v9986_v1 }
 0x24d   : > { %v3164_v36 = vadd.f32 %v3163_v54, %v3162_v46  ;;  %v3266_v45 = vrot.slane %v3265_v34, 4 }
 0x24f   : > { %v3165_v56 = vrot.slane %v3164_v36, 2  ;;  %v3267_v10 = vadd.f32 %v3266_v45, %v3265_v34 }
 0x251   : > { %v3166_v8 = vadd.f32 %v3165_v56, %v3164_v36  ;;  %v3268_v62 = vrot.slane %v3267_v10, 2 }
 0x253   : > { %v3167_v13 = vrot.slane %v3166_v8, 1  ;;  %v3269_v43 = vadd.f32 %v3268_v62, %v3267_v10 }
 0x255   : > { %v3168_v39 = vadd.f32 %v3167_v13, %v3166_v8  ;;  %v3270_v40 = vrot.slane %v3269_v43, 1 }
 0x257   : > { %v3170_v57 = vmul.f32 0.00390625, %v3168_v39  ;;  %v3271_v44 = vadd.f32 %v3270_v40, %v3269_v43 }
 0x259   : > { %v3272_v18 = vmul.f32 0.00390625, %v3271_v44  ;;  %v3273_v24 = vmul.f32 %v3170_v57, %v3170_v57 }
 0x25b   : > { %v3274_v9 = vsub.f32 %v3272_v18, %v3273_v24 }
 0x25d   : > { %v3275_v50 = vadd.f32 1e-09, %v3274_v9 }
 0x25f   : > { %7952 = vrsqrt.f32 %v3275_v50 }
 0x269   : > { %v7953_v32 = vpop.eup %7952 }
 0x26a   : > { %v3277_v14 = vmul.f32 %v7953_v32, %v3098_v26 }
 0x26c   : > { %v3282_v58 = vrot.slane %v3277_v14, %v9986_v1  ;;  %v3316_v27 = vmul.f32 %v3277_v14, %v3170_v57 }
 0x26e   : > { %v3312_v4 = vmul.f32 %v3282_v58, %v3094_v31  ;;  %v3313_v49 = vmul.f32 %v3282_v58, %v3095_v16  ;;  %v3317_v46 = vsub.f32 %v3099_v52, %v3316_v27  ;;  %v3284_v25 = vmul.f32 %v3282_v58, %v9727_v53 }
 0x26f   : > { %v3285_v15 = vmul.f32 %v3282_v58, %v9723_v23  ;;  %v3286_v54 = vmul.f32 %v3282_v58, %v9735_v0  ;;  %v3287_v34 = vmul.f32 %v3282_v58, %v9747_v2  ;;  %v3288_v36 = vmul.f32 %v3282_v58, %v9749_v22 }
 0x270   : > { %v9998_v45 = vrot.slane %v3317_v46, %v9986_v1  ;;  %v3289_v56 = vmul.f32 %v3282_v58, %v9758_v51  ;;  %v3290_v10 = vmul.f32 %v3282_v58, %v9774_v17  ;;  %v3291_v31 = vmul.f32 %v3282_v58, %v9781_v33 }
 0x271   : > { %v3292_v16 = vmul.f32 %v3282_v58, %v9783_v21  ;;  %v3293_v53 = vmul.f32 %v3282_v58, %v9794_v38  ;;  %v3294_v23 = vmul.f32 %v3282_v58, %v9810_v11  ;;  %v3295_v0 = vmul.f32 %v3282_v58, %v9815_v37 }
 0x272   : > { %v3352_v2 = vadd.f32 %v9998_v45, %v3312_v4  ;;  %v3353_v22 = vadd.f32 %v9998_v45, %v3313_v49  ;;  %v3296_v8 = vmul.f32 %v3282_v58, %v9817_v59  ;;  %v3297_v51 = vmul.f32 %v3282_v58, %v9830_v5 }
 0x273   : > { %v3298_v17 = vmul.f32 %v3282_v58, %v9844_v30  ;;  %v3299_v33 = vmul.f32 %v3282_v58, %v9851_v48  ;;  %v3300_v21 = vmul.f32 %v3282_v58, %v9855_v42  ;;  %v3301_v38 = vmul.f32 %v3282_v58, %v9864_v6 }
 0x274   : > { %v3384_v62 = vmax.f32 %v3352_v2, 0.0  ;;  %v3385_v11 = vmax.f32 %v3353_v22, 0.0  ;;  %v3302_v37 = vmul.f32 %v3282_v58, %v9878_v61  ;;  %v3303_v13 = vmul.f32 %v3282_v58, %v9887_v55 }
 0x275   : > { %v3304_v43 = vmul.f32 %v3282_v58, %v9894_v19  ;;  %v3305_v59 = vmul.f32 %v3282_v58, %v9904_v41  ;;  %v3306_v5 = vmul.f32 %v3282_v58, %v9914_v20  ;;  %v3307_v30 = vmul.f32 %v3282_v58, %v9921_v35 }
 0x276   : > { %v3494_v39 = vrot.slane %v3384_v62, 7  ;;  %v3495_v48 = vrot.slane %v3385_v11, 7  ;;  %v3562_v40 = vrot.slane %v3385_v11, 5  ;;  %v3308_v42 = vmul.f32 %v3282_v58, %v9934_v60 }
 0x277   : > { %v3309_v6 = vmul.f32 %v3282_v58, %v9945_v3  ;;  %v3310_v57 = vmul.f32 %v3282_v58, %v9932_v29  ;;  %v3311_v61 = vmul.f32 %v3282_v58, %v9943_v28  ;;  %v3314_v55 = vmul.f32 %v3282_v58, %v9964_v63 }
 0x278   : > { %v3496_v19 = vsel %vm376_vm0, %v3494_v39, %v3495_v48  ;;  %v3610_v41 = vsel %vm376_vm0, %v3495_v48, %v3562_v40  ;;  %v3315_v20 = vmul.f32 %v3282_v58, %v9968_v12  ;;  %v3418_v35 = vrot.slane %v3384_v62, 1 }
 0x279   : > { %3658 = vst.msk [vmem:[#allocation2 + $0x170] sm:$0xff] %vm537_vm1, %v3496_v19  ;;  %3664 = vst.msk [vmem:[#allocation2 + $0x1a0] sm:$0xff] %vm537_vm1, %v3496_v19  ;;  %v3326_v29 = vadd.f32 %v9998_v45, %v3286_v54  ;;  %v3327_v60 = vadd.f32 %v9998_v45, %v3287_v34  ;;  %v3324_v28 = vadd.f32 %v9998_v45, %v3284_v25 }
 0x27a   : > { %3659 = vst.msk [vmem:[#allocation2 + $0x178] sm:$0x3] %vm540_vm2, %v3610_v41  ;;  %3665 = vst.msk [vmem:[#allocation2 + $0x1a8] sm:$0x3] %vm540_vm2, %v3610_v41  ;;  %v3325_v3 = vadd.f32 %v9998_v45, %v3285_v15  ;;  %v10038_v63 = vadd.f32 %v9998_v45, %v3288_v36  ;;  %v10041_v12 = vadd.f32 %v9998_v45, %v3289_v56 }
 0x27b   : > { %v10044_v44 = vadd.f32 %v9998_v45, %v3290_v10  ;;  %v10047_v18 = vadd.f32 %v9998_v45, %v3291_v31  ;;  %v3358_v24 = vmax.f32 %v3326_v29, 0.0  ;;  %v3359_v9 = vmax.f32 %v3327_v60, 0.0 }
 0x27c   : > { %v10050_v50 = vadd.f32 %v9998_v45, %v3292_v16  ;;  %v10053_v47 = vadd.f32 %v9998_v45, %v3293_v53  ;;  %v10056_v7 = vadd.f32 %v9998_v45, %v3294_v23  ;;  %v10059_v26 = vadd.f32 %v9998_v45, %v3295_v0 }
 0x27d   : > { %v10062_v32 = vadd.f32 %v9998_v45, %v3296_v8  ;;  %v10065_v14 = vadd.f32 %v9998_v45, %v3297_v51  ;;  %v3404_v52 = vrot.slane %v3358_v24, 1  ;;  %v3452_v58 = vrot.slane %v3358_v24, 7 }
 0x27e   : > { %v3453_v27 = vrot.slane %v3359_v9, 7  ;;  %v3548_v4 = vrot.slane %v3359_v9, 5  ;;  %v10068_v49 = vadd.f32 %v9998_v45, %v3298_v17  ;;  %v10071_v46 = vadd.f32 %v9998_v45, %v3299_v33 }
 0x27f   : > { %v10074_v25 = vadd.f32 %v9998_v45, %v3300_v21  ;;  %v10077_v15 = vadd.f32 %v9998_v45, %v3301_v38  ;;  %v3580_v34 = vsel %vm376_vm0, %v3404_v52, %v3452_v58  ;;  %v10083_v56 = vadd.f32 %v9998_v45, %v3302_v37 }
 0x280   : > { %v3454_v54 = vsel %vm376_vm0, %v3452_v58, %v3453_v27  ;;  %v3596_v36 = vsel %vm376_vm0, %v3453_v27, %v3548_v4  ;;  %3612 = vst.msk [vmem:[#allocation2] sm:$0xff] %vm537_vm1, %v3580_v34  ;;  %v10089_v10 = vadd.f32 %v9998_v45, %v3303_v13  ;;  %v10092_v31 = vadd.f32 %v9998_v45, %v3304_v43 }
 0x281   : > { %3613 = vst.msk [vmem:[#allocation2 + $0x8] sm:$0xff] %vm537_vm1, %v3454_v54  ;;  %v10095_v16 = vadd.f32 %v9998_v45, %v3305_v59  ;;  %v10098_v53 = vadd.f32 %v9998_v45, %v3306_v5  ;;  %3618 = vst.msk [vmem:[#allocation2 + $0x30] sm:$0xff] %vm537_vm1, %v3580_v34  ;;  %v10104_v23 = vadd.f32 %v9998_v45, %v3307_v30  ;;  %v3356_v21 = vmax.f32 %v3324_v28, 0.0 }
 0x282   : > { %3614 = vst.msk [vmem:[#allocation2 + $0x10] sm:$0x3] %vm540_vm2, %v3596_v36  ;;  %3620 = vst.msk [vmem:[#allocation2 + $0x40] sm:$0x3] %vm540_vm2, %v3596_v36  ;;  %v10107_v0 = vadd.f32 %v9998_v45, %v3308_v42  ;;  %v10110_v2 = vadd.f32 %v9998_v45, %v3309_v6  ;;  %v10113_v22 = vadd.f32 %v9998_v45, %v3310_v57  ;;  %v3357_v38 = vmax.f32 %v3325_v3, 0.0 }
 0x283   : > { %3619 = vst.msk [vmem:[#allocation2 + $0x38] sm:$0xff] %vm537_vm1, %v3454_v54  ;;  %v10116_v8 = vadd.f32 %v9998_v45, %v3311_v61  ;;  %v10119_v51 = vadd.f32 %v9998_v45, %v3314_v55  ;;  %v10122_v17 = vadd.f32 %v9998_v45, %v3315_v20  ;;  %v3594_v33 = vsel %vm376_vm0, %v3418_v35, %v3494_v39 }
 0x284   : > { %v3360_v62 = vmax.f32 %v10038_v63, 0.0  ;;  %v12434_v11 = vmax.f32 %v10041_v12, 0.0  ;;  %3657 = vst.msk [vmem:[#allocation2 + $0x168] sm:$0xff] %vm537_vm1, %v3594_v33  ;;  %3663 = vst.msk [vmem:[#allocation2 + $0x198] sm:$0xff] %vm537_vm1, %v3594_v33  ;;  %v3362_v37 = vmax.f32 %v10044_v44, 0.0  ;;  %v12433_v13 = vmax.f32 %v10047_v18, 0.0 }
 0x285   : > { %v3364_v43 = vmax.f32 %v10050_v50, 0.0  ;;  %v12431_v45 = vmax.f32 %v10053_v47, 0.0  ;;  %v3405_v59 = vrot.slane %v3356_v21, 1  ;;  %v3455_v5 = vrot.slane %v3356_v21, 7 }
 0x286   : > { %v3456_v30 = vrot.slane %v3357_v38, 7  ;;  %v3549_v39 = vrot.slane %v3357_v38, 5  ;;  %v3366_v48 = vmax.f32 %v10056_v7, 0.0  ;;  %v12429_v40 = vmax.f32 %v10059_v26, 0.0 }
 0x287   : > { %v3368_v42 = vmax.f32 %v10062_v32, 0.0  ;;  %v12428_v6 = vmax.f32 %v10065_v14, 0.0  ;;  %v3666_v57 = vld [vmem:[#allocation2] sm:$0xff]  ;;  %v3581_v41 = vsel %vm376_vm0, %v3405_v59, %v3455_v5  ;;  %v3370_v35 = vmax.f32 %v10068_v49, 0.0 }
 0x288   : > { %v3667_v61 = vld [vmem:[#allocation2 + $0x8] sm:$0xff]  ;;  %v3457_v19 = vsel %vm376_vm0, %v3455_v5, %v3456_v30  ;;  %v3597_v20 = vsel %vm376_vm0, %v3456_v30, %v3549_v39  ;;  %v3762_v29 = vrot.slane %v3666_v57, 1  ;;  %3615 = vst.msk [vmem:[#allocation2 + $0x18] sm:$0xff] %vm537_vm1, %v3581_v41  ;;  %v12430_v24 = vmax.f32 %v10071_v46, 0.0 }
 0x289   : > { %v3668_v55 = vld [vmem:[#allocation2 + $0x10] sm:$0x3]  ;;  %v3763_v60 = vrot.slane %v3667_v61, 1  ;;  %3616 = vst.msk [vmem:[#allocation2 + $0x20] sm:$0xff] %vm537_vm1, %v3457_v19  ;;  %v3372_v9 = vmax.f32 %v10074_v25, 0.0  ;;  %v12432_v52 = vmax.f32 %v10077_v15, 0.0 }
 0x28a   : > { %v3765_v28 = vrot.slane %v3668_v55, 1  ;;  %v3941_v3 = vrot.slane %v3668_v55, 2  ;;  %3617 = vst.msk [vmem:[#allocation2 + $0x28] sm:$0x3] %vm540_vm2, %v3597_v20  ;;  %v3374_v58 = vmax.f32 %v10083_v56, 0.0  ;;  %v3376_v34 = vmax.f32 %v10092_v31, 0.0 }
 0x28b   : > { %v3764_v27 = vsel %vm689_vm4, %v3762_v29, %v3763_v60  ;;  %v3378_v21 = vmax.f32 %v10098_v53, 0.0  ;;  %v3380_v25 = vmax.f32 %v10107_v0, 0.0  ;;  %v3382_v56 = vmax.f32 %v10113_v22, 0.0 }
 0x28c   : > { %v3766_v4 = vsel %vm689_vm4, %v3763_v60, %v3765_v28  ;;  %v3386_v30 = vmax.f32 %v10119_v51, 0.0  ;;  %v3938_v39 = vrot.slane %v3666_v57, 2  ;;  %v3939_v55 = vrot.slane %v3667_v61, 2 }
 0x28d   : > { %v7466_v36 = vpack.i.bf16 %v3766_v4, %v3764_v27  ;;  %v10164_v53 = vrot.slane %v3360_v62, 1  ;;  %v10168_v0 = vrot.slane %v3362_v37, 1  ;;  %v10172_v22 = vrot.slane %v3364_v43, 1 }
 0x28e   : > { %v10176_v19 = vrot.slane %v3366_v48, 1  ;;  %v3940_v41 = vsel %vm866_vm3, %v3938_v39, %v3939_v55  ;;  %v3942_v20 = vsel %vm866_vm3, %v3939_v55, %v3941_v3  ;;  %v10186_v29 = vrot.slane %v3368_v42, 1 }
 0x28f   : > { %7467 = vrot.lane.b32.xlu0 %v7466_v36, %s8092_s8  ;;  %v10178_v51 = vld [vmem:[#allocation2 + $0x18] sm:$0xff]  ;;  %v10190_v60 = vrot.slane %v3370_v35, 1  ;;  %v7476_v31 = vpack.i.bf16 %v3942_v20, %v3940_v41  ;;  %v10197_v39 = vrot.slane %v3372_v9, 1  ;;  %v10199_v3 = vrot.slane %v3374_v58, 1 }
 0x290   : > { %v3670_v57 = vld [vmem:[#allocation2 + $0x20] sm:$0xff]  ;;  %v3767_v28 = vrot.slane %v10178_v51, 1  ;;  %v10201_v55 = vrot.slane %v3376_v34, 1  ;;  %v10209_v38 = vrot.slane %v3378_v21, 1  ;;  %v10211_v33 = vrot.slane %v3380_v25, 1 }
 0x291   : > { %v10180_v61 = vld [vmem:[#allocation2 + $0x28] sm:$0x3]  ;;  %v10193_v27 = vrot.slane %v3670_v57, 1  ;;  %v10215_v41 = vrot.slane %v3382_v56, 1  ;;  %v10217_v20 = vrot.slane %v3386_v30, 1  ;;  %v10221_v54 = vrot.slane %v3360_v62, 7 }
 0x292   : > { %v3770_v4 = vrot.slane %v10180_v61, 1  ;;  %v3946_v36 = vrot.slane %v10180_v61, 2  ;;  %v10242_v63 = vrot.slane %v12431_v45, 7  ;;  %v10246_v62 = vrot.slane %v3366_v48, 7 }
 0x293   : > { %12523 = vst [vmem:[#allocation7_spill] sm:$0xff] %v10193_v27  ;;  %v10205_v5 = vsel %vm689_vm4, %v3767_v28, %v10193_v27  ;;  %7477 = vrot.lane.b32.xlu0 %v7476_v31, %s8091_s30  ;;  %12525 = vst [vmem:[#allocation4_spill] sm:$0xff] %v10217_v20  ;;  %v10225_v28 = vrot.slane %v12434_v11, 7  ;;  %v10237_v31 = vrot.slane %v3364_v43, 7  ;;  %v10250_v44 = vrot.slane %v12429_v40, 7 }
 0x294   : > { %12524 = vst [vmem:[#allocation8_spill] sm:$0xff] %v10205_v5  ;;  %v3771_v59 = vsel %vm689_vm4, %v10193_v27, %v3770_v4  ;;  %v10229_v4 = vrot.slane %v3362_v37, 7  ;;  %v10254_v37 = vrot.slane %v3368_v42, 7  ;;  %v10258_v50 = vrot.slane %v12428_v6, 7 }
 0x295   : > { %v7471_v61 = vpack.i.bf16 %v3771_v59, %v10205_v5  ;;  %v10233_v59 = vrot.slane %v12433_v13, 7  ;;  %v10262_v43 = vrot.slane %v3370_v35, 7  ;;  %v10266_v7 = vrot.slane %v12430_v24, 7 }
 0x296   : > { %v10268_v48 = vrot.slane %v3372_v9, 7  ;;  %v10274_v32 = vrot.slane %v3374_v58, 7  ;;  %v12526_v42 = vmax.f32 %v10089_v10, 0.0  ;;  %v10280_v40 = vrot.slane %v3376_v34, 7 }
 0x297   : > { %7472 = vrot.lane.b32.xlu1 %v7471_v61, %s8092_s8  ;;  %v10272_v61 = vrot.slane %v12432_v52, 7  ;;  %v12527_v49 = vmax.f32 %v10095_v16, 0.0  ;;  %v10286_v24 = vrot.slane %v3378_v21, 7  ;;  %v12528_v9 = vmax.f32 %v10104_v23, 0.0 }
 0x298   : > { %v10278_v6 = vrot.slane %v12526_v42, 7  ;;  %v10292_v52 = vrot.slane %v3380_v25, 7  ;;  %v12529_v58 = vmax.f32 %v10110_v2, 0.0  ;;  %v10298_v42 = vrot.slane %v3382_v56, 7 }
 0x299   : > { %v10284_v35 = vrot.slane %v12527_v49, 7  ;;  %v10290_v45 = vrot.slane %v12528_v9, 7  ;;  %v12530_v34 = vmax.f32 %v10116_v8, 0.0  ;;  %v10304_v49 = vrot.slane %v3386_v30, 7 }
 0x29a   : > { %v10296_v13 = vrot.slane %v12529_v58, 7  ;;  %v12531_v21 = vmax.f32 %v10122_v17, 0.0  ;;  %v12532_v9 = vmax.f32 %v10041_v12, 0.0  ;;  %v12533_v5 = vmax.f32 %v10047_v18, 0.0 }
 0x29b   : > { %v10302_v11 = vrot.slane %v12530_v34, 7  ;;  %v12534_v56 = vmax.f32 %v10053_v47, 0.0  ;;  %v12535_v34 = vmax.f32 %v10059_v26, 0.0  ;;  %v12536_v20 = vmax.f32 %v10065_v14, 0.0 }
 0x29c   : > { %v10308_v1 = vrot.slane %v12531_v21, 7  ;;  %v10312_v25 = vrot.slane %v12532_v9, 5  ;;  %v10316_v58 = vrot.slane %v12533_v5, 5  ;;  %v12537_v12 = vmax.f32 %v10071_v46, 0.0 }
 0x29d   : > { %v10320_v27 = vrot.slane %v12534_v56, 5  ;;  %v10324_v30 = vrot.slane %v12535_v34, 5  ;;  %v10328_v21 = vrot.slane %v12536_v20, 5  ;;  %v12538_v18 = vmax.f32 %v10077_v15, 0.0 }
 0x29e   : > { %v10332_v9 = vrot.slane %v12537_v12, 5  ;;  %v12539_v47 = vmax.f32 %v10089_v10, 0.0  ;;  %v12540_v26 = vmax.f32 %v10095_v16, 0.0  ;;  %v12541_v14 = vmax.f32 %v10104_v23, 0.0 }
 0x29f   : > { %v10336_v5 = vrot.slane %v12538_v18, 5  ;;  %v12542_v46 = vmax.f32 %v10110_v2, 0.0  ;;  %v12543_v15 = vmax.f32 %v10116_v8, 0.0  ;;  %v12544_v10 = vmax.f32 %v10122_v17, 0.0 }
 0x2a0   : > { %v10340_v56 = vrot.slane %v12539_v47, 5  ;;  %v10344_v34 = vrot.slane %v12540_v26, 5  ;;  %v10348_v20 = vrot.slane %v12541_v14, 5  ;;  %v3943_v16 = vrot.slane %v10178_v51, 2 }
 0x2a1   : > { %v10352_v12 = vrot.slane %v12542_v46, 5  ;;  %v10356_v18 = vrot.slane %v12543_v15, 5  ;;  %v10360_v47 = vrot.slane %v12544_v10, 5  ;;  %v10363_v26 = vrot.slane %v3670_v57, 2 }
 0x2a2   : > { %v3460_v23 = vsel %vm376_vm0, %v10221_v54, %v10225_v28  ;;  %v3463_v2 = vsel %vm376_vm0, %v10229_v4, %v10233_v59  ;;  %v3466_v8 = vsel %vm376_vm0, %v10237_v31, %v10242_v63  ;;  %v3469_v17 = vsel %vm376_vm0, %v10246_v62, %v10250_v44 }
 0x2a3   : > { %v10379_v51 = vsel %vm866_vm3, %v3943_v16, %v10363_v26  ;;  %v3947_v57 = vsel %vm866_vm3, %v10363_v26, %v3946_v36  ;;  %v3472_v14 = vsel %vm376_vm0, %v10254_v37, %v10258_v50  ;;  %v3475_v46 = vsel %vm376_vm0, %v10262_v43, %v10266_v7  ;;  %3622 = vst.msk [vmem:[#allocation2 + $0x50] sm:$0xff] %vm537_vm1, %v3460_v23 }
 0x2a4   : > { %3625 = vst.msk [vmem:[#allocation2 + $0x68] sm:$0xff] %vm537_vm1, %v3463_v2  ;;  %3628 = vst.msk [vmem:[#allocation2 + $0x80] sm:$0xff] %vm537_vm1, %v3466_v8  ;;  %v7481_v15 = vpack.i.bf16 %v3947_v57, %v10379_v51  ;;  %v3478_v36 = vsel %vm376_vm0, %v10268_v48, %v10272_v61  ;;  %v3481_v10 = vsel %vm376_vm0, %v10274_v32, %v10278_v6 }
 0x2a5   : > { %3631 = vst.msk [vmem:[#allocation2 + $0x98] sm:$0xff] %vm537_vm1, %v3469_v17  ;;  %v3484_v16 = vsel %vm376_vm0, %v10280_v40, %v10284_v35  ;;  %3634 = vst.msk [vmem:[#allocation2 + $0xb0] sm:$0xff] %vm537_vm1, %v3472_v14  ;;  %v3487_v23 = vsel %vm376_vm0, %v10286_v24, %v10290_v45  ;;  %v3490_v2 = vsel %vm376_vm0, %v10292_v52, %v10296_v13 }
 0x2a6   : > { %3637 = vst.msk [vmem:[#allocation2 + $0xc8] sm:$0xff] %vm537_vm1, %v3475_v46  ;;  %v3493_v8 = vsel %vm376_vm0, %v10298_v42, %v10302_v11  ;;  %v3499_v17 = vsel %vm376_vm0, %v10304_v49, %v10308_v1  ;;  %3640 = vst.msk [vmem:[#allocation2 + $0xe0] sm:$0xff] %vm537_vm1, %v3478_v36  ;;  %7482 = vrot.lane.b32.xlu1 %v7481_v15, %s8091_s30  ;;  %v3582_v57 = vsel %vm376_vm0, %v10164_v53, %v10221_v54 }
 0x2a7   : > { %3643 = vst.msk [vmem:[#allocation2 + $0xf8] sm:$0xff] %vm537_vm1, %v3481_v10  ;;  %3646 = vst.msk [vmem:[#allocation2 + $0x110] sm:$0xff] %vm537_vm1, %v3484_v16  ;;  %v3583_v14 = vsel %vm376_vm0, %v10168_v0, %v10229_v4  ;;  %v3584_v46 = vsel %vm376_vm0, %v10172_v22, %v10237_v31  ;;  %v3585_v36 = vsel %vm376_vm0, %v10176_v19, %v10246_v62  ;;  %v10456_v19 = vld [vmem:[%s12407_s2] sm:$0x3f]  }
 0x2a8   : > { %3649 = vst.msk [vmem:[#allocation2 + $0x128] sm:$0xff] %vm537_vm1, %v3487_v23  ;;  %3652 = vst.msk [vmem:[#allocation2 + $0x140] sm:$0xff] %vm537_vm1, %v3490_v2  ;;  %v3586_v54 = vsel %vm376_vm0, %v10186_v29, %v10254_v37  ;;  %v3587_v53 = vsel %vm376_vm0, %v10190_v60, %v10262_v43  ;;  %v3588_v0 = vsel %vm376_vm0, %v10197_v39, %v10268_v48  ;;  %6973 = vmatprep.subr.msk.bf16.mxu1 %vm866_vm3, %v10456_v19  ;;  %v3674_v31 = vld [vmem:[#allocation2 + $0x40] sm:$0x3] }
 0x2a9   : > { %3655 = vst.msk [vmem:[#allocation2 + $0x158] sm:$0xff] %vm537_vm1, %v3493_v8  ;;  %3661 = vst.msk [vmem:[#allocation2 + $0x188] sm:$0xff] %vm537_vm1, %v3499_v17  ;;  %v3589_v22 = vsel %vm376_vm0, %v10199_v3, %v10274_v32  ;;  %v3590_v29 = vsel %vm376_vm0, %v10201_v55, %v10280_v40  ;;  %v3591_v60 = vsel %vm376_vm0, %v10209_v38, %v10286_v24  ;;  %v12546_v40 = vld [vmem:[#allocation4_spill] sm:$0xff]  ;;  %v3775_v48 = vrot.slane %v3674_v31, 1 }
 0x2aa   : > { %3621 = vst.msk [vmem:[#allocation2 + $0x48] sm:$0xff] %vm537_vm1, %v3582_v57  ;;  %3624 = vst.msk [vmem:[#allocation2 + $0x60] sm:$0xff] %vm537_vm1, %v3583_v14  ;;  %v3592_v39 = vsel %vm376_vm0, %v10211_v33, %v10292_v52  ;;  %v3593_v3 = vsel %vm376_vm0, %v10215_v41, %v10298_v42  ;;  %v3595_v24 = vsel %vm376_vm0, %v12546_v40, %v10304_v49  ;;  %v10486_v55 = vld [vmem:[#allocation2 + $0x30] sm:$0xff]  ;;  %v10488_v41 = vld [vmem:[#allocation2 + $0x38] sm:$0xff]  ;;  %v3951_v42 = vrot.slane %v3674_v31, 2 }
 0x2ab   : > { %3627 = vst.msk [vmem:[#allocation2 + $0x78] sm:$0xff] %vm537_vm1, %v3584_v46  ;;  %3630 = vst.msk [vmem:[#allocation2 + $0x90] sm:$0xff] %vm537_vm1, %v3585_v36  ;;  %v3598_v52 = vsel %vm376_vm0, %v10225_v28, %v10312_v25  ;;  %v3599_v33 = vsel %vm376_vm0, %v10233_v59, %v10316_v58  ;;  %v3600_v38 = vsel %vm376_vm0, %v10242_v63, %v10320_v27  ;;  %v3676_v63 = vld [vmem:[#allocation2 + $0x50] sm:$0xff] }
 0x2ac   : > { %12545 = vst [vmem:[#allocation6_spill] sm:$0xff] %v10456_v19  ;;  %3633 = vst.msk [vmem:[#allocation2 + $0xa8] sm:$0xff] %vm537_vm1, %v3586_v54  ;;  %v3601_v28 = vsel %vm376_vm0, %v10250_v44, %v10324_v30  ;;  %v3602_v27 = vsel %vm376_vm0, %v10258_v50, %v10328_v21  ;;  %v3603_v4 = vsel %vm376_vm0, %v10266_v7, %v10332_v9  ;;  %v3772_v7 = vrot.slane %v10486_v55, 1 }
 0x2ad   : > { %3636 = vst.msk [vmem:[#allocation2 + $0xc0] sm:$0xff] %vm537_vm1, %v3587_v53  ;;  %3639 = vst.msk [vmem:[#allocation2 + $0xd8] sm:$0xff] %vm537_vm1, %v3588_v0  ;;  %v3604_v59 = vsel %vm376_vm0, %v10272_v61, %v10336_v5  ;;  %v3605_v62 = vsel %vm376_vm0, %v10278_v6, %v10340_v56  ;;  %v3606_v44 = vsel %vm376_vm0, %v10284_v35, %v10344_v34  ;;  %v3679_v6 = vld [vmem:[#allocation2 + $0x68] sm:$0xff]  ;;  %v10548_v61 = vrot.slane %v10488_v41, 2 }
 0x2ae   : > { %3642 = vst.msk [vmem:[#allocation2 + $0xf0] sm:$0xff] %vm537_vm1, %v3589_v22  ;;  %12547 = vst [vmem:[#allocation9_spill] sm:$0xff] %v10486_v55  ;;  %v3607_v37 = vsel %vm376_vm0, %v10290_v45, %v10348_v20  ;;  %v3608_v50 = vsel %vm376_vm0, %v10296_v13, %v10352_v12  ;;  %v3609_v43 = vsel %vm376_vm0, %v10302_v11, %v10356_v18  ;;  %v10536_v13 = vrot.slane %v10488_v41, 1  ;;  %v3682_v20 = vld [vmem:[#allocation2 + $0x80] sm:$0xff] }
 0x2af   : > { %12548 = vst [vmem:[#allocation10_spill] sm:$0xff] %v10488_v41  ;;  %3645 = vst.msk [vmem:[#allocation2 + $0x108] sm:$0xff] %vm537_vm1, %v3590_v29  ;;  %v3611_v45 = vsel %vm376_vm0, %v10308_v1, %v10360_v47  ;;  %v10544_v11 = vrot.slane %v3676_v63, 1  ;;  %v3948_v1 = vrot.slane %v10486_v55, 2  ;;  %v10558_v25 = vrot.slane %v3679_v6, 1 }
 0x2b0   : > { %3648 = vst.msk [vmem:[#allocation2 + $0x120] sm:$0xff] %vm537_vm1, %v3591_v60  ;;  %3651 = vst.msk [vmem:[#allocation2 + $0x138] sm:$0xff] %vm537_vm1, %v3592_v39  ;;  %v10552_v32 = vsel %vm689_vm4, %v3772_v7, %v10536_v13  ;;  %v3776_v30 = vsel %vm689_vm4, %v10536_v13, %v3775_v48  ;;  %v10563_v9 = vrot.slane %v3676_v63, 2  ;;  %v3952_v10 = vsel %vm866_vm3, %v10548_v61, %v3951_v42  ;;  %v3685_v60 = vld [vmem:[#allocation2 + $0x98] sm:$0xff] }
 0x2b1   : > { %3654 = vst.msk [vmem:[#allocation2 + $0x150] sm:$0xff] %vm537_vm1, %v3593_v3  ;;  %3660 = vst.msk [vmem:[#allocation2 + $0x180] sm:$0xff] %vm537_vm1, %v3595_v24  ;;  %v10554_v35 = vld [vmem:[#allocation2 + $0x48] sm:$0xff]  ;;  %v10556_v49 = vld [vmem:[#allocation2 + $0x60] sm:$0xff]  ;;  %v7486_v5 = vpack.i.bf16 %v3776_v30, %v10552_v32  ;;  %v10574_v15 = vsel %vm866_vm3, %v3948_v1, %v10548_v61  ;;  %v10583_v14 = vrot.slane %v3682_v20, 1  ;;  %v10586_v54 = vrot.slane %v3679_v6, 2 }
 0x2b2   : > { %3623 = vst.msk [vmem:[#allocation2 + $0x58] sm:$0x3] %vm540_vm2, %v3598_v52  ;;  %3626 = vst.msk [vmem:[#allocation2 + $0x70] sm:$0x3] %vm540_vm2, %v3599_v33  ;;  %v3681_v58 = vld [vmem:[#allocation2 + $0x78] sm:$0xff]  ;;  %v3777_v21 = vrot.slane %v10554_v35, 1  ;;  %v7496_v0 = vpack.i.bf16 %v3952_v10, %v10574_v15 }
 0x2b3   : > { %3629 = vst.msk [vmem:[#allocation2 + $0x88] sm:$0x3] %vm540_vm2, %v3600_v38  ;;  %3632 = vst.msk [vmem:[#allocation2 + $0xa0] sm:$0x3] %vm540_vm2, %v3601_v28  ;;  %v3953_v56 = vrot.slane %v10554_v35, 2  ;;  %v3782_v34 = vrot.slane %v10556_v49, 1  ;;  %7487 = vrot.lane.b32.xlu0 %v7486_v5, %s8092_s8 }
 0x2b4   : > { %3635 = vst.msk [vmem:[#allocation2 + $0xb8] sm:$0x3] %vm540_vm2, %v3602_v27  ;;  %3638 = vst.msk [vmem:[#allocation2 + $0xd0] sm:$0x3] %vm540_vm2, %v3603_v4  ;;  %v3787_v12 = vrot.slane %v3681_v58, 1  ;;  %v10570_v47 = vsel %vm689_vm4, %v3777_v21, %v10544_v11  ;;  %v3958_v36 = vrot.slane %v10556_v49, 2 }
 0x2b5   : > { %3641 = vst.msk [vmem:[#allocation2 + $0xe8] sm:$0x3] %vm540_vm2, %v3604_v59  ;;  %3644 = vst.msk [vmem:[#allocation2 + $0x100] sm:$0x3] %vm540_vm2, %v3605_v62  ;;  %v10581_v17 = vsel %vm689_vm4, %v3782_v34, %v10558_v25  ;;  %v10596_v3 = vsel %vm866_vm3, %v3953_v56, %v10563_v9  ;;  %v3684_v24 = vld [vmem:[#allocation2 + $0x90] sm:$0xff]  ;;  %v3687_v33 = vld [vmem:[#allocation2 + $0xa8] sm:$0xff] }
 0x2b6   : > { %3647 = vst.msk [vmem:[#allocation2 + $0x118] sm:$0x3] %vm540_vm2, %v3606_v44  ;;  %3650 = vst.msk [vmem:[#allocation2 + $0x130] sm:$0x3] %vm540_vm2, %v3607_v37  ;;  %v10604_v28 = vsel %vm689_vm4, %v3787_v12, %v10583_v14  ;;  %v3963_v4 = vrot.slane %v3681_v58, 2  ;;  %v3688_v59 = vld [vmem:[#allocation2 + $0xb0] sm:$0xff]  ;;  %v10611_v63 = vsel %vm866_vm3, %v3958_v36, %v10586_v54 }
 0x2b7   : > { %3653 = vst.msk [vmem:[#allocation2 + $0x148] sm:$0x3] %vm540_vm2, %v3608_v50  ;;  %3656 = vst.msk [vmem:[#allocation2 + $0x160] sm:$0x3] %vm540_vm2, %v3609_v43  ;;  %7497 = vrot.lane.b32.xlu0 %v7496_v0, %s8091_s30  ;;  %v10615_v44 = vrot.slane %v3682_v20, 2  ;;  %v3792_v50 = vrot.slane %v3684_v24, 1 }
 0x2b8   : > { %3662 = vst.msk [vmem:[#allocation2 + $0x190] sm:$0x3] %vm540_vm2, %v3611_v45  ;;  %12549 = vst [vmem:[#allocation11_spill] sm:$0xff] %v10554_v35  ;;  %v10617_v6 = vrot.slane %v3685_v60, 1  ;;  %v3797_v45 = vrot.slane %v3687_v33, 1  ;;  %v10620_v48 = vrot.slane %v3688_v59, 1 }
 0x2b9   : > { %12550 = vst [vmem:[#allocation12_spill] sm:$0xff] %v10556_v49  ;;  %v3677_v18 = vld [vmem:[#allocation2 + $0x58] sm:$0x3]  ;;  %v3680_v16 = vld [vmem:[#allocation2 + $0x70] sm:$0x3]  ;;  %v10627_v30 = vsel %vm866_vm3, %v3963_v4, %v10615_v44  ;;  %v3968_v21 = vrot.slane %v3684_v24, 2 }
 0x2ba   : > { %v3683_v23 = vld [vmem:[#allocation2 + $0x88] sm:$0x3]  ;;  %v3780_v2 = vrot.slane %v3677_v18, 1  ;;  %v3956_v8 = vrot.slane %v3677_v18, 2  ;;  %v3785_v57 = vrot.slane %v3680_v16, 1  ;;  %v3961_v29 = vrot.slane %v3680_v16, 2 }
 0x2bb   : > { %v3790_v46 = vrot.slane %v3683_v23, 1  ;;  %v3686_v52 = vld [vmem:[#allocation2 + $0xa0] sm:$0x3]  ;;  %v3689_v31 = vld [vmem:[#allocation2 + $0xb8] sm:$0x3]  ;;  %v3966_v37 = vrot.slane %v3683_v23, 2  ;;  %v10634_v20 = vsel %vm689_vm4, %v3792_v50, %v10617_v6  ;;  %v10642_v16 = vsel %vm689_vm4, %v3797_v45, %v10620_v48 }
 0x2bc   : > { %v3781_v53 = vsel %vm689_vm4, %v10544_v11, %v3780_v2  ;;  %v3786_v22 = vsel %vm689_vm4, %v10558_v25, %v3785_v57  ;;  %v3957_v40 = vsel %vm866_vm3, %v10563_v9, %v3956_v8  ;;  %v3962_v62 = vsel %vm866_vm3, %v10586_v54, %v3961_v29  ;;  %v3690_v5 = vld [vmem:[#allocation2 + $0xc0] sm:$0xff]  ;;  %v3691_v56 = vld [vmem:[#allocation2 + $0xc8] sm:$0xff]  ;;  %v3692_v57 = vld [vmem:[#allocation2 + $0xd0] sm:$0x3] }
 0x2bd   : > { %v7491_v39 = vpack.i.bf16 %v3781_v53, %v10570_v47  ;;  %v7506_v38 = vpack.i.bf16 %v3786_v22, %v10581_v17  ;;  %v3791_v27 = vsel %vm689_vm4, %v10583_v14, %v3790_v46  ;;  %v3795_v43 = vrot.slane %v3686_v52, 1  ;;  %v3694_v10 = vld [vmem:[#allocation2 + $0xe0] sm:$0xff]  ;;  %v3693_v46 = vld [vmem:[#allocation2 + $0xd8] sm:$0xff]  ;;  %v3695_v29 = vld [vmem:[#allocation2 + $0xe8] sm:$0x3] }
 0x2be   : > { %v7501_v7 = vpack.i.bf16 %v3957_v40, %v10596_v3  ;;  %v3800_v1 = vrot.slane %v3689_v31, 1  ;;  %v7511_v42 = vpack.i.bf16 %v3791_v27, %v10604_v28  ;;  %v7516_v58 = vpack.i.bf16 %v3962_v62, %v10611_v63  ;;  %v3704_v55 = vld [vmem:[#allocation2 + $0x130] sm:$0x3]  ;;  %v4453_v19 = vld [vmem:[#allocation2 + $0x58] sm:$0x3] }
 0x2bf   : > { %7492 = vrot.lane.b32.xlu1 %v7491_v39, %s8092_s8  ;;  %7507 = vrot.lane.b32.xlu0 %v7506_v38, %s8092_s8  ;;  %v3967_v34 = vsel %vm866_vm3, %v10615_v44, %v3966_v37  ;;  %v3796_v12 = vsel %vm689_vm4, %v10617_v6, %v3795_v43  ;;  %v10638_v18 = vrot.slane %v3685_v60, 2  ;;  %v3971_v23 = vrot.slane %v3686_v52, 2  ;;  %v3696_v37 = vld [vmem:[#allocation2 + $0xf0] sm:$0xff] }
 0x2c0   : > { %v3973_v2 = vrot.slane %v3687_v33, 2  ;;  %v10644_v8 = vrot.slane %v3688_v59, 2  ;;  %v3801_v36 = vsel %vm689_vm4, %v10620_v48, %v3800_v1  ;;  %v3976_v53 = vrot.slane %v3689_v31, 2  ;;  %v3697_v1 = vld [vmem:[#allocation2 + $0xf8] sm:$0xff] }
 0x2c1   : > { %v3802_v0 = vrot.slane %v3690_v5, 1  ;;  %v10648_v22 = vrot.slane %v3691_v56, 1  ;;  %v7521_v60 = vpack.i.bf16 %v3967_v34, %v10627_v30  ;;  %v10654_v39 = vsel %vm866_vm3, %v3968_v21, %v10638_v18 }
 0x2c2   : > { %v3972_v40 = vsel %vm866_vm3, %v10638_v18, %v3971_v23  ;;  %v10660_v24 = vsel %vm866_vm3, %v3973_v2, %v10644_v8  ;;  %v10665_v52 = vsel %vm866_vm3, %v10644_v8, %v3976_v53  ;;  %v3805_v33 = vrot.slane %v3692_v57, 1  ;;  %v3699_v23 = vld [vmem:[#allocation2 + $0x108] sm:$0xff]  ;;  %v3701_v53 = vld [vmem:[#allocation2 + $0x118] sm:$0x3] }
 0x2c3   : > { %7502 = vrot.lane.b32.xlu1 %v7501_v7, %s8091_s30  ;;  %7517 = vrot.lane.b32.xlu0 %v7516_v58, %s8091_s30  ;;  %12551 = vst [vmem:[#allocation13_spill] sm:$0xff] %v10660_v24  ;;  %v3807_v38 = vrot.slane %v3693_v46, 1  ;;  %v10667_v27 = vrot.slane %v3694_v10, 1  ;;  %v7526_v4 = vpack.i.bf16 %v3796_v12, %v10634_v20  ;;  %v7531_v59 = vpack.i.bf16 %v3801_v36, %v10642_v16  ;;  %v3698_v12 = vld [vmem:[#allocation2 + $0x100] sm:$0x3] }
 0x2c4   : > { %v3810_v31 = vrot.slane %v3695_v29, 1  ;;  %v3978_v62 = vrot.slane %v3690_v5, 2  ;;  %v7536_v50 = vpack.i.bf16 %v3972_v40, %v10654_v39  ;;  %v10674_v43 = vsel %vm689_vm4, %v3802_v0, %v10648_v22 }
 0x2c5   : > { %12552 = vst [vmem:[#allocation4_spill] sm:$0xff] %v10667_v27  ;;  %v10676_v45 = vrot.slane %v3691_v56, 2  ;;  %v3981_v7 = vrot.slane %v3692_v57, 2  ;;  %v7541_v58 = vpack.i.bf16 %v10665_v52, %v10660_v24  ;;  %v3983_v21 = vrot.slane %v3693_v46, 2 }
 0x2c6   : > { %v10681_v34 = vrot.slane %v3694_v10, 2  ;;  %v3986_v5 = vrot.slane %v3695_v29, 2  ;;  %v3806_v56 = vsel %vm689_vm4, %v10648_v22, %v3805_v33  ;;  %v10688_v2 = vsel %vm689_vm4, %v3807_v38, %v10667_v27 }
 0x2c7   : > { %7512 = vrot.lane.b32.xlu1 %v7511_v42, %s8092_s8  ;;  %12553 = vst [vmem:[#allocation14_spill] sm:$0xff] %v10676_v45  ;;  %v3700_v42 = vld [vmem:[#allocation2 + $0x110] sm:$0xff]  ;;  %7527 = vrot.lane.b32.xlu0 %v7526_v4, %s8092_s8  ;;  %12555 = vst [vmem:[#allocation16_spill] sm:$0xff] %v10688_v2  ;;  %v3811_v57 = vsel %vm689_vm4, %v10667_v27, %v3810_v31  ;;  %v3812_v36 = vrot.slane %v3696_v37, 1  ;;  %v10694_v10 = vsel %vm866_vm3, %v3978_v62, %v10676_v45  ;;  %v3707_v27 = vld [vmem:[#allocation2 + $0x148] sm:$0x3] }
 0x2c8   : > { %12554 = vst [vmem:[#allocation15_spill] sm:$0xff] %v10681_v34  ;;  %12556 = vst [vmem:[#allocation17_spill] sm:$0xff] %v10694_v10  ;;  %v3982_v46 = vsel %vm866_vm3, %v10676_v45, %v3981_v7  ;;  %v10700_v0 = vsel %vm866_vm3, %v3983_v21, %v10681_v34  ;;  %v10702_v29 = vrot.slane %v3697_v1, 1  ;;  %v3815_v40 = vrot.slane %v3698_v12, 1  ;;  %v3702_v7 = vld [vmem:[#allocation2 + $0x120] sm:$0xff] }
 0x2c9   : > { %12557 = vst [vmem:[#allocation18_spill] sm:$0xff] %v10700_v0  ;;  %v3817_v52 = vrot.slane %v3699_v23, 1  ;;  %v10708_v33 = vrot.slane %v3700_v42, 1  ;;  %v3820_v4 = vrot.slane %v3701_v53, 1  ;;  %v3988_v31 = vrot.slane %v3696_v37, 2 }
 0x2ca   : > { %12558 = vst [vmem:[#allocation19_spill] sm:$0xff] %v10702_v29  ;;  %v10713_v38 = vsel %vm689_vm4, %v3812_v36, %v10702_v29  ;;  %v10715_v62 = vrot.slane %v3697_v1, 2  ;;  %v7546_v21 = vpack.i.bf16 %v3806_v56, %v10674_v43  ;;  %v3816_v49 = vsel %vm689_vm4, %v10702_v29, %v3815_v40  ;;  %v4450_v29 = vld [vmem:[#allocation2 + $0x40] sm:$0x3] }
 0x2cb   : > { %7522 = vrot.lane.b32.xlu1 %v7521_v60, %s8091_s30  ;;  %v10706_v60 = vsel %vm866_vm3, %v10681_v34, %v3986_v5  ;;  %12559 = vst [vmem:[#allocation20_spill] sm:$0xff] %v10708_v33  ;;  %7537 = vrot.lane.b32.xlu0 %v7536_v50, %s8091_s30  ;;  %12560 = vst [vmem:[#allocation21_spill] sm:$0xff] %v10713_v38  ;;  %v7551_v5 = vpack.i.bf16 %v3811_v57, %v10688_v2  ;;  %v3991_v35 = vrot.slane %v3698_v12, 2  ;;  %v3703_v50 = vld [vmem:[#allocation2 + $0x128] sm:$0xff]  ;;  %v3705_v34 = vld [vmem:[#allocation2 + $0x138] sm:$0xff] }
 0x2cc   : > { %12561 = vst [vmem:[#allocation22_spill] sm:$0xff] %v10715_v62  ;;  %v7556_v36 = vpack.i.bf16 %v3982_v46, %v10694_v10  ;;  %v7561_v37 = vpack.i.bf16 %v10706_v60, %v10700_v0  ;;  %v3993_v1 = vrot.slane %v3699_v23, 2  ;;  %v10725_v41 = vrot.slane %v3700_v42, 2 }
 0x2cd   : > { %v7566_v56 = vpack.i.bf16 %v3816_v49, %v10713_v38  ;;  %v10730_v57 = vsel %vm689_vm4, %v3817_v52, %v10708_v33  ;;  %v3996_v12 = vrot.slane %v3701_v53, 2  ;;  %v3822_v40 = vrot.slane %v3702_v7, 1 }
 0x2ce   : > { %12562 = vst [vmem:[#allocation23_spill] sm:$0xff] %v10725_v41  ;;  %12563 = vst [vmem:[#allocation24_spill] sm:$0xff] %v10730_v57  ;;  %v10735_v46 = vsel %vm689_vm4, %v10708_v33, %v3820_v4  ;;  %v10739_v42 = vsel %vm866_vm3, %v3988_v31, %v10715_v62  ;;  %v10741_v23 = vrot.slane %v3703_v50, 1  ;;  %v3825_v60 = vrot.slane %v3704_v55, 1 }
 0x2cf   : > { %7532 = vrot.lane.b32.xlu1 %v7531_v59, %s8092_s8  ;;  %v3706_v59 = vld [vmem:[#allocation2 + $0x140] sm:$0xff]  ;;  %7547 = vrot.lane.b32.xlu0 %v7546_v21, %s8092_s8  ;;  %12564 = vst [vmem:[#allocation25_spill] sm:$0xff] %v10739_v42  ;;  %v3992_v49 = vsel %vm866_vm3, %v10715_v62, %v3991_v35  ;;  %v3827_v53 = vrot.slane %v3705_v34, 1  ;;  %v3830_v0 = vrot.slane %v3707_v27, 1  ;;  %v10748_v21 = vsel %vm866_vm3, %v3993_v1, %v10725_v41 }
 0x2d0   : > { %12565 = vst [vmem:[#allocation26_spill] sm:$0xff] %v10741_v23  ;;  %v3828_v52 = vrot.slane %v3706_v59, 1  ;;  %12566 = vst [vmem:[#allocation27_spill] sm:$0xff] %v10748_v21  ;;  %v10752_v4 = vsel %vm866_vm3, %v10725_v41, %v3996_v12  ;;  %v10756_v31 = vsel %vm689_vm4, %v3822_v40, %v10741_v23  ;;  %v3998_v33 = vrot.slane %v3702_v7, 2 }
 0x2d1   : > { %12567 = vst [vmem:[#allocation28_spill] sm:$0xff] %v10756_v31  ;;  %v10760_v35 = vsel %vm689_vm4, %v10741_v23, %v3825_v60  ;;  %v10768_v38 = vrot.slane %v3703_v50, 2  ;;  %v7571_v12 = vpack.i.bf16 %v10735_v46, %v10730_v57  ;;  %v4001_v40 = vrot.slane %v3704_v55, 2  ;;  %v3708_v50 = vld [vmem:[#allocation2 + $0x150] sm:$0xff]  ;;  %v3711_v46 = vld [vmem:[#allocation2 + $0x168] sm:$0xff] }
 0x2d2   : > { %v10763_v62 = vsel %vm689_vm4, %v3827_v53, %v3828_v52  ;;  %v10766_v1 = vsel %vm689_vm4, %v3828_v52, %v3830_v0  ;;  %v4003_v7 = vrot.slane %v3705_v34, 2  ;;  %v4004_v41 = vrot.slane %v3706_v59, 2  ;;  %v3710_v59 = vld [vmem:[#allocation2 + $0x160] sm:$0x3]  ;;  %v3713_v23 = vld [vmem:[#allocation2 + $0x178] sm:$0x3] }
 0x2d3   : > { %7542 = vrot.lane.b32.xlu1 %v7541_v58, %s8091_s30  ;;  %v4447_v58 = vld [vmem:[#allocation2 + $0x28] sm:$0x3]  ;;  %12568 = vst [vmem:[#allocation29_spill] sm:$0xff] %v10768_v38  ;;  %7557 = vrot.lane.b32.xlu0 %v7556_v36, %s8091_s30  ;;  %v7576_v60 = vpack.i.bf16 %v3992_v49, %v10739_v42  ;;  %v7581_v53 = vpack.i.bf16 %v10752_v4, %v10748_v21  ;;  %v4006_v0 = vrot.slane %v3707_v27, 2  ;;  %v4549_v21 = vrot.slane %v4450_v29, 1 }
 0x2d4   : > { %v4544_v52 = vrot.slane %v4447_v58, 1  ;;  %v7586_v36 = vpack.i.bf16 %v10760_v35, %v10756_v31  ;;  %v10783_v55 = vsel %vm866_vm3, %v3998_v33, %v10768_v38  ;;  %v4720_v34 = vrot.slane %v4447_v58, 2  ;;  %v12570_v4 = vld [vmem:[#allocation7_spill] sm:$0xff]  ;;  %v3712_v31 = vld [vmem:[#allocation2 + $0x170] sm:$0xff] }
 0x2d5   : > { %12569 = vst [vmem:[#allocation30_spill] sm:$0xff] %v10783_v55  ;;  %v10787_v49 = vsel %vm866_vm3, %v10768_v38, %v4001_v40  ;;  %v10790_v27 = vsel %vm866_vm3, %v4003_v7, %v4004_v41  ;;  %v10798_v33 = vsel %vm866_vm3, %v4004_v41, %v4006_v0  ;;  %v12571_v58 = vld [vmem:[#allocation8_spill] sm:$0xff]  ;;  %v3832_v38 = vrot.slane %v3708_v50, 1 }
 0x2d6   : > { %v10794_v35 = vsel %vm689_vm4, %v12570_v4, %v4544_v52  ;;  %v10804_v7 = vsel %vm866_vm3, %v10363_v26, %v4720_v34  ;;  %v3835_v57 = vrot.slane %v3710_v59, 1  ;;  %v4725_v42 = vrot.slane %v4450_v29, 2  ;;  %v10817_v52 = vld [vmem:[#allocation2 + $0x70] sm:$0x3] }
 0x2d7   : > { %7552 = vrot.lane.b32.xlu1 %v7551_v5, %s8092_s8  ;;  %v3709_v5 = vld [vmem:[#allocation2 + $0x158] sm:$0xff]  ;;  %7567 = vrot.lane.b32.xlu0 %v7566_v56, %s8092_s8  ;;  %v3837_v56 = vrot.slane %v3711_v46, 1  ;;  %v3838_v2 = vrot.slane %v3712_v31, 1  ;;  %v3840_v41 = vrot.slane %v3713_v23, 1  ;;  %v4008_v0 = vrot.slane %v3708_v50, 2 }
 0x2d8   : > { %v3833_v4 = vrot.slane %v3709_v5, 1  ;;  %v7596_v40 = vpack.i.bf16 %v10787_v49, %v10783_v55  ;;  %v10815_v34 = vsel %vm689_vm4, %v10536_v13, %v4549_v21  ;;  %v10828_v49 = vsel %vm866_vm3, %v10548_v61, %v4725_v42  ;;  %v5291_v21 = vld [vmem:[#allocation2 + $0x40] sm:$0x3] }
 0x2d9   : > { %v10831_v26 = vsel %vm689_vm4, %v3837_v56, %v3838_v2  ;;  %v4013_v55 = vrot.slane %v3711_v46, 2  ;;  %v4554_v10 = vrot.slane %v4453_v19, 1  ;;  %v4559_v42 = vrot.slane %v10817_v52, 1 }
 0x2da   : > { %v10821_v29 = vsel %vm689_vm4, %v3832_v38, %v3833_v4  ;;  %v10824_v50 = vsel %vm689_vm4, %v3833_v4, %v3835_v57  ;;  %v4011_v38 = vrot.slane %v3710_v59, 2  ;;  %v4014_v57 = vrot.slane %v3712_v31, 2  ;;  %v5294_v59 = vld [vmem:[#allocation2 + $0x58] sm:$0x3] }
 0x2db   : > { %7562 = vrot.lane.b32.xlu1 %v7561_v37, %s8091_s30  ;;  %v4009_v37 = vrot.slane %v3709_v5, 2  ;;  %7577 = vrot.lane.b32.xlu0 %v7576_v60, %s8091_s30  ;;  %v10835_v5 = vsel %vm689_vm4, %v3838_v2, %v3840_v41  ;;  %v4016_v4 = vrot.slane %v3713_v23, 2  ;;  %v7611_v56 = vpack.i.bf16 %v10815_v34, %v10552_v32 }
 0x2dc   : > { %v5388_v24 = vrot.slane %v5291_v21, 1  ;;  %v10850_v46 = vsel %vm866_vm3, %v4013_v55, %v4014_v57  ;;  %v10857_v31 = vsel %vm689_vm4, %v10544_v11, %v4554_v10  ;;  %v5393_v10 = vrot.slane %v5294_v59, 1 }
 0x2dd   : > { %v10838_v60 = vsel %vm866_vm3, %v4008_v0, %v4009_v37  ;;  %v10844_v45 = vsel %vm866_vm3, %v4009_v37, %v4011_v38  ;;  %v10853_v23 = vsel %vm866_vm3, %v4014_v57, %v4016_v4  ;;  %v4459_v0 = vld [vmem:[#allocation2 + $0x88] sm:$0x3]  ;;  %v4462_v37 = vld [vmem:[#allocation2 + $0xa0] sm:$0x3]  ;;  %v5297_v4 = vld [vmem:[#allocation2 + $0x70] sm:$0x3]  ;;  %v12581_v34 = vpack.i.bf16 %v10828_v49, %v10574_v15 }
 0x2de   : > { %v10877_v57 = vsel %vm689_vm4, %v10536_v13, %v5388_v24  ;;  %v5564_v55 = vrot.slane %v5291_v21, 2  ;;  %v5569_v38 = vrot.slane %v5294_v59, 2  ;;  %v4564_v2 = vrot.slane %v4459_v0, 1 }
 0x2df   : > { %7572 = vrot.lane.b32.xlu1 %v7571_v12, %s8092_s8  ;;  %v4730_v12 = vrot.slane %v4453_v19, 2  ;;  %7587 = vrot.lane.b32.xlu0 %v7586_v36, %s8092_s8  ;;  %v4740_v19 = vrot.slane %v4459_v0, 2  ;;  %v12572_v13 = vpack.i.bf16 %v10766_v1, %v10763_v62  ;;  %v10892_v24 = vsel %vm689_vm4, %v10544_v11, %v5393_v10  ;;  %v5300_v1 = vld [vmem:[#allocation2 + $0x88] sm:$0x3]  ;;  %v4468_v10 = vld [vmem:[#allocation2 + $0xd0] sm:$0x3] }
 0x2e0   : > { %v4745_v21 = vrot.slane %v4462_v37, 2  ;;  %v5398_v36 = vrot.slane %v5297_v4, 1  ;;  %v10904_v62 = vsel %vm866_vm3, %v10563_v9, %v5569_v38  ;;  %v10908_v11 = vsel %vm689_vm4, %v10583_v14, %v4564_v2  ;;  %v5303_v0 = vld [vmem:[#allocation2 + $0xa0] sm:$0x3] }
 0x2e1   : > { %v10881_v41 = vsel %vm866_vm3, %v10563_v9, %v4730_v12  ;;  %v10896_v12 = vsel %vm866_vm3, %v10548_v61, %v5564_v55  ;;  %v10913_v61 = vld [vmem:[%s12407_s2 + $0x8] sm:$0x3f]   ;;  %v10925_v2 = vsel %vm866_vm3, %v10615_v44, %v4740_v19  ;;  %v12573_v38 = vpack.i.bf16 %v10794_v35, %v12571_v58 }
 0x2e2   : > { %v10941_v19 = vsel %vm689_vm4, %v10558_v25, %v5398_v36  ;;  %v12574_v35 = vpack.i.bf16 %v10798_v33, %v10790_v27  ;;  %v5574_v55 = vrot.slane %v5297_v4, 2  ;;  %6974 = vmatprep.subr.msk.bf16.mxu0 %vm866_vm3, %v10913_v61  ;;  %v4579_v36 = vrot.slane %v4468_v10, 1 }
 0x2e3   : > { %7582 = vrot.lane.b32.xlu1 %v7581_v53, %s8091_s30  ;;  %v10873_v53 = vsel %vm689_vm4, %v10558_v25, %v4559_v42  ;;  %7597 = vrot.lane.b32.xlu0 %v7596_v40, %s8091_s30  ;;  %v4569_v42 = vrot.slane %v4462_v37, 1  ;;  %v4465_v37 = vld [vmem:[#allocation2 + $0xb8] sm:$0x3]  ;;  %v4755_v33 = vrot.slane %v4468_v10, 2  ;;  %v12575_v4 = vpack.i.bf16 %v10804_v7, %v10379_v51  ;;  %v12579_v51 = vld [vmem:[#allocation14_spill] sm:$0xff] }
 0x2e4   : > { %v4574_v25 = vrot.slane %v4465_v37, 1  ;;  %v4750_v40 = vrot.slane %v4465_v37, 2  ;;  %v10959_v27 = vsel %vm866_vm3, %v10586_v54, %v5574_v55  ;;  %v5306_v10 = vld [vmem:[#allocation2 + $0xb8] sm:$0x3]  ;;  %v12593_v37 = vpack.i.bf16 %v10844_v45, %v10838_v60 }
 0x2e5   : > { %v10921_v9 = vsel %vm689_vm4, %v10617_v6, %v4569_v42  ;;  %v10937_v42 = vsel %vm866_vm3, %v10638_v18, %v4745_v21  ;;  %v5579_v21 = vrot.slane %v5300_v1, 2  ;;  %v12580_v7 = vld [vmem:[#allocation17_spill] sm:$0xff]  ;;  %v5413_v58 = vrot.slane %v5306_v10, 1 }
 0x2e6   : > { %v10975_v55 = vsel %vm689_vm4, %v10620_v48, %v4574_v25  ;;  %v4474_v25 = vld [vmem:[#allocation2 + $0x100] sm:$0x3]  ;;  %v12598_v45 = vld [vmem:[#allocation25_spill] sm:$0xff] }
 0x2e7   : > { %7592 = vrot.lane.b32.xlu1 %v12572_v13, %s8092_s8  ;;  %7607 = vrot.lane.b32.xlu0 %v12573_v38, %s8092_s8  ;;  %v5403_v13 = vrot.slane %v5300_v1, 1  ;;  %v10999_v1 = vsel %vm866_vm3, %v12579_v51, %v4755_v33  ;;  %v5584_v38 = vrot.slane %v5303_v0, 2 }
 0x2e9   : > { %v10955_v59 = vsel %vm689_vm4, %v10583_v14, %v5403_v13  ;;  %v10971_v14 = vsel %vm866_vm3, %v10615_v44, %v5579_v21  ;;  %v10987_v44 = vsel %vm689_vm4, %v10648_v22, %v4579_v36  ;;  %v10991_v13 = vsel %vm866_vm3, %v10644_v8, %v4750_v40  ;;  %v4471_v21 = vld [vmem:[#allocation2 + $0xe8] sm:$0x3] }
 0x2ea   : > { %12576 = vst [vmem:[#allocation7_spill] sm:$0xff] %v10987_v44  ;;  %12577 = vst [vmem:[#allocation8_spill] sm:$0xff] %v10991_v13  ;;  %v4584_v33 = vrot.slane %v4471_v21, 1  ;;  %v4589_v44 = vrot.slane %v4474_v25, 1  ;;  %v12582_v13 = vld [vmem:[#allocation6_spill] sm:$0xff]  ;;  %v11021_v40 = vsel %vm689_vm4, %v10620_v48, %v5413_v58  ;;  %v4760_v49 = vrot.slane %v4471_v21, 2 }
 0x2eb   : > { %7602 = vrot.lane.b32.xlu1 %v12574_v35, %s8091_s30  ;;  %v5408_v35 = vrot.slane %v5303_v0, 1  ;;  %7617 = vrot.lane.b32.xlu0 %v12575_v4, %s8091_s30  ;;  %v5589_v4 = vrot.slane %v5306_v10, 2  ;;  %v11025_v0 = vsel %vm866_vm3, %v10638_v18, %v5584_v38  ;;  %v4765_v10 = vrot.slane %v4474_v25, 2  ;;  %v12586_v48 = vld [vmem:[#allocation4_spill] sm:$0xff]  ;;  %v5312_v18 = vld [vmem:[#allocation2 + $0xe8] sm:$0x3] }
 0x2ec   : > { %v11042_v58 = vld [vmem:[%s12407_s2 + $0x10] sm:$0x3f]  }
 0x2ed   : > { %v11003_v36 = vsel %vm689_vm4, %v10617_v6, %v5408_v35  ;;  %v4250_v6 = vsel %vm866_vm3, %v12582_v13, 0  ;;  %v12583_v35 = vpack.i.bf16 %v10824_v50, %v10821_v29  ;;  %v11033_v29 = vsel %vm866_vm3, %v10644_v8, %v5589_v4  ;;  %v12588_v21 = vld [vmem:[#allocation16_spill] sm:$0xff]  ;;  %v12591_v4 = vld [vmem:[#allocation15_spill] sm:$0xff] }
 0x2ee   : > { %6869 = vmatpush3.bf16.msra.mxu1 %v4250_v6  ;;  %12585 = vst [vmem:[#allocation14_spill] sm:$0xff] %v11033_v29  ;;  %v11037_v50 = vsel %vm689_vm4, %v12586_v48, %v4584_v33  ;;  %v12589_v6 = vld [vmem:[#allocation19_spill] sm:$0xff]  ;;  %v11054_v33 = vsel %vm866_vm3, %v12591_v4, %v4760_v49  ;;  %v4480_v13 = vld [vmem:[#allocation2 + $0x130] sm:$0x3]  ;;  %v12595_v29 = vld [vmem:[#allocation18_spill] sm:$0xff]  ;;  %v12597_v49 = vpack.i.bf16 %v10835_v5, %v10831_v26 }
 0x2ef   : > { %7612 = vrot.lane.b32.xlu1 %v7611_v56, %s8092_s8  ;;  %v12578_v56 = vld [vmem:[#allocation13_spill] sm:$0xff]  ;;  %7627 = vrot.lane.b32.xlu0 %v12581_v34, %s8091_s30  ;;  %v5309_v34 = vld [vmem:[#allocation2 + $0xd0] sm:$0x3]  ;;  %12587 = vst [vmem:[#allocation17_spill] sm:$0xff] %v11037_v50  ;;  %v11050_v8 = vsel %vm689_vm4, %v12589_v6, %v4589_v44  ;;  %12592 = vst [vmem:[#allocation4_spill] sm:$0xff] %v11054_v33 }
 0x2f0   : > { %12584 = vst [vmem:[#allocation13_spill] sm:$0xff] %v11021_v40  ;;  %12590 = vst [vmem:[#allocation6_spill] sm:$0xff] %v11050_v8  ;;  %v12596_v50 = vld [vmem:[#allocation22_spill] sm:$0xff]  ;;  %v5418_v6 = vrot.slane %v5309_v34, 1  ;;  %6975 = vmatprep.subr.msk.bf16.mxu1 %vm866_vm3, %v11042_v58  ;;  %v5594_v38 = vrot.slane %v5309_v34, 2  ;;  %v5599_v40 = vrot.slane %v5312_v18, 2 }
 0x2f1   : > { %v11066_v44 = vsel %vm866_vm3, %v12596_v50, %v4765_v10  ;;  %v4599_v50 = vrot.slane %v4480_v13, 1 }
 0x2f2   : > { %v7781_v60 = vpack.i.bf16 %v11066_v44, %v12598_v45  ;;  %v11078_v25 = vsel %vm689_vm4, %v10648_v22, %v5418_v6  ;;  %v11088_v5 = vsel %vm866_vm3, %v12579_v51, %v5594_v38  ;;  %v11092_v34 = vsel %vm866_vm3, %v12591_v4, %v5599_v40  ;;  %v12600_v51 = vld [vmem:[#allocation20_spill] sm:$0xff]  ;;  %v12603_v6 = vld [vmem:[#allocation26_spill] sm:$0xff]  ;;  %v12607_v4 = vld [vmem:[#allocation29_spill] sm:$0xff] }
 0x2f3   : > { %7622 = vrot.lane.b32.xlu1 %v12583_v35, %s8092_s8  ;;  %v4477_v35 = vld [vmem:[#allocation2 + $0x118] sm:$0x3]  ;;  %7637 = vrot.lane.b32.xlu0 %v12593_v37, %s8091_s30  ;;  %v5423_v37 = vrot.slane %v5312_v18, 1  ;;  %v7786_v33 = vpack.i.bf16 %v11078_v25, %v10674_v43  ;;  %v12599_v22 = vpack.i.bf16 %v10857_v31, %v10570_v47  ;;  %v12601_v40 = vpack.i.bf16 %v10853_v23, %v10850_v46  ;;  %v12602_v31 = vld [vmem:[#allocation24_spill] sm:$0xff]  ;;  %v12606_v46 = vld [vmem:[#allocation27_spill] sm:$0xff] }
 0x2f4   : > { %v4594_v10 = vrot.slane %v4477_v35, 1  ;;  %v4770_v8 = vrot.slane %v4477_v35, 2  ;;  %v4775_v35 = vrot.slane %v4480_v13, 2  ;;  %v12608_v13 = vrot.slane %v10817_v52, 2 }
 0x2f5   : > { %v11084_v26 = vsel %vm689_vm4, %v12586_v48, %v5423_v37  ;;  %v7796_v48 = vpack.i.bf16 %v11088_v5, %v12580_v7  ;;  %v12604_v37 = vld [vmem:[#allocation23_spill] sm:$0xff]  ;;  %v12611_v52 = vpack.i.bf16 %v10896_v12, %v10574_v15  ;;  %v12615_v15 = vpack.i.bf16 %v10925_v2, %v10627_v30 }
 0x2f6   : > { %v11106_v38 = vsel %vm689_vm4, %v12600_v51, %v4594_v10  ;;  %v7656_v10 = vpack.i.bf16 %v10881_v41, %v10596_v3  ;;  %v12605_v51 = vld [vmem:[#allocation28_spill] sm:$0xff]  ;;  %v4736_v41 = vsel %vm866_vm3, %v10586_v54, %v12608_v13  ;;  %v12612_v54 = vpack.i.bf16 %v10892_v24, %v10570_v47 }
 0x2f7   : > { %7632 = vrot.lane.b32.xlu1 %v12597_v49, %s8092_s8  ;;  %7647 = vrot.lane.b32.xlu0 %v12599_v22, %s8092_s8  ;;  %v11116_v49 = vsel %vm689_vm4, %v12603_v6, %v4599_v50  ;;  %v11120_v22 = vsel %vm866_vm3, %v12604_v37, %v4770_v8  ;;  %v11132_v50 = vsel %vm866_vm3, %v12607_v4, %v4775_v35  ;;  %v12609_v8 = vld [vmem:[#allocation30_spill] sm:$0xff] }
 0x2f8   : > { %v7811_v18 = vpack.i.bf16 %v11116_v49, %v12605_v51  ;;  %v7816_v23 = vpack.i.bf16 %v11120_v22, %v12606_v46  ;;  %v7821_v6 = vpack.i.bf16 %v11132_v50, %v12609_v8  ;;  %v7661_v37 = vpack.i.bf16 %v4736_v41, %v10611_v63 }
 0x2f9   : > { %v12613_v35 = vpack.i.bf16 %v10908_v11, %v10604_v28  ;;  %v12616_v47 = vpack.i.bf16 %v10921_v9, %v10634_v20  ;;  %v12617_v4 = vpack.i.bf16 %v10941_v19, %v10581_v17  ;;  %v12618_v2 = vpack.i.bf16 %v10937_v42, %v10654_v39  ;;  %v8006_v9 = vld [vmem:[#allocation2] sm:$0xff] }
 0x2fa   : > { %v5030_v42 = vsel %vm866_vm3, %v10913_v61, 0  ;;  %v12620_v19 = vpack.i.bf16 %v10955_v59, %v10604_v28  ;;  %v12623_v61 = vld [vmem:[#allocation8_spill] sm:$0xff] }
 0x2fb   : > { %7642 = vrot.lane.b32.xlu1 %v12601_v40, %s8091_s30  ;;  %v7651_v40 = vpack.i.bf16 %v10873_v53, %v10581_v17  ;;  %7657 = vrot.lane.b32.xlu0 %v7656_v10, %s8091_s30  ;;  %v12610_v53 = vpack.i.bf16 %v10877_v57, %v10552_v32  ;;  %v12614_v32 = vpack.i.bf16 %v10904_v62, %v10596_v3  ;;  %v8005_v10 = vld [vmem:[#allocation2 + $0x8] sm:$0xff] }
 0x2fc   : > { %v12619_v17 = vpack.i.bf16 %v10959_v27, %v10611_v63  ;;  %6903 = vmatpush3.bf16.msra.mxu0 %v5030_v42  ;;  %v12622_v63 = vpack.i.bf16 %v10971_v14, %v10627_v30  ;;  %v12624_v27 = vpack.i.bf16 %v12623_v61, %v12578_v56  ;;  %v12627_v30 = vpack.i.bf16 %v11003_v36, %v10634_v20  ;;  %v11215_v14 = vld [vmem:[#allocation2 + $0x20] sm:$0xff] }
 0x2ff   : > { %7652 = vrot.lane.b32.xlu1 %v7651_v40, %s8092_s8  ;;  %7667 = vrot.lane.b32.xlu0 %v12610_v53, %s8092_s8 }
 0x301   : > { %v7468_v57 = vpop.permute.xlu0 %7467 }
 0x302   : > { %v7470_v24 = vunpack.i.h.bf16 %v7468_v57  ;;  %v7469_v12 = vunpack.i.l.bf16 %v7468_v57 }
 0x303   : > { %7662 = vrot.lane.b32.xlu1 %v7661_v37, %s8091_s30  ;;  %7677 = vrot.lane.b32.xlu0 %v12611_v52, %s8091_s30  ;;  %v12621_v52 = vpack.i.bf16 %v10975_v55, %v10642_v16 }
 0x304   : > { %v4115_v40 = vsel %vm537_vm1, %v8005_v10, %v7470_v24  ;;  %v4114_v13 = vsel %vm537_vm1, %v8006_v9, %v7469_v12  ;;  %v11219_v24 = vld [vmem:[#allocation2 + $0x18] sm:$0xff]  ;;  %v5313_v10 = vld [vmem:[#allocation2 + $0xf0] sm:$0xff]  ;;  %v5315_v9 = vld [vmem:[#allocation2 + $0x100] sm:$0x3] }
 0x305   : > { %v7478_v11 = vpop.permute.xlu0 %7477  ;;  %v5428_v42 = vrot.slane %v5315_v9, 1  ;;  %v5601_v61 = vrot.slane %v5313_v10, 2 }
 0x306   : > { %v7480_v3 = vunpack.i.h.bf16 %v7478_v11  ;;  %v7479_v62 = vunpack.i.l.bf16 %v7478_v11  ;;  %v12628_v11 = vpack.i.bf16 %v10999_v1, %v12580_v7 }
 0x307   : > { %7672 = vrot.lane.b32.xlu1 %v12612_v54, %s8092_s8  ;;  %7687 = vrot.lane.b32.xlu0 %v12613_v35, %s8092_s8  ;;  %v12625_v35 = vld [vmem:[#allocation7_spill] sm:$0xff] }
 0x308   : > { %v4146_v41 = vsel %vm1075_vm5, %v4114_v13, %v7479_v62  ;;  %v4147_v37 = vsel %vm1075_vm5, %v4115_v40, %v7480_v3  ;;  %v5874_v3 = vsel %vm866_vm3, %v11042_v58, 0  ;;  %v12629_v62 = vpack.i.bf16 %v11025_v0, %v10654_v39  ;;  %v5314_v40 = vld [vmem:[#allocation2 + $0xf8] sm:$0xff]  ;;  %v5316_v13 = vld [vmem:[#allocation2 + $0x108] sm:$0xff]  ;;  %v12634_v0 = vld [vmem:[#allocation14_spill] sm:$0xff] }
 0x309   : > { %v4178_v53 = vpack.c.bf16 %v4147_v37, %v4146_v41  ;;  %v7473_v54 = vpop.permute.xlu1 %7472  ;;  %v5317_v41 = vld [vmem:[#allocation2 + $0x110] sm:$0xff]  ;;  %v5318_v37 = vld [vmem:[#allocation2 + $0x118] sm:$0x3]  ;;  %v5425_v39 = vrot.slane %v5313_v10, 1 }
 0x30a   : > { %v7475_v28 = vunpack.i.h.bf16 %v7473_v54  ;;  %v7474_v59 = vunpack.i.l.bf16 %v7473_v54  ;;  %v12632_v58 = vld [vmem:[#allocation17_spill] sm:$0xff] }
 0x30b   : > { %7682 = vrot.lane.b32.xlu1 %v12614_v32, %s8091_s30  ;;  %7697 = vrot.lane.b32.xlu0 %v12615_v15, %s8091_s30  ;;  %v12626_v32 = vpack.i.bf16 %v12625_v35, %v10674_v43 }
 0x30c   : > { %6870 = vmatprep.mubr.msk.bf16.mxu1 %vm1131_vm6, %v4178_v53  ;;  %v4116_v12 = vsel %vm537_vm1, %v11219_v24, %v7474_v59  ;;  %v12633_v53 = vpack.i.bf16 %v12632_v58, %v12588_v21 }
 0x30f   : > { %7692 = vrot.lane.b32.xlu1 %v12616_v47, %s8092_s8  ;;  %7707 = vrot.lane.b32.xlu0 %v12617_v4, %s8092_s8  ;;  %v4117_v47 = vsel %vm537_vm1, %v11215_v14, %v7475_v28  ;;  %v5604_v28 = vrot.slane %v5315_v9, 2  ;;  %v12641_v9 = vld [vmem:[#allocation10_spill] sm:$0xff] }
 0x313   : > { %7702 = vrot.lane.b32.xlu1 %v12618_v2, %s8091_s30  ;;  %7717 = vrot.lane.b32.xlu0 %v12619_v17, %s8091_s30  ;;  %v12630_v2 = vld [vmem:[#allocation13_spill] sm:$0xff]  ;;  %v12635_v17 = vpack.i.bf16 %v12634_v0, %v12578_v56 }
 0x314   : > { %v12631_v1 = vpack.i.bf16 %v12630_v2, %v10642_v16  ;;  %v5426_v16 = vrot.slane %v5314_v40, 1  ;;  %v12639_v56 = vld [vmem:[#allocation21_spill] sm:$0xff] }
 0x317   : > { %7712 = vrot.lane.b32.xlu1 %v12620_v19, %s8092_s8  ;;  %7727 = vrot.lane.b32.xlu0 %v12621_v52, %s8092_s8  ;;  %v5430_v19 = vrot.slane %v5316_v13, 1  ;;  %v5431_v52 = vrot.slane %v5317_v41, 1 }
 0x318   : > { %v7483_v55 = vpop.permute.xlu1 %7482 }
 0x319   : > { %v7485_v57 = vunpack.i.h.bf16 %v7483_v55  ;;  %v7484_v15 = vunpack.i.l.bf16 %v7483_v55 }
 0x31b   : > { %7722 = vrot.lane.b32.xlu1 %v12622_v63, %s8091_s30  ;;  %7737 = vrot.lane.b32.xlu0 %v12624_v27, %s8091_s30  ;;  %v4148_v4 = vsel %vm1075_vm5, %v4116_v12, %v7484_v15  ;;  %v4149_v20 = vsel %vm1075_vm5, %v4117_v47, %v7485_v57  ;;  %v5433_v63 = vrot.slane %v5318_v37, 1  ;;  %v5602_v27 = vrot.slane %v5314_v40, 2  ;;  %v12638_v57 = vld [vmem:[#allocation6_spill] sm:$0xff] }
 0x31c   : > { %v4179_v36 = vpack.c.bf16 %v4149_v20, %v4148_v4  ;;  %v12640_v15 = vpack.i.bf16 %v12638_v57, %v12639_v56  ;;  %v11260_v47 = vsel %vm689_vm4, %v5426_v16, %v5428_v42  ;;  %v11263_v12 = vsel %vm689_vm4, %v5430_v19, %v5431_v52  ;;  %v11316_v57 = vld [vmem:[#allocation2 + $0x50] sm:$0xff] }
 0x31d   : > { %v11266_v4 = vsel %vm689_vm4, %v5431_v52, %v5433_v63  ;;  %v11269_v20 = vsel %vm866_vm3, %v5601_v61, %v5602_v27  ;;  %v11272_v10 = vsel %vm866_vm3, %v5602_v27, %v5604_v28  ;;  %v5609_v40 = vrot.slane %v5318_v37, 2  ;;  %v11296_v52 = vld [vmem:[#allocation2 + $0x148] sm:$0x3]  ;;  %v4485_v27 = vld [vmem:[#allocation2 + $0x158] sm:$0xff]  ;;  %v11309_v28 = vld [vmem:[#allocation2 + $0x160] sm:$0x3] }
 0x31e   : > { %6871 = vmatmul.mubr.msk.bf16.vlgmr.msra.gmra.mrb[32].mxu1 %vm1131_vm6, %v4179_v36  ;;  %v5606_v36 = vrot.slane %v5316_v13, 2  ;;  %v11282_v13 = vld [vmem:[#allocation2 + $0x138] sm:$0xff]  ;;  %v7831_v25 = vpack.i.bf16 %v11266_v4, %v11263_v12 }
 0x31f   : > { %7732 = vrot.lane.b32.xlu1 %v12626_v32, %s8092_s8  ;;  %7747 = vrot.lane.b32.xlu0 %v12627_v30, %s8092_s8  ;;  %v12636_v32 = vld [vmem:[#allocation4_spill] sm:$0xff]  ;;  %v11257_v30 = vsel %vm689_vm4, %v5425_v39, %v5426_v16  ;;  %v4601_v63 = vrot.slane %v11282_v13, 1 }
 0x320   : > { %6937 = vmatpush3.bf16.msra.mxu1 %v5874_v3  ;;  %v12637_v55 = vpack.i.bf16 %v12636_v32, %v12595_v29  ;;  %v5607_v3 = vrot.slane %v5317_v41, 2  ;;  %v4482_v41 = vld [vmem:[#allocation2 + $0x140] sm:$0xff]  ;;  %v7826_v43 = vpack.i.bf16 %v11260_v47, %v11257_v30 }
 0x321   : > { %v11307_v61 = vrot.slane %v4482_v41, 1 }
 0x322   : > { %v11301_v45 = vsel %vm866_vm3, %v5606_v36, %v5607_v3  ;;  %v12644_v36 = vpack.i.bf16 %v11084_v26, %v12588_v21  ;;  %v4777_v21 = vrot.slane %v11282_v13, 2  ;;  %v11334_v26 = vld [vmem:[#allocation2 + $0x68] sm:$0xff]  ;;  %v12647_v13 = vpack.i.bf16 %v11092_v34, %v12595_v29 }
 0x323   : > { %7742 = vrot.lane.b32.xlu1 %v12628_v11, %s8091_s30  ;;  %7757 = vrot.lane.b32.xlu0 %v12629_v62, %s8091_s30 }
 0x325   : > { %v7488_v54 = vpop.permute.xlu0 %7487 }
 0x326   : > { %v7490_v59 = vunpack.i.h.bf16 %v7488_v54  ;;  %v7489_v35 = vunpack.i.l.bf16 %v7488_v54  ;;  %v11298_v54 = vld [vmem:[#allocation2 + $0x150] sm:$0xff] }
 0x327   : > { %7752 = vrot.lane.b32.xlu1 %v12631_v1, %s8092_s8  ;;  %7767 = vrot.lane.b32.xlu0 %v12633_v53, %s8092_s8  ;;  %v12642_v53 = vld [vmem:[#allocation9_spill] sm:$0xff]  ;;  %v4606_v7 = vrot.slane %v11298_v54, 1 }
 0x328   : > { %v4119_v58 = vsel %vm537_vm1, %v12641_v9, %v7490_v59  ;;  %v4118_v39 = vsel %vm537_vm1, %v12642_v53, %v7489_v35 }
 0x329   : > { %v7498_v11 = vpop.permute.xlu0 %7497 }
 0x32a   : > { %v7500_v2 = vunpack.i.h.bf16 %v7498_v11  ;;  %v7499_v1 = vunpack.i.l.bf16 %v7498_v11 }
 0x32b   : > { %7762 = vrot.lane.b32.xlu1 %v12635_v17, %s8091_s30  ;;  %7777 = vrot.lane.b32.xlu0 %v12637_v55, %s8091_s30 }
 0x32c   : > { %v4150_v37 = vsel %vm1075_vm5, %v4118_v39, %v7499_v1  ;;  %v4151_v16 = vsel %vm1075_vm5, %v4119_v58, %v7500_v2  ;;  %v11330_v2 = vrot.slane %v4485_v27, 1  ;;  %v4609_v1 = vrot.slane %v11309_v28, 1 }
 0x32d   : > { %v4180_v42 = vpack.c.bf16 %v4151_v16, %v4150_v37  ;;  %v12646_v37 = vpack.i.bf16 %v11106_v38, %v12602_v31  ;;  %v11344_v16 = vrot.slane %v4482_v41, 2  ;;  %v11358_v41 = vsel %vm689_vm4, %v4601_v63, %v11307_v61 }
 0x32e   : > { %v11366_v34 = vsel %vm689_vm4, %v4606_v7, %v11330_v2  ;;  %v11382_v7 = vld [vmem:[#allocation2 + $0x128] sm:$0xff] }
 0x32f   : > { %7772 = vrot.lane.b32.xlu1 %v12640_v15, %s8092_s8  ;;  %7787 = vrot.lane.b32.xlu0 %v7786_v33, %s8092_s8  ;;  %v7836_v33 = vpack.i.bf16 %v11272_v10, %v11269_v20  ;;  %v12643_v15 = vld [vmem:[#allocation11_spill] sm:$0xff]  ;;  %v11398_v22 = vsel %vm866_vm3, %v4777_v21, %v11344_v16  ;;  %v5436_v21 = vrot.slane %v11382_v7, 1  ;;  %v5612_v20 = vrot.slane %v11382_v7, 2 }
 0x330   : > { %6874 = vmatprep.mubr.msk.bf16.mxu1 %vm1131_vm6, %v4180_v42  ;;  %v4780_v42 = vrot.slane %v11296_v52, 2 }
 0x331   : > { %v7493_v62 = vpop.permute.xlu1 %7492  ;;  %v7508_v19 = vpop.permute.xlu0 %7507 }
 0x332   : > { %v7495_v0 = vunpack.i.h.bf16 %v7493_v62  ;;  %v7494_v17 = vunpack.i.l.bf16 %v7493_v62  ;;  %v7510_v32 = vunpack.i.h.bf16 %v7508_v19  ;;  %v7509_v55 = vunpack.i.l.bf16 %v7508_v19 }
 0x333   : > { %7782 = vrot.lane.b32.xlu1 %v7781_v60, %s8091_s30  ;;  %v11304_v60 = vsel %vm866_vm3, %v5607_v3, %v5609_v40  ;;  %7797 = vrot.lane.b32.xlu0 %v7796_v48, %s8091_s30  ;;  %v4604_v3 = vrot.slane %v11296_v52, 1  ;;  %v11402_v46 = vsel %vm866_vm3, %v11344_v16, %v4780_v42  ;;  %v11417_v42 = vld [vmem:[#allocation2 + $0x90] sm:$0xff] }
 0x334   : > { %v4121_v56 = vsel %vm537_vm1, %v11316_v57, %v7495_v0  ;;  %v4120_v11 = vsel %vm537_vm1, %v12643_v15, %v7494_v17  ;;  %v4123_v39 = vsel %vm537_vm1, %v11334_v26, %v7510_v32  ;;  %v12645_v0 = vld [vmem:[#allocation12_spill] sm:$0xff]  ;;  %v7841_v31 = vpack.i.bf16 %v11304_v60, %v11301_v45 }
 0x335   : > { %v7503_v44 = vpop.permute.xlu1 %7502  ;;  %v7518_v62 = vpop.permute.xlu0 %7517  ;;  %v4122_v17 = vsel %vm537_vm1, %v12645_v0, %v7509_v55  ;;  %v11362_v52 = vsel %vm689_vm4, %v11307_v61, %v4604_v3  ;;  %v11370_v55 = vsel %vm689_vm4, %v11330_v2, %v4609_v1  ;;  %v11373_v15 = vrot.slane %v4485_v27, 2  ;;  %v11388_v27 = vld [vmem:[#allocation2 + $0x78] sm:$0xff]  ;;  %v11411_v0 = vld [vmem:[#allocation2 + $0x148] sm:$0x3] }
 0x336   : > { %v7505_v59 = vunpack.i.h.bf16 %v7503_v44  ;;  %v7504_v35 = vunpack.i.l.bf16 %v7503_v44  ;;  %v7520_v58 = vunpack.i.h.bf16 %v7518_v62  ;;  %v7519_v53 = vunpack.i.l.bf16 %v7518_v62 }
 0x337   : > { %7792 = vrot.lane.b32.xlu1 %v12644_v36, %s8092_s8  ;;  %7807 = vrot.lane.b32.xlu0 %v12646_v37, %s8092_s8 }
 0x338   : > { %v4152_v5 = vsel %vm1075_vm5, %v4120_v11, %v7504_v35  ;;  %v4153_v48 = vsel %vm1075_vm5, %v4121_v56, %v7505_v59  ;;  %v4154_v59 = vsel %vm1075_vm5, %v4122_v17, %v7519_v53  ;;  %v4155_v35 = vsel %vm1075_vm5, %v4123_v39, %v7520_v58  ;;  %v11375_v11 = vld [vmem:[#allocation2 + $0x120] sm:$0xff]  ;;  %v11408_v39 = vld [vmem:[#allocation2 + $0x130] sm:$0x3]  ;;  %v11413_v17 = vld [vmem:[#allocation2 + $0x98] sm:$0xff] }
 0x339   : > { %v4181_v40 = vpack.c.bf16 %v4153_v48, %v4152_v5  ;;  %v7513_v9 = vpop.permute.xlu1 %7512  ;;  %v4182_v32 = vpack.c.bf16 %v4155_v35, %v4154_v59  ;;  %v7528_v38 = vpop.permute.xlu0 %7527  ;;  %v4782_v56 = vrot.slane %v11298_v54, 2  ;;  %v11384_v48 = vld [vmem:[#allocation2 + $0x80] sm:$0xff]  ;;  %v5435_v58 = vrot.slane %v11375_v11, 1 }
 0x33a   : > { %v7515_v19 = vunpack.i.h.bf16 %v7513_v9  ;;  %v7514_v44 = vunpack.i.l.bf16 %v7513_v9  ;;  %v7530_v5 = vunpack.i.h.bf16 %v7528_v38  ;;  %v7529_v3 = vunpack.i.l.bf16 %v7528_v38 }
 0x33b   : > { %7802 = vrot.lane.b32.xlu1 %v12647_v13, %s8091_s30  ;;  %6875 = vmatmul.mubr.msk.bf16.gmra.mrb[36].mxu1 %vm1131_vm6, %v4181_v40  ;;  %v4785_v9 = vrot.slane %v11309_v28, 2  ;;  %v5438_v38 = vrot.slane %v11408_v39, 1  ;;  %v11442_v50 = vsel %vm866_vm3, %v4782_v56, %v11373_v15  ;;  %v11457_v56 = vld [vmem:[#allocation2 + $0xb0] sm:$0xff]  ;;  %v5614_v10 = vrot.slane %v11408_v39, 2  ;;  %v11485_v39 = vld [vmem:[#allocation2 + $0xc0] sm:$0xff] }
 0x33c   : > { %7817 = vrot.lane.b32.xlu0 %v7816_v23, %s8091_s30  ;;  %6878 = vmatprep.mubr.msk.bf16.mxu1 %vm1131_vm6, %v4182_v32  ;;  %v4125_v54 = vsel %vm537_vm1, %v11384_v48, %v7515_v19  ;;  %v4124_v62 = vsel %vm537_vm1, %v11388_v27, %v7514_v44  ;;  %v4127_v37 = vsel %vm537_vm1, %v11413_v17, %v7530_v5 }
 0x33d   : > { %v7523_v29 = vpop.permute.xlu1 %7522  ;;  %v7538_v40 = vpop.permute.xlu0 %7537  ;;  %v4126_v28 = vsel %vm537_vm1, %v11417_v42, %v7529_v3  ;;  %v7846_v19 = vpack.i.bf16 %v11362_v52, %v11358_v41  ;;  %v7851_v44 = vpack.i.bf16 %v11370_v55, %v11366_v34  ;;  %v7856_v32 = vpack.i.bf16 %v11402_v46, %v11398_v22  ;;  %v11461_v46 = vld [vmem:[#allocation2 + $0xa8] sm:$0xff] }
 0x33e   : > { %v7525_v63 = vunpack.i.h.bf16 %v7523_v29  ;;  %v7524_v36 = vunpack.i.l.bf16 %v7523_v29  ;;  %v7539_v51 = vunpack.i.l.bf16 %v7538_v40  ;;  %v5443_v52 = vrot.slane %v11411_v0, 1 }
 0x33f   : > { %7812 = vrot.lane.b32.xlu1 %v7811_v18, %s8092_s8  ;;  %v7540_v18 = vunpack.i.h.bf16 %v7538_v40  ;;  %v11446_v8 = vsel %vm866_vm3, %v11373_v15, %v4785_v9 }
 0x340   : > { %v4156_v23 = vsel %vm1075_vm5, %v4124_v62, %v7524_v36  ;;  %v4157_v1 = vsel %vm1075_vm5, %v4125_v54, %v7525_v63  ;;  %7827 = vrot.lane.b32.xlu0 %v7826_v43, %s8092_s8  ;;  %v4158_v35 = vsel %vm1075_vm5, %v4126_v28, %v7539_v51  ;;  %v5611_v63 = vrot.slane %v11375_v11, 2 }
 0x341   : > { %v4183_v53 = vpack.c.bf16 %v4157_v1, %v4156_v23  ;;  %v7533_v49 = vpop.permute.xlu1 %7532  ;;  %v4159_v30 = vsel %vm1075_vm5, %v4127_v37, %v7540_v18  ;;  %v7548_v43 = vpop.permute.xlu0 %7547  ;;  %v4488_v23 = vld [vmem:[#allocation2 + $0x170] sm:$0xff]  ;;  %v11481_v18 = vld [vmem:[#allocation2 + $0xc8] sm:$0xff] }
 0x342   : > { %v7535_v13 = vunpack.i.h.bf16 %v7533_v49  ;;  %v7534_v59 = vunpack.i.l.bf16 %v7533_v49  ;;  %v4184_v47 = vpack.c.bf16 %v4159_v30, %v4158_v35  ;;  %v7550_v3 = vunpack.i.h.bf16 %v7548_v43 }
 0x343   : > { %7822 = vrot.lane.b32.xlu1 %v7821_v6, %s8091_s30  ;;  %6879 = vmatmul.mubr.msk.bf16.gmra.mrb[40].mxu1 %vm1131_vm6, %v4183_v53  ;;  %v11449_v6 = vsel %vm689_vm4, %v5435_v58, %v5436_v21  ;;  %v7549_v54 = vunpack.i.l.bf16 %v7548_v43  ;;  %v5439_v58 = vsel %vm689_vm4, %v5436_v21, %v5438_v38  ;;  %v11478_v53 = vsel %vm689_vm4, %v11307_v61, %v5443_v52  ;;  %v11490_v61 = vld [vmem:[#allocation2 + $0x178] sm:$0x3]  ;;  %v11507_v52 = vld [vmem:[#allocation2 + $0x180] sm:$0xff] }
 0x344   : > { %7837 = vrot.lane.b32.xlu0 %v7836_v33, %s8091_s30  ;;  %6882 = vmatprep.mubr.msk.bf16.mxu1 %vm1131_vm6, %v4184_v47  ;;  %v4129_v62 = vsel %vm537_vm1, %v11457_v56, %v7535_v13  ;;  %v4128_v11 = vsel %vm537_vm1, %v11461_v46, %v7534_v59  ;;  %v11471_v33 = vld [vmem:[#allocation2 + $0x168] sm:$0xff]  ;;  %v5619_v49 = vrot.slane %v11411_v0, 2  ;;  %v4131_v51 = vsel %vm537_vm1, %v11481_v18, %v7550_v3 }
 0x345   : > { %v7543_v29 = vpop.permute.xlu1 %7542  ;;  %v7558_v9 = vpop.permute.xlu0 %7557  ;;  %v4130_v21 = vsel %vm537_vm1, %v11485_v39, %v7549_v54  ;;  %v4611_v37 = vrot.slane %v11471_v33, 1  ;;  %v11493_v28 = vrot.slane %v4488_v23, 1  ;;  %v7861_v47 = vpack.i.bf16 %v11446_v8, %v11442_v50 }
 0x346   : > { %v7545_v36 = vunpack.i.h.bf16 %v7543_v29  ;;  %v7544_v5 = vunpack.i.l.bf16 %v7543_v29  ;;  %v7559_v7 = vunpack.i.l.bf16 %v7558_v9  ;;  %v7866_v43 = vpack.i.bf16 %v5439_v58, %v11449_v6 }
 0x347   : > { %7832 = vrot.lane.b32.xlu1 %v7831_v25, %s8092_s8  ;;  %v7560_v25 = vunpack.i.h.bf16 %v7558_v9  ;;  %v7871_v38 = vpack.i.bf16 %v11478_v53, %v11358_v41  ;;  %v5613_v60 = vsel %vm866_vm3, %v5611_v63, %v5612_v20  ;;  %v11513_v29 = vsel %vm866_vm3, %v11344_v16, %v5619_v49  ;;  %v11547_v49 = vld [vmem:[#allocation2 + $0xf8] sm:$0xff] }
 0x348   : > { %v4160_v1 = vsel %vm1075_vm5, %v4128_v11, %v7544_v5  ;;  %v4161_v40 = vsel %vm1075_vm5, %v4129_v62, %v7545_v36  ;;  %7847 = vrot.lane.b32.xlu0 %v7846_v19, %s8092_s8  ;;  %v4162_v59 = vsel %vm1075_vm5, %v4130_v21, %v7559_v7  ;;  %v4614_v36 = vrot.slane %v11490_v61, 1  ;;  %v11516_v5 = vld [vmem:[#allocation2 + $0x188] sm:$0xff]  ;;  %v11520_v62 = vld [vmem:[#allocation2 + $0xe0] sm:$0xff]  ;;  %v11524_v11 = vld [vmem:[#allocation2 + $0xd8] sm:$0xff] }
 0x349   : > { %v4185_v12 = vpack.c.bf16 %v4161_v40, %v4160_v1  ;;  %v7553_v4 = vpop.permute.xlu1 %7552  ;;  %v4163_v35 = vsel %vm1075_vm5, %v4131_v51, %v7560_v25  ;;  %v7568_v30 = vpop.permute.xlu0 %7567  ;;  %v11540_v9 = vrot.slane %v11516_v5, 1  ;;  %v4787_v58 = vrot.slane %v11471_v33, 2  ;;  %v11543_v25 = vld [vmem:[#allocation2 + $0x190] sm:$0x3] }
 0x34a   : > { %v7555_v13 = vunpack.i.h.bf16 %v7553_v4  ;;  %v7554_v0 = vunpack.i.l.bf16 %v7553_v4  ;;  %v4186_v19 = vpack.c.bf16 %v4163_v35, %v4162_v59  ;;  %v7570_v3 = vunpack.i.h.bf16 %v7568_v30  ;;  %v11551_v21 = vld [vmem:[#allocation2 + $0xf0] sm:$0xff] }
 0x34b   : > { %7842 = vrot.lane.b32.xlu1 %v7841_v31, %s8091_s30  ;;  %6883 = vmatmul.mubr.msk.bf16.gmra.mrb[44].mxu1 %vm1131_vm6, %v4185_v12  ;;  %v5615_v31 = vsel %vm866_vm3, %v5612_v20, %v5614_v10  ;;  %v7569_v54 = vunpack.i.l.bf16 %v7568_v30  ;;  %v4616_v20 = vrot.slane %v11507_v52, 1  ;;  %v11545_v7 = vrot.slane %v4488_v23, 2 }
 0x34c   : > { %7857 = vrot.lane.b32.xlu0 %v7856_v32, %s8091_s30  ;;  %6886 = vmatprep.mubr.msk.bf16.mxu1 %vm1131_vm6, %v4186_v19  ;;  %v4133_v63 = vsel %vm537_vm1, %v11520_v62, %v7555_v13  ;;  %v4132_v16 = vsel %vm537_vm1, %v11524_v11, %v7554_v0  ;;  %v11534_v32 = vsel %vm689_vm4, %v4611_v37, %v11493_v28  ;;  %v4790_v13 = vrot.slane %v11490_v61, 2 }
 0x34d   : > { %v7563_v45 = vpop.permute.xlu1 %7562  ;;  %v7578_v40 = vpop.permute.xlu0 %7577  ;;  %v4135_v51 = vsel %vm537_vm1, %v11547_v49, %v7570_v3  ;;  %v4134_v37 = vsel %vm537_vm1, %v11551_v21, %v7569_v54  ;;  %v4615_v33 = vsel %vm689_vm4, %v11493_v28, %v4614_v36  ;;  %v4619_v36 = vrot.slane %v11543_v25, 1  ;;  %v11575_v54 = vld [vmem:[#allocation2 + $0x160] sm:$0x3] }
 0x34e   : > { %v7565_v8 = vunpack.i.h.bf16 %v7563_v45  ;;  %v7564_v6 = vunpack.i.l.bf16 %v7563_v45  ;;  %v7580_v55 = vunpack.i.h.bf16 %v7578_v40  ;;  %v7876_v45 = vpack.i.bf16 %v5615_v31, %v5613_v60 }
 0x34f   : > { %7852 = vrot.lane.b32.xlu1 %v7851_v44, %s8092_s8  ;;  %v7579_v44 = vunpack.i.l.bf16 %v7578_v40  ;;  %v7886_v61 = vpack.i.bf16 %v4615_v33, %v11534_v32  ;;  %v11573_v3 = vrot.slane %v11516_v5, 2  ;;  %v11595_v40 = vsel %vm866_vm3, %v4787_v58, %v11545_v7  ;;  %v11604_v58 = vld [vmem:[#allocation2 + $0x128] sm:$0xff] }
 0x350   : > { %v4164_v10 = vsel %vm1075_vm5, %v4132_v16, %v7564_v6  ;;  %v4165_v1 = vsel %vm1075_vm5, %v4133_v63, %v7565_v8  ;;  %7867 = vrot.lane.b32.xlu0 %v7866_v43, %s8092_s8  ;;  %v4167_v35 = vsel %vm1075_vm5, %v4135_v51, %v7580_v55  ;;  %v7881_v43 = vpack.i.bf16 %v11513_v29, %v11398_v22  ;;  %v11579_v29 = vld [vmem:[#allocation2 + $0x178] sm:$0x3]  ;;  %v11581_v16 = vld [vmem:[#allocation2 + $0x110] sm:$0xff] }
 0x351   : > { %v4187_v12 = vpack.c.bf16 %v4165_v1, %v4164_v10  ;;  %v7573_v4 = vpop.permute.xlu1 %7572  ;;  %v4166_v59 = vsel %vm1075_vm5, %v4134_v37, %v7579_v44  ;;  %v7588_v30 = vpop.permute.xlu0 %7587  ;;  %v4792_v6 = vrot.slane %v11507_v52, 2  ;;  %v11585_v10 = vld [vmem:[#allocation2 + $0x108] sm:$0xff]  ;;  %v4795_v51 = vrot.slane %v11543_v25, 2 }
 0x352   : > { %v7575_v0 = vunpack.i.h.bf16 %v7573_v4  ;;  %v7574_v23 = vunpack.i.l.bf16 %v7573_v4  ;;  %v4188_v19 = vpack.c.bf16 %v4167_v35, %v4166_v59  ;;  %v7590_v63 = vunpack.i.h.bf16 %v7588_v30 }
 0x353   : > { %7862 = vrot.lane.b32.xlu1 %v7861_v47, %s8091_s30  ;;  %6887 = vmatmul.mubr.msk.bf16.gmra.mrb[48].mxu1 %vm1131_vm6, %v4187_v12  ;;  %v11569_v47 = vsel %vm689_vm4, %v4616_v20, %v11540_v9  ;;  %v7589_v22 = vunpack.i.l.bf16 %v7588_v30  ;;  %v4791_v12 = vsel %vm866_vm3, %v11545_v7, %v4790_v13  ;;  %v5448_v37 = vrot.slane %v11575_v54, 1 }
 0x354   : > { %7877 = vrot.lane.b32.xlu0 %v7876_v45, %s8091_s30  ;;  %6890 = vmatprep.mubr.msk.bf16.mxu1 %vm1131_vm6, %v4188_v19  ;;  %v4137_v20 = vsel %vm537_vm1, %v11581_v16, %v7575_v0  ;;  %v4136_v1 = vsel %vm537_vm1, %v11585_v10, %v7574_v23  ;;  %v4139_v13 = vsel %vm537_vm1, %v11604_v58, %v7590_v63  ;;  %v11608_v23 = vld [vmem:[#allocation2 + $0x120] sm:$0xff] }
 0x355   : > { %v7583_v8 = vpop.permute.xlu1 %7582  ;;  %v7598_v44 = vpop.permute.xlu0 %7597  ;;  %v4138_v59 = vsel %vm537_vm1, %v11608_v23, %v7589_v22  ;;  %v4620_v25 = vsel %vm689_vm4, %v11540_v9, %v4619_v36  ;;  %v11617_v35 = vsel %vm866_vm3, %v4792_v6, %v11573_v3  ;;  %v4796_v36 = vsel %vm866_vm3, %v11573_v3, %v4795_v51 }
 0x356   : > { %v7585_v60 = vunpack.i.h.bf16 %v7583_v8  ;;  %v7584_v31 = vunpack.i.l.bf16 %v7583_v8  ;;  %v7600_v41 = vunpack.i.h.bf16 %v7598_v44  ;;  %v7599_v53 = vunpack.i.l.bf16 %v7598_v44 }
 0x357   : > { %7872 = vrot.lane.b32.xlu1 %v7871_v38, %s8092_s8  ;;  %v5453_v38 = vrot.slane %v11579_v29, 1  ;;  %v5449_v6 = vsel %vm689_vm4, %v11330_v2, %v5448_v37  ;;  %v7891_v22 = vpack.i.bf16 %v4620_v25, %v11569_v47  ;;  %v8027_v2 = vld [vmem:[#allocation2 + $0x140] sm:$0xff]  ;;  %v8028_v37 = vld [vmem:[#allocation2 + $0x138] sm:$0xff] }
 0x358   : > { %v4168_v4 = vsel %vm1075_vm5, %v4136_v1, %v7584_v31  ;;  %v4169_v55 = vsel %vm1075_vm5, %v4137_v20, %v7585_v60  ;;  %7887 = vrot.lane.b32.xlu0 %v7886_v61, %s8092_s8  ;;  %v4170_v45 = vsel %vm1075_vm5, %v4138_v59, %v7599_v53  ;;  %v4171_v8 = vsel %vm1075_vm5, %v4139_v13, %v7600_v41  ;;  %v11646_v59 = vld [vmem:[#allocation2 + $0x198] sm:$0xff] }
 0x359   : > { %v4189_v33 = vpack.c.bf16 %v4169_v55, %v4168_v4  ;;  %v7593_v0 = vpop.permute.xlu1 %7592  ;;  %v4190_v60 = vpack.c.bf16 %v4171_v8, %v4170_v45  ;;  %v7608_v31 = vpop.permute.xlu0 %7607  ;;  %v7896_v61 = vpack.i.bf16 %v4791_v12, %v11595_v40  ;;  %v5624_v20 = vrot.slane %v11575_v54, 2  ;;  %v11633_v4 = vld [vmem:[#allocation2 + $0x190] sm:$0x3] }
 0x35a   : > { %v7595_v19 = vunpack.i.h.bf16 %v7593_v0  ;;  %v7594_v30 = vunpack.i.l.bf16 %v7593_v0  ;;  %v5629_v1 = vrot.slane %v11579_v29, 2  ;;  %v7610_v44 = vunpack.i.h.bf16 %v7608_v31 }
 0x35b   : > { %7882 = vrot.lane.b32.xlu1 %v7881_v43, %s8091_s30  ;;  %6891 = vmatmul.mubr.msk.bf16.gmra.mrb[52].mxu1 %vm1131_vm6, %v4189_v33  ;;  %v5454_v43 = vsel %vm689_vm4, %v11493_v28, %v5453_v38  ;;  %v7609_v33 = vunpack.i.l.bf16 %v7608_v31  ;;  %v7901_v54 = vpack.i.bf16 %v4796_v36, %v11617_v35  ;;  %v7906_v29 = vpack.i.bf16 %v5449_v6, %v11366_v34  ;;  %v5336_v36 = vld [vmem:[#allocation2 + $0x1a8] sm:$0x3] }
 0x35c   : > { %7897 = vrot.lane.b32.xlu0 %v7896_v61, %s8091_s30  ;;  %6894 = vmatprep.mubr.msk.bf16.mxu1 %vm1131_vm6, %v4190_v60  ;;  %v4141_v51 = vsel %vm537_vm1, %v8027_v2, %v7595_v19  ;;  %v4140_v28 = vsel %vm537_vm1, %v8028_v37, %v7594_v30  ;;  %v7911_v38 = vpack.i.bf16 %v5454_v43, %v11534_v32  ;;  %v5458_v13 = vrot.slane %v11633_v4, 1  ;;  %v11650_v60 = vld [vmem:[#allocation2 + $0x1a0] sm:$0xff]  ;;  %v11669_v37 = vld [vmem:[#allocation2 + $0x38] sm:$0xff] }
 0x35d   : > { %v7603_v63 = vpop.permute.xlu1 %7602  ;;  %v7618_v53 = vpop.permute.xlu0 %7617  ;;  %v5625_v8 = vsel %vm866_vm3, %v11373_v15, %v5624_v20  ;;  %v4894_v34 = vsel %vm537_vm1, %v11215_v14, %v7610_v44  ;;  %v4893_v31 = vsel %vm537_vm1, %v11219_v24, %v7609_v33  ;;  %v5460_v14 = vrot.slane %v11646_v59, 1 }
 0x35e   : > { %v7605_v55 = vunpack.i.h.bf16 %v7603_v63  ;;  %v7604_v12 = vunpack.i.l.bf16 %v7603_v63  ;;  %v7620_v30 = vunpack.i.h.bf16 %v7618_v53  ;;  %v7619_v45 = vunpack.i.l.bf16 %v7618_v53 }
 0x35f   : > { %7892 = vrot.lane.b32.xlu1 %v7891_v22, %s8092_s8  ;;  %v5630_v63 = vsel %vm866_vm3, %v11545_v7, %v5629_v1  ;;  %v7916_v43 = vpack.i.bf16 %v5625_v8, %v11442_v50  ;;  %v5459_v20 = vsel %vm689_vm4, %v11540_v9, %v5458_v13  ;;  %v5463_v2 = vrot.slane %v5336_v36, 1  ;;  %v11673_v1 = vld [vmem:[#allocation2 + $0x30] sm:$0xff] }
 0x360   : > { %v4172_v0 = vsel %vm1075_vm5, %v4140_v28, %v7604_v12  ;;  %v4173_v41 = vsel %vm1075_vm5, %v4141_v51, %v7605_v55  ;;  %7907 = vrot.lane.b32.xlu0 %v7906_v29, %s8092_s8  ;;  %v4925_v6 = vsel %vm1075_vm5, %v4893_v31, %v7619_v45  ;;  %v4926_v15 = vsel %vm1075_vm5, %v4894_v34, %v7620_v30  ;;  %v8031_v31 = vld [vmem:[#allocation2 + $0x158] sm:$0xff] }
 0x361   : > { %v4191_v25 = vpack.c.bf16 %v4173_v41, %v4172_v0  ;;  %v7613_v19 = vpop.permute.xlu1 %7612  ;;  %v4957_v22 = vpack.c.bf16 %v4926_v15, %v4925_v6  ;;  %v7628_v24 = vpop.permute.xlu0 %7627  ;;  %v5461_v55 = vrot.slane %v11650_v60, 1  ;;  %v5634_v51 = vrot.slane %v11633_v4, 2 }
 0x362   : > { %v7615_v32 = vunpack.i.h.bf16 %v7613_v19  ;;  %v7614_v61 = vunpack.i.l.bf16 %v7613_v19  ;;  %v7630_v44 = vunpack.i.h.bf16 %v7628_v24  ;;  %v7629_v33 = vunpack.i.l.bf16 %v7628_v24 }
 0x363   : > { %7902 = vrot.lane.b32.xlu1 %v7901_v54, %s8091_s30  ;;  %6895 = vmatmul.mubr.msk.bf16.gmra.mrb[56].mxu1 %vm1131_vm6, %v4191_v25  ;;  %v7921_v29 = vpack.i.bf16 %v5630_v63, %v11595_v40  ;;  %v7926_v0 = vpack.i.bf16 %v5459_v20, %v11569_v47  ;;  %v5462_v13 = vsel %vm689_vm4, %v5460_v14, %v5461_v55  ;;  %v5636_v25 = vrot.slane %v11646_v59, 2 }
 0x364   : > { %v4896_v7 = vsel %vm537_vm1, %v11669_v37, %v7615_v32  ;;  %v4895_v50 = vsel %vm537_vm1, %v11673_v1, %v7614_v61  ;;  %7917 = vrot.lane.b32.xlu0 %v7916_v43, %s8091_s30  ;;  %6904 = vmatprep.mubr.msk.bf16.mxu0 %vm1131_vm6, %v4957_v22  ;;  %v5637_v19 = vrot.slane %v11650_v60, 2  ;;  %v5639_v34 = vrot.slane %v5336_v36, 2  ;;  %v8032_v32 = vld [vmem:[#allocation2 + $0x150] sm:$0xff] }
 0x365   : > { %v7623_v12 = vpop.permute.xlu1 %7622  ;;  %v4927_v4 = vsel %vm1075_vm5, %v4895_v50, %v7629_v33  ;;  %v4928_v54 = vsel %vm1075_vm5, %v4896_v7, %v7630_v44  ;;  %v7638_v53 = vpop.permute.xlu0 %7637  ;;  %v5464_v61 = vsel %vm689_vm4, %v5461_v55, %v5463_v2  ;;  %v8034_v50 = vld [vmem:[#allocation2 + $0x168] sm:$0xff] }
 0x366   : > { %v7625_v28 = vunpack.i.h.bf16 %v7623_v12  ;;  %v7624_v9 = vunpack.i.l.bf16 %v7623_v12  ;;  %v4958_v41 = vpack.c.bf16 %v4928_v54, %v4927_v4  ;;  %v7640_v45 = vunpack.i.h.bf16 %v7638_v53 }
 0x367   : > { %7912 = vrot.lane.b32.xlu1 %v7911_v38, %s8092_s8  ;;  %v7639_v8 = vunpack.i.l.bf16 %v7638_v53  ;;  %v5635_v38 = vsel %vm866_vm3, %v11573_v3, %v5634_v51  ;;  %v7931_v43 = vpack.i.bf16 %v5464_v61, %v5462_v13  ;;  %v5638_v20 = vsel %vm866_vm3, %v5636_v25, %v5637_v19  ;;  %v8033_v51 = vld [vmem:[#allocation2 + $0x170] sm:$0xff]  ;;  %v8035_v25 = vld [vmem:[#allocation2 + $0x48] sm:$0xff] }
 0x368   : > { %v4143_v40 = vsel %vm537_vm1, %v8031_v31, %v7625_v28  ;;  %v4142_v47 = vsel %vm537_vm1, %v8032_v32, %v7624_v9  ;;  %7927 = vrot.lane.b32.xlu0 %v7926_v0, %s8092_s8  ;;  %6905 = vmatmul.mubr.msk.bf16.vlgmr.msra.gmra.mrb[64].mxu0 %vm1131_vm6, %v4958_v41  ;;  %v7936_v22 = vpack.i.bf16 %v5635_v38, %v11617_v35 }
 0x369   : > { %v7633_v30 = vpop.permute.xlu1 %7632  ;;  %v4174_v63 = vsel %vm1075_vm5, %v4142_v47, %v7639_v8  ;;  %v4175_v3 = vsel %vm1075_vm5, %v4143_v40, %v7640_v45  ;;  %v7648_v14 = vpop.permute.xlu0 %7647  ;;  %v5640_v55 = vsel %vm866_vm3, %v5637_v19, %v5639_v34 }
 0x36a   : > { %v7635_v6 = vunpack.i.h.bf16 %v7633_v30  ;;  %v7634_v15 = vunpack.i.l.bf16 %v7633_v30  ;;  %v4192_v36 = vpack.c.bf16 %v4175_v3, %v4174_v63  ;;  %v7650_v33 = vunpack.i.h.bf16 %v7648_v14  ;;  %v8036_v63 = vld [vmem:[#allocation2 + $0x60] sm:$0xff] }
 0x36b   : > { %7922 = vrot.lane.b32.xlu1 %v7921_v29, %s8091_s30  ;;  %v7649_v2 = vunpack.i.l.bf16 %v7648_v14  ;;  %v7941_v0 = vpack.i.bf16 %v5640_v55, %v5638_v20 }
 0x36c   : > { %7937 = vrot.lane.b32.xlu0 %v7936_v22, %s8091_s30  ;;  %6898 = vmatprep.mubr.msk.bf16.mxu1 %vm1131_vm6, %v4192_v36  ;;  %v4145_v7 = vsel %vm537_vm1, %v8033_v51, %v7635_v6  ;;  %v4144_v35 = vsel %vm537_vm1, %v8034_v50, %v7634_v15  ;;  %v4898_v13 = vsel %vm537_vm1, %v11316_v57, %v7650_v33 }
 0x36d   : > { %v7643_v24 = vpop.permute.xlu1 %7642  ;;  %v7658_v4 = vpop.permute.xlu0 %7657  ;;  %v4897_v19 = vsel %vm537_vm1, %v8035_v25, %v7649_v2 }
 0x36e   : > { %v7645_v12 = vunpack.i.h.bf16 %v7643_v24  ;;  %v7644_v44 = vunpack.i.l.bf16 %v7643_v24  ;;  %v7660_v41 = vunpack.i.h.bf16 %v7658_v4  ;;  %v7659_v53 = vunpack.i.l.bf16 %v7658_v4 }
 0x36f   : > { %7932 = vrot.lane.b32.xlu1 %v7931_v43, %s8092_s8 }
 0x370   : > { %v4176_v28 = vsel %vm1075_vm5, %v4144_v35, %v7644_v44  ;;  %v4177_v9 = vsel %vm1075_vm5, %v4145_v7, %v7645_v12  ;;  %v4929_v8 = vsel %vm1075_vm5, %v4897_v19, %v7659_v53  ;;  %v4930_v38 = vsel %vm1075_vm5, %v4898_v13, %v7660_v41 }
 0x371   : > { %v4193_v54 = vpack.c.bf16 %v4177_v9, %v4176_v28  ;;  %v7653_v29 = vpop.permute.xlu1 %7652  ;;  %v4959_v34 = vpack.c.bf16 %v4930_v38, %v4929_v8  ;;  %v7668_v31 = vpop.permute.xlu0 %7667 }
 0x372   : > { %v7655_v30 = vunpack.i.h.bf16 %v7653_v29  ;;  %v7654_v45 = vunpack.i.l.bf16 %v7653_v29  ;;  %v7670_v61 = vunpack.i.h.bf16 %v7668_v31  ;;  %v7669_v6 = vunpack.i.l.bf16 %v7668_v31 }
 0x373   : > { %7942 = vrot.lane.b32.xlu1 %v7941_v0, %s8091_s30  ;;  %6899 = vmatmul.mubr.msk.bf16.gmra.mrb[60].mxu1 %vm1131_vm6, %v4193_v54 }
 0x374   : > { %6908 = vmatprep.mubr.msk.bf16.mxu0 %vm1131_vm6, %v4959_v34  ;;  %v4900_v15 = vsel %vm537_vm1, %v11334_v26, %v7655_v30  ;;  %v4899_v3 = vsel %vm537_vm1, %v8036_v63, %v7654_v45  ;;  %v5738_v12 = vsel %vm537_vm1, %v11669_v37, %v7670_v61  ;;  %v5737_v44 = vsel %vm537_vm1, %v11673_v1, %v7669_v6 }
 0x375   : > { %v7663_v40 = vpop.permute.xlu1 %7662  ;;  %v7678_v22 = vpop.permute.xlu0 %7677 }
 0x376   : > { %v7665_v32 = vunpack.i.h.bf16 %v7663_v40  ;;  %v7664_v47 = vunpack.i.l.bf16 %v7663_v40  ;;  %v7680_v20 = vunpack.i.h.bf16 %v7678_v22  ;;  %v7679_v55 = vunpack.i.l.bf16 %v7678_v22 }
 0x378   : > { %v4931_v36 = vsel %vm1075_vm5, %v4899_v3, %v7664_v47  ;;  %v4932_v14 = vsel %vm1075_vm5, %v4900_v15, %v7665_v32  ;;  %v5769_v51 = vsel %vm1075_vm5, %v5737_v44, %v7679_v55  ;;  %v5770_v7 = vsel %vm1075_vm5, %v5738_v12, %v7680_v20 }
 0x379   : > { %v4960_v24 = vpack.c.bf16 %v4932_v14, %v4931_v36  ;;  %v7673_v43 = vpop.permute.xlu1 %7672  ;;  %v5801_v50 = vpack.c.bf16 %v5770_v7, %v5769_v51  ;;  %v7688_v35 = vpop.permute.xlu0 %7687 }
 0x37a   : > { %v7675_v33 = vunpack.i.h.bf16 %v7673_v43  ;;  %v7674_v2 = vunpack.i.l.bf16 %v7673_v43  ;;  %v7690_v54 = vunpack.i.h.bf16 %v7688_v35  ;;  %v7689_v29 = vunpack.i.l.bf16 %v7688_v35 }
 0x37b   : > { %6909 = vmatmul.mubr.msk.bf16.gmra.mrb[68].mxu0 %vm1131_vm6, %v4960_v24  ;;  %6938 = vmatprep.mubr.msk.bf16.mxu1 %vm1131_vm6, %v5801_v50 }
 0x37c   : > { %v5740_v37 = vsel %vm537_vm1, %v11316_v57, %v7675_v33  ;;  %v5739_v1 = vsel %vm537_vm1, %v8035_v25, %v7674_v2  ;;  %v4902_v8 = vsel %vm537_vm1, %v11384_v48, %v7690_v54  ;;  %v4901_v38 = vsel %vm537_vm1, %v11388_v27, %v7689_v29 }
 0x37d   : > { %v7683_v28 = vpop.permute.xlu1 %7682  ;;  %v7698_v53 = vpop.permute.xlu0 %7697 }
 0x37e   : > { %v7685_v9 = vunpack.i.h.bf16 %v7683_v28  ;;  %v7684_v4 = vunpack.i.l.bf16 %v7683_v28  ;;  %v7700_v30 = vunpack.i.h.bf16 %v7698_v53  ;;  %v7699_v45 = vunpack.i.l.bf16 %v7698_v53 }
 0x380   : > { %v5771_v0 = vsel %vm1075_vm5, %v5739_v1, %v7684_v4  ;;  %v5772_v41 = vsel %vm1075_vm5, %v5740_v37, %v7685_v9  ;;  %v4933_v57 = vsel %vm1075_vm5, %v4901_v38, %v7699_v45  ;;  %v4934_v25 = vsel %vm1075_vm5, %v4902_v8, %v7700_v30 }
 0x381   : > { %v5802_v13 = vpack.c.bf16 %v5772_v41, %v5771_v0  ;;  %v7693_v19 = vpop.permute.xlu1 %7692  ;;  %v4961_v40 = vpack.c.bf16 %v4934_v25, %v4933_v57  ;;  %v7708_v32 = vpop.permute.xlu0 %7707 }
 0x382   : > { %v7695_v34 = vunpack.i.h.bf16 %v7693_v19  ;;  %v7694_v31 = vunpack.i.l.bf16 %v7693_v19  ;;  %v7710_v15 = vunpack.i.h.bf16 %v7708_v32  ;;  %v7709_v3 = vunpack.i.l.bf16 %v7708_v32 }
 0x383   : > { %6939 = vmatmul.mubr.msk.bf16.vlgmr.msra.gmra.mrb[64].mxu1 %vm1131_vm6, %v5802_v13  ;;  %6912 = vmatprep.mubr.msk.bf16.mxu0 %vm1131_vm6, %v4961_v40 }
 0x384   : > { %v4904_v36 = vsel %vm537_vm1, %v11413_v17, %v7695_v34  ;;  %v4903_v14 = vsel %vm537_vm1, %v11417_v42, %v7694_v31  ;;  %v5742_v33 = vsel %vm537_vm1, %v11334_v26, %v7710_v15  ;;  %v5741_v2 = vsel %vm537_vm1, %v8036_v63, %v7709_v3 }
 0x385   : > { %v7703_v47 = vpop.permute.xlu1 %7702  ;;  %v7718_v43 = vpop.permute.xlu0 %7717 }
 0x386   : > { %v7705_v61 = vunpack.i.h.bf16 %v7703_v47  ;;  %v7704_v6 = vunpack.i.l.bf16 %v7703_v47  ;;  %v7720_v12 = vunpack.i.h.bf16 %v7718_v43  ;;  %v7719_v44 = vunpack.i.l.bf16 %v7718_v43 }
 0x388   : > { %v4935_v22 = vsel %vm1075_vm5, %v4903_v14, %v7704_v6  ;;  %v4936_v24 = vsel %vm1075_vm5, %v4904_v36, %v7705_v61  ;;  %v5773_v50 = vsel %vm1075_vm5, %v5741_v2, %v7719_v44  ;;  %v5774_v35 = vsel %vm1075_vm5, %v5742_v33, %v7720_v12 }
 0x389   : > { %v4962_v20 = vpack.c.bf16 %v4936_v24, %v4935_v22  ;;  %v7713_v55 = vpop.permute.xlu1 %7712  ;;  %v5803_v28 = vpack.c.bf16 %v5774_v35, %v5773_v50  ;;  %v7728_v9 = vpop.permute.xlu0 %7727 }
 0x38a   : > { %v7715_v51 = vunpack.i.h.bf16 %v7713_v55  ;;  %v7714_v7 = vunpack.i.l.bf16 %v7713_v55  ;;  %v7730_v37 = vunpack.i.h.bf16 %v7728_v9  ;;  %v7729_v1 = vunpack.i.l.bf16 %v7728_v9 }
 0x38b   : > { %6913 = vmatmul.mubr.msk.bf16.gmra.mrb[72].mxu0 %vm1131_vm6, %v4962_v20  ;;  %6942 = vmatprep.mubr.msk.bf16.mxu1 %vm1131_vm6, %v5803_v28 }
 0x38c   : > { %v5744_v26 = vsel %vm537_vm1, %v11384_v48, %v7715_v51  ;;  %v5743_v63 = vsel %vm537_vm1, %v11388_v27, %v7714_v7  ;;  %v4906_v8 = vsel %vm537_vm1, %v11457_v56, %v7730_v37  ;;  %v4905_v38 = vsel %vm537_vm1, %v11461_v46, %v7729_v1 }
 0x38d   : > { %v7723_v4 = vpop.permute.xlu1 %7722  ;;  %v7738_v53 = vpop.permute.xlu0 %7737 }
 0x38e   : > { %v7725_v54 = vunpack.i.h.bf16 %v7723_v4  ;;  %v7724_v29 = vunpack.i.l.bf16 %v7723_v4  ;;  %v7740_v30 = vunpack.i.h.bf16 %v7738_v53  ;;  %v7739_v45 = vunpack.i.l.bf16 %v7738_v53 }
 0x390   : > { %v5775_v0 = vsel %vm1075_vm5, %v5743_v63, %v7724_v29  ;;  %v5776_v41 = vsel %vm1075_vm5, %v5744_v26, %v7725_v54  ;;  %v4937_v27 = vsel %vm1075_vm5, %v4905_v38, %v7739_v45  ;;  %v4938_v31 = vsel %vm1075_vm5, %v4906_v8, %v7740_v30 }
 0x391   : > { %v5804_v13 = vpack.c.bf16 %v5776_v41, %v5775_v0  ;;  %v7733_v19 = vpop.permute.xlu1 %7732  ;;  %v4963_v57 = vpack.c.bf16 %v4938_v31, %v4937_v27  ;;  %v7748_v25 = vpop.permute.xlu0 %7747 }
 0x392   : > { %v7735_v34 = vunpack.i.h.bf16 %v7733_v19  ;;  %v7734_v48 = vunpack.i.l.bf16 %v7733_v19  ;;  %v7750_v61 = vunpack.i.h.bf16 %v7748_v25  ;;  %v7749_v6 = vunpack.i.l.bf16 %v7748_v25 }
 0x393   : > { %6943 = vmatmul.mubr.msk.bf16.gmra.mrb[68].mxu1 %vm1131_vm6, %v5804_v13  ;;  %6916 = vmatprep.mubr.msk.bf16.mxu0 %vm1131_vm6, %v4963_v57 }
 0x394   : > { %v4908_v15 = vsel %vm537_vm1, %v11481_v18, %v7735_v34  ;;  %v4907_v3 = vsel %vm537_vm1, %v11485_v39, %v7734_v48  ;;  %v5746_v12 = vsel %vm537_vm1, %v11413_v17, %v7750_v61  ;;  %v5745_v44 = vsel %vm537_vm1, %v11417_v42, %v7749_v6 }
 0x395   : > { %v7743_v40 = vpop.permute.xlu1 %7742  ;;  %v7758_v22 = vpop.permute.xlu0 %7757 }
 0x396   : > { %v7745_v32 = vunpack.i.h.bf16 %v7743_v40  ;;  %v7744_v47 = vunpack.i.l.bf16 %v7743_v40  ;;  %v7760_v20 = vunpack.i.h.bf16 %v7758_v22  ;;  %v7759_v55 = vunpack.i.l.bf16 %v7758_v22 }
 0x398   : > { %v4939_v36 = vsel %vm1075_vm5, %v4907_v3, %v7744_v47  ;;  %v4940_v14 = vsel %vm1075_vm5, %v4908_v15, %v7745_v32  ;;  %v5777_v51 = vsel %vm1075_vm5, %v5745_v44, %v7759_v55  ;;  %v5778_v7 = vsel %vm1075_vm5, %v5746_v12, %v7760_v20 }
 0x399   : > { %v4964_v24 = vpack.c.bf16 %v4940_v14, %v4939_v36  ;;  %v7753_v43 = vpop.permute.xlu1 %7752  ;;  %v5805_v50 = vpack.c.bf16 %v5778_v7, %v5777_v51  ;;  %v7768_v35 = vpop.permute.xlu0 %7767 }
 0x39a   : > { %v7755_v33 = vunpack.i.h.bf16 %v7753_v43  ;;  %v7754_v2 = vunpack.i.l.bf16 %v7753_v43  ;;  %v7770_v54 = vunpack.i.h.bf16 %v7768_v35  ;;  %v7769_v29 = vunpack.i.l.bf16 %v7768_v35 }
 0x39b   : > { %6917 = vmatmul.mubr.msk.bf16.gmra.mrb[76].mxu0 %vm1131_vm6, %v4964_v24  ;;  %6946 = vmatprep.mubr.msk.bf16.mxu1 %vm1131_vm6, %v5805_v50 }
 0x39c   : > { %v5748_v17 = vsel %vm537_vm1, %v11457_v56, %v7755_v33  ;;  %v5747_v42 = vsel %vm537_vm1, %v11461_v46, %v7754_v2  ;;  %v4910_v13 = vsel %vm537_vm1, %v11520_v62, %v7770_v54  ;;  %v4909_v19 = vsel %vm537_vm1, %v11524_v11, %v7769_v29 }
 0x39d   : > { %v7763_v28 = vpop.permute.xlu1 %7762  ;;  %v7778_v26 = vpop.permute.xlu0 %7777 }
 0x39e   : > { %v7765_v9 = vunpack.i.h.bf16 %v7763_v28  ;;  %v7764_v4 = vunpack.i.l.bf16 %v7763_v28  ;;  %v7780_v41 = vunpack.i.h.bf16 %v7778_v26  ;;  %v7779_v53 = vunpack.i.l.bf16 %v7778_v26 }
 0x3a0   : > { %v5779_v37 = vsel %vm1075_vm5, %v5747_v42, %v7764_v4  ;;  %v5780_v1 = vsel %vm1075_vm5, %v5748_v17, %v7765_v9  ;;  %v4941_v46 = vsel %vm1075_vm5, %v4909_v19, %v7779_v53  ;;  %v4942_v45 = vsel %vm1075_vm5, %v4910_v13, %v7780_v41 }
 0x3a1   : > { %v5806_v63 = vpack.c.bf16 %v5780_v1, %v5779_v37  ;;  %v7773_v0 = vpop.permute.xlu1 %7772  ;;  %v4965_v8 = vpack.c.bf16 %v4942_v45, %v4941_v46  ;;  %v7788_v38 = vpop.permute.xlu0 %7787 }
 0x3a2   : > { %v7775_v30 = vunpack.i.h.bf16 %v7773_v0  ;;  %v7774_v56 = vunpack.i.l.bf16 %v7773_v0  ;;  %v7790_v31 = vunpack.i.h.bf16 %v7788_v38  ;;  %v7789_v57 = vunpack.i.l.bf16 %v7788_v38 }
 0x3a3   : > { %6947 = vmatmul.mubr.msk.bf16.gmra.mrb[72].mxu1 %vm1131_vm6, %v5806_v63  ;;  %6920 = vmatprep.mubr.msk.bf16.mxu0 %vm1131_vm6, %v4965_v8 }
 0x3a4   : > { %v4912_v25 = vsel %vm537_vm1, %v11547_v49, %v7775_v30  ;;  %v4911_v40 = vsel %vm537_vm1, %v11551_v21, %v7774_v56  ;;  %v5750_v14 = vsel %vm537_vm1, %v11481_v18, %v7790_v31  ;;  %v5749_v22 = vsel %vm537_vm1, %v11485_v39, %v7789_v57 }
 0x3a5   : > { %v7783_v34 = vpop.permute.xlu1 %7782  ;;  %v7798_v61 = vpop.permute.xlu0 %7797 }
 0x3a6   : > { %v7785_v48 = vunpack.i.h.bf16 %v7783_v34  ;;  %v7784_v27 = vunpack.i.l.bf16 %v7783_v34  ;;  %v7800_v3 = vunpack.i.h.bf16 %v7798_v61  ;;  %v7799_v36 = vunpack.i.l.bf16 %v7798_v61  ;;  %v8037_v34 = vld [vmem:[#allocation2 + $0xf8] sm:$0xff] }
 0x3a8   : > { %v4943_v32 = vsel %vm1075_vm5, %v4911_v40, %v7784_v27  ;;  %v4944_v47 = vsel %vm1075_vm5, %v4912_v25, %v7785_v48  ;;  %v5781_v21 = vsel %vm1075_vm5, %v5749_v22, %v7799_v36  ;;  %v5782_v43 = vsel %vm1075_vm5, %v5750_v14, %v7800_v3  ;;  %v8038_v27 = vld [vmem:[#allocation2 + $0xf0] sm:$0xff]  ;;  %v8040_v22 = vld [vmem:[#allocation2 + $0x108] sm:$0xff] }
 0x3a9   : > { %v4966_v6 = vpack.c.bf16 %v4944_v47, %v4943_v32  ;;  %v7793_v15 = vpop.permute.xlu1 %7792  ;;  %v5807_v20 = vpack.c.bf16 %v5782_v43, %v5781_v21  ;;  %v7808_v55 = vpop.permute.xlu0 %7807  ;;  %v8039_v36 = vld [vmem:[#allocation2 + $0x110] sm:$0xff] }
 0x3aa   : > { %v7795_v24 = vunpack.i.h.bf16 %v7793_v15  ;;  %v7794_v49 = vunpack.i.l.bf16 %v7793_v15  ;;  %v7810_v2 = vunpack.i.h.bf16 %v7808_v55  ;;  %v7809_v51 = vunpack.i.l.bf16 %v7808_v55 }
 0x3ab   : > { %6921 = vmatmul.mubr.msk.bf16.gmra.mrb[80].mxu0 %vm1131_vm6, %v4966_v6  ;;  %6950 = vmatprep.mubr.msk.bf16.mxu1 %vm1131_vm6, %v5807_v20 }
 0x3ac   : > { %v5752_v18 = vsel %vm537_vm1, %v11520_v62, %v7795_v24  ;;  %v5751_v39 = vsel %vm537_vm1, %v11524_v11, %v7794_v49  ;;  %v4914_v29 = vsel %vm537_vm1, %v11581_v16, %v7810_v2  ;;  %v4913_v17 = vsel %vm537_vm1, %v11585_v10, %v7809_v51  ;;  %v8042_v51 = vld [vmem:[#allocation2 + $0x138] sm:$0xff] }
 0x3ad   : > { %v7803_v12 = vpop.permute.xlu1 %7802 }
 0x3ae   : > { %v7805_v44 = vunpack.i.h.bf16 %v7803_v12  ;;  %v7804_v33 = vunpack.i.l.bf16 %v7803_v12  ;;  %v7818_v35 = vpop.permute.xlu0 %7817 }
 0x3af   : > { %v7820_v4 = vunpack.i.h.bf16 %v7818_v35  ;;  %v7819_v54 = vunpack.i.l.bf16 %v7818_v35 }
 0x3b0   : > { %v5783_v7 = vsel %vm1075_vm5, %v5751_v39, %v7804_v33  ;;  %v5784_v50 = vsel %vm1075_vm5, %v5752_v18, %v7805_v44  ;;  %v8041_v33 = vld [vmem:[#allocation2 + $0x140] sm:$0xff] }
 0x3b1   : > { %v5808_v28 = vpack.c.bf16 %v5784_v50, %v5783_v7  ;;  %v7813_v9 = vpop.permute.xlu1 %7812  ;;  %v4945_v11 = vsel %vm1075_vm5, %v4913_v17, %v7819_v54  ;;  %v4946_v37 = vsel %vm1075_vm5, %v4914_v29, %v7820_v4 }
 0x3b2   : > { %v7815_v42 = vunpack.i.h.bf16 %v7813_v9  ;;  %v7814_v62 = vunpack.i.l.bf16 %v7813_v9  ;;  %v4967_v1 = vpack.c.bf16 %v4946_v37, %v4945_v11  ;;  %v7828_v26 = vpop.permute.xlu0 %7827  ;;  %v11850_v37 = vld [vmem:[#allocation2 + $0x150] sm:$0xff] }
 0x3b3   : > { %6951 = vmatmul.mubr.msk.bf16.gmra.mrb[76].mxu1 %vm1131_vm6, %v5808_v28  ;;  %v7830_v53 = vunpack.i.h.bf16 %v7828_v26  ;;  %v7829_v13 = vunpack.i.l.bf16 %v7828_v26 }
 0x3b4   : > { %6924 = vmatprep.mubr.msk.bf16.mxu0 %vm1131_vm6, %v4967_v1  ;;  %v4916_v16 = vsel %vm537_vm1, %v11604_v58, %v7815_v42  ;;  %v4915_v10 = vsel %vm537_vm1, %v11608_v23, %v7814_v62  ;;  %v11846_v62 = vld [vmem:[#allocation2 + $0x158] sm:$0xff] }
 0x3b5   : > { %v7823_v63 = vpop.permute.xlu1 %7822  ;;  %v5754_v48 = vsel %vm537_vm1, %v8037_v34, %v7830_v53  ;;  %v5753_v31 = vsel %vm537_vm1, %v8038_v27, %v7829_v13 }
 0x3b6   : > { %v7825_v0 = vunpack.i.h.bf16 %v7823_v63  ;;  %v7824_v41 = vunpack.i.l.bf16 %v7823_v63  ;;  %v7838_v56 = vpop.permute.xlu0 %7837 }
 0x3b7   : > { %v7840_v8 = vunpack.i.h.bf16 %v7838_v56  ;;  %v7839_v38 = vunpack.i.l.bf16 %v7838_v56 }
 0x3b8   : > { %v4947_v19 = vsel %vm1075_vm5, %v4915_v10, %v7824_v41  ;;  %v4948_v30 = vsel %vm1075_vm5, %v4916_v16, %v7825_v0  ;;  %v8045_v10 = vld [vmem:[#allocation2 + $0x128] sm:$0xff] }
 0x3b9   : > { %v4968_v46 = vpack.c.bf16 %v4948_v30, %v4947_v19  ;;  %v7833_v45 = vpop.permute.xlu1 %7832  ;;  %v5785_v23 = vsel %vm1075_vm5, %v5753_v31, %v7839_v38  ;;  %v5786_v25 = vsel %vm1075_vm5, %v5754_v48, %v7840_v8  ;;  %v8046_v30 = vld [vmem:[#allocation2 + $0x120] sm:$0xff] }
 0x3ba   : > { %v7835_v57 = vunpack.i.h.bf16 %v7833_v45  ;;  %v7834_v58 = vunpack.i.l.bf16 %v7833_v45  ;;  %v5809_v40 = vpack.c.bf16 %v5786_v25, %v5785_v23  ;;  %v7848_v32 = vpop.permute.xlu0 %7847 }
 0x3bb   : > { %6925 = vmatmul.mubr.msk.bf16.gmra.mrb[84].mxu0 %vm1131_vm6, %v4968_v46  ;;  %v7850_v15 = vunpack.i.h.bf16 %v7848_v32  ;;  %v7849_v3 = vunpack.i.l.bf16 %v7848_v32 }
 0x3bc   : > { %6954 = vmatprep.mubr.msk.bf16.mxu1 %vm1131_vm6, %v5809_v40  ;;  %v5756_v14 = vsel %vm537_vm1, %v8039_v36, %v7835_v57  ;;  %v5755_v24 = vsel %vm537_vm1, %v8040_v22, %v7834_v58 }
 0x3bd   : > { %v7843_v47 = vpop.permute.xlu1 %7842  ;;  %v4918_v2 = vsel %vm537_vm1, %v8041_v33, %v7850_v15  ;;  %v4917_v18 = vsel %vm537_vm1, %v8042_v51, %v7849_v3 }
 0x3be   : > { %v7845_v61 = vunpack.i.h.bf16 %v7843_v47  ;;  %v7844_v6 = vunpack.i.l.bf16 %v7843_v47  ;;  %v7858_v43 = vpop.permute.xlu0 %7857 }
 0x3bf   : > { %v7860_v12 = vunpack.i.h.bf16 %v7858_v43  ;;  %v7859_v44 = vunpack.i.l.bf16 %v7858_v43 }
 0x3c0   : > { %v5787_v49 = vsel %vm1075_vm5, %v5755_v24, %v7844_v6  ;;  %v5788_v21 = vsel %vm1075_vm5, %v5756_v14, %v7845_v61  ;;  %v8047_v14 = vld [vmem:[#allocation2 + $0x170] sm:$0xff]  ;;  %v8048_v24 = vld [vmem:[#allocation2 + $0x168] sm:$0xff] }
 0x3c1   : > { %v5810_v20 = vpack.c.bf16 %v5788_v21, %v5787_v49  ;;  %v7853_v55 = vpop.permute.xlu1 %7852  ;;  %v4949_v50 = vsel %vm1075_vm5, %v4917_v18, %v7859_v44  ;;  %v4950_v35 = vsel %vm1075_vm5, %v4918_v2, %v7860_v12 }
 0x3c2   : > { %v7855_v39 = vunpack.i.h.bf16 %v7853_v55  ;;  %v7854_v7 = vunpack.i.l.bf16 %v7853_v55  ;;  %v4969_v28 = vpack.c.bf16 %v4950_v35, %v4949_v50  ;;  %v7868_v9 = vpop.permute.xlu0 %7867 }
 0x3c3   : > { %6955 = vmatmul.mubr.msk.bf16.gmra.mrb[80].mxu1 %vm1131_vm6, %v5810_v20  ;;  %v7870_v17 = vunpack.i.h.bf16 %v7868_v9  ;;  %v7869_v42 = vunpack.i.l.bf16 %v7868_v9 }
 0x3c4   : > { %6928 = vmatprep.mubr.msk.bf16.mxu0 %vm1131_vm6, %v4969_v28  ;;  %v4920_v11 = vsel %vm537_vm1, %v11846_v62, %v7855_v39  ;;  %v4919_v1 = vsel %vm537_vm1, %v11850_v37, %v7854_v7 }
 0x3c5   : > { %v7863_v4 = vpop.permute.xlu1 %7862  ;;  %v5758_v19 = vsel %vm537_vm1, %v8045_v10, %v7870_v17  ;;  %v5757_v56 = vsel %vm537_vm1, %v8046_v30, %v7869_v42 }
 0x3c6   : > { %v7865_v54 = vunpack.i.h.bf16 %v7863_v4  ;;  %v7864_v29 = vunpack.i.l.bf16 %v7863_v4  ;;  %v7878_v0 = vpop.permute.xlu0 %7877 }
 0x3c7   : > { %v7880_v13 = vunpack.i.h.bf16 %v7878_v0  ;;  %v7879_v16 = vunpack.i.l.bf16 %v7878_v0 }
 0x3c8   : > { %v4951_v26 = vsel %vm1075_vm5, %v4919_v1, %v7864_v29  ;;  %v4952_v63 = vsel %vm1075_vm5, %v4920_v11, %v7865_v54 }
 0x3c9   : > { %v4970_v41 = vpack.c.bf16 %v4952_v63, %v4951_v26  ;;  %v7873_v53 = vpop.permute.xlu1 %7872  ;;  %v5789_v8 = vsel %vm1075_vm5, %v5757_v56, %v7879_v16  ;;  %v5790_v38 = vsel %vm1075_vm5, %v5758_v19, %v7880_v13 }
 0x3ca   : > { %v7875_v46 = vunpack.i.h.bf16 %v7873_v53  ;;  %v7874_v45 = vunpack.i.l.bf16 %v7873_v53  ;;  %v5811_v34 = vpack.c.bf16 %v5790_v38, %v5789_v8  ;;  %v7888_v48 = vpop.permute.xlu0 %7887 }
 0x3cb   : > { %6929 = vmatmul.mubr.msk.bf16.gmra.mrb[88].mxu0 %vm1131_vm6, %v4970_v41  ;;  %v7890_v58 = vunpack.i.h.bf16 %v7888_v48  ;;  %v7889_v23 = vunpack.i.l.bf16 %v7888_v48 }
 0x3cc   : > { %6958 = vmatprep.mubr.msk.bf16.mxu1 %vm1131_vm6, %v5811_v34  ;;  %v5760_v25 = vsel %vm537_vm1, %v8041_v33, %v7875_v46  ;;  %v5759_v40 = vsel %vm537_vm1, %v8042_v51, %v7874_v45  ;;  %v8049_v34 = vld [vmem:[#allocation2 + $0x188] sm:$0xff] }
 0x3cd   : > { %v7883_v27 = vpop.permute.xlu1 %7882  ;;  %v4922_v22 = vsel %vm537_vm1, %v8047_v14, %v7890_v58  ;;  %v4921_v49 = vsel %vm537_vm1, %v8048_v24, %v7889_v23 }
 0x3ce   : > { %v7885_v31 = vunpack.i.h.bf16 %v7883_v27  ;;  %v7884_v57 = vunpack.i.l.bf16 %v7883_v27  ;;  %v7898_v61 = vpop.permute.xlu0 %7897  ;;  %v8050_v27 = vld [vmem:[#allocation2 + $0x180] sm:$0xff] }
 0x3cf   : > { %v7900_v3 = vunpack.i.h.bf16 %v7898_v61  ;;  %v7899_v36 = vunpack.i.l.bf16 %v7898_v61 }
 0x3d0   : > { %v5791_v32 = vsel %vm1075_vm5, %v5759_v40, %v7884_v57  ;;  %v5792_v47 = vsel %vm1075_vm5, %v5760_v25, %v7885_v31 }
 0x3d1   : > { %v5812_v6 = vpack.c.bf16 %v5792_v47, %v5791_v32  ;;  %v7893_v15 = vpop.permute.xlu1 %7892  ;;  %v4953_v20 = vsel %vm1075_vm5, %v4921_v49, %v7899_v36  ;;  %v4954_v55 = vsel %vm1075_vm5, %v4922_v22, %v7900_v3 }
 0x3d2   : > { %v7895_v21 = vunpack.i.h.bf16 %v7893_v15  ;;  %v7894_v43 = vunpack.i.l.bf16 %v7893_v15  ;;  %v4971_v12 = vpack.c.bf16 %v4954_v55, %v4953_v20  ;;  %v7908_v44 = vpop.permute.xlu0 %7907 }
 0x3d3   : > { %6959 = vmatmul.mubr.msk.bf16.gmra.mrb[84].mxu1 %vm1131_vm6, %v5812_v6  ;;  %v7910_v18 = vunpack.i.h.bf16 %v7908_v44  ;;  %v7909_v39 = vunpack.i.l.bf16 %v7908_v44 }
 0x3d4   : > { %6932 = vmatprep.mubr.msk.bf16.mxu0 %vm1131_vm6, %v4971_v12  ;;  %v4924_v7 = vsel %vm537_vm1, %v11516_v5, %v7895_v21  ;;  %v4923_v50 = vsel %vm537_vm1, %v11507_v52, %v7894_v43 }
 0x3d5   : > { %v7903_v33 = vpop.permute.xlu1 %7902  ;;  %v5762_v42 = vsel %vm537_vm1, %v11846_v62, %v7910_v18  ;;  %v5761_v11 = vsel %vm537_vm1, %v11850_v37, %v7909_v39 }
 0x3d6   : > { %v7905_v2 = vunpack.i.h.bf16 %v7903_v33  ;;  %v7904_v51 = vunpack.i.l.bf16 %v7903_v33  ;;  %v7918_v9 = vpop.permute.xlu0 %7917 }
 0x3d7   : > { %v7920_v29 = vunpack.i.h.bf16 %v7918_v9  ;;  %v7919_v17 = vunpack.i.l.bf16 %v7918_v9 }
 0x3d8   : > { %v4955_v35 = vsel %vm1075_vm5, %v4923_v50, %v7904_v51  ;;  %v4956_v28 = vsel %vm1075_vm5, %v4924_v7, %v7905_v2 }
 0x3d9   : > { %v4972_v4 = vpack.c.bf16 %v4956_v28, %v4955_v35  ;;  %v7913_v54 = vpop.permute.xlu1 %7912  ;;  %v5793_v52 = vsel %vm1075_vm5, %v5761_v11, %v7919_v17  ;;  %v5794_v26 = vsel %vm1075_vm5, %v5762_v42, %v7920_v29 }
 0x3da   : > { %v7915_v1 = vunpack.i.h.bf16 %v7913_v54  ;;  %v7914_v5 = vunpack.i.l.bf16 %v7913_v54  ;;  %v5813_v63 = vpack.c.bf16 %v5794_v26, %v5793_v52  ;;  %v7928_v0 = vpop.permute.xlu0 %7927 }
 0x3db   : > { %6933 = vmatmul.mubr.msk.bf16.gmra.mrb[92].mxu0 %vm1131_vm6, %v4972_v4  ;;  %v7930_v16 = vunpack.i.h.bf16 %v7928_v0  ;;  %v7929_v10 = vunpack.i.l.bf16 %v7928_v0 }
 0x3dc   : > { %6962 = vmatprep.mubr.msk.bf16.mxu1 %vm1131_vm6, %v5813_v63  ;;  %v5764_v62 = vsel %vm537_vm1, %v8047_v14, %v7915_v1  ;;  %v5763_v37 = vsel %vm537_vm1, %v8048_v24, %v7914_v5 }
 0x3dd   : > { %v7923_v41 = vpop.permute.xlu1 %7922  ;;  %v5766_v48 = vsel %vm537_vm1, %v8049_v34, %v7930_v16  ;;  %v5765_v31 = vsel %vm537_vm1, %v8050_v27, %v7929_v10 }
 0x3de   : > { %v7925_v53 = vunpack.i.h.bf16 %v7923_v41  ;;  %v7924_v13 = vunpack.i.l.bf16 %v7923_v41  ;;  %v7938_v56 = vpop.permute.xlu0 %7937 }
 0x3df   : > { %v7940_v8 = vunpack.i.h.bf16 %v7938_v56  ;;  %v7939_v38 = vunpack.i.l.bf16 %v7938_v56 }
 0x3e0   : > { %v5795_v19 = vsel %vm1075_vm5, %v5763_v37, %v7924_v13  ;;  %v5796_v30 = vsel %vm1075_vm5, %v5764_v62, %v7925_v53 }
 0x3e1   : > { %v5814_v46 = vpack.c.bf16 %v5796_v30, %v5795_v19  ;;  %v7933_v45 = vpop.permute.xlu1 %7932  ;;  %v5797_v23 = vsel %vm1075_vm5, %v5765_v31, %v7939_v38  ;;  %v5798_v25 = vsel %vm1075_vm5, %v5766_v48, %v7940_v8 }
 0x3e2   : > { %v7935_v57 = vunpack.i.h.bf16 %v7933_v45  ;;  %v7934_v58 = vunpack.i.l.bf16 %v7933_v45  ;;  %v5815_v40 = vpack.c.bf16 %v5798_v25, %v5797_v23 }
 0x3e3   : > { %6963 = vmatmul.mubr.msk.bf16.gmra.mrb[88].mxu1 %vm1131_vm6, %v5814_v46 }
 0x3e4   : > { %6966 = vmatprep.mubr.msk.bf16.mxu1 %vm1131_vm6, %v5815_v40  ;;  %v5768_v6 = vsel %vm537_vm1, %v11650_v60, %v7935_v57  ;;  %v5767_v15 = vsel %vm537_vm1, %v11646_v59, %v7934_v58 }
 0x3e5   : > { %v7943_v32 = vpop.permute.xlu1 %7942 }
 0x3e6   : > { %v7945_v47 = vunpack.i.h.bf16 %v7943_v32  ;;  %v7944_v61 = vunpack.i.l.bf16 %v7943_v32 }
 0x3e8   : > { %v5799_v3 = vsel %vm1075_vm5, %v5767_v15, %v7944_v61  ;;  %v5800_v36 = vsel %vm1075_vm5, %v5768_v6, %v7945_v47 }
 0x3e9   : > { %v5816_v14 = vpack.c.bf16 %v5800_v36, %v5799_v3 }
 0x3eb   : > { %6967 = vmatmul.mubr.msk.bf16.gmra.mrb[92].mxu1 %vm1131_vm6, %v5816_v14 }
 0x3f1   : > { %v6872_v22 = vpop.f32.mrb[32].mxu1 }
 0x3f2   : > { %4415 = vst.msk [vmem:[#allocation3 + $0x10] sm:$0xff] %vm537_vm1, %v6872_v22  ;;  %v4286_v24 = vpop.f32.mrb[33].mxu1 }
 0x3f3   : > { %4413 = vst.msk [vmem:[#allocation3] sm:$0xff] %vm537_vm1, %v4286_v24  ;;  %v6873_v49 = vpop.f32.mrb[34].mxu1 }
 0x3f4   : > { %4416 = vst.msk [vmem:[#allocation3 + $0x18] sm:$0xff] %vm537_vm1, %v6873_v49  ;;  %v4289_v60 = vpop.f32.mrb[35].mxu1 }
 0x3f5   : > { %4414 = vst.msk [vmem:[#allocation3 + $0x8] sm:$0xff] %vm537_vm1, %v4289_v60 }
 0x3f9   : > { %v5195_v52 = vld [vmem:[#allocation3 + $0x10] sm:$0xff] }
 0x3fa   : > { %v5193_v0 = vld [vmem:[#allocation3] sm:$0xff] }
 0x3fb   : > { %v5196_v13 = vld [vmem:[#allocation3 + $0x18] sm:$0xff] }
 0x3fc   : > { %v5194_v62 = vld [vmem:[#allocation3 + $0x8] sm:$0xff] }
 0x40e   : > { %v6876_v59 = vpop.f32.mrb[36].mxu1 }
 0x40f   : > { %4419 = vst.msk [vmem:[#allocation3 + $0x30] sm:$0xff] %vm537_vm1, %v6876_v59  ;;  %v4302_v21 = vpop.f32.mrb[37].mxu1 }
 0x410   : > { %4417 = vst.msk [vmem:[#allocation3 + $0x20] sm:$0xff] %vm537_vm1, %v4302_v21  ;;  %v6877_v43 = vpop.f32.mrb[38].mxu1 }
 0x411   : > { %4420 = vst.msk [vmem:[#allocation3 + $0x38] sm:$0xff] %vm537_vm1, %v6877_v43  ;;  %v4305_v20 = vpop.f32.mrb[39].mxu1 }
 0x412   : > { %4418 = vst.msk [vmem:[#allocation3 + $0x28] sm:$0xff] %vm537_vm1, %v4305_v20 }
 0x416   : > { %v6880_v55 = vpop.f32.mrb[40].mxu1  ;;  %v5199_v8 = vld [vmem:[#allocation3 + $0x30] sm:$0xff] }
 0x417   : > { %4423 = vst.msk [vmem:[#allocation3 + $0x50] sm:$0xff] %vm537_vm1, %v6880_v55  ;;  %v4318_v12 = vpop.f32.mrb[41].mxu1  ;;  %v5197_v48 = vld [vmem:[#allocation3 + $0x20] sm:$0xff] }
 0x418   : > { %4421 = vst.msk [vmem:[#allocation3 + $0x40] sm:$0xff] %vm537_vm1, %v4318_v12  ;;  %v6881_v44 = vpop.f32.mrb[42].mxu1  ;;  %v5200_v57 = vld [vmem:[#allocation3 + $0x38] sm:$0xff] }
 0x419   : > { %4424 = vst.msk [vmem:[#allocation3 + $0x58] sm:$0xff] %vm537_vm1, %v6881_v44  ;;  %v4321_v33 = vpop.f32.mrb[43].mxu1  ;;  %v5198_v25 = vld [vmem:[#allocation3 + $0x28] sm:$0xff] }
 0x41a   : > { %4422 = vst.msk [vmem:[#allocation3 + $0x48] sm:$0xff] %vm537_vm1, %v4321_v33 }
 0x41e   : > { %v6884_v2 = vpop.f32.mrb[44].mxu1  ;;  %v5203_v21 = vld [vmem:[#allocation3 + $0x50] sm:$0xff] }
 0x41f   : > { %4427 = vst.msk [vmem:[#allocation3 + $0x70] sm:$0xff] %vm537_vm1, %v6884_v2  ;;  %v4334_v51 = vpop.f32.mrb[45].mxu1  ;;  %v5201_v55 = vld [vmem:[#allocation3 + $0x40] sm:$0xff] }
 0x420   : > { %4425 = vst.msk [vmem:[#allocation3 + $0x60] sm:$0xff] %vm537_vm1, %v4334_v51  ;;  %v6885_v18 = vpop.f32.mrb[46].mxu1  ;;  %v5204_v33 = vld [vmem:[#allocation3 + $0x58] sm:$0xff] }
 0x421   : > { %4428 = vst.msk [vmem:[#allocation3 + $0x78] sm:$0xff] %vm537_vm1, %v6885_v18  ;;  %v4337_v39 = vpop.f32.mrb[47].mxu1  ;;  %v5202_v18 = vld [vmem:[#allocation3 + $0x48] sm:$0xff] }
 0x422   : > { %4426 = vst.msk [vmem:[#allocation3 + $0x68] sm:$0xff] %vm537_vm1, %v4337_v39 }
 0x426   : > { %v6888_v7 = vpop.f32.mrb[48].mxu1 }
 0x427   : > { %4431 = vst.msk [vmem:[#allocation3 + $0x90] sm:$0xff] %vm537_vm1, %v6888_v7  ;;  %v4350_v50 = vpop.f32.mrb[49].mxu1 }
 0x428   : > { %4429 = vst.msk [vmem:[#allocation3 + $0x80] sm:$0xff] %vm537_vm1, %v4350_v50  ;;  %v6889_v35 = vpop.f32.mrb[50].mxu1 }
 0x429   : > { %4432 = vst.msk [vmem:[#allocation3 + $0x98] sm:$0xff] %vm537_vm1, %v6889_v35  ;;  %v4353_v28 = vpop.f32.mrb[51].mxu1 }
 0x42a   : > { %4430 = vst.msk [vmem:[#allocation3 + $0x88] sm:$0xff] %vm537_vm1, %v4353_v28 }
 0x42e   : > { %v6892_v9 = vpop.f32.mrb[52].mxu1 }
 0x42f   : > { %4435 = vst.msk [vmem:[#allocation3 + $0xb0] sm:$0xff] %vm537_vm1, %v6892_v9  ;;  %v4366_v4 = vpop.f32.mrb[53].mxu1 }
 0x430   : > { %4433 = vst.msk [vmem:[#allocation3 + $0xa0] sm:$0xff] %vm537_vm1, %v4366_v4  ;;  %v6893_v54 = vpop.f32.mrb[54].mxu1 }
 0x431   : > { %4436 = vst.msk [vmem:[#allocation3 + $0xb8] sm:$0xff] %vm537_vm1, %v6893_v54  ;;  %v4369_v29 = vpop.f32.mrb[55].mxu1 }
 0x432   : > { %4434 = vst.msk [vmem:[#allocation3 + $0xa8] sm:$0xff] %vm537_vm1, %v4369_v29 }
 0x436   : > { %v6896_v17 = vpop.f32.mrb[56].mxu1 }
 0x437   : > { %4439 = vst.msk [vmem:[#allocation3 + $0xd0] sm:$0xff] %vm537_vm1, %v6896_v17  ;;  %v4382_v42 = vpop.f32.mrb[57].mxu1 }
 0x438   : > { %4437 = vst.msk [vmem:[#allocation3 + $0xc0] sm:$0xff] %vm537_vm1, %v4382_v42  ;;  %v6897_v11 = vpop.f32.mrb[58].mxu1 }
 0x439   : > { %4440 = vst.msk [vmem:[#allocation3 + $0xd8] sm:$0xff] %vm537_vm1, %v6897_v11  ;;  %v4385_v1 = vpop.f32.mrb[59].mxu1 }
 0x43a   : > { %4438 = vst.msk [vmem:[#allocation3 + $0xc8] sm:$0xff] %vm537_vm1, %v4385_v1 }
 0x43b   : > { %v6906_v5 = vpop.f32.mrb[64].mxu0 }
 0x43c   : > { %v5227_v26 = vadd.f32 %v6906_v5, %v5195_v52  ;;  %v5066_v63 = vpop.f32.mrb[65].mxu0 }
 0x43d   : > { %v5225_v41 = vadd.f32 %v5193_v0, %v5066_v63  ;;  %v6907_v53 = vpop.f32.mrb[66].mxu0  ;;  %v5207_v0 = vld [vmem:[#allocation3 + $0x70] sm:$0xff] }
 0x43e   : > { %5259 = vst.msk [vmem:[#allocation3 + $0x10] sm:$0xff] %vm537_vm1, %v5227_v26  ;;  %v5228_v16 = vadd.f32 %v6907_v53, %v5196_v13  ;;  %v5069_v10 = vpop.f32.mrb[67].mxu0  ;;  %v5205_v13 = vld [vmem:[#allocation3 + $0x60] sm:$0xff] }
 0x43f   : > { %5257 = vst.msk [vmem:[#allocation3] sm:$0xff] %vm537_vm1, %v5225_v41  ;;  %v5226_v37 = vadd.f32 %v5194_v62, %v5069_v10 }
 0x440   : > { %5260 = vst.msk [vmem:[#allocation3 + $0x18] sm:$0xff] %vm537_vm1, %v5228_v16 }
 0x441   : > { %5258 = vst.msk [vmem:[#allocation3 + $0x8] sm:$0xff] %vm537_vm1, %v5226_v37 }
 0x445   : > { %v6039_v47 = vld [vmem:[#allocation3 + $0x10] sm:$0xff] }
 0x446   : > { %v6900_v19 = vpop.f32.mrb[60].mxu1  ;;  %v6037_v15 = vld [vmem:[#allocation3] sm:$0xff] }
 0x447   : > { %4443 = vst.msk [vmem:[#allocation3 + $0xf0] sm:$0xff] %vm537_vm1, %v6900_v19  ;;  %v4398_v30 = vpop.f32.mrb[61].mxu1  ;;  %v6040_v14 = vld [vmem:[#allocation3 + $0x18] sm:$0xff] }
 0x448   : > { %4441 = vst.msk [vmem:[#allocation3 + $0xe0] sm:$0xff] %vm537_vm1, %v4398_v30  ;;  %v6901_v56 = vpop.f32.mrb[62].mxu1  ;;  %v6038_v49 = vld [vmem:[#allocation3 + $0x8] sm:$0xff]  ;;  %v5208_v19 = vld [vmem:[#allocation3 + $0x78] sm:$0xff] }
 0x449   : > { %4444 = vst.msk [vmem:[#allocation3 + $0xf8] sm:$0xff] %vm537_vm1, %v6901_v56  ;;  %v4401_v46 = vpop.f32.mrb[63].mxu1 }
 0x44a   : > { %4442 = vst.msk [vmem:[#allocation3 + $0xe8] sm:$0xff] %vm537_vm1, %v4401_v46 }
 0x44e   : > { %v6910_v45 = vpop.f32.mrb[68].mxu0 }
 0x44f   : > { %v5231_v38 = vadd.f32 %v6910_v45, %v5199_v8  ;;  %v5082_v34 = vpop.f32.mrb[69].mxu0  ;;  %v5206_v45 = vld [vmem:[#allocation3 + $0x68] sm:$0xff] }
 0x450   : > { %v5229_v27 = vadd.f32 %v5197_v48, %v5082_v34  ;;  %v6911_v31 = vpop.f32.mrb[70].mxu0 }
 0x451   : > { %5263 = vst.msk [vmem:[#allocation3 + $0x30] sm:$0xff] %vm537_vm1, %v5231_v38  ;;  %v5232_v58 = vadd.f32 %v6911_v31, %v5200_v57  ;;  %v5085_v23 = vpop.f32.mrb[71].mxu0 }
 0x452   : > { %5261 = vst.msk [vmem:[#allocation3 + $0x20] sm:$0xff] %vm537_vm1, %v5229_v27  ;;  %v5230_v40 = vadd.f32 %v5198_v25, %v5085_v23 }
 0x453   : > { %5264 = vst.msk [vmem:[#allocation3 + $0x38] sm:$0xff] %vm537_vm1, %v5232_v58 }
 0x454   : > { %5262 = vst.msk [vmem:[#allocation3 + $0x28] sm:$0xff] %vm537_vm1, %v5230_v40 }
 0x456   : > { %v6940_v32 = vpop.f32.mrb[64].mxu1 }
 0x457   : > { %v6071_v61 = vadd.f32 %v6940_v32, %v6039_v47  ;;  %v5910_v6 = vpop.f32.mrb[65].mxu1 }
 0x458   : > { %v6069_v3 = vadd.f32 %v6037_v15, %v5910_v6  ;;  %v6941_v36 = vpop.f32.mrb[66].mxu1  ;;  %v6043_v50 = vld [vmem:[#allocation3 + $0x30] sm:$0xff] }
 0x459   : > { %6103 = vst.msk [vmem:[#allocation3 + $0x10] sm:$0xff] %vm537_vm1, %v6071_v61  ;;  %v6072_v22 = vadd.f32 %v6941_v36, %v6040_v14  ;;  %v5913_v24 = vpop.f32.mrb[67].mxu1  ;;  %v6041_v9 = vld [vmem:[#allocation3 + $0x20] sm:$0xff] }
 0x45a   : > { %6101 = vst.msk [vmem:[#allocation3] sm:$0xff] %vm537_vm1, %v6069_v3  ;;  %v6070_v60 = vadd.f32 %v6038_v49, %v5913_v24  ;;  %v6044_v29 = vld [vmem:[#allocation3 + $0x38] sm:$0xff] }
 0x45b   : > { %6104 = vst.msk [vmem:[#allocation3 + $0x18] sm:$0xff] %vm537_vm1, %v6072_v22  ;;  %v6042_v11 = vld [vmem:[#allocation3 + $0x28] sm:$0xff] }
 0x45c   : > { %6102 = vst.msk [vmem:[#allocation3 + $0x8] sm:$0xff] %vm537_vm1, %v6070_v60 }
 0x45e   : > { %v6914_v59 = vpop.f32.mrb[72].mxu0 }
 0x45f   : > { %v5235_v43 = vadd.f32 %v6914_v59, %v5203_v21  ;;  %v5098_v20 = vpop.f32.mrb[73].mxu0 }
 0x460   : > { %v5233_v12 = vadd.f32 %v5201_v55, %v5098_v20  ;;  %v6915_v44 = vpop.f32.mrb[74].mxu0  ;;  %v11965_v30 = vld [vmem:[#allocation3 + $0x10] sm:$0xff] }
 0x461   : > { %5267 = vst.msk [vmem:[#allocation3 + $0x50] sm:$0xff] %vm537_vm1, %v5235_v43  ;;  %v5236_v2 = vadd.f32 %v6915_v44, %v5204_v33  ;;  %v5101_v51 = vpop.f32.mrb[75].mxu0  ;;  %v11957_v52 = vld [vmem:[#allocation3] sm:$0xff]  ;;  %v6239_v27 = vmul.f32 %v11965_v30, %v11965_v30  ;;  %v6170_v25 = vsel %vm537_vm1, %v11965_v30, 0.0 }
 0x462   : > { %5265 = vst.msk [vmem:[#allocation3 + $0x40] sm:$0xff] %vm537_vm1, %v5233_v12  ;;  %v5234_v39 = vadd.f32 %v5202_v18, %v5101_v51  ;;  %v6237_v16 = vmul.f32 %v11957_v52, %v11957_v52  ;;  %v6167_v8 = vsel %vm537_vm1, %v11957_v52, 0.0  ;;  %v11977_v57 = vld [vmem:[#allocation3 + $0x18] sm:$0xff] }
 0x463   : > { %5268 = vst.msk [vmem:[#allocation3 + $0x58] sm:$0xff] %vm537_vm1, %v5236_v2  ;;  %v11953_v5 = vld [vmem:[#allocation3 + $0x8] sm:$0xff]  ;;  %v6272_v3 = vsel %vm537_vm1, %v6239_v27, 0.0  ;;  %v6240_v36 = vmul.f32 %v11977_v57, %v11977_v57  ;;  %v6172_v55 = vsel %vm537_vm1, %v11977_v57, 0.0 }
 0x464   : > { %5266 = vst.msk [vmem:[#allocation3 + $0x48] sm:$0xff] %vm537_vm1, %v5234_v39  ;;  %v6238_v26 = vmul.f32 %v11953_v5, %v11953_v5  ;;  %v6168_v10 = vsel %vm537_vm1, %v11953_v5, 0.0  ;;  %v6269_v31 = vsel %vm537_vm1, %v6237_v16, 0.0 }
 0x465   : > { %v6169_v48 = vadd.f32 %v6168_v10, %v6167_v8  ;;  %v6274_v2 = vsel %vm537_vm1, %v6240_v36, 0.0 }
 0x466   : > { %v6944_v7 = vpop.f32.mrb[68].mxu1  ;;  %v6270_v38 = vsel %vm537_vm1, %v6238_v26, 0.0  ;;  %v5212_v26 = vld [vmem:[#allocation3 + $0x98] sm:$0xff] }
 0x467   : > { %v6075_v35 = vadd.f32 %v6944_v7, %v6043_v50  ;;  %v5926_v28 = vpop.f32.mrb[69].mxu1  ;;  %v6271_v58 = vadd.f32 %v6270_v38, %v6269_v31  ;;  %v6171_v47 = vadd.f32 %v6170_v25, %v6169_v48 }
 0x468   : > { %v6073_v4 = vadd.f32 %v6041_v9, %v5926_v28  ;;  %v6945_v54 = vpop.f32.mrb[70].mxu1  ;;  %v6047_v32 = vld [vmem:[#allocation3 + $0x50] sm:$0xff] }
 0x469   : > { %6107 = vst.msk [vmem:[#allocation3 + $0x30] sm:$0xff] %vm537_vm1, %v6075_v35  ;;  %v6076_v17 = vadd.f32 %v6945_v54, %v6044_v29  ;;  %v5929_v42 = vpop.f32.mrb[71].mxu1  ;;  %v6045_v15 = vld [vmem:[#allocation3 + $0x40] sm:$0xff]  ;;  %v6273_v60 = vadd.f32 %v6272_v3, %v6271_v58  ;;  %v6173_v33 = vadd.f32 %v6172_v55, %v6171_v47  ;;  %v5211_v28 = vld [vmem:[#allocation3 + $0x90] sm:$0xff] }
 0x46a   : > { %6105 = vst.msk [vmem:[#allocation3 + $0x20] sm:$0xff] %vm537_vm1, %v6073_v4  ;;  %v6074_v1 = vadd.f32 %v6042_v11, %v5929_v42  ;;  %v6048_v49 = vld [vmem:[#allocation3 + $0x58] sm:$0xff] }
 0x46b   : > { %6108 = vst.msk [vmem:[#allocation3 + $0x38] sm:$0xff] %vm537_vm1, %v6076_v17  ;;  %v6046_v20 = vld [vmem:[#allocation3 + $0x48] sm:$0xff]  ;;  %v6275_v7 = vadd.f32 %v6274_v2, %v6273_v60  ;;  %v5209_v17 = vld [vmem:[#allocation3 + $0x80] sm:$0xff]  ;;  %v5215_v2 = vld [vmem:[#allocation3 + $0xb0] sm:$0xff] }
 0x46c   : > { %6106 = vst.msk [vmem:[#allocation3 + $0x28] sm:$0xff] %vm537_vm1, %v6074_v1 }
 0x46e   : > { %v6918_v63 = vpop.f32.mrb[76].mxu0 }
 0x46f   : > { %v5239_v41 = vadd.f32 %v6918_v63, %v5207_v0  ;;  %v5114_v53 = vpop.f32.mrb[77].mxu0 }
 0x470   : > { %v5237_v62 = vadd.f32 %v5205_v13, %v5114_v53  ;;  %v6919_v37 = vpop.f32.mrb[78].mxu0  ;;  %v12004_v9 = vld [vmem:[#allocation3 + $0x30] sm:$0xff]  ;;  %v5210_v53 = vld [vmem:[#allocation3 + $0x88] sm:$0xff] }
 0x471   : > { %5271 = vst.msk [vmem:[#allocation3 + $0x70] sm:$0xff] %vm537_vm1, %v5239_v41  ;;  %v5240_v56 = vadd.f32 %v6919_v37, %v5208_v19  ;;  %v5117_v46 = vpop.f32.mrb[79].mxu0  ;;  %v11979_v23 = vld [vmem:[#allocation3 + $0x20] sm:$0xff]  ;;  %v6243_v13 = vmul.f32 %v12004_v9, %v12004_v9  ;;  %v6178_v19 = vsel %vm537_vm1, %v12004_v9, 0.0 }
 0x472   : > { %5269 = vst.msk [vmem:[#allocation3 + $0x60] sm:$0xff] %vm537_vm1, %v5237_v62  ;;  %v5238_v34 = vadd.f32 %v5206_v45, %v5117_v46  ;;  %v6241_v14 = vmul.f32 %v11979_v23, %v11979_v23  ;;  %v6174_v12 = vsel %vm537_vm1, %v11979_v23, 0.0  ;;  %v12011_v10 = vld [vmem:[#allocation3 + $0x38] sm:$0xff] }
 0x473   : > { %5272 = vst.msk [vmem:[#allocation3 + $0x78] sm:$0xff] %vm537_vm1, %v5240_v56  ;;  %v11988_v59 = vld [vmem:[#allocation3 + $0x28] sm:$0xff]  ;;  %v6175_v39 = vadd.f32 %v6174_v12, %v6173_v33  ;;  %v6280_v46 = vsel %vm537_vm1, %v6243_v13, 0.0  ;;  %v6244_v45 = vmul.f32 %v12011_v10, %v12011_v10 }
 0x474   : > { %5270 = vst.msk [vmem:[#allocation3 + $0x68] sm:$0xff] %vm537_vm1, %v5238_v34  ;;  %v6276_v51 = vsel %vm537_vm1, %v6241_v14, 0.0  ;;  %v6242_v18 = vmul.f32 %v11988_v59, %v11988_v59  ;;  %v6176_v50 = vsel %vm537_vm1, %v11988_v59, 0.0 }
 0x475   : > { %v6277_v4 = vadd.f32 %v6276_v51, %v6275_v7  ;;  %v6177_v63 = vadd.f32 %v6176_v50, %v6175_v39  ;;  %v5213_v7 = vld [vmem:[#allocation3 + $0xa0] sm:$0xff] }
 0x476   : > { %v6948_v40 = vpop.f32.mrb[72].mxu1  ;;  %v6278_v42 = vsel %vm537_vm1, %v6242_v18, 0.0 }
 0x477   : > { %v6079_v61 = vadd.f32 %v6948_v40, %v6047_v32  ;;  %v5942_v6 = vpop.f32.mrb[73].mxu1  ;;  %v6279_v62 = vadd.f32 %v6278_v42, %v6277_v4  ;;  %v6179_v56 = vadd.f32 %v6178_v19, %v6177_v63  ;;  %v6180_v40 = vsel %vm537_vm1, %v12011_v10, 0.0  ;;  %v5216_v4 = vld [vmem:[#allocation3 + $0xb8] sm:$0xff] }
 0x478   : > { %v6077_v22 = vadd.f32 %v6045_v15, %v5942_v6  ;;  %v6949_v24 = vpop.f32.mrb[74].mxu1  ;;  %v6051_v34 = vld [vmem:[#allocation3 + $0x70] sm:$0xff] }
 0x479   : > { %6111 = vst.msk [vmem:[#allocation3 + $0x50] sm:$0xff] %vm537_vm1, %v6079_v61  ;;  %v6080_v21 = vadd.f32 %v6949_v24, %v6048_v49  ;;  %v5945_v43 = vpop.f32.mrb[75].mxu1  ;;  %v6281_v48 = vadd.f32 %v6280_v46, %v6279_v62  ;;  %v6049_v25 = vld [vmem:[#allocation3 + $0x60] sm:$0xff]  ;;  %v6181_v15 = vadd.f32 %v6180_v40, %v6179_v56 }
 0x47a   : > { %6109 = vst.msk [vmem:[#allocation3 + $0x40] sm:$0xff] %vm537_vm1, %v6077_v22  ;;  %v6078_v44 = vadd.f32 %v6046_v20, %v5945_v43  ;;  %v6052_v6 = vld [vmem:[#allocation3 + $0x78] sm:$0xff]  ;;  %v6282_v22 = vsel %vm537_vm1, %v6244_v45, 0.0 }
 0x47b   : > { %6112 = vst.msk [vmem:[#allocation3 + $0x58] sm:$0xff] %vm537_vm1, %v6080_v21  ;;  %v6050_v14 = vld [vmem:[#allocation3 + $0x68] sm:$0xff]  ;;  %v6283_v43 = vadd.f32 %v6282_v22, %v6281_v48 }
 0x47c   : > { %6110 = vst.msk [vmem:[#allocation3 + $0x48] sm:$0xff] %vm537_vm1, %v6078_v44 }
 0x47e   : > { %v6922_v35 = vpop.f32.mrb[80].mxu0 }
 0x47f   : > { %v5243_v54 = vadd.f32 %v6922_v35, %v5211_v28  ;;  %v5130_v29 = vpop.f32.mrb[81].mxu0 }
 0x480   : > { %v5241_v11 = vadd.f32 %v5209_v17, %v5130_v29  ;;  %v6923_v1 = vpop.f32.mrb[82].mxu0  ;;  %v12040_v55 = vld [vmem:[#allocation3 + $0x50] sm:$0xff] }
 0x481   : > { %5275 = vst.msk [vmem:[#allocation3 + $0x90] sm:$0xff] %vm537_vm1, %v5243_v54  ;;  %v5244_v0 = vadd.f32 %v6923_v1, %v5212_v26  ;;  %v5133_v41 = vpop.f32.mrb[83].mxu0  ;;  %v12013_v37 = vld [vmem:[#allocation3 + $0x40] sm:$0xff]  ;;  %v6247_v50 = vmul.f32 %v12040_v55, %v12040_v55  ;;  %v5214_v1 = vld [vmem:[#allocation3 + $0xa8] sm:$0xff]  ;;  %v6186_v26 = vsel %vm537_vm1, %v12040_v55, 0.0 }
 0x482   : > { %5273 = vst.msk [vmem:[#allocation3 + $0x80] sm:$0xff] %vm537_vm1, %v5241_v11  ;;  %v5242_v16 = vadd.f32 %v5210_v53, %v5133_v41  ;;  %v6245_v8 = vmul.f32 %v12013_v37, %v12013_v37  ;;  %v6182_v32 = vsel %vm537_vm1, %v12013_v37, 0.0  ;;  %v12045_v54 = vld [vmem:[#allocation3 + $0x58] sm:$0xff] }
 0x483   : > { %5276 = vst.msk [vmem:[#allocation3 + $0x98] sm:$0xff] %vm537_vm1, %v5244_v0  ;;  %v12024_v27 = vld [vmem:[#allocation3 + $0x48] sm:$0xff]  ;;  %v6183_v21 = vadd.f32 %v6182_v32, %v6181_v15  ;;  %v6288_v41 = vsel %vm537_vm1, %v6247_v50, 0.0  ;;  %v6248_v53 = vmul.f32 %v12045_v54, %v12045_v54  ;;  %v6188_v19 = vsel %vm537_vm1, %v12045_v54, 0.0 }
 0x484   : > { %5274 = vst.msk [vmem:[#allocation3 + $0x88] sm:$0xff] %vm537_vm1, %v5242_v16  ;;  %v6284_v24 = vsel %vm537_vm1, %v6245_v8, 0.0  ;;  %v6246_v49 = vmul.f32 %v12024_v27, %v12024_v27  ;;  %v6184_v20 = vsel %vm537_vm1, %v12024_v27, 0.0 }
 0x485   : > { %v6285_v12 = vadd.f32 %v6284_v24, %v6283_v43  ;;  %v6185_v51 = vadd.f32 %v6184_v20, %v6183_v21 }
 0x486   : > { %v6952_v38 = vpop.f32.mrb[76].mxu1  ;;  %v6286_v44 = vsel %vm537_vm1, %v6246_v49, 0.0 }
 0x487   : > { %v6083_v31 = vadd.f32 %v6952_v38, %v6051_v34  ;;  %v5958_v58 = vpop.f32.mrb[77].mxu1  ;;  %v6287_v29 = vadd.f32 %v6286_v44, %v6285_v12  ;;  %v6187_v0 = vadd.f32 %v6186_v26, %v6185_v51  ;;  %v5219_v12 = vld [vmem:[#allocation3 + $0xd0] sm:$0xff] }
 0x488   : > { %v6081_v47 = vadd.f32 %v6049_v25, %v5958_v58  ;;  %v6953_v61 = vpop.f32.mrb[78].mxu1  ;;  %v6055_v45 = vld [vmem:[#allocation3 + $0x90] sm:$0xff] }
 0x489   : > { %6115 = vst.msk [vmem:[#allocation3 + $0x70] sm:$0xff] %vm537_vm1, %v6083_v31  ;;  %v6084_v3 = vadd.f32 %v6953_v61, %v6052_v6  ;;  %v5961_v36 = vpop.f32.mrb[79].mxu1  ;;  %v6289_v16 = vadd.f32 %v6288_v41, %v6287_v29  ;;  %v6189_v8 = vadd.f32 %v6188_v19, %v6187_v0  ;;  %v6053_v48 = vld [vmem:[#allocation3 + $0x80] sm:$0xff]  ;;  %v6290_v31 = vsel %vm537_vm1, %v6248_v53, 0.0 }
 0x48a   : > { %6113 = vst.msk [vmem:[#allocation3 + $0x60] sm:$0xff] %vm537_vm1, %v6081_v47  ;;  %v6082_v60 = vadd.f32 %v6050_v14, %v5961_v36  ;;  %v6056_v47 = vld [vmem:[#allocation3 + $0x98] sm:$0xff] }
 0x48b   : > { %6116 = vst.msk [vmem:[#allocation3 + $0x78] sm:$0xff] %vm537_vm1, %v6084_v3  ;;  %v6291_v6 = vadd.f32 %v6290_v31, %v6289_v16  ;;  %v6054_v36 = vld [vmem:[#allocation3 + $0x88] sm:$0xff] }
 0x48c   : > { %6114 = vst.msk [vmem:[#allocation3 + $0x68] sm:$0xff] %vm537_vm1, %v6082_v60 }
 0x48e   : > { %v6926_v33 = vpop.f32.mrb[84].mxu0 }
 0x48f   : > { %v5247_v18 = vadd.f32 %v6926_v33, %v5215_v2  ;;  %v5146_v39 = vpop.f32.mrb[85].mxu0 }
 0x490   : > { %v5245_v35 = vadd.f32 %v5213_v7, %v5146_v39  ;;  %v6927_v28 = vpop.f32.mrb[86].mxu0  ;;  %v12074_v24 = vld [vmem:[#allocation3 + $0x70] sm:$0xff] }
 0x491   : > { %v12047_v17 = vld [vmem:[#allocation3 + $0x60] sm:$0xff]  ;;  %5279 = vst.msk [vmem:[#allocation3 + $0xb0] sm:$0xff] %vm537_vm1, %v5247_v18  ;;  %v5248_v42 = vadd.f32 %v6927_v28, %v5216_v4  ;;  %v5149_v11 = vpop.f32.mrb[87].mxu0  ;;  %v6251_v43 = vmul.f32 %v12074_v24, %v12074_v24  ;;  %v6194_v39 = vsel %vm537_vm1, %v12074_v24, 0.0 }
 0x492   : > { %5277 = vst.msk [vmem:[#allocation3 + $0xa0] sm:$0xff] %vm537_vm1, %v5245_v35  ;;  %v5246_v63 = vadd.f32 %v5214_v1, %v5149_v11  ;;  %v6249_v13 = vmul.f32 %v12047_v17, %v12047_v17  ;;  %v6190_v56 = vsel %vm537_vm1, %v12047_v17, 0.0  ;;  %v12081_v44 = vld [vmem:[#allocation3 + $0x78] sm:$0xff]  ;;  %v5217_v18 = vld [vmem:[#allocation3 + $0xc0] sm:$0xff]  ;;  %v5218_v11 = vld [vmem:[#allocation3 + $0xc8] sm:$0xff] }
 0x493   : > { %5280 = vst.msk [vmem:[#allocation3 + $0xb8] sm:$0xff] %vm537_vm1, %v5248_v42  ;;  %v12060_v62 = vld [vmem:[#allocation3 + $0x68] sm:$0xff]  ;;  %v6191_v61 = vadd.f32 %v6190_v56, %v6189_v8  ;;  %v5220_v35 = vld [vmem:[#allocation3 + $0xd8] sm:$0xff]  ;;  %v6296_v1 = vsel %vm537_vm1, %v6251_v43, 0.0  ;;  %v6252_v26 = vmul.f32 %v12081_v44, %v12081_v44 }
 0x494   : > { %5278 = vst.msk [vmem:[#allocation3 + $0xa8] sm:$0xff] %vm537_vm1, %v5246_v63  ;;  %v6292_v58 = vsel %vm537_vm1, %v6249_v13, 0.0  ;;  %v6250_v25 = vmul.f32 %v12060_v62, %v12060_v62  ;;  %v6192_v14 = vsel %vm537_vm1, %v12060_v62, 0.0  ;;  %v6196_v13 = vsel %vm537_vm1, %v12081_v44, 0.0 }
 0x495   : > { %v6293_v49 = vadd.f32 %v6292_v58, %v6291_v6  ;;  %v6193_v21 = vadd.f32 %v6192_v14, %v6191_v61  ;;  %v6298_v56 = vsel %vm537_vm1, %v6252_v26, 0.0 }
 0x496   : > { %v6956_v46 = vpop.f32.mrb[80].mxu1  ;;  %v6294_v60 = vsel %vm537_vm1, %v6250_v25, 0.0 }
 0x497   : > { %v6087_v38 = vadd.f32 %v6956_v46, %v6055_v45  ;;  %v5974_v34 = vpop.f32.mrb[81].mxu1  ;;  %v6295_v33 = vadd.f32 %v6294_v60, %v6293_v49  ;;  %v6195_v28 = vadd.f32 %v6194_v39, %v6193_v21 }
 0x498   : > { %v6085_v40 = vadd.f32 %v6053_v48, %v5974_v34  ;;  %v6957_v32 = vpop.f32.mrb[82].mxu1 }
 0x499   : > { %6119 = vst.msk [vmem:[#allocation3 + $0x90] sm:$0xff] %vm537_vm1, %v6087_v38  ;;  %v6088_v15 = vadd.f32 %v6957_v32, %v6056_v47  ;;  %v5977_v3 = vpop.f32.mrb[83].mxu1  ;;  %v6297_v41 = vadd.f32 %v6296_v1, %v6295_v33  ;;  %v6197_v19 = vadd.f32 %v6196_v13, %v6195_v28  ;;  %v6059_v38 = vld [vmem:[#allocation3 + $0xb0] sm:$0xff]  ;;  %v6057_v25 = vld [vmem:[#allocation3 + $0xa0] sm:$0xff] }
 0x49a   : > { %6117 = vst.msk [vmem:[#allocation3 + $0x80] sm:$0xff] %vm537_vm1, %v6085_v40  ;;  %v6086_v22 = vadd.f32 %v6054_v36, %v5977_v3  ;;  %v6060_v61 = vld [vmem:[#allocation3 + $0xb8] sm:$0xff] }
 0x49b   : > { %6120 = vst.msk [vmem:[#allocation3 + $0x98] sm:$0xff] %vm537_vm1, %v6088_v15  ;;  %v6299_v48 = vadd.f32 %v6298_v56, %v6297_v41  ;;  %v6058_v14 = vld [vmem:[#allocation3 + $0xa8] sm:$0xff] }
 0x49c   : > { %6118 = vst.msk [vmem:[#allocation3 + $0x88] sm:$0xff] %vm537_vm1, %v6086_v22 }
 0x49e   : > { %v6930_v20 = vpop.f32.mrb[88].mxu0 }
 0x49f   : > { %v5251_v2 = vadd.f32 %v6930_v20, %v5219_v12  ;;  %v5162_v51 = vpop.f32.mrb[89].mxu0 }
 0x4a0   : > { %v5249_v7 = vadd.f32 %v5217_v18, %v5162_v51  ;;  %v6931_v50 = vpop.f32.mrb[90].mxu0  ;;  %v12108_v6 = vld [vmem:[#allocation3 + $0x90] sm:$0xff] }
 0x4a1   : > { %v12085_v4 = vld [vmem:[#allocation3 + $0x80] sm:$0xff]  ;;  %5283 = vst.msk [vmem:[#allocation3 + $0xd0] sm:$0xff] %vm537_vm1, %v5251_v2  ;;  %v5252_v29 = vadd.f32 %v6931_v50, %v5220_v35  ;;  %v5165_v42 = vpop.f32.mrb[91].mxu0  ;;  %v6255_v21 = vmul.f32 %v12108_v6, %v12108_v6  ;;  %v6202_v12 = vsel %vm537_vm1, %v12108_v6, 0.0  ;;  %v5223_v2 = vld [vmem:[#allocation3 + $0xf0] sm:$0xff] }
 0x4a2   : > { %v6253_v63 = vmul.f32 %v12085_v4, %v12085_v4  ;;  %5281 = vst.msk [vmem:[#allocation3 + $0xc0] sm:$0xff] %vm537_vm1, %v5249_v7  ;;  %v5250_v0 = vadd.f32 %v5218_v11, %v5165_v42  ;;  %v6198_v16 = vsel %vm537_vm1, %v12085_v4, 0.0  ;;  %v12117_v43 = vld [vmem:[#allocation3 + $0x98] sm:$0xff]  ;;  %v5221_v7 = vld [vmem:[#allocation3 + $0xe0] sm:$0xff] }
 0x4a3   : > { %v12094_v53 = vld [vmem:[#allocation3 + $0x88] sm:$0xff]  ;;  %5284 = vst.msk [vmem:[#allocation3 + $0xd8] sm:$0xff] %vm537_vm1, %v5252_v29  ;;  %v6199_v34 = vadd.f32 %v6198_v16, %v6197_v19  ;;  %v6304_v50 = vsel %vm537_vm1, %v6255_v21, 0.0  ;;  %v6256_v35 = vmul.f32 %v12117_v43, %v12117_v43  ;;  %v5224_v42 = vld [vmem:[#allocation3 + $0xf8] sm:$0xff]  ;;  %v6204_v41 = vsel %vm537_vm1, %v12117_v43, 0.0 }
 0x4a4   : > { %5282 = vst.msk [vmem:[#allocation3 + $0xc8] sm:$0xff] %vm537_vm1, %v5250_v0  ;;  %v6300_v46 = vsel %vm537_vm1, %v6253_v63, 0.0  ;;  %v6254_v45 = vmul.f32 %v12094_v53, %v12094_v53  ;;  %v6200_v40 = vsel %vm537_vm1, %v12094_v53, 0.0  ;;  %v5222_v0 = vld [vmem:[#allocation3 + $0xe8] sm:$0xff] }
 0x4a5   : > { %v6301_v15 = vadd.f32 %v6300_v46, %v6299_v48  ;;  %v6201_v60 = vadd.f32 %v6200_v40, %v6199_v34 }
 0x4a6   : > { %v6960_v8 = vpop.f32.mrb[84].mxu1  ;;  %v6302_v22 = vsel %vm537_vm1, %v6254_v45, 0.0  ;;  %v6306_v45 = vsel %vm537_vm1, %v6256_v35, 0.0 }
 0x4a7   : > { %v6091_v31 = vadd.f32 %v6960_v8, %v6059_v38  ;;  %v5990_v58 = vpop.f32.mrb[85].mxu1  ;;  %v6303_v20 = vadd.f32 %v6302_v22, %v6301_v15  ;;  %v6203_v51 = vadd.f32 %v6202_v12, %v6201_v60 }
 0x4a8   : > { %v6089_v32 = vadd.f32 %v6057_v25, %v5990_v58  ;;  %v6961_v47 = vpop.f32.mrb[86].mxu1  ;;  %v6063_v25 = vld [vmem:[#allocation3 + $0xd0] sm:$0xff] }
 0x4a9   : > { %6123 = vst.msk [vmem:[#allocation3 + $0xb0] sm:$0xff] %vm537_vm1, %v6091_v31  ;;  %v6092_v3 = vadd.f32 %v6961_v47, %v6060_v61  ;;  %v5993_v36 = vpop.f32.mrb[87].mxu1  ;;  %v6305_v11 = vadd.f32 %v6304_v50, %v6303_v20  ;;  %v6205_v56 = vadd.f32 %v6204_v41, %v6203_v51  ;;  %v6061_v15 = vld [vmem:[#allocation3 + $0xc0] sm:$0xff] }
 0x4aa   : > { %6121 = vst.msk [vmem:[#allocation3 + $0xa0] sm:$0xff] %vm537_vm1, %v6089_v32  ;;  %v6090_v49 = vadd.f32 %v6058_v14, %v5993_v36  ;;  %v6064_v22 = vld [vmem:[#allocation3 + $0xd8] sm:$0xff] }
 0x4ab   : > { %6124 = vst.msk [vmem:[#allocation3 + $0xb8] sm:$0xff] %vm537_vm1, %v6092_v3  ;;  %v6307_v48 = vadd.f32 %v6306_v45, %v6305_v11  ;;  %v6062_v20 = vld [vmem:[#allocation3 + $0xc8] sm:$0xff] }
 0x4ac   : > { %6122 = vst.msk [vmem:[#allocation3 + $0xa8] sm:$0xff] %vm537_vm1, %v6090_v49 }
 0x4ae   : > { %v6934_v33 = vpop.f32.mrb[92].mxu0 }
 0x4af   : > { %v5255_v18 = vadd.f32 %v6934_v33, %v5223_v2  ;;  %v5178_v39 = vpop.f32.mrb[93].mxu0 }
 0x4b0   : > { %v5253_v28 = vadd.f32 %v5221_v7, %v5178_v39  ;;  %v6935_v29 = vpop.f32.mrb[94].mxu0  ;;  %v12144_v40 = vld [vmem:[#allocation3 + $0xb0] sm:$0xff] }
 0x4b1   : > { %v12124_v1 = vld [vmem:[#allocation3 + $0xa0] sm:$0xff]  ;;  %5287 = vst.msk [vmem:[#allocation3 + $0xf0] sm:$0xff] %vm537_vm1, %v5255_v18  ;;  %v5256_v26 = vadd.f32 %v6935_v29, %v5224_v42  ;;  %v5181_v63 = vpop.f32.mrb[95].mxu0  ;;  %v6259_v12 = vmul.f32 %v12144_v40, %v12144_v40  ;;  %v6210_v18 = vsel %vm537_vm1, %v12144_v40, 0.0 }
 0x4b2   : > { %v6206_v13 = vsel %vm537_vm1, %v12124_v1, 0.0  ;;  %v6257_v16 = vmul.f32 %v12124_v1, %v12124_v1  ;;  %5285 = vst.msk [vmem:[#allocation3 + $0xe0] sm:$0xff] %vm537_vm1, %v5253_v28  ;;  %v5254_v19 = vadd.f32 %v5222_v0, %v5181_v63  ;;  %v12151_v2 = vld [vmem:[#allocation3 + $0xb8] sm:$0xff] }
 0x4b3   : > { %v12134_v46 = vld [vmem:[#allocation3 + $0xa8] sm:$0xff]  ;;  %5288 = vst.msk [vmem:[#allocation3 + $0xf8] sm:$0xff] %vm537_vm1, %v5256_v26  ;;  %v6207_v34 = vadd.f32 %v6206_v13, %v6205_v56  ;;  %v6312_v7 = vsel %vm537_vm1, %v6259_v12, 0.0  ;;  %v6260_v50 = vmul.f32 %v12151_v2, %v12151_v2  ;;  %v6212_v63 = vsel %vm537_vm1, %v12151_v2, 0.0 }
 0x4b4   : > { %v6308_v8 = vsel %vm537_vm1, %v6257_v16, 0.0  ;;  %v6258_v38 = vmul.f32 %v12134_v46, %v12134_v46  ;;  %5286 = vst.msk [vmem:[#allocation3 + $0xe8] sm:$0xff] %vm537_vm1, %v5254_v19  ;;  %v6208_v31 = vsel %vm537_vm1, %v12134_v46, 0.0 }
 0x4b5   : > { %v6309_v32 = vadd.f32 %v6308_v8, %v6307_v48  ;;  %v6209_v49 = vadd.f32 %v6208_v31, %v6207_v34  ;;  %v6314_v34 = vsel %vm537_vm1, %v6260_v50, 0.0 }
 0x4b6   : > { %v6964_v58 = vpop.f32.mrb[88].mxu1  ;;  %v6310_v3 = vsel %vm537_vm1, %v6258_v38, 0.0 }
 0x4b7   : > { %v6095_v47 = vadd.f32 %v6964_v58, %v6063_v25  ;;  %v6006_v61 = vpop.f32.mrb[89].mxu1  ;;  %v6311_v51 = vadd.f32 %v6310_v3, %v6309_v32  ;;  %v6211_v39 = vadd.f32 %v6210_v18, %v6209_v49 }
 0x4b8   : > { %v6093_v36 = vadd.f32 %v6061_v15, %v6006_v61  ;;  %v6965_v14 = vpop.f32.mrb[90].mxu1  ;;  %v6067_v28 = vld [vmem:[#allocation3 + $0xf0] sm:$0xff] }
 0x4b9   : > { %6127 = vst.msk [vmem:[#allocation3 + $0xd0] sm:$0xff] %vm537_vm1, %v6095_v47  ;;  %v6096_v60 = vadd.f32 %v6965_v14, %v6064_v22  ;;  %v6009_v21 = vpop.f32.mrb[91].mxu1  ;;  %v6313_v29 = vadd.f32 %v6312_v7, %v6311_v51  ;;  %v6065_v26 = vld [vmem:[#allocation3 + $0xe0] sm:$0xff]  ;;  %v6213_v56 = vadd.f32 %v6212_v63, %v6211_v39 }
 0x4ba   : > { %6125 = vst.msk [vmem:[#allocation3 + $0xc0] sm:$0xff] %vm537_vm1, %v6093_v36  ;;  %v6094_v33 = vadd.f32 %v6062_v20, %v6009_v21  ;;  %v6068_v13 = vld [vmem:[#allocation3 + $0xf8] sm:$0xff] }
 0x4bb   : > { %6128 = vst.msk [vmem:[#allocation3 + $0xd8] sm:$0xff] %vm537_vm1, %v6096_v60  ;;  %v6066_v38 = vld [vmem:[#allocation3 + $0xe8] sm:$0xff]  ;;  %v6315_v32 = vadd.f32 %v6314_v34, %v6313_v29 }
 0x4bc   : > { %6126 = vst.msk [vmem:[#allocation3 + $0xc8] sm:$0xff] %vm537_vm1, %v6094_v33 }
 0x4be   : > { %v6968_v35 = vpop.f32.mrb[92].mxu1 }
 0x4bf   : > { %v6099_v42 = vadd.f32 %v6968_v35, %v6067_v28  ;;  %v6022_v11 = vpop.f32.mrb[93].mxu1 }
 0x4c0   : > { %v6097_v0 = vadd.f32 %v6065_v26, %v6022_v11  ;;  %v6969_v41 = vpop.f32.mrb[94].mxu1  ;;  %v12162_v16 = vld [vmem:[#allocation3 + $0xd0] sm:$0xff] }
 0x4c1   : > { %v12164_v19 = vld [vmem:[#allocation3 + $0xc0] sm:$0xff]  ;;  %6131 = vst.msk [vmem:[#allocation3 + $0xf0] sm:$0xff] %vm537_vm1, %v6099_v42  ;;  %v6100_v45 = vadd.f32 %v6969_v41, %v6068_v13  ;;  %v6025_v8 = vpop.f32.mrb[95].mxu1  ;;  %v6263_v15 = vmul.f32 %v12162_v16, %v12162_v16  ;;  %v6218_v60 = vsel %vm537_vm1, %v12162_v16, 0.0 }
 0x4c2   : > { %v6214_v48 = vsel %vm537_vm1, %v12164_v19, 0.0  ;;  %v6261_v31 = vmul.f32 %v12164_v19, %v12164_v19  ;;  %6129 = vst.msk [vmem:[#allocation3 + $0xe0] sm:$0xff] %vm537_vm1, %v6097_v0  ;;  %v6098_v58 = vadd.f32 %v6066_v38, %v6025_v8  ;;  %v12173_v47 = vld [vmem:[#allocation3 + $0xd8] sm:$0xff] }
 0x4c3   : > { %v6215_v25 = vadd.f32 %v6214_v48, %v6213_v56  ;;  %v12175_v61 = vld [vmem:[#allocation3 + $0xc8] sm:$0xff]  ;;  %6132 = vst.msk [vmem:[#allocation3 + $0xf8] sm:$0xff] %vm537_vm1, %v6100_v45  ;;  %v6264_v21 = vmul.f32 %v12173_v47, %v12173_v47  ;;  %v6320_v51 = vsel %vm537_vm1, %v6263_v15, 0.0  ;;  %v6220_v18 = vsel %vm537_vm1, %v12173_v47, 0.0 }
 0x4c4   : > { %v6316_v3 = vsel %vm537_vm1, %v6261_v31, 0.0  ;;  %v6216_v36 = vsel %vm537_vm1, %v12175_v61, 0.0  ;;  %v6262_v14 = vmul.f32 %v12175_v61, %v12175_v61  ;;  %6130 = vst.msk [vmem:[#allocation3 + $0xe8] sm:$0xff] %vm537_vm1, %v6098_v58 }
 0x4c5   : > { %v6317_v22 = vadd.f32 %v6316_v3, %v6315_v32  ;;  %v6217_v49 = vadd.f32 %v6216_v36, %v6215_v25  ;;  %v6322_v28 = vsel %vm537_vm1, %v6264_v21, 0.0 }
 0x4c6   : > { %v6318_v20 = vsel %vm537_vm1, %v6262_v14, 0.0 }
 0x4c7   : > { %v6219_v12 = vadd.f32 %v6218_v60, %v6217_v49  ;;  %v6319_v33 = vadd.f32 %v6318_v20, %v6317_v22 }
 0x4c8   : > { %v12194_v7 = vld [vmem:[#allocation3 + $0xf0] sm:$0xff] }
 0x4c9   : > { %v6321_v39 = vadd.f32 %v6320_v51, %v6319_v33  ;;  %v12196_v50 = vld [vmem:[#allocation3 + $0xe0] sm:$0xff]  ;;  %v6221_v35 = vadd.f32 %v6220_v18, %v6219_v12  ;;  %v6267_v41 = vmul.f32 %v12194_v7, %v12194_v7  ;;  %v6226_v34 = vsel %vm537_vm1, %v12194_v7, 0.0 }
 0x4ca   : > { %v6222_v29 = vsel %vm537_vm1, %v12196_v50, 0.0  ;;  %v6265_v42 = vmul.f32 %v12196_v50, %v12196_v50  ;;  %v12203_v63 = vld [vmem:[#allocation3 + $0xf8] sm:$0xff] }
 0x4cb   : > { %v6223_v11 = vadd.f32 %v6222_v29, %v6221_v35  ;;  %v6323_v26 = vadd.f32 %v6322_v28, %v6321_v39  ;;  %v12205_v0 = vld [vmem:[#allocation3 + $0xe8] sm:$0xff]  ;;  %v6268_v48 = vmul.f32 %v12203_v63, %v12203_v63  ;;  %v6328_v32 = vsel %vm537_vm1, %v6267_v41, 0.0 }
 0x4cc   : > { %v6324_v13 = vsel %vm537_vm1, %v6265_v42, 0.0  ;;  %v6224_v56 = vsel %vm537_vm1, %v12205_v0, 0.0  ;;  %v6266_v45 = vmul.f32 %v12205_v0, %v12205_v0  ;;  %v6228_v15 = vsel %vm537_vm1, %v12203_v63, 0.0 }
 0x4cd   : > { %v6325_v8 = vadd.f32 %v6324_v13, %v6323_v26  ;;  %v6225_v38 = vadd.f32 %v6224_v56, %v6223_v11  ;;  %v6330_v14 = vsel %vm537_vm1, %v6268_v48, 0.0  ;;  %v6165_v56 = vld [vmem:[%s12410_s5] sm:$0x1] }
 0x4ce   : > { %v6326_v31 = vsel %vm537_vm1, %v6266_v45, 0.0 }
 0x4cf   : > { %v6227_v58 = vadd.f32 %v6226_v34, %v6225_v38  ;;  %v6327_v25 = vadd.f32 %v6326_v31, %v6325_v8  ;;  %v12648_v38 = vld [vmem:[#allocation5_spill] sm:$0xff] }
 0x4d1   : > { %v6229_v3 = vadd.f32 %v6228_v15, %v6227_v58  ;;  %v6329_v36 = vadd.f32 %v6328_v32, %v6327_v25 }
 0x4d3   : > { %v6230_v22 = vrot.slane %v6229_v3, 4  ;;  %v6331_v49 = vadd.f32 %v6330_v14, %v6329_v36  ;;  %v6166_v36 = vld [vmem:[%s12411_s6] sm:$0x1] }
 0x4d5   : > { %v6231_v60 = vadd.f32 %v6230_v22, %v6229_v3  ;;  %v6332_v21 = vrot.slane %v6331_v49, 4 }
 0x4d7   : > { %v6232_v20 = vrot.slane %v6231_v60, 2  ;;  %v6333_v12 = vadd.f32 %v6332_v21, %v6331_v49 }
 0x4d9   : > { %v6233_v33 = vadd.f32 %v6232_v20, %v6231_v60  ;;  %v6334_v51 = vrot.slane %v6333_v12, 2 }
 0x4db   : > { %v6234_v18 = vrot.slane %v6233_v33, 1  ;;  %v6335_v39 = vadd.f32 %v6334_v51, %v6333_v12 }
 0x4dd   : > { %v6235_v35 = vadd.f32 %v6234_v18, %v6233_v33  ;;  %v6336_v28 = vrot.slane %v6335_v39, 1 }
 0x4df   : > { %v6236_v29 = vmul.f32 0.00390625, %v6235_v35  ;;  %v6337_v42 = vadd.f32 %v6336_v28, %v6335_v39 }
 0x4e1   : > { %v6338_v11 = vmul.f32 0.00390625, %v6337_v42  ;;  %v6339_v26 = vmul.f32 %v6236_v29, %v6236_v29 }
 0x4e3   : > { %v6340_v41 = vsub.f32 %v6338_v11, %v6339_v26 }
 0x4e5   : > { %v6341_v13 = vadd.f32 1e-09, %v6340_v41 }
 0x4e7   : > { %7954 = vrsqrt.f32 %v6341_v13 }
 0x4f1   : > { %v7955_v45 = vpop.eup %7954 }
 0x4f2   : > { %v6343_v8 = vmul.f32 %v7955_v45, %v6165_v56 }
 0x4f4   : > { %v6348_v34 = vrot.slane %v6343_v8, %v12648_v38  ;;  %v6382_v58 = vmul.f32 %v6343_v8, %v6236_v29 }
 0x4f6   : > { %v6350_v48 = vmul.f32 %v6348_v34, %v11957_v52  ;;  %v6351_v31 = vmul.f32 %v6348_v34, %v11953_v5  ;;  %v6352_v25 = vmul.f32 %v6348_v34, %v11965_v30  ;;  %v6353_v32 = vmul.f32 %v6348_v34, %v11977_v57 }
 0x4f7   : > { %v6354_v15 = vmul.f32 %v6348_v34, %v11979_v23  ;;  %v6355_v3 = vmul.f32 %v6348_v34, %v11988_v59  ;;  %v6356_v14 = vmul.f32 %v6348_v34, %v12004_v9  ;;  %v6357_v22 = vmul.f32 %v6348_v34, %v12011_v10 }
 0x4f8   : > { %v6358_v52 = vmul.f32 %v6348_v34, %v12013_v37  ;;  %v6359_v5 = vmul.f32 %v6348_v34, %v12024_v27  ;;  %v6360_v30 = vmul.f32 %v6348_v34, %v12040_v55  ;;  %v6361_v57 = vmul.f32 %v6348_v34, %v12045_v54 }
 0x4f9   : > { %v6362_v23 = vmul.f32 %v6348_v34, %v12047_v17  ;;  %v6363_v59 = vmul.f32 %v6348_v34, %v12060_v62  ;;  %v6364_v49 = vmul.f32 %v6348_v34, %v12074_v24  ;;  %v6365_v60 = vmul.f32 %v6348_v34, %v12081_v44 }
 0x4fa   : > { %v6366_v9 = vmul.f32 %v6348_v34, %v12085_v4  ;;  %v6367_v10 = vmul.f32 %v6348_v34, %v12094_v53  ;;  %v6368_v37 = vmul.f32 %v6348_v34, %v12108_v6  ;;  %v6369_v27 = vmul.f32 %v6348_v34, %v12117_v43 }
 0x4fb   : > { %v6370_v55 = vmul.f32 %v6348_v34, %v12124_v1  ;;  %v6383_v21 = vsub.f32 %v6166_v36, %v6382_v58  ;;  %v6371_v54 = vmul.f32 %v6348_v34, %v12134_v46  ;;  %v6372_v17 = vmul.f32 %v6348_v34, %v12144_v40 }
 0x4fc   : > { %v6373_v62 = vmul.f32 %v6348_v34, %v12151_v2  ;;  %v6374_v24 = vmul.f32 %v6348_v34, %v12164_v19  ;;  %v6375_v44 = vmul.f32 %v6348_v34, %v12175_v61  ;;  %v6376_v4 = vmul.f32 %v6348_v34, %v12162_v16 }
 0x4fd   : > { %v6377_v53 = vmul.f32 %v6348_v34, %v12173_v47  ;;  %v6388_v6 = vrot.slane %v6383_v21, %v12648_v38  ;;  %v6378_v43 = vmul.f32 %v6348_v34, %v12196_v50  ;;  %v6379_v1 = vmul.f32 %v6348_v34, %v12205_v0 }
 0x4fe   : > { %v6380_v46 = vmul.f32 %v6348_v34, %v12194_v7  ;;  %v6381_v40 = vmul.f32 %v6348_v34, %v12203_v63 }
 0x4ff   : > { %v6390_v20 = vadd.f32 %v6388_v6, %v6350_v48  ;;  %v6391_v2 = vadd.f32 %v6388_v6, %v6351_v31  ;;  %v6392_v12 = vadd.f32 %v6388_v6, %v6352_v25  ;;  %v6393_v19 = vadd.f32 %v6388_v6, %v6353_v32  ;;  %v8051_v32 = vld [vmem:[%s8149_s29] sm:$0xff] }
 0x500   : > { %v6394_v33 = vadd.f32 %v6388_v6, %v6354_v15  ;;  %v6395_v61 = vadd.f32 %v6388_v6, %v6355_v3  ;;  %v6396_v51 = vadd.f32 %v6388_v6, %v6356_v14  ;;  %v6397_v16 = vadd.f32 %v6388_v6, %v6357_v22  ;;  %v8052_v3 = vld [vmem:[%s8149_s29 + $0x8] sm:$0xff]  ;;  %v8053_v14 = vld [vmem:[%s8149_s29 + $0x10] sm:$0xff] }
 0x501   : > { %v6398_v18 = vadd.f32 %v6388_v6, %v6358_v52  ;;  %v6399_v47 = vadd.f32 %v6388_v6, %v6359_v5  ;;  %v6400_v39 = vadd.f32 %v6388_v6, %v6360_v30  ;;  %v6401_v35 = vadd.f32 %v6388_v6, %v6361_v57  ;;  %v8054_v52 = vld [vmem:[%s8149_s29 + $0x18] sm:$0xff]  ;;  %v8055_v30 = vld [vmem:[%s8149_s29 + $0x20] sm:$0xff] }
 0x502   : > { %v6402_v28 = vadd.f32 %v6388_v6, %v6362_v23  ;;  %v6403_v50 = vadd.f32 %v6388_v6, %v6363_v59  ;;  %v6404_v0 = vadd.f32 %v6388_v6, %v6364_v49  ;;  %v6405_v29 = vadd.f32 %v6388_v6, %v6365_v60  ;;  %v8056_v23 = vld [vmem:[%s8149_s29 + $0x28] sm:$0xff]  ;;  %v8057_v49 = vld [vmem:[%s8149_s29 + $0x30] sm:$0xff] }
 0x503   : > { %v6406_v7 = vadd.f32 %v6388_v6, %v6366_v9  ;;  %v6407_v42 = vadd.f32 %v6388_v6, %v6367_v10  ;;  %v6408_v63 = vadd.f32 %v6388_v6, %v6368_v37  ;;  %v6409_v11 = vadd.f32 %v6388_v6, %v6369_v27  ;;  %v8058_v9 = vld [vmem:[%s8149_s29 + $0x38] sm:$0xff]  ;;  %v8059_v37 = vld [vmem:[%s8149_s29 + $0x40] sm:$0xff] }
 0x504   : > { %v12263_v26 = vadd.f32 %v6388_v6, %v6370_v55  ;;  %v12265_v41 = vadd.f32 %v6388_v6, %v6371_v54  ;;  %v12267_v13 = vadd.f32 %v6388_v6, %v6372_v17  ;;  %v12269_v56 = vadd.f32 %v6388_v6, %v6373_v62  ;;  %v8060_v55 = vld [vmem:[%s8149_s29 + $0x48] sm:$0xff]  ;;  %v8061_v54 = vld [vmem:[%s8149_s29 + $0x50] sm:$0xff]  ;;  %v8062_v62 = vld [vmem:[%s8149_s29 + $0x58] sm:$0xff] }
 0x505   : > { %v12271_v45 = vadd.f32 %v6388_v6, %v6374_v24  ;;  %v12273_v8 = vadd.f32 %v6388_v6, %v6375_v44  ;;  %v12275_v38 = vadd.f32 %v6388_v6, %v6376_v4  ;;  %v12277_v34 = vadd.f32 %v6388_v6, %v6377_v53  ;;  %v8063_v44 = vld [vmem:[%s8149_s29 + $0x60] sm:$0xff]  ;;  %v8064_v53 = vld [vmem:[%s8149_s29 + $0x68] sm:$0xff] }
 0x506   : > { %v12286_v48 = vadd.f32 %v6388_v6, %v6378_v43  ;;  %v12288_v31 = vadd.f32 %v6388_v6, %v6379_v1  ;;  %v12290_v58 = vadd.f32 %v6388_v6, %v6380_v46  ;;  %v12292_v25 = vadd.f32 %v6388_v6, %v6381_v40  ;;  %v8065_v43 = vld [vmem:[%s8149_s29 + $0x70] sm:$0xff]  ;;  %v8066_v46 = vld [vmem:[%s8149_s29 + $0x78] sm:$0xff] }
 0x507   : > { %v6422_v15 = vadd.f32 %v8051_v32, %v6390_v20  ;;  %v6423_v36 = vadd.f32 %v8052_v3, %v6391_v2  ;;  %v6424_v22 = vadd.f32 %v8053_v14, %v6392_v12  ;;  %v6425_v5 = vadd.f32 %v8054_v52, %v6393_v19  ;;  %v8067_v20 = vld [vmem:[%s8149_s29 + $0x80] sm:$0xff]  ;;  %v8068_v12 = vld [vmem:[%s8149_s29 + $0x88] sm:$0xff]  ;;  %v8081_v32 = vld [vmem:[%s8149_s29 + $0xf0] sm:$0xff] }
 0x508   : > { %v6426_v57 = vadd.f32 %v8055_v30, %v6394_v33  ;;  %v6427_v59 = vadd.f32 %v8056_v23, %v6395_v61  ;;  %v6428_v60 = vadd.f32 %v8057_v49, %v6396_v51  ;;  %v6429_v10 = vadd.f32 %v8058_v9, %v6397_v16  ;;  %v8069_v33 = vld [vmem:[%s8149_s29 + $0x90] sm:$0xff]  ;;  %v8070_v51 = vld [vmem:[%s8149_s29 + $0x98] sm:$0xff] }
 0x509   : > { %v6430_v27 = vadd.f32 %v8059_v37, %v6398_v18  ;;  %v6431_v21 = vadd.f32 %v8060_v55, %v6399_v47  ;;  %v6432_v17 = vadd.f32 %v8061_v54, %v6400_v39  ;;  %v6433_v24 = vadd.f32 %v8062_v62, %v6401_v35  ;;  %6454 = vst.msk [vmem:[%s12284_s12] sm:$0xff] %vm537_vm1, %v6422_v15  ;;  %v8071_v18 = vld [vmem:[%s8149_s29 + $0xa0] sm:$0xff]  ;;  %v8072_v39 = vld [vmem:[%s8149_s29 + $0xa8] sm:$0xff]  ;;  %v8082_v3 = vld [vmem:[%s8149_s29 + $0xf8] sm:$0xff] }
 0x50a   : > { %6455 = vst.msk [vmem:[%s12284_s12 + $0x8] sm:$0xff] %vm537_vm1, %v6423_v36  ;;  %6456 = vst.msk [vmem:[%s12284_s12 + $0x10] sm:$0xff] %vm537_vm1, %v6424_v22  ;;  %v6434_v4 = vadd.f32 %v8063_v44, %v6402_v28  ;;  %v6435_v6 = vadd.f32 %v8064_v53, %v6403_v50  ;;  %v6436_v1 = vadd.f32 %v8065_v43, %v6404_v0  ;;  %v8073_v28 = vld [vmem:[%s8149_s29 + $0xb0] sm:$0xff]  ;;  %v8074_v0 = vld [vmem:[%s8149_s29 + $0xb8] sm:$0xff] }
 0x50b   : > { %6457 = vst.msk [vmem:[%s12284_s12 + $0x18] sm:$0xff] %vm537_vm1, %v6425_v5  ;;  %v6437_v40 = vadd.f32 %v8066_v46, %v6405_v29  ;;  %6458 = vst.msk [vmem:[%s12284_s12 + $0x20] sm:$0xff] %vm537_vm1, %v6426_v57  ;;  %v6438_v2 = vadd.f32 %v8067_v20, %v6406_v7  ;;  %v6439_v19 = vadd.f32 %v8068_v12, %v6407_v42  ;;  %v8075_v7 = vld [vmem:[%s8149_s29 + $0xc0] sm:$0xff] }
 0x50c   : > { %6459 = vst.msk [vmem:[%s12284_s12 + $0x28] sm:$0xff] %vm537_vm1, %v6427_v59  ;;  %6460 = vst.msk [vmem:[%s12284_s12 + $0x30] sm:$0xff] %vm537_vm1, %v6428_v60  ;;  %v6440_v61 = vadd.f32 %v8069_v33, %v6408_v63  ;;  %v6441_v16 = vadd.f32 %v8070_v51, %v6409_v11  ;;  %v6442_v47 = vadd.f32 %v8071_v18, %v12263_v26  ;;  %v8076_v63 = vld [vmem:[%s8149_s29 + $0xc8] sm:$0xff]  ;;  %v8077_v26 = vld [vmem:[%s8149_s29 + $0xd0] sm:$0xff] }
 0x50d   : > { %6461 = vst.msk [vmem:[%s12284_s12 + $0x38] sm:$0xff] %vm537_vm1, %v6429_v10  ;;  %6462 = vst.msk [vmem:[%s12284_s12 + $0x40] sm:$0xff] %vm537_vm1, %v6430_v27  ;;  %v6443_v35 = vadd.f32 %v8072_v39, %v12265_v41  ;;  %v6444_v50 = vadd.f32 %v8073_v28, %v12267_v13  ;;  %v6445_v29 = vadd.f32 %v8074_v0, %v12269_v56  ;;  %v8078_v13 = vld [vmem:[%s8149_s29 + $0xd8] sm:$0xff] }
 0x50e   : > { %6463 = vst.msk [vmem:[%s12284_s12 + $0x48] sm:$0xff] %vm537_vm1, %v6431_v21  ;;  %6464 = vst.msk [vmem:[%s12284_s12 + $0x50] sm:$0xff] %vm537_vm1, %v6432_v17  ;;  %v6446_v42 = vadd.f32 %v8075_v7, %v12271_v45  ;;  %v6447_v11 = vadd.f32 %v8076_v63, %v12273_v8  ;;  %v6448_v41 = vadd.f32 %v8077_v26, %v12275_v38  ;;  %v8079_v45 = vld [vmem:[%s8149_s29 + $0xe0] sm:$0xff]  ;;  %v8080_v38 = vld [vmem:[%s8149_s29 + $0xe8] sm:$0xff] }
 0x50f   : > { %6465 = vst.msk [vmem:[%s12284_s12 + $0x58] sm:$0xff] %vm537_vm1, %v6433_v24  ;;  %6466 = vst.msk [vmem:[%s12284_s12 + $0x60] sm:$0xff] %vm537_vm1, %v6434_v4  ;;  %v6449_v56 = vadd.f32 %v8078_v13, %v12277_v34  ;;  %v6450_v8 = vadd.f32 %v8079_v45, %v12286_v48  ;;  %v6451_v34 = vadd.f32 %v8080_v38, %v12288_v31 }
 0x510   : > { %6467 = vst.msk [vmem:[%s12284_s12 + $0x68] sm:$0xff] %vm537_vm1, %v6435_v6  ;;  %6468 = vst.msk [vmem:[%s12284_s12 + $0x70] sm:$0xff] %vm537_vm1, %v6436_v1  ;;  %v6452_v15 = vadd.f32 %v8081_v32, %v12290_v58  ;;  %v6453_v36 = vadd.f32 %v8082_v3, %v12292_v25 }
 0x511   : > { %6469 = vst.msk [vmem:[%s12284_s12 + $0x78] sm:$0xff] %vm537_vm1, %v6437_v40  ;;  %6470 = vst.msk [vmem:[%s12284_s12 + $0x80] sm:$0xff] %vm537_vm1, %v6438_v2 }
 0x512   : > { %6471 = vst.msk [vmem:[%s12284_s12 + $0x88] sm:$0xff] %vm537_vm1, %v6439_v19  ;;  %6472 = vst.msk [vmem:[%s12284_s12 + $0x90] sm:$0xff] %vm537_vm1, %v6440_v61 }
 0x513   : > { %6473 = vst.msk [vmem:[%s12284_s12 + $0x98] sm:$0xff] %vm537_vm1, %v6441_v16  ;;  %6474 = vst.msk [vmem:[%s12284_s12 + $0xa0] sm:$0xff] %vm537_vm1, %v6442_v47 }
 0x514   : > { %6475 = vst.msk [vmem:[%s12284_s12 + $0xa8] sm:$0xff] %vm537_vm1, %v6443_v35  ;;  %6476 = vst.msk [vmem:[%s12284_s12 + $0xb0] sm:$0xff] %vm537_vm1, %v6444_v50 }
 0x515   : > { %6477 = vst.msk [vmem:[%s12284_s12 + $0xb8] sm:$0xff] %vm537_vm1, %v6445_v29  ;;  %6478 = vst.msk [vmem:[%s12284_s12 + $0xc0] sm:$0xff] %vm537_vm1, %v6446_v42 }
 0x516   : > { %6479 = vst.msk [vmem:[%s12284_s12 + $0xc8] sm:$0xff] %vm537_vm1, %v6447_v11  ;;  %6480 = vst.msk [vmem:[%s12284_s12 + $0xd0] sm:$0xff] %vm537_vm1, %v6448_v41 }
 0x517   : > { %6481 = vst.msk [vmem:[%s12284_s12 + $0xd8] sm:$0xff] %vm537_vm1, %v6449_v56  ;;  %6482 = vst.msk [vmem:[%s12284_s12 + $0xe0] sm:$0xff] %vm537_vm1, %v6450_v8 }
 0x518   : > { %6483 = vst.msk [vmem:[%s12284_s12 + $0xe8] sm:$0xff] %vm537_vm1, %v6451_v34  ;;  %6484 = vst.msk [vmem:[%s12284_s12 + $0xf0] sm:$0xff] %vm537_vm1, %v6452_v15 }
 0x519   : > { %6485 = vst.msk [vmem:[%s12284_s12 + $0xf8] sm:$0xff] %vm537_vm1, %v6453_v36 }
 0x51a PF: > { %s17_s24 = sadd.s32 1, %s8089_s24  }
 0x51b   : > { %p14_p4 = scmp.ge.s32.totalorder %s17_s24, 4  }
 0x51d   :  { %16 = sbr.rel (!%p14_p4) target bundleno = 1 (0x1), region = 84 }

</bundles_post_ra>
